<compile_context>
chip_gen: v5e
topology: v5e:2x2
jax: 0.10.0
libtpu: 0.0.40
codegen_flags: <defaults>
</compile_context>

<pallas_src>
import functools

import jax
import jax.numpy as jnp
from jax.experimental import pallas as pl
from jax.experimental.pallas import tpu as pltpu


# ----------------------------------------------------------------------------
# Fused kernel: all L-1 steps unrolled in one invocation, state in values.
# ----------------------------------------------------------------------------
def _fused_tree_kernel(h0_ref, c0_ref, lb_ref, wl_ref, wr_ref, b_ref, q_ref,
                       hf_ref, cf_ref, sel_ref,
                       *, roll_shift, mxu_dtype):
    B, L, D = h0_ref.shape
    n_steps = L - 1
    BL = B * L
    LANE = sel_ref.shape[-1]

    # Hoisted loads / broadcasts (the step loop is a static Python unroll, so
    # everything created here is emitted exactly once).
    h = h0_ref[...]                        # (B, L, D) running h state
    c = c0_ref[...]                        # (B, L, D) running c state
    lb = lb_ref[...]                       # (B, 1) int32 lengths
    wl = wl_ref[...]                       # (D, 5D) left-child weight
    wr = wr_ref[...]                       # (D, 5D) right-child weight
    bias = b_ref[...][None]                # (1, 1, 5D); +1 forget bias baked in
    q = q_ref[...][None]                   # (1, 1, D) composition query

    pos = jax.lax.broadcasted_iota(jnp.int32, (B, L), 1)
    pos_f = pos.astype(jnp.float32)
    lane_pos_f = jax.lax.broadcasted_iota(jnp.int32, (B, LANE), 1).astype(jnp.float32)
    dn = (((2,), (0,)), ((), ()))

    def shift_next(x):
        # x_next[p] = x[p + 1]; the wrapped-around tail row lands in a
        # position that the `valid` mask always excludes.
        if roll_shift is not None:
            # Tile-aligned sublane rotate on the XLU (no retile copies).
            return pltpu.roll(x.reshape(BL, D), roll_shift, axis=0).reshape(B, L, D)
        # Fallback: misaligned slice + concat (correct, slower).
        return jnp.concatenate([x[:, 1:, :], x[:, :1, :]], axis=1)

    for i in range(n_steps):
        hr = shift_next(h)
        cr = shift_next(c)

        # ---- BinaryTreeLSTMLayer: two accumulated MXU matmuls (no concat) ----
        v = (jax.lax.dot_general(h.astype(mxu_dtype), wl, dn,
                                 preferred_element_type=jnp.float32)
             + jax.lax.dot_general(hr.astype(mxu_dtype), wr, dn,
                                   preferred_element_type=jnp.float32)
             + bias)
        ig = v[..., 0 * D:1 * D]
        fl = v[..., 1 * D:2 * D]
        fr = v[..., 2 * D:3 * D]
        u = v[..., 3 * D:4 * D]
        o = v[..., 4 * D:5 * D]
        new_c = (c * jax.nn.sigmoid(fl) + cr * jax.nn.sigmoid(fr)
                 + jnp.tanh(u) * jax.nn.sigmoid(ig))
        new_h = jax.nn.sigmoid(o) * jnp.tanh(new_c)

        if i < n_steps - 1:
            # ---- greedy selection (eval path) as first-occurrence argmax ----
            comp_w = jnp.sum(new_h * q, axis=-1)               # (B, L)
            valid = (i + 1 + pos) < lb                         # (B, L)
            logits = jnp.where(valid, comp_w, -1e30)
            m = jnp.max(logits, axis=1, keepdims=True)
            cand = jnp.where(logits == m, pos_f, float(L))
            first = jnp.min(cand, axis=1, keepdims=True)       # (B, 1) argmax

            sel = (pos_f == first).astype(jnp.float32)
            left = (pos_f < first).astype(jnp.float32)
            right = (pos_f > first).astype(jnp.float32)
            comb_h = sel[..., None] * new_h + left[..., None] * h + right[..., None] * hr
            comb_c = sel[..., None] * new_c + left[..., None] * c + right[..., None] * cr

            # Lane-dense (B, 128k) select-mask row derived straight from the
            # argmax index (no concat / padding copy), written once.
            sel_ref[i] = (lane_pos_f == first).astype(jnp.float32)
        else:
            # Last step: select_composition is skipped in the reference.
            comb_h, comb_c = new_h, new_c

        # update_state: freeze batches whose sequence is already fully reduced.
        done = ((i + 1) < lb).astype(jnp.float32)[..., None]   # (B, 1, 1)
        h = done * comb_h + (1.0 - done) * h
        c = done * comb_c + (1.0 - done) * c

    # Root is always position 0; written exactly once.
    hf_ref[...] = h[:, 0, :]
    cf_ref[...] = c[:, 0, :]


# ----------------------------------------------------------------------------
# One-time probe: detect pltpu.roll's sublane-rotation direction (and that the
# (B,L,D)<->(B*L,D) reshape + roll lowers at all).  Must be called eagerly.
# ----------------------------------------------------------------------------
def _roll_probe_kernel(x_ref, o_ref):
    B, L, D = x_ref.shape
    x2 = x_ref[...].reshape(B * L, D)
    o_ref[...] = pltpu.roll(x2, 1, axis=0).reshape(B, L, D)


def detect_roll_direction():
    """Returns "gather_next" if roll(x,1,axis=0)[p]==x[p+1], "jnp_roll" if it
    matches jnp.roll, or None if the roll path is unavailable (slice fallback)."""
    try:
        rows = jnp.arange(16, dtype=jnp.float32)
        x = jnp.broadcast_to(rows[:, None], (16, 128)).reshape(2, 8, 128)
        out = pl.pallas_call(
            _roll_probe_kernel,
            out_shape=jax.ShapeDtypeStruct((2, 8, 128), jnp.float32),
        )(x)
        v = float(jax.device_get(out)[0, 0, 0])
        if v == 1.0:
            return "gather_next"
        if v == 15.0:
            return "jnp_roll"
    except Exception:
        pass
    return None


# ----------------------------------------------------------------------------
# BinaryTreeLSTM.forward (single pallas_call, no grid)
# ----------------------------------------------------------------------------
def binary_tree_lstm_forward(inp, length, wt, b, q, *,
                             roll_direction=None, mxu_dtype=jnp.float32):
    B, L, two_d = inp.shape
    D = two_d // 2
    h0, c0 = inp[..., :D], inp[..., D:]
    lb = length.astype(jnp.int32).reshape(B, 1)
    # Bake the +1.0 forget-gate bias (fl, fr slices) into the bias once.
    b_fused = b.at[:, D:3 * D].add(1.0)
    # Split the fused (2D, 5D) weight into left/right halves: kills the
    # per-step LHS concat; the MXU accumulates the two K=D matmuls.
    wl = wt[:D].astype(mxu_dtype)
    wr = wt[D:].astype(mxu_dtype)

    n_sel = max(L - 2, 1)
    lane = 128 * pl.cdiv(L - 1, 128)          # lane-dense select-mask rows

    use_roll = (roll_direction is not None) and (L % 8 == 0) and (D % 128 == 0)
    roll_shift = None
    if use_roll:
        roll_shift = 1 if roll_direction == "gather_next" else (B * L - 1)

    kernel = functools.partial(_fused_tree_kernel,
                               roll_shift=roll_shift, mxu_dtype=mxu_dtype)
    vmem = pl.BlockSpec(memory_space=pltpu.MemorySpace.VMEM)

    hf, cf, sel_pad = pl.pallas_call(
        kernel,
        out_shape=(jax.ShapeDtypeStruct((B, D), jnp.float32),
                   jax.ShapeDtypeStruct((B, D), jnp.float32),
                   jax.ShapeDtypeStruct((n_sel, B, lane), jnp.float32)),
        in_specs=[vmem] * 7,
        out_specs=(vmem, vmem, vmem),
    )(h0, c0, lb, wl, wr, b_fused, q)

    select_masks = [sel_pad[i, :, :L - 1 - i] for i in range(L - 2)]
    return hf, cf, select_masks


# ----------------------------------------------------------------------------
# Pure-JAX reference (mirrors the PyTorch forward, eval mode)
# ----------------------------------------------------------------------------
def masked_softmax(logits, mask):
    eps = 1e-20
    probs = jax.nn.softmax(logits, axis=1)
    probs = probs * mask + eps
    probs = probs / jnp.sum(probs, axis=1, keepdims=True)
    return probs


def greedy_select(logits, mask):
    probs = masked_softmax(logits, mask)
    idx = jnp.argmax(probs, axis=1)
    return jax.nn.one_hot(idx, logits.shape[1], dtype=jnp.float32)


def ref_forward(inp, length, wt, b, q):
    B, L, two_d = inp.shape
    D = two_d // 2
    h, c = inp[..., :D], inp[..., D:]
    length_mask = jnp.arange(L)[None, :] < length[:, None]
    select_masks = []
    for i in range(L - 1):
        hl, hr = h[:, :-1, :], h[:, 1:, :]
        cl, cr = c[:, :-1, :], c[:, 1:, :]
        v = jnp.concatenate([hl, hr], axis=-1) @ wt + b
        ig, fl, fr, u, o = [v[..., j * D:(j + 1) * D] for j in range(5)]
        new_c = (cl * jax.nn.sigmoid(fl + 1.0)
                 + cr * jax.nn.sigmoid(fr + 1.0)
                 + jnp.tanh(u) * jax.nn.sigmoid(ig))
        new_h = jax.nn.sigmoid(o) * jnp.tanh(new_c)
        if i < L - 2:
            comp_w = jnp.sum(new_h * q[0][None, None, :], axis=-1)
            mask = length_mask[:, i + 1:].astype(jnp.float32)
            sel = greedy_select(comp_w, mask)
            select_masks.append(sel)
            cum = jnp.cumsum(sel, axis=1)
            left = 1.0 - cum
            right = jnp.concatenate(
                [jnp.zeros((B, 1), jnp.float32), cum[:, :-1]], axis=1)
            new_h = sel[:, :, None] * new_h + left[:, :, None] * hl + right[:, :, None] * hr
            new_c = sel[:, :, None] * new_c + left[:, :, None] * cl + right[:, :, None] * cr
        done = length_mask[:, i + 1].astype(jnp.float32)[:, None, None]
        h = done * new_h + (1.0 - done) * hl
        c = done * new_c + (1.0 - done) * cl
    return h[:, 0, :], c[:, 0, :], select_masks


if __name__ == "__main__":
    B, L, D = 2, 8, 128          # batch, max_length, hidden_dim (word_dim = 2*D)

    key = jax.random.PRNGKey(0)
    k_w, k_q, k_x = jax.random.split(key, 3)

    # comp_linear: nn.Linear(2D, 5D), HeKaiming init on weight (5D, 2D), zero bias.
    w = jax.random.normal(k_w, (5 * D, 2 * D), jnp.float32) * jnp.sqrt(2.0 / (2 * D))
    wt = w.T                                  # (2D, 5D)
    b = jnp.zeros((1, 5 * D), jnp.float32)
    # comp_query: nn.Linear(D, 1); only weight.squeeze() is used.
    q = jax.random.normal(k_q, (1, D), jnp.float32) * jnp.sqrt(2.0 / D)

    # input is (B, L, 2*hidden_dim): chunked into (h, c) inside forward.
    x = jax.random.normal(k_x, (B, L, 2 * D), jnp.float32) * 0.5
    length = jnp.array([8, 5], jnp.int32)

    # Probe the roll direction once (eagerly, outside jit).  None -> the kernel
    # uses the slice+concat fallback, so correctness never depends on the probe.
    roll_dir = detect_roll_direction()

    # f32 MXU path: verified against the f32 reference (exact select masks).
    fwd = jax.jit(functools.partial(binary_tree_lstm_forward,
                                    roll_direction=roll_dir,
                                    mxu_dtype=jnp.float32))
    h_out, c_out, sel_masks = fwd(x, length, wt, b, q)
    jax.block_until_ready((h_out, c_out, sel_masks))

    h_ref, c_ref, sel_ref_masks = ref_forward(x, length, wt, b, q)
    assert h_out.shape == (B, D) and c_out.shape == (B, D)
    assert jnp.allclose(h_out, h_ref, atol=2e-2, rtol=2e-2)
    assert jnp.allclose(c_out, c_ref, atol=2e-2, rtol=2e-2)
    assert len(sel_masks) == len(sel_ref_masks)
    for s_p, s_r in zip(sel_masks, sel_ref_masks):
        assert s_p.shape == s_r.shape
        assert jnp.array_equal(s_p, s_r)

    # bf16 MXU path (the v6e/v7x lever): sanity-checked for shape/finiteness
    # only, since reduced-precision logits may legitimately flip a near-tie
    # argmax relative to the f32 reference.
    fwd_bf16 = jax.jit(functools.partial(binary_tree_lstm_forward,
                                         roll_direction=roll_dir,
                                         mxu_dtype=jnp.bfloat16))
    h_bf, c_bf, _ = fwd_bf16(x, length, wt, b, q)
    jax.block_until_ready((h_bf, c_bf))
    assert h_bf.shape == (B, D) and c_bf.shape == (B, D)
    assert bool(jnp.all(jnp.isfinite(h_bf))) and bool(jnp.all(jnp.isfinite(c_bf)))

    print("KERNEL_OK")
</pallas_src>

<mosaic_0001>
module attributes {stable_mosaic.version = 11 : i64} {
  func.func @_roll_probe_kernel(%arg0: memref<2x8x128xf32, #tpu.memory_space<vmem>>, %arg1: memref<2x8x128xf32, #tpu.memory_space<vmem>>) attributes {dimension_semantics = [], scalar_prefetch = 0 : i64, scratch_operands = 0 : i64, tpu.core_type = #tpu.core_type<tc>} {
    %c0 = arith.constant 0 : index
    %c0_0 = arith.constant 0 : index
    %c0_1 = arith.constant 0 : index
    %0 = vector.load %arg0[%c0, %c0_0, %c0_1] : memref<2x8x128xf32, #tpu.memory_space<vmem>>, vector<2x8x128xf32>
    %1 = vector.shape_cast %0 : vector<2x8x128xf32> to vector<16x128xf32>
    %c1_i32 = arith.constant 1 : i32
    %2 = tpu.dynamic_rotate %1 by %c1_i32 dim 0 : vector<16x128xf32>, i32 -> vector<16x128xf32>
    %3 = vector.shape_cast %2 : vector<16x128xf32> to vector<2x8x128xf32>
    %c0_2 = arith.constant 0 : index
    %c0_3 = arith.constant 0 : index
    %c0_4 = arith.constant 0 : index
    %4 = vector.load %arg1[%c0_2, %c0_3, %c0_4] : memref<2x8x128xf32, #tpu.memory_space<vmem>>, vector<2x8x128xf32>
    tpu.vector_store %arg1[%c0_2, %c0_3, %c0_4], %3 {strides = array<i32>} : memref<2x8x128xf32, #tpu.memory_space<vmem>>, vector<2x8x128xf32>,
    return
  }
}

module attributes {stable_mosaic.version = 11 : i64} {
  func.func @_fused_tree_kernel(%arg0: memref<2x8x128xf32, #tpu.memory_space<vmem>>, %arg1: memref<2x8x128xf32, #tpu.memory_space<vmem>>, %arg2: memref<2x1xi32, #tpu.memory_space<vmem>>, %arg3: memref<128x640xf32, #tpu.memory_space<vmem>>, %arg4: memref<128x640xf32, #tpu.memory_space<vmem>>, %arg5: memref<1x640xf32, #tpu.memory_space<vmem>>, %arg6: memref<1x128xf32, #tpu.memory_space<vmem>>, %arg7: memref<2x128xf32, #tpu.memory_space<vmem>>, %arg8: memref<2x128xf32, #tpu.memory_space<vmem>>, %arg9: memref<6x2x128xf32, #tpu.memory_space<vmem>>) attributes {dimension_semantics = [], scalar_prefetch = 0 : i64, scratch_operands = 0 : i64, tpu.core_type = #tpu.core_type<tc>} {
    %c0 = arith.constant 0 : index
    %c0_0 = arith.constant 0 : index
    %c0_1 = arith.constant 0 : index
    %0 = vector.load %arg0[%c0, %c0_0, %c0_1] : memref<2x8x128xf32, #tpu.memory_space<vmem>>, vector<2x8x128xf32>
    %c0_2 = arith.constant 0 : index
    %c0_3 = arith.constant 0 : index
    %c0_4 = arith.constant 0 : index
    %1 = vector.load %arg1[%c0_2, %c0_3, %c0_4] : memref<2x8x128xf32, #tpu.memory_space<vmem>>, vector<2x8x128xf32>
    %c0_5 = arith.constant 0 : index
    %c0_6 = arith.constant 0 : index
    %2 = vector.load %arg2[%c0_5, %c0_6] : memref<2x1xi32, #tpu.memory_space<vmem>>, vector<2x1xi32>
    %c0_7 = arith.constant 0 : index
    %c0_8 = arith.constant 0 : index
    %3 = vector.load %arg3[%c0_7, %c0_8] : memref<128x640xf32, #tpu.memory_space<vmem>>, vector<128x640xf32>
    %c0_9 = arith.constant 0 : index
    %c0_10 = arith.constant 0 : index
    %4 = vector.load %arg4[%c0_9, %c0_10] : memref<128x640xf32, #tpu.memory_space<vmem>>, vector<128x640xf32>
    %c0_11 = arith.constant 0 : index
    %c0_12 = arith.constant 0 : index
    %5 = vector.load %arg5[%c0_11, %c0_12] : memref<1x640xf32, #tpu.memory_space<vmem>>, vector<1x640xf32>
    %6 = vector.shape_cast %5 : vector<1x640xf32> to vector<1x1x640xf32>
    %c0_13 = arith.constant 0 : index
    %c0_14 = arith.constant 0 : index
    %7 = vector.load %arg6[%c0_13, %c0_14] : memref<1x128xf32, #tpu.memory_space<vmem>>, vector<1x128xf32>
    %8 = vector.shape_cast %7 : vector<1x128xf32> to vector<1x1x128xf32>
    %9 = tpu.iota {dimensions = array<i32: 1>} : vector<2x8xi32>
    %10 = arith.sitofp %9 : vector<2x8xi32> to vector<2x8xf32>
    %11 = tpu.iota {dimensions = array<i32: 1>} : vector<2x128xi32>
    %12 = arith.sitofp %11 : vector<2x128xi32> to vector<2x128xf32>
    %13 = vector.extract_strided_slice %0 {offsets = [0, 1, 0], sizes = [2, 7, 128], strides = [1, 1, 1]} : vector<2x8x128xf32> to vector<2x7x128xf32>
    %14 = vector.extract_strided_slice %0 {offsets = [0, 0, 0], sizes = [2, 1, 128], strides = [1, 1, 1]} : vector<2x8x128xf32> to vector<2x1x128xf32>
    %15 = tpu.concatenate %13, %14 in 1 : vector<2x7x128xf32>, vector<2x1x128xf32> -> vector<2x8x128xf32>
    %16 = vector.extract_strided_slice %1 {offsets = [0, 1, 0], sizes = [2, 7, 128], strides = [1, 1, 1]} : vector<2x8x128xf32> to vector<2x7x128xf32>
    %17 = vector.extract_strided_slice %1 {offsets = [0, 0, 0], sizes = [2, 1, 128], strides = [1, 1, 1]} : vector<2x8x128xf32> to vector<2x1x128xf32>
    %18 = tpu.concatenate %16, %17 in 1 : vector<2x7x128xf32>, vector<2x1x128xf32> -> vector<2x8x128xf32>
    %cst = arith.constant dense<0.000000e+00> : vector<2x8x640xf32>
    %19 = tpu.matmul %0, %3, %cst {dimension_numbers = #tpu.dot_dimension_numbers<[2], [0], [0, 1], [1], [0, 0, 0, 1, 1, 1], [], []>} : vector<2x8x128xf32>, vector<128x640xf32>, vector<2x8x640xf32> -> vector<2x8x640xf32>
    %cst_15 = arith.constant dense<0.000000e+00> : vector<2x8x640xf32>
    %20 = tpu.matmul %15, %4, %cst_15 {dimension_numbers = #tpu.dot_dimension_numbers<[2], [0], [0, 1], [1], [0, 0, 0, 1, 1, 1], [], []>} : vector<2x8x128xf32>, vector<128x640xf32>, vector<2x8x640xf32> -> vector<2x8x640xf32>
    %21 = arith.addf %19, %20 : vector<2x8x640xf32>
    %22 = vector.broadcast %6 : vector<1x1x640xf32> to vector<2x8x640xf32>
    %23 = arith.addf %21, %22 : vector<2x8x640xf32>
    %24 = vector.extract_strided_slice %23 {offsets = [0, 0, 0], sizes = [2, 8, 128], strides = [1, 1, 1]} : vector<2x8x640xf32> to vector<2x8x128xf32>
    %25 = vector.extract_strided_slice %23 {offsets = [0, 0, 128], sizes = [2, 8, 128], strides = [1, 1, 1]} : vector<2x8x640xf32> to vector<2x8x128xf32>
    %26 = vector.extract_strided_slice %23 {offsets = [0, 0, 256], sizes = [2, 8, 128], strides = [1, 1, 1]} : vector<2x8x640xf32> to vector<2x8x128xf32>
    %27 = vector.extract_strided_slice %23 {offsets = [0, 0, 384], sizes = [2, 8, 128], strides = [1, 1, 1]} : vector<2x8x640xf32> to vector<2x8x128xf32>
    %28 = vector.extract_strided_slice %23 {offsets = [0, 0, 512], sizes = [2, 8, 128], strides = [1, 1, 1]} : vector<2x8x640xf32> to vector<2x8x128xf32>
    %29 = arith.negf %25 : vector<2x8x128xf32>
    %30 = math.exp %29 : vector<2x8x128xf32>
    %cst_16 = arith.constant 1.000000e+00 : f32
    %31 = vector.broadcast %cst_16 : f32 to vector<2x8x128xf32>
    %32 = arith.addf %31, %30 : vector<2x8x128xf32>
    %33 = arith.divf %31, %32 : vector<2x8x128xf32>
    %34 = arith.mulf %1, %33 : vector<2x8x128xf32>
    %35 = arith.negf %26 : vector<2x8x128xf32>
    %36 = math.exp %35 : vector<2x8x128xf32>
    %cst_17 = arith.constant 1.000000e+00 : f32
    %37 = vector.broadcast %cst_17 : f32 to vector<2x8x128xf32>
    %38 = arith.addf %37, %36 : vector<2x8x128xf32>
    %39 = arith.divf %37, %38 : vector<2x8x128xf32>
    %40 = arith.mulf %18, %39 : vector<2x8x128xf32>
    %41 = arith.addf %34, %40 : vector<2x8x128xf32>
    %42 = math.tanh %27 : vector<2x8x128xf32>
    %43 = arith.negf %24 : vector<2x8x128xf32>
    %44 = math.exp %43 : vector<2x8x128xf32>
    %cst_18 = arith.constant 1.000000e+00 : f32
    %45 = vector.broadcast %cst_18 : f32 to vector<2x8x128xf32>
    %46 = arith.addf %45, %44 : vector<2x8x128xf32>
    %47 = arith.divf %45, %46 : vector<2x8x128xf32>
    %48 = arith.mulf %42, %47 : vector<2x8x128xf32>
    %49 = arith.addf %41, %48 : vector<2x8x128xf32>
    %50 = arith.negf %28 : vector<2x8x128xf32>
    %51 = math.exp %50 : vector<2x8x128xf32>
    %cst_19 = arith.constant 1.000000e+00 : f32
    %52 = vector.broadcast %cst_19 : f32 to vector<2x8x128xf32>
    %53 = arith.addf %52, %51 : vector<2x8x128xf32>
    %54 = arith.divf %52, %53 : vector<2x8x128xf32>
    %55 = math.tanh %49 : vector<2x8x128xf32>
    %56 = arith.mulf %54, %55 : vector<2x8x128xf32>
    %57 = vector.broadcast %8 : vector<1x1x128xf32> to vector<2x8x128xf32>
    %58 = arith.mulf %56, %57 : vector<2x8x128xf32>
    %cst_20 = arith.constant dense<0.000000e+00> : vector<2x8xf32>
    %59 = vector.multi_reduction <add>, %58, %cst_20 [2] : vector<2x8x128xf32> to vector<2x8xf32>
    %c1_i32 = arith.constant 1 : i32
    %60 = vector.broadcast %c1_i32 : i32 to vector<2x8xi32>
    %61 = arith.addi %60, %9 : vector<2x8xi32>
    %62 = vector.broadcast %2 : vector<2x1xi32> to vector<2x8xi32>
    %63 = arith.cmpi slt, %61, %62 : vector<2x8xi32>
    %cst_21 = arith.constant -1.000000e+30 : f32
    %64 = vector.broadcast %cst_21 : f32 to vector<2x8xf32>
    %65 = arith.select %63, %59, %64 : vector<2x8xi1>, vector<2x8xf32>
    %cst_22 = arith.constant dense<0xFF800000> : vector<2xf32>
    %66 = vector.multi_reduction <maximumf>, %65, %cst_22 [1] : vector<2x8xf32> to vector<2xf32>
    %67 = vector.shape_cast %66 : vector<2xf32> to vector<2x1xf32>
    %68 = vector.broadcast %67 : vector<2x1xf32> to vector<2x8xf32>
    %69 = arith.cmpf oeq, %65, %68 : vector<2x8xf32>
    %cst_23 = arith.constant 8.000000e+00 : f32
    %70 = vector.broadcast %cst_23 : f32 to vector<2x8xf32>
    %71 = arith.select %69, %10, %70 : vector<2x8xi1>, vector<2x8xf32>
    %cst_24 = arith.constant dense<0x7F800000> : vector<2xf32>
    %72 = vector.multi_reduction <minimumf>, %71, %cst_24 [1] : vector<2x8xf32> to vector<2xf32>
    %73 = vector.shape_cast %72 : vector<2xf32> to vector<2x1xf32>
    %74 = vector.broadcast %73 : vector<2x1xf32> to vector<2x8xf32>
    %75 = arith.cmpf oeq, %10, %74 : vector<2x8xf32>
    %76 = arith.extui %75 : vector<2x8xi1> to vector<2x8xi32>
    %77 = arith.sitofp %76 : vector<2x8xi32> to vector<2x8xf32>
    %78 = vector.broadcast %73 : vector<2x1xf32> to vector<2x8xf32>
    %79 = arith.cmpf olt, %10, %78 : vector<2x8xf32>
    %80 = arith.extui %79 : vector<2x8xi1> to vector<2x8xi32>
    %81 = arith.sitofp %80 : vector<2x8xi32> to vector<2x8xf32>
    %82 = vector.broadcast %73 : vector<2x1xf32> to vector<2x8xf32>
    %83 = arith.cmpf ogt, %10, %82 : vector<2x8xf32>
    %84 = arith.extui %83 : vector<2x8xi1> to vector<2x8xi32>
    %85 = arith.sitofp %84 : vector<2x8xi32> to vector<2x8xf32>
    %86 = vector.shape_cast %77 : vector<2x8xf32> to vector<2x8x1xf32>
    %87 = vector.broadcast %86 : vector<2x8x1xf32> to vector<2x8x128xf32>
    %88 = arith.mulf %87, %56 : vector<2x8x128xf32>
    %89 = vector.shape_cast %81 : vector<2x8xf32> to vector<2x8x1xf32>
    %90 = vector.broadcast %89 : vector<2x8x1xf32> to vector<2x8x128xf32>
    %91 = arith.mulf %90, %0 : vector<2x8x128xf32>
    %92 = arith.addf %88, %91 : vector<2x8x128xf32>
    %93 = vector.shape_cast %85 : vector<2x8xf32> to vector<2x8x1xf32>
    %94 = vector.broadcast %93 : vector<2x8x1xf32> to vector<2x8x128xf32>
    %95 = arith.mulf %94, %15 : vector<2x8x128xf32>
    %96 = arith.addf %92, %95 : vector<2x8x128xf32>
    %97 = vector.shape_cast %77 : vector<2x8xf32> to vector<2x8x1xf32>
    %98 = vector.broadcast %97 : vector<2x8x1xf32> to vector<2x8x128xf32>
    %99 = arith.mulf %98, %49 : vector<2x8x128xf32>
    %100 = vector.shape_cast %81 : vector<2x8xf32> to vector<2x8x1xf32>
    %101 = vector.broadcast %100 : vector<2x8x1xf32> to vector<2x8x128xf32>
    %102 = arith.mulf %101, %1 : vector<2x8x128xf32>
    %103 = arith.addf %99, %102 : vector<2x8x128xf32>
    %104 = vector.shape_cast %85 : vector<2x8xf32> to vector<2x8x1xf32>
    %105 = vector.broadcast %104 : vector<2x8x1xf32> to vector<2x8x128xf32>
    %106 = arith.mulf %105, %18 : vector<2x8x128xf32>
    %107 = arith.addf %103, %106 : vector<2x8x128xf32>
    %108 = vector.broadcast %73 : vector<2x1xf32> to vector<2x128xf32>
    %109 = arith.cmpf oeq, %12, %108 : vector<2x128xf32>
    %110 = arith.extui %109 : vector<2x128xi1> to vector<2x128xi32>
    %111 = arith.sitofp %110 : vector<2x128xi32> to vector<2x128xf32>
    %c0_25 = arith.constant 0 : index
    %c0_26 = arith.constant 0 : index
    %c0_27 = arith.constant 0 : index
    %112 = vector.load %arg9[%c0_25, %c0_26, %c0_27] : memref<6x2x128xf32, #tpu.memory_space<vmem>>, vector<1x2x128xf32>
    %113 = vector.shape_cast %112 : vector<1x2x128xf32> to vector<2x128xf32>
    %114 = vector.shape_cast %111 : vector<2x128xf32> to vector<1x2x128xf32>
    tpu.vector_store %arg9[%c0_25, %c0_26, %c0_27], %114 {strides = array<i32>} : memref<6x2x128xf32, #tpu.memory_space<vmem>>, vector<1x2x128xf32>,
    %c1_i32_28 = arith.constant 1 : i32
    %115 = vector.broadcast %c1_i32_28 : i32 to vector<2x1xi32>
    %116 = arith.cmpi sgt, %2, %115 : vector<2x1xi32>
    %117 = arith.extui %116 : vector<2x1xi1> to vector<2x1xi32>
    %118 = arith.sitofp %117 : vector<2x1xi32> to vector<2x1xf32>
    %119 = vector.shape_cast %118 : vector<2x1xf32> to vector<2x1x1xf32>
    %120 = vector.broadcast %119 : vector<2x1x1xf32> to vector<2x8x128xf32>
    %121 = arith.mulf %120, %96 : vector<2x8x128xf32>
    %cst_29 = arith.constant 1.000000e+00 : f32
    %122 = vector.broadcast %cst_29 : f32 to vector<2x1x1xf32>
    %123 = arith.subf %122, %119 : vector<2x1x1xf32>
    %124 = vector.broadcast %123 : vector<2x1x1xf32> to vector<2x8x128xf32>
    %125 = arith.mulf %124, %0 : vector<2x8x128xf32>
    %126 = arith.addf %121, %125 : vector<2x8x128xf32>
    %127 = vector.broadcast %119 : vector<2x1x1xf32> to vector<2x8x128xf32>
    %128 = arith.mulf %127, %107 : vector<2x8x128xf32>
    %cst_30 = arith.constant 1.000000e+00 : f32
    %129 = vector.broadcast %cst_30 : f32 to vector<2x1x1xf32>
    %130 = arith.subf %129, %119 : vector<2x1x1xf32>
    %131 = vector.broadcast %130 : vector<2x1x1xf32> to vector<2x8x128xf32>
    %132 = arith.mulf %131, %1 : vector<2x8x128xf32>
    %133 = arith.addf %128, %132 : vector<2x8x128xf32>
    %134 = vector.extract_strided_slice %126 {offsets = [0, 1, 0], sizes = [2, 7, 128], strides = [1, 1, 1]} : vector<2x8x128xf32> to vector<2x7x128xf32>
    %135 = vector.extract_strided_slice %126 {offsets = [0, 0, 0], sizes = [2, 1, 128], strides = [1, 1, 1]} : vector<2x8x128xf32> to vector<2x1x128xf32>
    %136 = tpu.concatenate %134, %135 in 1 : vector<2x7x128xf32>, vector<2x1x128xf32> -> vector<2x8x128xf32>
    %137 = vector.extract_strided_slice %133 {offsets = [0, 1, 0], sizes = [2, 7, 128], strides = [1, 1, 1]} : vector<2x8x128xf32> to vector<2x7x128xf32>
    %138 = vector.extract_strided_slice %133 {offsets = [0, 0, 0], sizes = [2, 1, 128], strides = [1, 1, 1]} : vector<2x8x128xf32> to vector<2x1x128xf32>
    %139 = tpu.concatenate %137, %138 in 1 : vector<2x7x128xf32>, vector<2x1x128xf32> -> vector<2x8x128xf32>
    %cst_31 = arith.constant dense<0.000000e+00> : vector<2x8x640xf32>
    %140 = tpu.matmul %126, %3, %cst_31 {dimension_numbers = #tpu.dot_dimension_numbers<[2], [0], [0, 1], [1], [0, 0, 0, 1, 1, 1], [], []>} : vector<2x8x128xf32>, vector<128x640xf32>, vector<2x8x640xf32> -> vector<2x8x640xf32>
    %cst_32 = arith.constant dense<0.000000e+00> : vector<2x8x640xf32>
    %141 = tpu.matmul %136, %4, %cst_32 {dimension_numbers = #tpu.dot_dimension_numbers<[2], [0], [0, 1], [1], [0, 0, 0, 1, 1, 1], [], []>} : vector<2x8x128xf32>, vector<128x640xf32>, vector<2x8x640xf32> -> vector<2x8x640xf32>
    %142 = arith.addf %140, %141 : vector<2x8x640xf32>
    %143 = vector.broadcast %6 : vector<1x1x640xf32> to vector<2x8x640xf32>
    %144 = arith.addf %142, %143 : vector<2x8x640xf32>
    %145 = vector.extract_strided_slice %144 {offsets = [0, 0, 0], sizes = [2, 8, 128], strides = [1, 1, 1]} : vector<2x8x640xf32> to vector<2x8x128xf32>
    %146 = vector.extract_strided_slice %144 {offsets = [0, 0, 128], sizes = [2, 8, 128], strides = [1, 1, 1]} : vector<2x8x640xf32> to vector<2x8x128xf32>
    %147 = vector.extract_strided_slice %144 {offsets = [0, 0, 256], sizes = [2, 8, 128], strides = [1, 1, 1]} : vector<2x8x640xf32> to vector<2x8x128xf32>
    %148 = vector.extract_strided_slice %144 {offsets = [0, 0, 384], sizes = [2, 8, 128], strides = [1, 1, 1]} : vector<2x8x640xf32> to vector<2x8x128xf32>
    %149 = vector.extract_strided_slice %144 {offsets = [0, 0, 512], sizes = [2, 8, 128], strides = [1, 1, 1]} : vector<2x8x640xf32> to vector<2x8x128xf32>
    %150 = arith.negf %146 : vector<2x8x128xf32>
    %151 = math.exp %150 : vector<2x8x128xf32>
    %cst_33 = arith.constant 1.000000e+00 : f32
    %152 = vector.broadcast %cst_33 : f32 to vector<2x8x128xf32>
    %153 = arith.addf %152, %151 : vector<2x8x128xf32>
    %154 = arith.divf %152, %153 : vector<2x8x128xf32>
    %155 = arith.mulf %133, %154 : vector<2x8x128xf32>
    %156 = arith.negf %147 : vector<2x8x128xf32>
    %157 = math.exp %156 : vector<2x8x128xf32>
    %cst_34 = arith.constant 1.000000e+00 : f32
    %158 = vector.broadcast %cst_34 : f32 to vector<2x8x128xf32>
    %159 = arith.addf %158, %157 : vector<2x8x128xf32>
    %160 = arith.divf %158, %159 : vector<2x8x128xf32>
    %161 = arith.mulf %139, %160 : vector<2x8x128xf32>
    %162 = arith.addf %155, %161 : vector<2x8x128xf32>
    %163 = math.tanh %148 : vector<2x8x128xf32>
    %164 = arith.negf %145 : vector<2x8x128xf32>
    %165 = math.exp %164 : vector<2x8x128xf32>
    %cst_35 = arith.constant 1.000000e+00 : f32
    %166 = vector.broadcast %cst_35 : f32 to vector<2x8x128xf32>
    %167 = arith.addf %166, %165 : vector<2x8x128xf32>
    %168 = arith.divf %166, %167 : vector<2x8x128xf32>
    %169 = arith.mulf %163, %168 : vector<2x8x128xf32>
    %170 = arith.addf %162, %169 : vector<2x8x128xf32>
    %171 = arith.negf %149 : vector<2x8x128xf32>
    %172 = math.exp %171 : vector<2x8x128xf32>
    %cst_36 = arith.constant 1.000000e+00 : f32
    %173 = vector.broadcast %cst_36 : f32 to vector<2x8x128xf32>
    %174 = arith.addf %173, %172 : vector<2x8x128xf32>
    %175 = arith.divf %173, %174 : vector<2x8x128xf32>
    %176 = math.tanh %170 : vector<2x8x128xf32>
    %177 = arith.mulf %175, %176 : vector<2x8x128xf32>
    %178 = vector.broadcast %8 : vector<1x1x128xf32> to vector<2x8x128xf32>
    %179 = arith.mulf %177, %178 : vector<2x8x128xf32>
    %cst_37 = arith.constant dense<0.000000e+00> : vector<2x8xf32>
    %180 = vector.multi_reduction <add>, %179, %cst_37 [2] : vector<2x8x128xf32> to vector<2x8xf32>
    %c2_i32 = arith.constant 2 : i32
    %181 = vector.broadcast %c2_i32 : i32 to vector<2x8xi32>
    %182 = arith.addi %181, %9 : vector<2x8xi32>
    %183 = vector.broadcast %2 : vector<2x1xi32> to vector<2x8xi32>
    %184 = arith.cmpi slt, %182, %183 : vector<2x8xi32>
    %cst_38 = arith.constant -1.000000e+30 : f32
    %185 = vector.broadcast %cst_38 : f32 to vector<2x8xf32>
    %186 = arith.select %184, %180, %185 : vector<2x8xi1>, vector<2x8xf32>
    %cst_39 = arith.constant dense<0xFF800000> : vector<2xf32>
    %187 = vector.multi_reduction <maximumf>, %186, %cst_39 [1] : vector<2x8xf32> to vector<2xf32>
    %188 = vector.shape_cast %187 : vector<2xf32> to vector<2x1xf32>
    %189 = vector.broadcast %188 : vector<2x1xf32> to vector<2x8xf32>
    %190 = arith.cmpf oeq, %186, %189 : vector<2x8xf32>
    %cst_40 = arith.constant 8.000000e+00 : f32
    %191 = vector.broadcast %cst_40 : f32 to vector<2x8xf32>
    %192 = arith.select %190, %10, %191 : vector<2x8xi1>, vector<2x8xf32>
    %cst_41 = arith.constant dense<0x7F800000> : vector<2xf32>
    %193 = vector.multi_reduction <minimumf>, %192, %cst_41 [1] : vector<2x8xf32> to vector<2xf32>
    %194 = vector.shape_cast %193 : vector<2xf32> to vector<2x1xf32>
    %195 = vector.broadcast %194 : vector<2x1xf32> to vector<2x8xf32>
    %196 = arith.cmpf oeq, %10, %195 : vector<2x8xf32>
    %197 = arith.extui %196 : vector<2x8xi1> to vector<2x8xi32>
    %198 = arith.sitofp %197 : vector<2x8xi32> to vector<2x8xf32>
    %199 = vector.broadcast %194 : vector<2x1xf32> to vector<2x8xf32>
    %200 = arith.cmpf olt, %10, %199 : vector<2x8xf32>
    %201 = arith.extui %200 : vector<2x8xi1> to vector<2x8xi32>
    %202 = arith.sitofp %201 : vector<2x8xi32> to vector<2x8xf32>
    %203 = vector.broadcast %194 : vector<2x1xf32> to vector<2x8xf32>
    %204 = arith.cmpf ogt, %10, %203 : vector<2x8xf32>
    %205 = arith.extui %204 : vector<2x8xi1> to vector<2x8xi32>
    %206 = arith.sitofp %205 : vector<2x8xi32> to vector<2x8xf32>
    %207 = vector.shape_cast %198 : vector<2x8xf32> to vector<2x8x1xf32>
    %208 = vector.broadcast %207 : vector<2x8x1xf32> to vector<2x8x128xf32>
    %209 = arith.mulf %208, %177 : vector<2x8x128xf32>
    %210 = vector.shape_cast %202 : vector<2x8xf32> to vector<2x8x1xf32>
    %211 = vector.broadcast %210 : vector<2x8x1xf32> to vector<2x8x128xf32>
    %212 = arith.mulf %211, %126 : vector<2x8x128xf32>
    %213 = arith.addf %209, %212 : vector<2x8x128xf32>
    %214 = vector.shape_cast %206 : vector<2x8xf32> to vector<2x8x1xf32>
    %215 = vector.broadcast %214 : vector<2x8x1xf32> to vector<2x8x128xf32>
    %216 = arith.mulf %215, %136 : vector<2x8x128xf32>
    %217 = arith.addf %213, %216 : vector<2x8x128xf32>
    %218 = vector.shape_cast %198 : vector<2x8xf32> to vector<2x8x1xf32>
    %219 = vector.broadcast %218 : vector<2x8x1xf32> to vector<2x8x128xf32>
    %220 = arith.mulf %219, %170 : vector<2x8x128xf32>
    %221 = vector.shape_cast %202 : vector<2x8xf32> to vector<2x8x1xf32>
    %222 = vector.broadcast %221 : vector<2x8x1xf32> to vector<2x8x128xf32>
    %223 = arith.mulf %222, %133 : vector<2x8x128xf32>
    %224 = arith.addf %220, %223 : vector<2x8x128xf32>
    %225 = vector.shape_cast %206 : vector<2x8xf32> to vector<2x8x1xf32>
    %226 = vector.broadcast %225 : vector<2x8x1xf32> to vector<2x8x128xf32>
    %227 = arith.mulf %226, %139 : vector<2x8x128xf32>
    %228 = arith.addf %224, %227 : vector<2x8x128xf32>
    %229 = vector.broadcast %194 : vector<2x1xf32> to vector<2x128xf32>
    %230 = arith.cmpf oeq, %12, %229 : vector<2x128xf32>
    %231 = arith.extui %230 : vector<2x128xi1> to vector<2x128xi32>
    %232 = arith.sitofp %231 : vector<2x128xi32> to vector<2x128xf32>
    %c1 = arith.constant 1 : index
    %c0_42 = arith.constant 0 : index
    %c0_43 = arith.constant 0 : index
    %233 = vector.load %arg9[%c1, %c0_42, %c0_43] : memref<6x2x128xf32, #tpu.memory_space<vmem>>, vector<1x2x128xf32>
    %234 = vector.shape_cast %233 : vector<1x2x128xf32> to vector<2x128xf32>
    %235 = vector.shape_cast %232 : vector<2x128xf32> to vector<1x2x128xf32>
    tpu.vector_store %arg9[%c1, %c0_42, %c0_43], %235 {strides = array<i32>} : memref<6x2x128xf32, #tpu.memory_space<vmem>>, vector<1x2x128xf32>,
    %c2_i32_44 = arith.constant 2 : i32
    %236 = vector.broadcast %c2_i32_44 : i32 to vector<2x1xi32>
    %237 = arith.cmpi sgt, %2, %236 : vector<2x1xi32>
    %238 = arith.extui %237 : vector<2x1xi1> to vector<2x1xi32>
    %239 = arith.sitofp %238 : vector<2x1xi32> to vector<2x1xf32>
    %240 = vector.shape_cast %239 : vector<2x1xf32> to vector<2x1x1xf32>
    %241 = vector.broadcast %240 : vector<2x1x1xf32> to vector<2x8x128xf32>
    %242 = arith.mulf %241, %217 : vector<2x8x128xf32>
    %cst_45 = arith.constant 1.000000e+00 : f32
    %243 = vector.broadcast %cst_45 : f32 to vector<2x1x1xf32>
    %244 = arith.subf %243, %240 : vector<2x1x1xf32>
    %245 = vector.broadcast %244 : vector<2x1x1xf32> to vector<2x8x128xf32>
    %246 = arith.mulf %245, %126 : vector<2x8x128xf32>
    %247 = arith.addf %242, %246 : vector<2x8x128xf32>
    %248 = vector.broadcast %240 : vector<2x1x1xf32> to vector<2x8x128xf32>
    %249 = arith.mulf %248, %228 : vector<2x8x128xf32>
    %cst_46 = arith.constant 1.000000e+00 : f32
    %250 = vector.broadcast %cst_46 : f32 to vector<2x1x1xf32>
    %251 = arith.subf %250, %240 : vector<2x1x1xf32>
    %252 = vector.broadcast %251 : vector<2x1x1xf32> to vector<2x8x128xf32>
    %253 = arith.mulf %252, %133 : vector<2x8x128xf32>
    %254 = arith.addf %249, %253 : vector<2x8x128xf32>
    %255 = vector.extract_strided_slice %247 {offsets = [0, 1, 0], sizes = [2, 7, 128], strides = [1, 1, 1]} : vector<2x8x128xf32> to vector<2x7x128xf32>
    %256 = vector.extract_strided_slice %247 {offsets = [0, 0, 0], sizes = [2, 1, 128], strides = [1, 1, 1]} : vector<2x8x128xf32> to vector<2x1x128xf32>
    %257 = tpu.concatenate %255, %256 in 1 : vector<2x7x128xf32>, vector<2x1x128xf32> -> vector<2x8x128xf32>
    %258 = vector.extract_strided_slice %254 {offsets = [0, 1, 0], sizes = [2, 7, 128], strides = [1, 1, 1]} : vector<2x8x128xf32> to vector<2x7x128xf32>
    %259 = vector.extract_strided_slice %254 {offsets = [0, 0, 0], sizes = [2, 1, 128], strides = [1, 1, 1]} : vector<2x8x128xf32> to vector<2x1x128xf32>
    %260 = tpu.concatenate %258, %259 in 1 : vector<2x7x128xf32>, vector<2x1x128xf32> -> vector<2x8x128xf32>
    %cst_47 = arith.constant dense<0.000000e+00> : vector<2x8x640xf32>
    %261 = tpu.matmul %247, %3, %cst_47 {dimension_numbers = #tpu.dot_dimension_numbers<[2], [0], [0, 1], [1], [0, 0, 0, 1, 1, 1], [], []>} : vector<2x8x128xf32>, vector<128x640xf32>, vector<2x8x640xf32> -> vector<2x8x640xf32>
    %cst_48 = arith.constant dense<0.000000e+00> : vector<2x8x640xf32>
    %262 = tpu.matmul %257, %4, %cst_48 {dimension_numbers = #tpu.dot_dimension_numbers<[2], [0], [0, 1], [1], [0, 0, 0, 1, 1, 1], [], []>} : vector<2x8x128xf32>, vector<128x640xf32>, vector<2x8x640xf32> -> vector<2x8x640xf32>
    %263 = arith.addf %261, %262 : vector<2x8x640xf32>
    %264 = vector.broadcast %6 : vector<1x1x640xf32> to vector<2x8x640xf32>
    %265 = arith.addf %263, %264 : vector<2x8x640xf32>
    %266 = vector.extract_strided_slice %265 {offsets = [0, 0, 0], sizes = [2, 8, 128], strides = [1, 1, 1]} : vector<2x8x640xf32> to vector<2x8x128xf32>
    %267 = vector.extract_strided_slice %265 {offsets = [0, 0, 128], sizes = [2, 8, 128], strides = [1, 1, 1]} : vector<2x8x640xf32> to vector<2x8x128xf32>
    %268 = vector.extract_strided_slice %265 {offsets = [0, 0, 256], sizes = [2, 8, 128], strides = [1, 1, 1]} : vector<2x8x640xf32> to vector<2x8x128xf32>
    %269 = vector.extract_strided_slice %265 {offsets = [0, 0, 384], sizes = [2, 8, 128], strides = [1, 1, 1]} : vector<2x8x640xf32> to vector<2x8x128xf32>
    %270 = vector.extract_strided_slice %265 {offsets = [0, 0, 512], sizes = [2, 8, 128], strides = [1, 1, 1]} : vector<2x8x640xf32> to vector<2x8x128xf32>
    %271 = arith.negf %267 : vector<2x8x128xf32>
    %272 = math.exp %271 : vector<2x8x128xf32>
    %cst_49 = arith.constant 1.000000e+00 : f32
    %273 = vector.broadcast %cst_49 : f32 to vector<2x8x128xf32>
    %274 = arith.addf %273, %272 : vector<2x8x128xf32>
    %275 = arith.divf %273, %274 : vector<2x8x128xf32>
    %276 = arith.mulf %254, %275 : vector<2x8x128xf32>
    %277 = arith.negf %268 : vector<2x8x128xf32>
    %278 = math.exp %277 : vector<2x8x128xf32>
    %cst_50 = arith.constant 1.000000e+00 : f32
    %279 = vector.broadcast %cst_50 : f32 to vector<2x8x128xf32>
    %280 = arith.addf %279, %278 : vector<2x8x128xf32>
    %281 = arith.divf %279, %280 : vector<2x8x128xf32>
    %282 = arith.mulf %260, %281 : vector<2x8x128xf32>
    %283 = arith.addf %276, %282 : vector<2x8x128xf32>
    %284 = math.tanh %269 : vector<2x8x128xf32>
    %285 = arith.negf %266 : vector<2x8x128xf32>
    %286 = math.exp %285 : vector<2x8x128xf32>
    %cst_51 = arith.constant 1.000000e+00 : f32
    %287 = vector.broadcast %cst_51 : f32 to vector<2x8x128xf32>
    %288 = arith.addf %287, %286 : vector<2x8x128xf32>
    %289 = arith.divf %287, %288 : vector<2x8x128xf32>
    %290 = arith.mulf %284, %289 : vector<2x8x128xf32>
    %291 = arith.addf %283, %290 : vector<2x8x128xf32>
    %292 = arith.negf %270 : vector<2x8x128xf32>
    %293 = math.exp %292 : vector<2x8x128xf32>
    %cst_52 = arith.constant 1.000000e+00 : f32
    %294 = vector.broadcast %cst_52 : f32 to vector<2x8x128xf32>
    %295 = arith.addf %294, %293 : vector<2x8x128xf32>
    %296 = arith.divf %294, %295 : vector<2x8x128xf32>
    %297 = math.tanh %291 : vector<2x8x128xf32>
    %298 = arith.mulf %296, %297 : vector<2x8x128xf32>
    %299 = vector.broadcast %8 : vector<1x1x128xf32> to vector<2x8x128xf32>
    %300 = arith.mulf %298, %299 : vector<2x8x128xf32>
    %cst_53 = arith.constant dense<0.000000e+00> : vector<2x8xf32>
    %301 = vector.multi_reduction <add>, %300, %cst_53 [2] : vector<2x8x128xf32> to vector<2x8xf32>
    %c3_i32 = arith.constant 3 : i32
    %302 = vector.broadcast %c3_i32 : i32 to vector<2x8xi32>
    %303 = arith.addi %302, %9 : vector<2x8xi32>
    %304 = vector.broadcast %2 : vector<2x1xi32> to vector<2x8xi32>
    %305 = arith.cmpi slt, %303, %304 : vector<2x8xi32>
    %cst_54 = arith.constant -1.000000e+30 : f32
    %306 = vector.broadcast %cst_54 : f32 to vector<2x8xf32>
    %307 = arith.select %305, %301, %306 : vector<2x8xi1>, vector<2x8xf32>
    %cst_55 = arith.constant dense<0xFF800000> : vector<2xf32>
    %308 = vector.multi_reduction <maximumf>, %307, %cst_55 [1] : vector<2x8xf32> to vector<2xf32>
    %309 = vector.shape_cast %308 : vector<2xf32> to vector<2x1xf32>
    %310 = vector.broadcast %309 : vector<2x1xf32> to vector<2x8xf32>
    %311 = arith.cmpf oeq, %307, %310 : vector<2x8xf32>
    %cst_56 = arith.constant 8.000000e+00 : f32
    %312 = vector.broadcast %cst_56 : f32 to vector<2x8xf32>
    %313 = arith.select %311, %10, %312 : vector<2x8xi1>, vector<2x8xf32>
    %cst_57 = arith.constant dense<0x7F800000> : vector<2xf32>
    %314 = vector.multi_reduction <minimumf>, %313, %cst_57 [1] : vector<2x8xf32> to vector<2xf32>
    %315 = vector.shape_cast %314 : vector<2xf32> to vector<2x1xf32>
    %316 = vector.broadcast %315 : vector<2x1xf32> to vector<2x8xf32>
    %317 = arith.cmpf oeq, %10, %316 : vector<2x8xf32>
    %318 = arith.extui %317 : vector<2x8xi1> to vector<2x8xi32>
    %319 = arith.sitofp %318 : vector<2x8xi32> to vector<2x8xf32>
    %320 = vector.broadcast %315 : vector<2x1xf32> to vector<2x8xf32>
    %321 = arith.cmpf olt, %10, %320 : vector<2x8xf32>
    %322 = arith.extui %321 : vector<2x8xi1> to vector<2x8xi32>
    %323 = arith.sitofp %322 : vector<2x8xi32> to vector<2x8xf32>
    %324 = vector.broadcast %315 : vector<2x1xf32> to vector<2x8xf32>
    %325 = arith.cmpf ogt, %10, %324 : vector<2x8xf32>
    %326 = arith.extui %325 : vector<2x8xi1> to vector<2x8xi32>
    %327 = arith.sitofp %326 : vector<2x8xi32> to vector<2x8xf32>
    %328 = vector.shape_cast %319 : vector<2x8xf32> to vector<2x8x1xf32>
    %329 = vector.broadcast %328 : vector<2x8x1xf32> to vector<2x8x128xf32>
    %330 = arith.mulf %329, %298 : vector<2x8x128xf32>
    %331 = vector.shape_cast %323 : vector<2x8xf32> to vector<2x8x1xf32>
    %332 = vector.broadcast %331 : vector<2x8x1xf32> to vector<2x8x128xf32>
    %333 = arith.mulf %332, %247 : vector<2x8x128xf32>
    %334 = arith.addf %330, %333 : vector<2x8x128xf32>
    %335 = vector.shape_cast %327 : vector<2x8xf32> to vector<2x8x1xf32>
    %336 = vector.broadcast %335 : vector<2x8x1xf32> to vector<2x8x128xf32>
    %337 = arith.mulf %336, %257 : vector<2x8x128xf32>
    %338 = arith.addf %334, %337 : vector<2x8x128xf32>
    %339 = vector.shape_cast %319 : vector<2x8xf32> to vector<2x8x1xf32>
    %340 = vector.broadcast %339 : vector<2x8x1xf32> to vector<2x8x128xf32>
    %341 = arith.mulf %340, %291 : vector<2x8x128xf32>
    %342 = vector.shape_cast %323 : vector<2x8xf32> to vector<2x8x1xf32>
    %343 = vector.broadcast %342 : vector<2x8x1xf32> to vector<2x8x128xf32>
    %344 = arith.mulf %343, %254 : vector<2x8x128xf32>
    %345 = arith.addf %341, %344 : vector<2x8x128xf32>
    %346 = vector.shape_cast %327 : vector<2x8xf32> to vector<2x8x1xf32>
    %347 = vector.broadcast %346 : vector<2x8x1xf32> to vector<2x8x128xf32>
    %348 = arith.mulf %347, %260 : vector<2x8x128xf32>
    %349 = arith.addf %345, %348 : vector<2x8x128xf32>
    %350 = vector.broadcast %315 : vector<2x1xf32> to vector<2x128xf32>
    %351 = arith.cmpf oeq, %12, %350 : vector<2x128xf32>
    %352 = arith.extui %351 : vector<2x128xi1> to vector<2x128xi32>
    %353 = arith.sitofp %352 : vector<2x128xi32> to vector<2x128xf32>
    %c2 = arith.constant 2 : index
    %c0_58 = arith.constant 0 : index
    %c0_59 = arith.constant 0 : index
    %354 = vector.load %arg9[%c2, %c0_58, %c0_59] : memref<6x2x128xf32, #tpu.memory_space<vmem>>, vector<1x2x128xf32>
    %355 = vector.shape_cast %354 : vector<1x2x128xf32> to vector<2x128xf32>
    %356 = vector.shape_cast %353 : vector<2x128xf32> to vector<1x2x128xf32>
    tpu.vector_store %arg9[%c2, %c0_58, %c0_59], %356 {strides = array<i32>} : memref<6x2x128xf32, #tpu.memory_space<vmem>>, vector<1x2x128xf32>,
    %c3_i32_60 = arith.constant 3 : i32
    %357 = vector.broadcast %c3_i32_60 : i32 to vector<2x1xi32>
    %358 = arith.cmpi sgt, %2, %357 : vector<2x1xi32>
    %359 = arith.extui %358 : vector<2x1xi1> to vector<2x1xi32>
    %360 = arith.sitofp %359 : vector<2x1xi32> to vector<2x1xf32>
    %361 = vector.shape_cast %360 : vector<2x1xf32> to vector<2x1x1xf32>
    %362 = vector.broadcast %361 : vector<2x1x1xf32> to vector<2x8x128xf32>
    %363 = arith.mulf %362, %338 : vector<2x8x128xf32>
    %cst_61 = arith.constant 1.000000e+00 : f32
    %364 = vector.broadcast %cst_61 : f32 to vector<2x1x1xf32>
    %365 = arith.subf %364, %361 : vector<2x1x1xf32>
    %366 = vector.broadcast %365 : vector<2x1x1xf32> to vector<2x8x128xf32>
    %367 = arith.mulf %366, %247 : vector<2x8x128xf32>
    %368 = arith.addf %363, %367 : vector<2x8x128xf32>
    %369 = vector.broadcast %361 : vector<2x1x1xf32> to vector<2x8x128xf32>
    %370 = arith.mulf %369, %349 : vector<2x8x128xf32>
    %cst_62 = arith.constant 1.000000e+00 : f32
    %371 = vector.broadcast %cst_62 : f32 to vector<2x1x1xf32>
    %372 = arith.subf %371, %361 : vector<2x1x1xf32>
    %373 = vector.broadcast %372 : vector<2x1x1xf32> to vector<2x8x128xf32>
    %374 = arith.mulf %373, %254 : vector<2x8x128xf32>
    %375 = arith.addf %370, %374 : vector<2x8x128xf32>
    %376 = vector.extract_strided_slice %368 {offsets = [0, 1, 0], sizes = [2, 7, 128], strides = [1, 1, 1]} : vector<2x8x128xf32> to vector<2x7x128xf32>
    %377 = vector.extract_strided_slice %368 {offsets = [0, 0, 0], sizes = [2, 1, 128], strides = [1, 1, 1]} : vector<2x8x128xf32> to vector<2x1x128xf32>
    %378 = tpu.concatenate %376, %377 in 1 : vector<2x7x128xf32>, vector<2x1x128xf32> -> vector<2x8x128xf32>
    %379 = vector.extract_strided_slice %375 {offsets = [0, 1, 0], sizes = [2, 7, 128], strides = [1, 1, 1]} : vector<2x8x128xf32> to vector<2x7x128xf32>
    %380 = vector.extract_strided_slice %375 {offsets = [0, 0, 0], sizes = [2, 1, 128], strides = [1, 1, 1]} : vector<2x8x128xf32> to vector<2x1x128xf32>
    %381 = tpu.concatenate %379, %380 in 1 : vector<2x7x128xf32>, vector<2x1x128xf32> -> vector<2x8x128xf32>
    %cst_63 = arith.constant dense<0.000000e+00> : vector<2x8x640xf32>
    %382 = tpu.matmul %368, %3, %cst_63 {dimension_numbers = #tpu.dot_dimension_numbers<[2], [0], [0, 1], [1], [0, 0, 0, 1, 1, 1], [], []>} : vector<2x8x128xf32>, vector<128x640xf32>, vector<2x8x640xf32> -> vector<2x8x640xf32>
    %cst_64 = arith.constant dense<0.000000e+00> : vector<2x8x640xf32>
    %383 = tpu.matmul %378, %4, %cst_64 {dimension_numbers = #tpu.dot_dimension_numbers<[2], [0], [0, 1], [1], [0, 0, 0, 1, 1, 1], [], []>} : vector<2x8x128xf32>, vector<128x640xf32>, vector<2x8x640xf32> -> vector<2x8x640xf32>
    %384 = arith.addf %382, %383 : vector<2x8x640xf32>
    %385 = vector.broadcast %6 : vector<1x1x640xf32> to vector<2x8x640xf32>
    %386 = arith.addf %384, %385 : vector<2x8x640xf32>
    %387 = vector.extract_strided_slice %386 {offsets = [0, 0, 0], sizes = [2, 8, 128], strides = [1, 1, 1]} : vector<2x8x640xf32> to vector<2x8x128xf32>
    %388 = vector.extract_strided_slice %386 {offsets = [0, 0, 128], sizes = [2, 8, 128], strides = [1, 1, 1]} : vector<2x8x640xf32> to vector<2x8x128xf32>
    %389 = vector.extract_strided_slice %386 {offsets = [0, 0, 256], sizes = [2, 8, 128], strides = [1, 1, 1]} : vector<2x8x640xf32> to vector<2x8x128xf32>
    %390 = vector.extract_strided_slice %386 {offsets = [0, 0, 384], sizes = [2, 8, 128], strides = [1, 1, 1]} : vector<2x8x640xf32> to vector<2x8x128xf32>
    %391 = vector.extract_strided_slice %386 {offsets = [0, 0, 512], sizes = [2, 8, 128], strides = [1, 1, 1]} : vector<2x8x640xf32> to vector<2x8x128xf32>
    %392 = arith.negf %388 : vector<2x8x128xf32>
    %393 = math.exp %392 : vector<2x8x128xf32>
    %cst_65 = arith.constant 1.000000e+00 : f32
    %394 = vector.broadcast %cst_65 : f32 to vector<2x8x128xf32>
    %395 = arith.addf %394, %393 : vector<2x8x128xf32>
    %396 = arith.divf %394, %395 : vector<2x8x128xf32>
    %397 = arith.mulf %375, %396 : vector<2x8x128xf32>
    %398 = arith.negf %389 : vector<2x8x128xf32>
    %399 = math.exp %398 : vector<2x8x128xf32>
    %cst_66 = arith.constant 1.000000e+00 : f32
    %400 = vector.broadcast %cst_66 : f32 to vector<2x8x128xf32>
    %401 = arith.addf %400, %399 : vector<2x8x128xf32>
    %402 = arith.divf %400, %401 : vector<2x8x128xf32>
    %403 = arith.mulf %381, %402 : vector<2x8x128xf32>
    %404 = arith.addf %397, %403 : vector<2x8x128xf32>
    %405 = math.tanh %390 : vector<2x8x128xf32>
    %406 = arith.negf %387 : vector<2x8x128xf32>
    %407 = math.exp %406 : vector<2x8x128xf32>
    %cst_67 = arith.constant 1.000000e+00 : f32
    %408 = vector.broadcast %cst_67 : f32 to vector<2x8x128xf32>
    %409 = arith.addf %408, %407 : vector<2x8x128xf32>
    %410 = arith.divf %408, %409 : vector<2x8x128xf32>
    %411 = arith.mulf %405, %410 : vector<2x8x128xf32>
    %412 = arith.addf %404, %411 : vector<2x8x128xf32>
    %413 = arith.negf %391 : vector<2x8x128xf32>
    %414 = math.exp %413 : vector<2x8x128xf32>
    %cst_68 = arith.constant 1.000000e+00 : f32
    %415 = vector.broadcast %cst_68 : f32 to vector<2x8x128xf32>
    %416 = arith.addf %415, %414 : vector<2x8x128xf32>
    %417 = arith.divf %415, %416 : vector<2x8x128xf32>
    %418 = math.tanh %412 : vector<2x8x128xf32>
    %419 = arith.mulf %417, %418 : vector<2x8x128xf32>
    %420 = vector.broadcast %8 : vector<1x1x128xf32> to vector<2x8x128xf32>
    %421 = arith.mulf %419, %420 : vector<2x8x128xf32>
    %cst_69 = arith.constant dense<0.000000e+00> : vector<2x8xf32>
    %422 = vector.multi_reduction <add>, %421, %cst_69 [2] : vector<2x8x128xf32> to vector<2x8xf32>
    %c4_i32 = arith.constant 4 : i32
    %423 = vector.broadcast %c4_i32 : i32 to vector<2x8xi32>
    %424 = arith.addi %423, %9 : vector<2x8xi32>
    %425 = vector.broadcast %2 : vector<2x1xi32> to vector<2x8xi32>
    %426 = arith.cmpi slt, %424, %425 : vector<2x8xi32>
    %cst_70 = arith.constant -1.000000e+30 : f32
    %427 = vector.broadcast %cst_70 : f32 to vector<2x8xf32>
    %428 = arith.select %426, %422, %427 : vector<2x8xi1>, vector<2x8xf32>
    %cst_71 = arith.constant dense<0xFF800000> : vector<2xf32>
    %429 = vector.multi_reduction <maximumf>, %428, %cst_71 [1] : vector<2x8xf32> to vector<2xf32>
    %430 = vector.shape_cast %429 : vector<2xf32> to vector<2x1xf32>
    %431 = vector.broadcast %430 : vector<2x1xf32> to vector<2x8xf32>
    %432 = arith.cmpf oeq, %428, %431 : vector<2x8xf32>
    %cst_72 = arith.constant 8.000000e+00 : f32
    %433 = vector.broadcast %cst_72 : f32 to vector<2x8xf32>
    %434 = arith.select %432, %10, %433 : vector<2x8xi1>, vector<2x8xf32>
    %cst_73 = arith.constant dense<0x7F800000> : vector<2xf32>
    %435 = vector.multi_reduction <minimumf>, %434, %cst_73 [1] : vector<2x8xf32> to vector<2xf32>
    %436 = vector.shape_cast %435 : vector<2xf32> to vector<2x1xf32>
    %437 = vector.broadcast %436 : vector<2x1xf32> to vector<2x8xf32>
    %438 = arith.cmpf oeq, %10, %437 : vector<2x8xf32>
    %439 = arith.extui %438 : vector<2x8xi1> to vector<2x8xi32>
    %440 = arith.sitofp %439 : vector<2x8xi32> to vector<2x8xf32>
    %441 = vector.broadcast %436 : vector<2x1xf32> to vector<2x8xf32>
    %442 = arith.cmpf olt, %10, %441 : vector<2x8xf32>
    %443 = arith.extui %442 : vector<2x8xi1> to vector<2x8xi32>
    %444 = arith.sitofp %443 : vector<2x8xi32> to vector<2x8xf32>
    %445 = vector.broadcast %436 : vector<2x1xf32> to vector<2x8xf32>
    %446 = arith.cmpf ogt, %10, %445 : vector<2x8xf32>
    %447 = arith.extui %446 : vector<2x8xi1> to vector<2x8xi32>
    %448 = arith.sitofp %447 : vector<2x8xi32> to vector<2x8xf32>
    %449 = vector.shape_cast %440 : vector<2x8xf32> to vector<2x8x1xf32>
    %450 = vector.broadcast %449 : vector<2x8x1xf32> to vector<2x8x128xf32>
    %451 = arith.mulf %450, %419 : vector<2x8x128xf32>
    %452 = vector.shape_cast %444 : vector<2x8xf32> to vector<2x8x1xf32>
    %453 = vector.broadcast %452 : vector<2x8x1xf32> to vector<2x8x128xf32>
    %454 = arith.mulf %453, %368 : vector<2x8x128xf32>
    %455 = arith.addf %451, %454 : vector<2x8x128xf32>
    %456 = vector.shape_cast %448 : vector<2x8xf32> to vector<2x8x1xf32>
    %457 = vector.broadcast %456 : vector<2x8x1xf32> to vector<2x8x128xf32>
    %458 = arith.mulf %457, %378 : vector<2x8x128xf32>
    %459 = arith.addf %455, %458 : vector<2x8x128xf32>
    %460 = vector.shape_cast %440 : vector<2x8xf32> to vector<2x8x1xf32>
    %461 = vector.broadcast %460 : vector<2x8x1xf32> to vector<2x8x128xf32>
    %462 = arith.mulf %461, %412 : vector<2x8x128xf32>
    %463 = vector.shape_cast %444 : vector<2x8xf32> to vector<2x8x1xf32>
    %464 = vector.broadcast %463 : vector<2x8x1xf32> to vector<2x8x128xf32>
    %465 = arith.mulf %464, %375 : vector<2x8x128xf32>
    %466 = arith.addf %462, %465 : vector<2x8x128xf32>
    %467 = vector.shape_cast %448 : vector<2x8xf32> to vector<2x8x1xf32>
    %468 = vector.broadcast %467 : vector<2x8x1xf32> to vector<2x8x128xf32>
    %469 = arith.mulf %468, %381 : vector<2x8x128xf32>
    %470 = arith.addf %466, %469 : vector<2x8x128xf32>
    %471 = vector.broadcast %436 : vector<2x1xf32> to vector<2x128xf32>
    %472 = arith.cmpf oeq, %12, %471 : vector<2x128xf32>
    %473 = arith.extui %472 : vector<2x128xi1> to vector<2x128xi32>
    %474 = arith.sitofp %473 : vector<2x128xi32> to vector<2x128xf32>
    %c3 = arith.constant 3 : index
    %c0_74 = arith.constant 0 : index
    %c0_75 = arith.constant 0 : index
    %475 = vector.load %arg9[%c3, %c0_74, %c0_75] : memref<6x2x128xf32, #tpu.memory_space<vmem>>, vector<1x2x128xf32>
    %476 = vector.shape_cast %475 : vector<1x2x128xf32> to vector<2x128xf32>
    %477 = vector.shape_cast %474 : vector<2x128xf32> to vector<1x2x128xf32>
    tpu.vector_store %arg9[%c3, %c0_74, %c0_75], %477 {strides = array<i32>} : memref<6x2x128xf32, #tpu.memory_space<vmem>>, vector<1x2x128xf32>,
    %c4_i32_76 = arith.constant 4 : i32
    %478 = vector.broadcast %c4_i32_76 : i32 to vector<2x1xi32>
    %479 = arith.cmpi sgt, %2, %478 : vector<2x1xi32>
    %480 = arith.extui %479 : vector<2x1xi1> to vector<2x1xi32>
    %481 = arith.sitofp %480 : vector<2x1xi32> to vector<2x1xf32>
    %482 = vector.shape_cast %481 : vector<2x1xf32> to vector<2x1x1xf32>
    %483 = vector.broadcast %482 : vector<2x1x1xf32> to vector<2x8x128xf32>
    %484 = arith.mulf %483, %459 : vector<2x8x128xf32>
    %cst_77 = arith.constant 1.000000e+00 : f32
    %485 = vector.broadcast %cst_77 : f32 to vector<2x1x1xf32>
    %486 = arith.subf %485, %482 : vector<2x1x1xf32>
    %487 = vector.broadcast %486 : vector<2x1x1xf32> to vector<2x8x128xf32>
    %488 = arith.mulf %487, %368 : vector<2x8x128xf32>
    %489 = arith.addf %484, %488 : vector<2x8x128xf32>
    %490 = vector.broadcast %482 : vector<2x1x1xf32> to vector<2x8x128xf32>
    %491 = arith.mulf %490, %470 : vector<2x8x128xf32>
    %cst_78 = arith.constant 1.000000e+00 : f32
    %492 = vector.broadcast %cst_78 : f32 to vector<2x1x1xf32>
    %493 = arith.subf %492, %482 : vector<2x1x1xf32>
    %494 = vector.broadcast %493 : vector<2x1x1xf32> to vector<2x8x128xf32>
    %495 = arith.mulf %494, %375 : vector<2x8x128xf32>
    %496 = arith.addf %491, %495 : vector<2x8x128xf32>
    %497 = vector.extract_strided_slice %489 {offsets = [0, 1, 0], sizes = [2, 7, 128], strides = [1, 1, 1]} : vector<2x8x128xf32> to vector<2x7x128xf32>
    %498 = vector.extract_strided_slice %489 {offsets = [0, 0, 0], sizes = [2, 1, 128], strides = [1, 1, 1]} : vector<2x8x128xf32> to vector<2x1x128xf32>
    %499 = tpu.concatenate %497, %498 in 1 : vector<2x7x128xf32>, vector<2x1x128xf32> -> vector<2x8x128xf32>
    %500 = vector.extract_strided_slice %496 {offsets = [0, 1, 0], sizes = [2, 7, 128], strides = [1, 1, 1]} : vector<2x8x128xf32> to vector<2x7x128xf32>
    %501 = vector.extract_strided_slice %496 {offsets = [0, 0, 0], sizes = [2, 1, 128], strides = [1, 1, 1]} : vector<2x8x128xf32> to vector<2x1x128xf32>
    %502 = tpu.concatenate %500, %501 in 1 : vector<2x7x128xf32>, vector<2x1x128xf32> -> vector<2x8x128xf32>
    %cst_79 = arith.constant dense<0.000000e+00> : vector<2x8x640xf32>
    %503 = tpu.matmul %489, %3, %cst_79 {dimension_numbers = #tpu.dot_dimension_numbers<[2], [0], [0, 1], [1], [0, 0, 0, 1, 1, 1], [], []>} : vector<2x8x128xf32>, vector<128x640xf32>, vector<2x8x640xf32> -> vector<2x8x640xf32>
    %cst_80 = arith.constant dense<0.000000e+00> : vector<2x8x640xf32>
    %504 = tpu.matmul %499, %4, %cst_80 {dimension_numbers = #tpu.dot_dimension_numbers<[2], [0], [0, 1], [1], [0, 0, 0, 1, 1, 1], [], []>} : vector<2x8x128xf32>, vector<128x640xf32>, vector<2x8x640xf32> -> vector<2x8x640xf32>
    %505 = arith.addf %503, %504 : vector<2x8x640xf32>
    %506 = vector.broadcast %6 : vector<1x1x640xf32> to vector<2x8x640xf32>
    %507 = arith.addf %505, %506 : vector<2x8x640xf32>
    %508 = vector.extract_strided_slice %507 {offsets = [0, 0, 0], sizes = [2, 8, 128], strides = [1, 1, 1]} : vector<2x8x640xf32> to vector<2x8x128xf32>
    %509 = vector.extract_strided_slice %507 {offsets = [0, 0, 128], sizes = [2, 8, 128], strides = [1, 1, 1]} : vector<2x8x640xf32> to vector<2x8x128xf32>
    %510 = vector.extract_strided_slice %507 {offsets = [0, 0, 256], sizes = [2, 8, 128], strides = [1, 1, 1]} : vector<2x8x640xf32> to vector<2x8x128xf32>
    %511 = vector.extract_strided_slice %507 {offsets = [0, 0, 384], sizes = [2, 8, 128], strides = [1, 1, 1]} : vector<2x8x640xf32> to vector<2x8x128xf32>
    %512 = vector.extract_strided_slice %507 {offsets = [0, 0, 512], sizes = [2, 8, 128], strides = [1, 1, 1]} : vector<2x8x640xf32> to vector<2x8x128xf32>
    %513 = arith.negf %509 : vector<2x8x128xf32>
    %514 = math.exp %513 : vector<2x8x128xf32>
    %cst_81 = arith.constant 1.000000e+00 : f32
    %515 = vector.broadcast %cst_81 : f32 to vector<2x8x128xf32>
    %516 = arith.addf %515, %514 : vector<2x8x128xf32>
    %517 = arith.divf %515, %516 : vector<2x8x128xf32>
    %518 = arith.mulf %496, %517 : vector<2x8x128xf32>
    %519 = arith.negf %510 : vector<2x8x128xf32>
    %520 = math.exp %519 : vector<2x8x128xf32>
    %cst_82 = arith.constant 1.000000e+00 : f32
    %521 = vector.broadcast %cst_82 : f32 to vector<2x8x128xf32>
    %522 = arith.addf %521, %520 : vector<2x8x128xf32>
    %523 = arith.divf %521, %522 : vector<2x8x128xf32>
    %524 = arith.mulf %502, %523 : vector<2x8x128xf32>
    %525 = arith.addf %518, %524 : vector<2x8x128xf32>
    %526 = math.tanh %511 : vector<2x8x128xf32>
    %527 = arith.negf %508 : vector<2x8x128xf32>
    %528 = math.exp %527 : vector<2x8x128xf32>
    %cst_83 = arith.constant 1.000000e+00 : f32
    %529 = vector.broadcast %cst_83 : f32 to vector<2x8x128xf32>
    %530 = arith.addf %529, %528 : vector<2x8x128xf32>
    %531 = arith.divf %529, %530 : vector<2x8x128xf32>
    %532 = arith.mulf %526, %531 : vector<2x8x128xf32>
    %533 = arith.addf %525, %532 : vector<2x8x128xf32>
    %534 = arith.negf %512 : vector<2x8x128xf32>
    %535 = math.exp %534 : vector<2x8x128xf32>
    %cst_84 = arith.constant 1.000000e+00 : f32
    %536 = vector.broadcast %cst_84 : f32 to vector<2x8x128xf32>
    %537 = arith.addf %536, %535 : vector<2x8x128xf32>
    %538 = arith.divf %536, %537 : vector<2x8x128xf32>
    %539 = math.tanh %533 : vector<2x8x128xf32>
    %540 = arith.mulf %538, %539 : vector<2x8x128xf32>
    %541 = vector.broadcast %8 : vector<1x1x128xf32> to vector<2x8x128xf32>
    %542 = arith.mulf %540, %541 : vector<2x8x128xf32>
    %cst_85 = arith.constant dense<0.000000e+00> : vector<2x8xf32>
    %543 = vector.multi_reduction <add>, %542, %cst_85 [2] : vector<2x8x128xf32> to vector<2x8xf32>
    %c5_i32 = arith.constant 5 : i32
    %544 = vector.broadcast %c5_i32 : i32 to vector<2x8xi32>
    %545 = arith.addi %544, %9 : vector<2x8xi32>
    %546 = vector.broadcast %2 : vector<2x1xi32> to vector<2x8xi32>
    %547 = arith.cmpi slt, %545, %546 : vector<2x8xi32>
    %cst_86 = arith.constant -1.000000e+30 : f32
    %548 = vector.broadcast %cst_86 : f32 to vector<2x8xf32>
    %549 = arith.select %547, %543, %548 : vector<2x8xi1>, vector<2x8xf32>
    %cst_87 = arith.constant dense<0xFF800000> : vector<2xf32>
    %550 = vector.multi_reduction <maximumf>, %549, %cst_87 [1] : vector<2x8xf32> to vector<2xf32>
    %551 = vector.shape_cast %550 : vector<2xf32> to vector<2x1xf32>
    %552 = vector.broadcast %551 : vector<2x1xf32> to vector<2x8xf32>
    %553 = arith.cmpf oeq, %549, %552 : vector<2x8xf32>
    %cst_88 = arith.constant 8.000000e+00 : f32
    %554 = vector.broadcast %cst_88 : f32 to vector<2x8xf32>
    %555 = arith.select %553, %10, %554 : vector<2x8xi1>, vector<2x8xf32>
    %cst_89 = arith.constant dense<0x7F800000> : vector<2xf32>
    %556 = vector.multi_reduction <minimumf>, %555, %cst_89 [1] : vector<2x8xf32> to vector<2xf32>
    %557 = vector.shape_cast %556 : vector<2xf32> to vector<2x1xf32>
    %558 = vector.broadcast %557 : vector<2x1xf32> to vector<2x8xf32>
    %559 = arith.cmpf oeq, %10, %558 : vector<2x8xf32>
    %560 = arith.extui %559 : vector<2x8xi1> to vector<2x8xi32>
    %561 = arith.sitofp %560 : vector<2x8xi32> to vector<2x8xf32>
    %562 = vector.broadcast %557 : vector<2x1xf32> to vector<2x8xf32>
    %563 = arith.cmpf olt, %10, %562 : vector<2x8xf32>
    %564 = arith.extui %563 : vector<2x8xi1> to vector<2x8xi32>
    %565 = arith.sitofp %564 : vector<2x8xi32> to vector<2x8xf32>
    %566 = vector.broadcast %557 : vector<2x1xf32> to vector<2x8xf32>
    %567 = arith.cmpf ogt, %10, %566 : vector<2x8xf32>
    %568 = arith.extui %567 : vector<2x8xi1> to vector<2x8xi32>
    %569 = arith.sitofp %568 : vector<2x8xi32> to vector<2x8xf32>
    %570 = vector.shape_cast %561 : vector<2x8xf32> to vector<2x8x1xf32>
    %571 = vector.broadcast %570 : vector<2x8x1xf32> to vector<2x8x128xf32>
    %572 = arith.mulf %571, %540 : vector<2x8x128xf32>
    %573 = vector.shape_cast %565 : vector<2x8xf32> to vector<2x8x1xf32>
    %574 = vector.broadcast %573 : vector<2x8x1xf32> to vector<2x8x128xf32>
    %575 = arith.mulf %574, %489 : vector<2x8x128xf32>
    %576 = arith.addf %572, %575 : vector<2x8x128xf32>
    %577 = vector.shape_cast %569 : vector<2x8xf32> to vector<2x8x1xf32>
    %578 = vector.broadcast %577 : vector<2x8x1xf32> to vector<2x8x128xf32>
    %579 = arith.mulf %578, %499 : vector<2x8x128xf32>
    %580 = arith.addf %576, %579 : vector<2x8x128xf32>
    %581 = vector.shape_cast %561 : vector<2x8xf32> to vector<2x8x1xf32>
    %582 = vector.broadcast %581 : vector<2x8x1xf32> to vector<2x8x128xf32>
    %583 = arith.mulf %582, %533 : vector<2x8x128xf32>
    %584 = vector.shape_cast %565 : vector<2x8xf32> to vector<2x8x1xf32>
    %585 = vector.broadcast %584 : vector<2x8x1xf32> to vector<2x8x128xf32>
    %586 = arith.mulf %585, %496 : vector<2x8x128xf32>
    %587 = arith.addf %583, %586 : vector<2x8x128xf32>
    %588 = vector.shape_cast %569 : vector<2x8xf32> to vector<2x8x1xf32>
    %589 = vector.broadcast %588 : vector<2x8x1xf32> to vector<2x8x128xf32>
    %590 = arith.mulf %589, %502 : vector<2x8x128xf32>
    %591 = arith.addf %587, %590 : vector<2x8x128xf32>
    %592 = vector.broadcast %557 : vector<2x1xf32> to vector<2x128xf32>
    %593 = arith.cmpf oeq, %12, %592 : vector<2x128xf32>
    %594 = arith.extui %593 : vector<2x128xi1> to vector<2x128xi32>
    %595 = arith.sitofp %594 : vector<2x128xi32> to vector<2x128xf32>
    %c4 = arith.constant 4 : index
    %c0_90 = arith.constant 0 : index
    %c0_91 = arith.constant 0 : index
    %596 = vector.load %arg9[%c4, %c0_90, %c0_91] : memref<6x2x128xf32, #tpu.memory_space<vmem>>, vector<1x2x128xf32>
    %597 = vector.shape_cast %596 : vector<1x2x128xf32> to vector<2x128xf32>
    %598 = vector.shape_cast %595 : vector<2x128xf32> to vector<1x2x128xf32>
    tpu.vector_store %arg9[%c4, %c0_90, %c0_91], %598 {strides = array<i32>} : memref<6x2x128xf32, #tpu.memory_space<vmem>>, vector<1x2x128xf32>,
    %c5_i32_92 = arith.constant 5 : i32
    %599 = vector.broadcast %c5_i32_92 : i32 to vector<2x1xi32>
    %600 = arith.cmpi sgt, %2, %599 : vector<2x1xi32>
    %601 = arith.extui %600 : vector<2x1xi1> to vector<2x1xi32>
    %602 = arith.sitofp %601 : vector<2x1xi32> to vector<2x1xf32>
    %603 = vector.shape_cast %602 : vector<2x1xf32> to vector<2x1x1xf32>
    %604 = vector.broadcast %603 : vector<2x1x1xf32> to vector<2x8x128xf32>
    %605 = arith.mulf %604, %580 : vector<2x8x128xf32>
    %cst_93 = arith.constant 1.000000e+00 : f32
    %606 = vector.broadcast %cst_93 : f32 to vector<2x1x1xf32>
    %607 = arith.subf %606, %603 : vector<2x1x1xf32>
    %608 = vector.broadcast %607 : vector<2x1x1xf32> to vector<2x8x128xf32>
    %609 = arith.mulf %608, %489 : vector<2x8x128xf32>
    %610 = arith.addf %605, %609 : vector<2x8x128xf32>
    %611 = vector.broadcast %603 : vector<2x1x1xf32> to vector<2x8x128xf32>
    %612 = arith.mulf %611, %591 : vector<2x8x128xf32>
    %cst_94 = arith.constant 1.000000e+00 : f32
    %613 = vector.broadcast %cst_94 : f32 to vector<2x1x1xf32>
    %614 = arith.subf %613, %603 : vector<2x1x1xf32>
    %615 = vector.broadcast %614 : vector<2x1x1xf32> to vector<2x8x128xf32>
    %616 = arith.mulf %615, %496 : vector<2x8x128xf32>
    %617 = arith.addf %612, %616 : vector<2x8x128xf32>
    %618 = vector.extract_strided_slice %610 {offsets = [0, 1, 0], sizes = [2, 7, 128], strides = [1, 1, 1]} : vector<2x8x128xf32> to vector<2x7x128xf32>
    %619 = vector.extract_strided_slice %610 {offsets = [0, 0, 0], sizes = [2, 1, 128], strides = [1, 1, 1]} : vector<2x8x128xf32> to vector<2x1x128xf32>
    %620 = tpu.concatenate %618, %619 in 1 : vector<2x7x128xf32>, vector<2x1x128xf32> -> vector<2x8x128xf32>
    %621 = vector.extract_strided_slice %617 {offsets = [0, 1, 0], sizes = [2, 7, 128], strides = [1, 1, 1]} : vector<2x8x128xf32> to vector<2x7x128xf32>
    %622 = vector.extract_strided_slice %617 {offsets = [0, 0, 0], sizes = [2, 1, 128], strides = [1, 1, 1]} : vector<2x8x128xf32> to vector<2x1x128xf32>
    %623 = tpu.concatenate %621, %622 in 1 : vector<2x7x128xf32>, vector<2x1x128xf32> -> vector<2x8x128xf32>
    %cst_95 = arith.constant dense<0.000000e+00> : vector<2x8x640xf32>
    %624 = tpu.matmul %610, %3, %cst_95 {dimension_numbers = #tpu.dot_dimension_numbers<[2], [0], [0, 1], [1], [0, 0, 0, 1, 1, 1], [], []>} : vector<2x8x128xf32>, vector<128x640xf32>, vector<2x8x640xf32> -> vector<2x8x640xf32>
    %cst_96 = arith.constant dense<0.000000e+00> : vector<2x8x640xf32>
    %625 = tpu.matmul %620, %4, %cst_96 {dimension_numbers = #tpu.dot_dimension_numbers<[2], [0], [0, 1], [1], [0, 0, 0, 1, 1, 1], [], []>} : vector<2x8x128xf32>, vector<128x640xf32>, vector<2x8x640xf32> -> vector<2x8x640xf32>
    %626 = arith.addf %624, %625 : vector<2x8x640xf32>
    %627 = vector.broadcast %6 : vector<1x1x640xf32> to vector<2x8x640xf32>
    %628 = arith.addf %626, %627 : vector<2x8x640xf32>
    %629 = vector.extract_strided_slice %628 {offsets = [0, 0, 0], sizes = [2, 8, 128], strides = [1, 1, 1]} : vector<2x8x640xf32> to vector<2x8x128xf32>
    %630 = vector.extract_strided_slice %628 {offsets = [0, 0, 128], sizes = [2, 8, 128], strides = [1, 1, 1]} : vector<2x8x640xf32> to vector<2x8x128xf32>
    %631 = vector.extract_strided_slice %628 {offsets = [0, 0, 256], sizes = [2, 8, 128], strides = [1, 1, 1]} : vector<2x8x640xf32> to vector<2x8x128xf32>
    %632 = vector.extract_strided_slice %628 {offsets = [0, 0, 384], sizes = [2, 8, 128], strides = [1, 1, 1]} : vector<2x8x640xf32> to vector<2x8x128xf32>
    %633 = vector.extract_strided_slice %628 {offsets = [0, 0, 512], sizes = [2, 8, 128], strides = [1, 1, 1]} : vector<2x8x640xf32> to vector<2x8x128xf32>
    %634 = arith.negf %630 : vector<2x8x128xf32>
    %635 = math.exp %634 : vector<2x8x128xf32>
    %cst_97 = arith.constant 1.000000e+00 : f32
    %636 = vector.broadcast %cst_97 : f32 to vector<2x8x128xf32>
    %637 = arith.addf %636, %635 : vector<2x8x128xf32>
    %638 = arith.divf %636, %637 : vector<2x8x128xf32>
    %639 = arith.mulf %617, %638 : vector<2x8x128xf32>
    %640 = arith.negf %631 : vector<2x8x128xf32>
    %641 = math.exp %640 : vector<2x8x128xf32>
    %cst_98 = arith.constant 1.000000e+00 : f32
    %642 = vector.broadcast %cst_98 : f32 to vector<2x8x128xf32>
    %643 = arith.addf %642, %641 : vector<2x8x128xf32>
    %644 = arith.divf %642, %643 : vector<2x8x128xf32>
    %645 = arith.mulf %623, %644 : vector<2x8x128xf32>
    %646 = arith.addf %639, %645 : vector<2x8x128xf32>
    %647 = math.tanh %632 : vector<2x8x128xf32>
    %648 = arith.negf %629 : vector<2x8x128xf32>
    %649 = math.exp %648 : vector<2x8x128xf32>
    %cst_99 = arith.constant 1.000000e+00 : f32
    %650 = vector.broadcast %cst_99 : f32 to vector<2x8x128xf32>
    %651 = arith.addf %650, %649 : vector<2x8x128xf32>
    %652 = arith.divf %650, %651 : vector<2x8x128xf32>
    %653 = arith.mulf %647, %652 : vector<2x8x128xf32>
    %654 = arith.addf %646, %653 : vector<2x8x128xf32>
    %655 = arith.negf %633 : vector<2x8x128xf32>
    %656 = math.exp %655 : vector<2x8x128xf32>
    %cst_100 = arith.constant 1.000000e+00 : f32
    %657 = vector.broadcast %cst_100 : f32 to vector<2x8x128xf32>
    %658 = arith.addf %657, %656 : vector<2x8x128xf32>
    %659 = arith.divf %657, %658 : vector<2x8x128xf32>
    %660 = math.tanh %654 : vector<2x8x128xf32>
    %661 = arith.mulf %659, %660 : vector<2x8x128xf32>
    %662 = vector.broadcast %8 : vector<1x1x128xf32> to vector<2x8x128xf32>
    %663 = arith.mulf %661, %662 : vector<2x8x128xf32>
    %cst_101 = arith.constant dense<0.000000e+00> : vector<2x8xf32>
    %664 = vector.multi_reduction <add>, %663, %cst_101 [2] : vector<2x8x128xf32> to vector<2x8xf32>
    %c6_i32 = arith.constant 6 : i32
    %665 = vector.broadcast %c6_i32 : i32 to vector<2x8xi32>
    %666 = arith.addi %665, %9 : vector<2x8xi32>
    %667 = vector.broadcast %2 : vector<2x1xi32> to vector<2x8xi32>
    %668 = arith.cmpi slt, %666, %667 : vector<2x8xi32>
    %cst_102 = arith.constant -1.000000e+30 : f32
    %669 = vector.broadcast %cst_102 : f32 to vector<2x8xf32>
    %670 = arith.select %668, %664, %669 : vector<2x8xi1>, vector<2x8xf32>
    %cst_103 = arith.constant dense<0xFF800000> : vector<2xf32>
    %671 = vector.multi_reduction <maximumf>, %670, %cst_103 [1] : vector<2x8xf32> to vector<2xf32>
    %672 = vector.shape_cast %671 : vector<2xf32> to vector<2x1xf32>
    %673 = vector.broadcast %672 : vector<2x1xf32> to vector<2x8xf32>
    %674 = arith.cmpf oeq, %670, %673 : vector<2x8xf32>
    %cst_104 = arith.constant 8.000000e+00 : f32
    %675 = vector.broadcast %cst_104 : f32 to vector<2x8xf32>
    %676 = arith.select %674, %10, %675 : vector<2x8xi1>, vector<2x8xf32>
    %cst_105 = arith.constant dense<0x7F800000> : vector<2xf32>
    %677 = vector.multi_reduction <minimumf>, %676, %cst_105 [1] : vector<2x8xf32> to vector<2xf32>
    %678 = vector.shape_cast %677 : vector<2xf32> to vector<2x1xf32>
    %679 = vector.broadcast %678 : vector<2x1xf32> to vector<2x8xf32>
    %680 = arith.cmpf oeq, %10, %679 : vector<2x8xf32>
    %681 = arith.extui %680 : vector<2x8xi1> to vector<2x8xi32>
    %682 = arith.sitofp %681 : vector<2x8xi32> to vector<2x8xf32>
    %683 = vector.broadcast %678 : vector<2x1xf32> to vector<2x8xf32>
    %684 = arith.cmpf olt, %10, %683 : vector<2x8xf32>
    %685 = arith.extui %684 : vector<2x8xi1> to vector<2x8xi32>
    %686 = arith.sitofp %685 : vector<2x8xi32> to vector<2x8xf32>
    %687 = vector.broadcast %678 : vector<2x1xf32> to vector<2x8xf32>
    %688 = arith.cmpf ogt, %10, %687 : vector<2x8xf32>
    %689 = arith.extui %688 : vector<2x8xi1> to vector<2x8xi32>
    %690 = arith.sitofp %689 : vector<2x8xi32> to vector<2x8xf32>
    %691 = vector.shape_cast %682 : vector<2x8xf32> to vector<2x8x1xf32>
    %692 = vector.broadcast %691 : vector<2x8x1xf32> to vector<2x8x128xf32>
    %693 = arith.mulf %692, %661 : vector<2x8x128xf32>
    %694 = vector.shape_cast %686 : vector<2x8xf32> to vector<2x8x1xf32>
    %695 = vector.broadcast %694 : vector<2x8x1xf32> to vector<2x8x128xf32>
    %696 = arith.mulf %695, %610 : vector<2x8x128xf32>
    %697 = arith.addf %693, %696 : vector<2x8x128xf32>
    %698 = vector.shape_cast %690 : vector<2x8xf32> to vector<2x8x1xf32>
    %699 = vector.broadcast %698 : vector<2x8x1xf32> to vector<2x8x128xf32>
    %700 = arith.mulf %699, %620 : vector<2x8x128xf32>
    %701 = arith.addf %697, %700 : vector<2x8x128xf32>
    %702 = vector.shape_cast %682 : vector<2x8xf32> to vector<2x8x1xf32>
    %703 = vector.broadcast %702 : vector<2x8x1xf32> to vector<2x8x128xf32>
    %704 = arith.mulf %703, %654 : vector<2x8x128xf32>
    %705 = vector.shape_cast %686 : vector<2x8xf32> to vector<2x8x1xf32>
    %706 = vector.broadcast %705 : vector<2x8x1xf32> to vector<2x8x128xf32>
    %707 = arith.mulf %706, %617 : vector<2x8x128xf32>
    %708 = arith.addf %704, %707 : vector<2x8x128xf32>
    %709 = vector.shape_cast %690 : vector<2x8xf32> to vector<2x8x1xf32>
    %710 = vector.broadcast %709 : vector<2x8x1xf32> to vector<2x8x128xf32>
    %711 = arith.mulf %710, %623 : vector<2x8x128xf32>
    %712 = arith.addf %708, %711 : vector<2x8x128xf32>
    %713 = vector.broadcast %678 : vector<2x1xf32> to vector<2x128xf32>
    %714 = arith.cmpf oeq, %12, %713 : vector<2x128xf32>
    %715 = arith.extui %714 : vector<2x128xi1> to vector<2x128xi32>
    %716 = arith.sitofp %715 : vector<2x128xi32> to vector<2x128xf32>
    %c5 = arith.constant 5 : index
    %c0_106 = arith.constant 0 : index
    %c0_107 = arith.constant 0 : index
    %717 = vector.load %arg9[%c5, %c0_106, %c0_107] : memref<6x2x128xf32, #tpu.memory_space<vmem>>, vector<1x2x128xf32>
    %718 = vector.shape_cast %717 : vector<1x2x128xf32> to vector<2x128xf32>
    %719 = vector.shape_cast %716 : vector<2x128xf32> to vector<1x2x128xf32>
    tpu.vector_store %arg9[%c5, %c0_106, %c0_107], %719 {strides = array<i32>} : memref<6x2x128xf32, #tpu.memory_space<vmem>>, vector<1x2x128xf32>,
    %c6_i32_108 = arith.constant 6 : i32
    %720 = vector.broadcast %c6_i32_108 : i32 to vector<2x1xi32>
    %721 = arith.cmpi sgt, %2, %720 : vector<2x1xi32>
    %722 = arith.extui %721 : vector<2x1xi1> to vector<2x1xi32>
    %723 = arith.sitofp %722 : vector<2x1xi32> to vector<2x1xf32>
    %724 = vector.shape_cast %723 : vector<2x1xf32> to vector<2x1x1xf32>
    %725 = vector.broadcast %724 : vector<2x1x1xf32> to vector<2x8x128xf32>
    %726 = arith.mulf %725, %701 : vector<2x8x128xf32>
    %cst_109 = arith.constant 1.000000e+00 : f32
    %727 = vector.broadcast %cst_109 : f32 to vector<2x1x1xf32>
    %728 = arith.subf %727, %724 : vector<2x1x1xf32>
    %729 = vector.broadcast %728 : vector<2x1x1xf32> to vector<2x8x128xf32>
    %730 = arith.mulf %729, %610 : vector<2x8x128xf32>
    %731 = arith.addf %726, %730 : vector<2x8x128xf32>
    %732 = vector.broadcast %724 : vector<2x1x1xf32> to vector<2x8x128xf32>
    %733 = arith.mulf %732, %712 : vector<2x8x128xf32>
    %cst_110 = arith.constant 1.000000e+00 : f32
    %734 = vector.broadcast %cst_110 : f32 to vector<2x1x1xf32>
    %735 = arith.subf %734, %724 : vector<2x1x1xf32>
    %736 = vector.broadcast %735 : vector<2x1x1xf32> to vector<2x8x128xf32>
    %737 = arith.mulf %736, %617 : vector<2x8x128xf32>
    %738 = arith.addf %733, %737 : vector<2x8x128xf32>
    %739 = vector.extract_strided_slice %731 {offsets = [0, 1, 0], sizes = [2, 7, 128], strides = [1, 1, 1]} : vector<2x8x128xf32> to vector<2x7x128xf32>
    %740 = vector.extract_strided_slice %731 {offsets = [0, 0, 0], sizes = [2, 1, 128], strides = [1, 1, 1]} : vector<2x8x128xf32> to vector<2x1x128xf32>
    %741 = tpu.concatenate %739, %740 in 1 : vector<2x7x128xf32>, vector<2x1x128xf32> -> vector<2x8x128xf32>
    %742 = vector.extract_strided_slice %738 {offsets = [0, 1, 0], sizes = [2, 7, 128], strides = [1, 1, 1]} : vector<2x8x128xf32> to vector<2x7x128xf32>
    %743 = vector.extract_strided_slice %738 {offsets = [0, 0, 0], sizes = [2, 1, 128], strides = [1, 1, 1]} : vector<2x8x128xf32> to vector<2x1x128xf32>
    %744 = tpu.concatenate %742, %743 in 1 : vector<2x7x128xf32>, vector<2x1x128xf32> -> vector<2x8x128xf32>
    %cst_111 = arith.constant dense<0.000000e+00> : vector<2x8x640xf32>
    %745 = tpu.matmul %731, %3, %cst_111 {dimension_numbers = #tpu.dot_dimension_numbers<[2], [0], [0, 1], [1], [0, 0, 0, 1, 1, 1], [], []>} : vector<2x8x128xf32>, vector<128x640xf32>, vector<2x8x640xf32> -> vector<2x8x640xf32>
    %cst_112 = arith.constant dense<0.000000e+00> : vector<2x8x640xf32>
    %746 = tpu.matmul %741, %4, %cst_112 {dimension_numbers = #tpu.dot_dimension_numbers<[2], [0], [0, 1], [1], [0, 0, 0, 1, 1, 1], [], []>} : vector<2x8x128xf32>, vector<128x640xf32>, vector<2x8x640xf32> -> vector<2x8x640xf32>
    %747 = arith.addf %745, %746 : vector<2x8x640xf32>
    %748 = vector.broadcast %6 : vector<1x1x640xf32> to vector<2x8x640xf32>
    %749 = arith.addf %747, %748 : vector<2x8x640xf32>
    %750 = vector.extract_strided_slice %749 {offsets = [0, 0, 0], sizes = [2, 8, 128], strides = [1, 1, 1]} : vector<2x8x640xf32> to vector<2x8x128xf32>
    %751 = vector.extract_strided_slice %749 {offsets = [0, 0, 128], sizes = [2, 8, 128], strides = [1, 1, 1]} : vector<2x8x640xf32> to vector<2x8x128xf32>
    %752 = vector.extract_strided_slice %749 {offsets = [0, 0, 256], sizes = [2, 8, 128], strides = [1, 1, 1]} : vector<2x8x640xf32> to vector<2x8x128xf32>
    %753 = vector.extract_strided_slice %749 {offsets = [0, 0, 384], sizes = [2, 8, 128], strides = [1, 1, 1]} : vector<2x8x640xf32> to vector<2x8x128xf32>
    %754 = vector.extract_strided_slice %749 {offsets = [0, 0, 512], sizes = [2, 8, 128], strides = [1, 1, 1]} : vector<2x8x640xf32> to vector<2x8x128xf32>
    %755 = arith.negf %751 : vector<2x8x128xf32>
    %756 = math.exp %755 : vector<2x8x128xf32>
    %cst_113 = arith.constant 1.000000e+00 : f32
    %757 = vector.broadcast %cst_113 : f32 to vector<2x8x128xf32>
    %758 = arith.addf %757, %756 : vector<2x8x128xf32>
    %759 = arith.divf %757, %758 : vector<2x8x128xf32>
    %760 = arith.mulf %738, %759 : vector<2x8x128xf32>
    %761 = arith.negf %752 : vector<2x8x128xf32>
    %762 = math.exp %761 : vector<2x8x128xf32>
    %cst_114 = arith.constant 1.000000e+00 : f32
    %763 = vector.broadcast %cst_114 : f32 to vector<2x8x128xf32>
    %764 = arith.addf %763, %762 : vector<2x8x128xf32>
    %765 = arith.divf %763, %764 : vector<2x8x128xf32>
    %766 = arith.mulf %744, %765 : vector<2x8x128xf32>
    %767 = arith.addf %760, %766 : vector<2x8x128xf32>
    %768 = math.tanh %753 : vector<2x8x128xf32>
    %769 = arith.negf %750 : vector<2x8x128xf32>
    %770 = math.exp %769 : vector<2x8x128xf32>
    %cst_115 = arith.constant 1.000000e+00 : f32
    %771 = vector.broadcast %cst_115 : f32 to vector<2x8x128xf32>
    %772 = arith.addf %771, %770 : vector<2x8x128xf32>
    %773 = arith.divf %771, %772 : vector<2x8x128xf32>
    %774 = arith.mulf %768, %773 : vector<2x8x128xf32>
    %775 = arith.addf %767, %774 : vector<2x8x128xf32>
    %776 = arith.negf %754 : vector<2x8x128xf32>
    %777 = math.exp %776 : vector<2x8x128xf32>
    %cst_116 = arith.constant 1.000000e+00 : f32
    %778 = vector.broadcast %cst_116 : f32 to vector<2x8x128xf32>
    %779 = arith.addf %778, %777 : vector<2x8x128xf32>
    %780 = arith.divf %778, %779 : vector<2x8x128xf32>
    %781 = math.tanh %775 : vector<2x8x128xf32>
    %782 = arith.mulf %780, %781 : vector<2x8x128xf32>
    %c7_i32 = arith.constant 7 : i32
    %783 = vector.broadcast %c7_i32 : i32 to vector<2x1xi32>
    %784 = arith.cmpi sgt, %2, %783 : vector<2x1xi32>
    %785 = arith.extui %784 : vector<2x1xi1> to vector<2x1xi32>
    %786 = arith.sitofp %785 : vector<2x1xi32> to vector<2x1xf32>
    %787 = vector.shape_cast %786 : vector<2x1xf32> to vector<2x1x1xf32>
    %788 = vector.broadcast %787 : vector<2x1x1xf32> to vector<2x8x128xf32>
    %789 = arith.mulf %788, %782 : vector<2x8x128xf32>
    %cst_117 = arith.constant 1.000000e+00 : f32
    %790 = vector.broadcast %cst_117 : f32 to vector<2x1x1xf32>
    %791 = arith.subf %790, %787 : vector<2x1x1xf32>
    %792 = vector.broadcast %791 : vector<2x1x1xf32> to vector<2x8x128xf32>
    %793 = arith.mulf %792, %731 : vector<2x8x128xf32>
    %794 = arith.addf %789, %793 : vector<2x8x128xf32>
    %795 = vector.broadcast %787 : vector<2x1x1xf32> to vector<2x8x128xf32>
    %796 = arith.mulf %795, %775 : vector<2x8x128xf32>
    %cst_118 = arith.constant 1.000000e+00 : f32
    %797 = vector.broadcast %cst_118 : f32 to vector<2x1x1xf32>
    %798 = arith.subf %797, %787 : vector<2x1x1xf32>
    %799 = vector.broadcast %798 : vector<2x1x1xf32> to vector<2x8x128xf32>
    %800 = arith.mulf %799, %738 : vector<2x8x128xf32>
    %801 = arith.addf %796, %800 : vector<2x8x128xf32>
    %802 = vector.extract_strided_slice %794 {offsets = [0, 0, 0], sizes = [2, 1, 128], strides = [1, 1, 1]} : vector<2x8x128xf32> to vector<2x1x128xf32>
    %803 = vector.shape_cast %802 : vector<2x1x128xf32> to vector<2x128xf32>
    %c0_119 = arith.constant 0 : index
    %c0_120 = arith.constant 0 : index
    %804 = vector.load %arg7[%c0_119, %c0_120] : memref<2x128xf32, #tpu.memory_space<vmem>>, vector<2x128xf32>
    tpu.vector_store %arg7[%c0_119, %c0_120], %803 {strides = array<i32>} : memref<2x128xf32, #tpu.memory_space<vmem>>, vector<2x128xf32>,
    %805 = vector.extract_strided_slice %801 {offsets = [0, 0, 0], sizes = [2, 1, 128], strides = [1, 1, 1]} : vector<2x8x128xf32> to vector<2x1x128xf32>
    %806 = vector.shape_cast %805 : vector<2x1x128xf32> to vector<2x128xf32>
    %c0_121 = arith.constant 0 : index
    %c0_122 = arith.constant 0 : index
    %807 = vector.load %arg8[%c0_121, %c0_122] : memref<2x128xf32, #tpu.memory_space<vmem>>, vector<2x128xf32>
    tpu.vector_store %arg8[%c0_121, %c0_122], %806 {strides = array<i32>} : memref<2x128xf32, #tpu.memory_space<vmem>>, vector<2x128xf32>,
    return
  }
}

</mosaic_0001>

<bundles_post_ra>
// kernel: tpu_custom_call.1
= control target key start
LH: loop header
LB: loop body
LE: loop exit
PB: predicated region body
PF: predicated region fallthrough
CT: control target
= control target key end

     0   :  { %6 = vsyncpa [#allocation3], 0  ;;  %s131_s0 = inlined_call_operand.hbm [shape: f32[2,8,128], index: 0, kind: input, shape index: {}]   ;;  %s132_s1 = inlined_call_operand.hbm [shape: f32[2,8,128], index: 1, kind: output, shape index: {}]  }
   0x1   :  { %7 = vsyncpa [#allocation4], 0  ;;  %s12_s8 = sshll.u32 %s131_s0, 4  ;;  %s111_s9 = smov [#allocation2]   ;;  %s13_s8 = int_to_ptr.hbm [resolvable:$true] %s12_s8 }
   0x2   :  { %s14_s10 = sshll.u32 %s111_s9, 4  ;;  %s112_s11 = smov 128   ;;  %s15_s10 = int_to_ptr.vmem [resolvable:$true] %s14_s10 }
   0x3   :  { %s113_s12 = smov 8  }
   0x4   :  { %20 = dma.hbm_to_vmem [thread:$0]  %s13_s8, 256, %s15_s10, [#allocation3], %s112_s11, %s112_s11, %s113_s12  }
   0x5   :  { %107 = dma.done.wait [#allocation3], 256  }
   0x6   :  { %108 = vsyncadd [#allocation3], 4294967040  ;;  %v29_v0 = vlaneseq  ;;  %v25_v2 = vld [vmem:[#allocation2] sm:$0xff]  ;;  %v26_v3 = vld [vmem:[#allocation2 + $0x8] sm:$0xff]  ;;  %s114_s13 = smov [#allocation5]   ;;  %s42_s0 = sshll.u32 %s132_s1, 4  ;;  %s43_s0 = int_to_ptr.hbm [resolvable:$true] %s42_s0 }
   0x7   :  { %s40_s14 = sshll.u32 %s114_s13, 4  ;;  %v27_v4 = vrot.slane %v25_v2, 7  ;;  %v28_v5 = vrot.slane %v26_v3, 7  ;;  %s41_s14 = int_to_ptr.vmem [resolvable:$true] %s40_s14 }
   0x8   :  { %v30_v1 = vshrl.u32 %v29_v0, 7 }
   0xa   :  { %vm31_vm0 = vcmp.lt.s32.totalorder %v30_v1, 1 }
   0xb   :  { %v33_v6 = vsel %vm31_vm0, %v28_v5, %v27_v4  ;;  %v32_v7 = vsel %vm31_vm0, %v27_v4, %v28_v5 }
   0xc   :  { %34 = vst [vmem:[#allocation5] sm:$0xff] %v33_v6 }
   0xd   :  { %35 = vst [vmem:[#allocation5 + $0x8] sm:$0xff] %v32_v7 }
   0xe   :  { %48 = dma.vmem_to_hbm [thread:$0]  %s41_s14, 256, %s43_s0, [#allocation4], %s112_s11, %s112_s11, %s113_s12  }
   0xf   :  { %109 = dma.done.wait [#allocation4], 256  }
  0x10   :  { %110 = vsyncadd [#allocation4], 4294967040 }
  0x11   :  { %53 = vsyncpa [#allocation3], 1 }
  0x12   :  { %54 = vsyncpa [#allocation4], 1 }

// kernel: binary_tree_lstm_forward.1
= control target key start
LH: loop header
LB: loop body
LE: loop exit
PB: predicated region body
PF: predicated region fallthrough
CT: control target
= control target key end

     0   :  { %15 = vsyncpa [#allocation3], 0  ;;  %s10982_s0 = inlined_call_operand.vmem [shape: f32[2,8,128], index: 0, kind: input, shape index: {}]   ;;  %s10983_s1 = inlined_call_operand.vmem [shape: f32[2,8,128], index: 1, kind: input, shape index: {}]   ;;  %s10984_s2 = inlined_call_operand.vmem [shape: s32[2,1], index: 2, kind: input, shape index: {}]   ;;  %s10985_s3 = inlined_call_operand.vmem [shape: f32[128,640], index: 3, kind: input, shape index: {}]   ;;  %s10986_s4 = inlined_call_operand.vmem [shape: f32[128,640], index: 4, kind: input, shape index: {}]   ;;  %s10987_s5 = inlined_call_operand.vmem [shape: f32[1,640], index: 5, kind: input, shape index: {}]   ;;  %s10988_s6 = inlined_call_operand.vmem [shape: f32[1,128], index: 6, kind: input, shape index: {}]   ;;  %s10989_s7 = inlined_call_operand.hbm [shape: f32[2,128], index: 7, kind: output, shape index: {0}]   ;;  %s10990_s8 = inlined_call_operand.hbm [shape: f32[2,128], index: 8, kind: output, shape index: {1}]   ;;  %s10991_s9 = inlined_call_operand.vmem [shape: f32[6,2,128], index: 9, kind: output, shape index: {2}]  }
   0x1   :  { %v5267_v0 = vld [vmem:[%s10986_s4 + $0x258] sm:$0xff]  ;;  %v5272_v1 = vld [vmem:[%s10986_s4 + $0x260] sm:$0xff]  ;;  %v5277_v2 = vld [vmem:[%s10986_s4 + $0x268] sm:$0xff] }
   0x2   :  { %218 = vmatpush.msra.mxu0 %v5267_v0  ;;  %241 = vmatpush.msra.mxu1 %v5272_v1  ;;  %v5284_v3 = vld [vmem:[%s10986_s4 + $0x270] sm:$0xff]  ;;  %v5294_v5 = vld [vmem:[%s10986_s4 + $0x238] sm:$0xff]  ;;  %v5301_v6 = vld [vmem:[%s10986_s4 + $0x240] sm:$0xff] }
   0x3   :  { %v5289_v4 = vld [vmem:[%s10986_s4 + $0x230] sm:$0xff]  ;;  %264 = vmatpush.msra.mxu2 %v5277_v2  ;;  %287 = vmatpush.msra.mxu3 %v5284_v3  ;;  %v5306_v7 = vld [vmem:[%s10986_s4 + $0x248] sm:$0xff]  ;;  %v5323_v10 = vld [vmem:[%s10986_s4 + $0x218] sm:$0xff] }
   0x4   :  { %v5311_v8 = vld [vmem:[%s10986_s4 + $0x208] sm:$0xff]  ;;  %219 = vmatpush.msra.mxu0 %v5289_v4  ;;  %242 = vmatpush.msra.mxu1 %v5294_v5  ;;  %v5318_v9 = vld [vmem:[%s10986_s4 + $0x210] sm:$0xff]  ;;  %v5328_v11 = vld [vmem:[%s10986_s4 + $0x220] sm:$0xff] }
   0x5   :  { %265 = vmatpush.msra.mxu2 %v5301_v6  ;;  %288 = vmatpush.msra.mxu3 %v5306_v7  ;;  %v5335_v12 = vld [vmem:[%s10986_s4 + $0x1e0] sm:$0xff]  ;;  %v5340_v13 = vld [vmem:[%s10986_s4 + $0x1e8] sm:$0xff]  ;;  %v5347_v14 = vld [vmem:[%s10986_s4 + $0x1f0] sm:$0xff] }
   0x6   :  { %220 = vmatpush.msra.mxu0 %v5311_v8  ;;  %243 = vmatpush.msra.mxu1 %v5318_v9  ;;  %v5352_v15 = vld [vmem:[%s10986_s4 + $0x1f8] sm:$0xff]  ;;  %v5364_v17 = vld [vmem:[%s10986_s4 + $0x1c0] sm:$0xff]  ;;  %v5371_v18 = vld [vmem:[%s10986_s4 + $0x1c8] sm:$0xff] }
   0x7   :  { %266 = vmatpush.msra.mxu2 %v5323_v10  ;;  %289 = vmatpush.msra.mxu3 %v5328_v11  ;;  %v5359_v16 = vld [vmem:[%s10986_s4 + $0x1b8] sm:$0xff]  ;;  %v5376_v19 = vld [vmem:[%s10986_s4 + $0x1d0] sm:$0xff]  ;;  %v5395_v22 = vld [vmem:[%s10986_s4 + $0x1a0] sm:$0xff] }
   0x8   :  { %221 = vmatpush.msra.mxu0 %v5335_v12  ;;  %244 = vmatpush.msra.mxu1 %v5340_v13  ;;  %v5383_v20 = vld [vmem:[%s10986_s4 + $0x190] sm:$0xff]  ;;  %v5388_v21 = vld [vmem:[%s10986_s4 + $0x198] sm:$0xff]  ;;  %v5400_v23 = vld [vmem:[%s10986_s4 + $0x1a8] sm:$0xff] }
   0x9   :  { %267 = vmatpush.msra.mxu2 %v5347_v14  ;;  %290 = vmatpush.msra.mxu3 %v5352_v15  ;;  %v5407_v24 = vld [vmem:[%s10986_s4 + $0x168] sm:$0xff]  ;;  %v5412_v25 = vld [vmem:[%s10986_s4 + $0x170] sm:$0xff]  ;;  %v5419_v26 = vld [vmem:[%s10986_s4 + $0x178] sm:$0xff] }
   0xa   :  { %222 = vmatpush.msra.mxu0 %v5359_v16  ;;  %245 = vmatpush.msra.mxu1 %v5364_v17  ;;  %v5424_v27 = vld [vmem:[%s10986_s4 + $0x180] sm:$0xff]  ;;  %v5436_v29 = vld [vmem:[%s10986_s4 + $0x148] sm:$0xff]  ;;  %v5443_v30 = vld [vmem:[%s10986_s4 + $0x150] sm:$0xff] }
   0xb   :  { %268 = vmatpush.msra.mxu2 %v5371_v18  ;;  %291 = vmatpush.msra.mxu3 %v5376_v19  ;;  %v5431_v28 = vld [vmem:[%s10986_s4 + $0x140] sm:$0xff]  ;;  %v5448_v31 = vld [vmem:[%s10986_s4 + $0x158] sm:$0xff]  ;;  %v5467_v34 = vld [vmem:[%s10986_s4 + $0x128] sm:$0xff] }
   0xc   :  { %223 = vmatpush.msra.mxu0 %v5383_v20  ;;  %246 = vmatpush.msra.mxu1 %v5388_v21  ;;  %11405 = vst [vmem:[#allocation8_spill] sm:$0xff] %v5448_v31  ;;  %v5455_v32 = vld [vmem:[%s10986_s4 + $0x118] sm:$0xff]  ;;  %v5460_v33 = vld [vmem:[%s10986_s4 + $0x120] sm:$0xff]  ;;  %v5472_v35 = vld [vmem:[%s10986_s4 + $0x130] sm:$0xff] }
   0xd   :  { %269 = vmatpush.msra.mxu2 %v5395_v22  ;;  %292 = vmatpush.msra.mxu3 %v5400_v23  ;;  %11406 = vst [vmem:[#allocation9_spill] sm:$0xff] %v5467_v34  ;;  %v5479_v36 = vld [vmem:[%s10986_s4 + $0xf0] sm:$0xff]  ;;  %v5484_v37 = vld [vmem:[%s10986_s4 + $0xf8] sm:$0xff]  ;;  %v5491_v38 = vld [vmem:[%s10986_s4 + $0x100] sm:$0xff] }
   0xe   :  { %224 = vmatpush.msra.mxu0 %v5407_v24  ;;  %247 = vmatpush.msra.mxu1 %v5412_v25  ;;  %11407 = vst [vmem:[#allocation10_spill] sm:$0xff] %v5472_v35  ;;  %v5496_v39 = vld [vmem:[%s10986_s4 + $0x108] sm:$0xff]  ;;  %v5508_v41 = vld [vmem:[%s10986_s4 + $0xd0] sm:$0xff]  ;;  %v5515_v42 = vld [vmem:[%s10986_s4 + $0xd8] sm:$0xff] }
   0xf   :  { %270 = vmatpush.msra.mxu2 %v5419_v26  ;;  %293 = vmatpush.msra.mxu3 %v5424_v27  ;;  %11408 = vst [vmem:[#allocation11_spill] sm:$0xff] %v5491_v38  ;;  %v5503_v40 = vld [vmem:[%s10986_s4 + $0xc8] sm:$0xff]  ;;  %v5520_v43 = vld [vmem:[%s10986_s4 + $0xe0] sm:$0xff]  ;;  %v5539_v46 = vld [vmem:[%s10986_s4 + $0xb0] sm:$0xff] }
  0x10   :  { %225 = vmatpush.msra.mxu0 %v5431_v28  ;;  %248 = vmatpush.msra.mxu1 %v5436_v29  ;;  %11409 = vst [vmem:[#allocation12_spill] sm:$0xff] %v5496_v39  ;;  %v5527_v44 = vld [vmem:[%s10986_s4 + $0xa0] sm:$0xff]  ;;  %v5532_v45 = vld [vmem:[%s10986_s4 + $0xa8] sm:$0xff]  ;;  %v5544_v47 = vld [vmem:[%s10986_s4 + $0xb8] sm:$0xff] }
  0x11   :  { %271 = vmatpush.msra.mxu2 %v5443_v30  ;;  %294 = vmatpush.msra.mxu3 %v5448_v31  ;;  %11410 = vst [vmem:[#allocation13_spill] sm:$0xff] %v5515_v42  ;;  %v5551_v48 = vld [vmem:[%s10986_s4 + $0x78] sm:$0xff]  ;;  %v5556_v49 = vld [vmem:[%s10986_s4 + $0x80] sm:$0xff]  ;;  %v5563_v50 = vld [vmem:[%s10986_s4 + $0x88] sm:$0xff] }
  0x12   :  { %226 = vmatpush.msra.mxu0 %v5455_v32  ;;  %249 = vmatpush.msra.mxu1 %v5460_v33  ;;  %11411 = vst [vmem:[#allocation14_spill] sm:$0xff] %v5520_v43  ;;  %v5568_v51 = vld [vmem:[%s10986_s4 + $0x90] sm:$0xff]  ;;  %v5580_v53 = vld [vmem:[%s10986_s4 + $0x58] sm:$0xff]  ;;  %v5587_v54 = vld [vmem:[%s10986_s4 + $0x60] sm:$0xff] }
  0x13   :  { %272 = vmatpush.msra.mxu2 %v5467_v34  ;;  %295 = vmatpush.msra.mxu3 %v5472_v35  ;;  %11412 = vst [vmem:[#allocation15_spill] sm:$0xff] %v5539_v46  ;;  %v5575_v52 = vld [vmem:[%s10986_s4 + $0x50] sm:$0xff]  ;;  %v5592_v55 = vld [vmem:[%s10986_s4 + $0x68] sm:$0xff]  ;;  %v5611_v58 = vld [vmem:[%s10986_s4 + $0x38] sm:$0xff] }
  0x14   :  { %227 = vmatpush.msra.mxu0 %v5479_v36  ;;  %250 = vmatpush.msra.mxu1 %v5484_v37  ;;  %11413 = vst [vmem:[#allocation16_spill] sm:$0xff] %v5544_v47  ;;  %v5599_v56 = vld [vmem:[%s10986_s4 + $0x28] sm:$0xff]  ;;  %v5604_v57 = vld [vmem:[%s10986_s4 + $0x30] sm:$0xff]  ;;  %v5616_v59 = vld [vmem:[%s10986_s4 + $0x40] sm:$0xff] }
  0x15   :  { %273 = vmatpush.msra.mxu2 %v5491_v38  ;;  %296 = vmatpush.msra.mxu3 %v5496_v39  ;;  %11414 = vst [vmem:[#allocation17_spill] sm:$0xff] %v5563_v50  ;;  %v5623_v60 = vld [vmem:[%s10986_s4] sm:$0xff]  ;;  %v5628_v61 = vld [vmem:[%s10986_s4 + $0x8] sm:$0xff]  ;;  %v5635_v62 = vld [vmem:[%s10986_s4 + $0x10] sm:$0xff] }
  0x16   :  { %228 = vmatpush.msra.mxu0 %v5503_v40  ;;  %251 = vmatpush.msra.mxu1 %v5508_v41  ;;  %11415 = vst [vmem:[#allocation18_spill] sm:$0xff] %v5568_v51  ;;  %v5640_v63 = vld [vmem:[%s10986_s4 + $0x18] sm:$0xff]  ;;  %v5767_v35 = vld [vmem:[%s10986_s4 + $0x1b0] sm:$0xff] }
  0x17   :  { %274 = vmatpush.msra.mxu2 %v5515_v42  ;;  %297 = vmatpush.msra.mxu3 %v5520_v43  ;;  %11416 = vst [vmem:[#allocation19_spill] sm:$0xff] %v5587_v54  ;;  %v5719_v43 = vld [vmem:[%s10986_s4 + $0x200] sm:$0xff]  ;;  %v5743_v39 = vld [vmem:[%s10986_s4 + $0x1d8] sm:$0xff] }
  0x18   :  { %229 = vmatpush.msra.mxu0 %v5527_v44  ;;  %252 = vmatpush.msra.mxu1 %v5532_v45  ;;  %11417 = vst [vmem:[#allocation20_spill] sm:$0xff] %v5592_v55  ;;  %v5724_v42 = vld [vmem:[%s10985_s3 + $0x1e0] sm:$0xff]  ;;  %v5748_v38 = vld [vmem:[%s10985_s3 + $0x1b8] sm:$0xff] }
  0x19   :  { %275 = vmatpush.msra.mxu2 %v5539_v46  ;;  %298 = vmatpush.msra.mxu3 %v5544_v47  ;;  %11418 = vst [vmem:[#allocation21_spill] sm:$0xff] %v5611_v58  ;;  %v5695_v47 = vld [vmem:[%s10986_s4 + $0x228] sm:$0xff] }
  0x1a   :  { %230 = vmatpush.msra.mxu0 %v5551_v48  ;;  %253 = vmatpush.msra.mxu1 %v5556_v49  ;;  %11419 = vst [vmem:[#allocation22_spill] sm:$0xff] %v5616_v59  ;;  %v5700_v46 = vld [vmem:[%s10985_s3 + $0x208] sm:$0xff] }
  0x1b   :  { %276 = vmatpush.msra.mxu2 %v5563_v50  ;;  %299 = vmatpush.msra.mxu3 %v5568_v51  ;;  %11420 = vst [vmem:[#allocation23_spill] sm:$0xff] %v5635_v62  ;;  %v5671_v51 = vld [vmem:[%s10986_s4 + $0x250] sm:$0xff] }
  0x1c   :  { %231 = vmatpush.msra.mxu0 %v5575_v52  ;;  %254 = vmatpush.msra.mxu1 %v5580_v53  ;;  %11421 = vst [vmem:[#allocation24_spill] sm:$0xff] %v5640_v63  ;;  %v5676_v50 = vld [vmem:[%s10985_s3 + $0x230] sm:$0xff] }
  0x1d   :  { %277 = vmatpush.msra.mxu2 %v5587_v54  ;;  %300 = vmatpush.msra.mxu3 %v5592_v55  ;;  %v5647_v55 = vld [vmem:[%s10986_s4 + $0x278] sm:$0xff]  ;;  %11426 = vst [vmem:[#allocation29_spill] sm:$0xff] %v5700_v46 }
  0x1e   :  { %232 = vmatpush.msra.mxu0 %v5599_v56  ;;  %255 = vmatpush.msra.mxu1 %v5604_v57  ;;  %v5652_v54 = vld [vmem:[%s10985_s3 + $0x258] sm:$0xff]  ;;  %11429 = vst [vmem:[#allocation32_spill] sm:$0xff] %v5719_v43 }
  0x1f   :  { %278 = vmatpush.msra.mxu2 %v5611_v58  ;;  %301 = vmatpush.msra.mxu3 %v5616_v59  ;;  %v5659_v58 = vld [vmem:[%s10985_s3 + $0x260] sm:$0xff]  ;;  %v5664_v59 = vld [vmem:[%s10985_s3 + $0x268] sm:$0xff]  ;;  %11430 = vst [vmem:[#allocation33_spill] sm:$0xff] %v5724_v42 }
  0x20   :  { %233 = vmatpush.msra.mxu0 %v5623_v60  ;;  %256 = vmatpush.msra.mxu1 %v5628_v61  ;;  %11422 = vst [vmem:[#allocation25_spill] sm:$0xff] %v5659_v58 }
  0x21   :  { %11423 = vst [vmem:[#allocation26_spill] sm:$0xff] %v5664_v59  ;;  %279 = vmatpush.msra.mxu2 %v5635_v62  ;;  %302 = vmatpush.msra.mxu3 %v5640_v63  ;;  %v5683_v62 = vld [vmem:[%s10985_s3 + $0x238] sm:$0xff]  ;;  %v5688_v63 = vld [vmem:[%s10985_s3 + $0x240] sm:$0xff] }
  0x22   :  { %310 = vmatpush.msrb.mxu0 %v5647_v55  ;;  %333 = vmatpush.msrb.mxu1 %v5652_v54  ;;  %11424 = vst [vmem:[#allocation27_spill] sm:$0xff] %v5683_v62 }
  0x23   :  { %11425 = vst [vmem:[#allocation28_spill] sm:$0xff] %v5688_v63  ;;  %356 = vmatpush.msrb.mxu2 %v5659_v58  ;;  %379 = vmatpush.msrb.mxu3 %v5664_v59  ;;  %v5707_v58 = vld [vmem:[%s10985_s3 + $0x210] sm:$0xff]  ;;  %v5712_v59 = vld [vmem:[%s10985_s3 + $0x218] sm:$0xff] }
  0x24   :  { %311 = vmatpush.msrb.mxu0 %v5671_v51  ;;  %334 = vmatpush.msrb.mxu1 %v5676_v50  ;;  %11427 = vst [vmem:[#allocation30_spill] sm:$0xff] %v5707_v58 }
  0x25   :  { %11428 = vst [vmem:[#allocation31_spill] sm:$0xff] %v5712_v59  ;;  %357 = vmatpush.msrb.mxu2 %v5683_v62  ;;  %380 = vmatpush.msrb.mxu3 %v5688_v63  ;;  %v5731_v62 = vld [vmem:[%s10985_s3 + $0x1e8] sm:$0xff]  ;;  %v5736_v63 = vld [vmem:[%s10985_s3 + $0x1f0] sm:$0xff] }
  0x26   :  { %312 = vmatpush.msrb.mxu0 %v5695_v47  ;;  %335 = vmatpush.msrb.mxu1 %v5700_v46  ;;  %11431 = vst [vmem:[#allocation34_spill] sm:$0xff] %v5731_v62 }
  0x27   :  { %11432 = vst [vmem:[#allocation35_spill] sm:$0xff] %v5736_v63  ;;  %358 = vmatpush.msrb.mxu2 %v5707_v58  ;;  %381 = vmatpush.msrb.mxu3 %v5712_v59  ;;  %v5755_v58 = vld [vmem:[%s10985_s3 + $0x1c0] sm:$0xff]  ;;  %v5760_v59 = vld [vmem:[%s10985_s3 + $0x1c8] sm:$0xff] }
  0x28   :  { %11433 = vst [vmem:[#allocation36_spill] sm:$0xff] %v5743_v39  ;;  %313 = vmatpush.msrb.mxu0 %v5719_v43  ;;  %336 = vmatpush.msrb.mxu1 %v5724_v42  ;;  %v5772_v42 = vld [vmem:[%s10985_s3 + $0x190] sm:$0xff]  ;;  %v5801_v43 = vld [vmem:[%s10982_s0] sm:$0xff] }
  0x29   :  { %11434 = vst [vmem:[#allocation37_spill] sm:$0xff] %v5748_v38  ;;  %359 = vmatpush.msrb.mxu2 %v5731_v62  ;;  %382 = vmatpush.msrb.mxu3 %v5736_v63  ;;  %v5779_v62 = vld [vmem:[%s10985_s3 + $0x198] sm:$0xff]  ;;  %v5784_v63 = vld [vmem:[%s10985_s3 + $0x1a0] sm:$0xff]  ;;  %v5840_v34 = vrot.slane %v5801_v43, 1 }
  0x2a   :  { %11435 = vst [vmem:[#allocation38_spill] sm:$0xff] %v5755_v58  ;;  %314 = vmatpush.msrb.mxu0 %v5743_v39  ;;  %337 = vmatpush.msrb.mxu1 %v5748_v38  ;;  %v5791_v39 = vld [vmem:[%s10986_s4 + $0x188] sm:$0xff] }
  0x2b   :  { %11436 = vst [vmem:[#allocation39_spill] sm:$0xff] %v5760_v59  ;;  %360 = vmatpush.msrb.mxu2 %v5755_v58  ;;  %383 = vmatpush.msrb.mxu3 %v5760_v59  ;;  %v5796_v38 = vld [vmem:[%s10985_s3 + $0x168] sm:$0xff]  ;;  %v5808_v59 = vld [vmem:[%s10985_s3 + $0x170] sm:$0xff]  ;;  %v5813_v58 = vld [vmem:[%s10985_s3 + $0x178] sm:$0xff] }
  0x2c   :  { %11437 = vst [vmem:[#allocation40_spill] sm:$0xff] %v5767_v35  ;;  %315 = vmatpush.msrb.mxu0 %v5767_v35  ;;  %338 = vmatpush.msrb.mxu1 %v5772_v42  ;;  %v5820_v35 = vld [vmem:[%s10986_s4 + $0x160] sm:$0xff] }
  0x2d   :  { %11438 = vst [vmem:[#allocation41_spill] sm:$0xff] %v5772_v42  ;;  %361 = vmatpush.msrb.mxu2 %v5779_v62  ;;  %384 = vmatpush.msrb.mxu3 %v5784_v63  ;;  %v5825_v42 = vld [vmem:[%s10985_s3 + $0x140] sm:$0xff] }
  0x2e   :  { %11439 = vst [vmem:[#allocation42_spill] sm:$0xff] %v5779_v62  ;;  %316 = vmatpush.msrb.mxu0 %v5791_v39  ;;  %339 = vmatpush.msrb.mxu1 %v5796_v38  ;;  %v5832_v62 = vld [vmem:[%s10985_s3 + $0x148] sm:$0xff] }
  0x2f   :  { %11440 = vst [vmem:[#allocation43_spill] sm:$0xff] %v5784_v63  ;;  %v5837_v63 = vld [vmem:[%s10985_s3 + $0x150] sm:$0xff]  ;;  %362 = vmatpush.msrb.mxu2 %v5808_v59  ;;  %385 = vmatpush.msrb.mxu3 %v5813_v58 }
  0x30   :  { %11441 = vst [vmem:[#allocation44_spill] sm:$0xff] %v5791_v39  ;;  %317 = vmatpush.msrb.mxu0 %v5820_v35  ;;  %340 = vmatpush.msrb.mxu1 %v5825_v42 }
  0x31   :  { %11442 = vst [vmem:[#allocation45_spill] sm:$0xff] %v5796_v38  ;;  %v5849_v38 = vld [vmem:[%s10986_s4 + $0x138] sm:$0xff] }
  0x32   :  { %11443 = vst [vmem:[#allocation46_spill] sm:$0xff] %v5808_v59 }
  0x33   :  { %11444 = vst [vmem:[#allocation47_spill] sm:$0xff] %v5813_v58 }
  0x34   :  { %11445 = vst [vmem:[#allocation48_spill] sm:$0xff] %v5820_v35 }
  0x35   :  { %11446 = vst [vmem:[#allocation49_spill] sm:$0xff] %v5825_v42 }
  0x36   :  { %11447 = vst [vmem:[#allocation50_spill] sm:$0xff] %v5832_v62 }
  0x37   :  { %11448 = vst [vmem:[#allocation51_spill] sm:$0xff] %v5837_v63 }
  0x38   :  { %11449 = vst [vmem:[#allocation52_spill] sm:$0xff] %v5849_v38 }
  0x39   :  { %16 = vsyncpa [#allocation5], 0  ;;  %363 = vmatpush.msrb.mxu2 %v5832_v62  ;;  %386 = vmatpush.msrb.mxu3 %v5837_v63  ;;  %v5856_v59 = vld [vmem:[%s10985_s3 + $0x118] sm:$0xff]  ;;  %v5861_v58 = vld [vmem:[%s10985_s3 + $0x120] sm:$0xff]  ;;  %s5213_s11 = smov [#allocation2]   ;;  %s4077_s14 = sshll.u32 %s10989_s7, 4  ;;  %s4078_s14 = int_to_ptr.hbm [resolvable:$true] %s4077_s14 }
  0x3a   :  { %11450 = vst [vmem:[#allocation53_spill] sm:$0xff] %v5856_v59  ;;  %257 = vmatmul.f32.vlgmr.msra.gmra.mxu1 %v5840_v34  ;;  %280 = vmatmul.f32.vlgmr.msra.gmra.mxu2 %v5840_v34  ;;  %v5868_v62 = vld [vmem:[%s10985_s3 + $0x128] sm:$0xff]  ;;  %v5873_v63 = vld [vmem:[%s10986_s4 + $0x110] sm:$0xff]  ;;  %v5885_v35 = vld [vmem:[%s10985_s3 + $0xf8] sm:$0xff] }
  0x3b   :  { %11451 = vst [vmem:[#allocation54_spill] sm:$0xff] %v5861_v58  ;;  %303 = vmatmul.f32.vlgmr.msra.gmra.mxu3 %v5840_v34  ;;  %318 = vmatpush.msrb.mxu0 %v5849_v38  ;;  %v5880_v42 = vld [vmem:[%s10985_s3 + $0xf0] sm:$0xff]  ;;  %v5892_v39 = vld [vmem:[%s10985_s3 + $0x100] sm:$0xff]  ;;  %v5897_v38 = vld [vmem:[%s10986_s4 + $0xe8] sm:$0xff] }
  0x3c   :  { %11452 = vst [vmem:[#allocation55_spill] sm:$0xff] %v5868_v62  ;;  %341 = vmatpush.msrb.mxu1 %v5856_v59  ;;  %364 = vmatpush.msrb.mxu2 %v5861_v58  ;;  %v5902_v46 = vld [vmem:[%s10982_s0 + $0x8] sm:$0xff]  ;;  %v5914_v59 = vld [vmem:[%s10985_s3 + $0xd0] sm:$0xff] }
  0x3d   :  { %11453 = vst [vmem:[#allocation56_spill] sm:$0xff] %v5873_v63  ;;  %387 = vmatpush.msrb.mxu3 %v5868_v62  ;;  %319 = vmatpush.msrb.mxu0 %v5873_v63  ;;  %v5909_v58 = vld [vmem:[%s10985_s3 + $0xc8] sm:$0xff]  ;;  %v5921_v62 = vld [vmem:[%s10985_s3 + $0xd8] sm:$0xff]  ;;  %v5926_v63 = vld [vmem:[%s10986_s4 + $0xc0] sm:$0xff]  ;;  %v5941_v31 = vrot.slane %v5902_v46, 1 }
  0x3e   :  { %11454 = vst [vmem:[#allocation57_spill] sm:$0xff] %v5880_v42  ;;  %342 = vmatpush.msrb.mxu1 %v5880_v42  ;;  %365 = vmatpush.msrb.mxu2 %v5885_v35  ;;  %v5933_v42 = vld [vmem:[%s10985_s3 + $0xa0] sm:$0xff] }
  0x3f   :  { %11455 = vst [vmem:[#allocation58_spill] sm:$0xff] %v5885_v35  ;;  %388 = vmatpush.msrb.mxu3 %v5892_v39  ;;  %320 = vmatpush.msrb.mxu0 %v5897_v38  ;;  %v5938_v35 = vld [vmem:[%s10985_s3 + $0xa8] sm:$0xff] }
  0x40   :  { %11456 = vst [vmem:[#allocation59_spill] sm:$0xff] %v5892_v39  ;;  %343 = vmatpush.msrb.mxu1 %v5909_v58  ;;  %366 = vmatpush.msrb.mxu2 %v5914_v59  ;;  %v5948_v39 = vld [vmem:[%s10985_s3 + $0xb0] sm:$0xff] }
  0x41   :  { %11457 = vst [vmem:[#allocation60_spill] sm:$0xff] %v5897_v38  ;;  %389 = vmatpush.msrb.mxu3 %v5921_v62  ;;  %321 = vmatpush.msrb.mxu0 %v5926_v63  ;;  %v5957_v38 = vld [vmem:[%s10986_s4 + $0x98] sm:$0xff] }
  0x42   :  { %11458 = vst [vmem:[#allocation61_spill] sm:$0xff] %v5909_v58  ;;  %344 = vmatpush.msrb.mxu1 %v5933_v42  ;;  %367 = vmatpush.msrb.mxu2 %v5938_v35  ;;  %v5998_v58 = vld [vmem:[%s10985_s3 + $0x60] sm:$0xff] }
  0x43   :  { %11459 = vst [vmem:[#allocation62_spill] sm:$0xff] %v5914_v59  ;;  %v5962_v59 = vld [vmem:[%s10985_s3 + $0x78] sm:$0xff]  ;;  %390 = vmatpush.msrb.mxu3 %v5948_v39  ;;  %260 = vmatmul.f32.gmra.mxu1 %v5941_v31 }
  0x44   :  { %11460 = vst [vmem:[#allocation63_spill] sm:$0xff] %v5921_v62  ;;  %v5969_v62 = vld [vmem:[%s10985_s3 + $0x80] sm:$0xff]  ;;  %283 = vmatmul.f32.gmra.mxu2 %v5941_v31  ;;  %306 = vmatmul.f32.gmra.mxu3 %v5941_v31 }
  0x45   :  { %11461 = vst [vmem:[#allocation64_spill] sm:$0xff] %v5926_v63  ;;  %322 = vmatpush.msrb.mxu0 %v5957_v38  ;;  %345 = vmatpush.msrb.mxu1 %v5962_v59  ;;  %v5993_v63 = vld [vmem:[%s10985_s3 + $0x58] sm:$0xff] }
  0x46   :  { %11462 = vst [vmem:[#allocation65_spill] sm:$0xff] %v5933_v42  ;;  %v5986_v42 = vld [vmem:[%s10985_s3 + $0x50] sm:$0xff]  ;;  %368 = vmatpush.msrb.mxu2 %v5969_v62  ;;  %234 = vmatmul.f32.vlgmr.msra.gmra.mxu0 %v5840_v34 }
  0x47   :  { %11463 = vst [vmem:[#allocation66_spill] sm:$0xff] %v5938_v35  ;;  %v5974_v35 = vld [vmem:[%s10985_s3 + $0x88] sm:$0xff]  ;;  %346 = vmatpush.msrb.mxu1 %v5986_v42 }
  0x48   :  { %11464 = vst [vmem:[#allocation67_spill] sm:$0xff] %v5948_v39  ;;  %v5981_v39 = vld [vmem:[%s10986_s4 + $0x70] sm:$0xff]  ;;  %391 = vmatpush.msrb.mxu3 %v5974_v35  ;;  %369 = vmatpush.msrb.mxu2 %v5993_v63 }
  0x49   :  { %11465 = vst [vmem:[#allocation68_spill] sm:$0xff] %v5957_v38  ;;  %v6005_v38 = vld [vmem:[%s10986_s4 + $0x48] sm:$0xff]  ;;  %323 = vmatpush.msrb.mxu0 %v5981_v39 }
  0x4a   :  { %11466 = vst [vmem:[#allocation69_spill] sm:$0xff] %v5962_v59  ;;  %v6010_v59 = vld [vmem:[%s10985_s3 + $0x28] sm:$0xff]  ;;  %392 = vmatpush.msrb.mxu3 %v5998_v58 }
  0x4b   :  { %11467 = vst [vmem:[#allocation70_spill] sm:$0xff] %v5969_v62  ;;  %v6017_v62 = vld [vmem:[%s10985_s3 + $0x30] sm:$0xff]  ;;  %324 = vmatpush.msrb.mxu0 %v6005_v38  ;;  %347 = vmatpush.msrb.mxu1 %v6010_v59 }
  0x4c   :  { %11468 = vst [vmem:[#allocation71_spill] sm:$0xff] %v5974_v35  ;;  %v6022_v35 = vld [vmem:[%s10985_s3 + $0x38] sm:$0xff]  ;;  %370 = vmatpush.msrb.mxu2 %v6017_v62 }
  0x4d   :  { %11469 = vst [vmem:[#allocation72_spill] sm:$0xff] %v5981_v39  ;;  %v6029_v39 = vld [vmem:[%s10985_s3] sm:$0xff]  ;;  %393 = vmatpush.msrb.mxu3 %v6022_v35 }
  0x4e   :  { %11470 = vst [vmem:[#allocation73_spill] sm:$0xff] %v5986_v42  ;;  %v6036_v42 = vld [vmem:[%s10986_s4 + $0x20] sm:$0xff]  ;;  %348 = vmatpush.msrb.mxu1 %v6029_v39  ;;  %237 = vmatmul.f32.gmra.mxu0 %v5941_v31 }
  0x4f   :  { %11471 = vst [vmem:[#allocation74_spill] sm:$0xff] %v5993_v63  ;;  %v6041_v63 = vld [vmem:[%s10985_s3 + $0x8] sm:$0xff]  ;;  %325 = vmatpush.msrb.mxu0 %v6036_v42  ;;  %349 = vmatmul.f32.vlgmr.msrb.gmra.mxu1 %v5801_v43 }
  0x50   :  { %11472 = vst [vmem:[#allocation75_spill] sm:$0xff] %v5998_v58  ;;  %v6048_v58 = vld [vmem:[%s10985_s3 + $0x10] sm:$0xff]  ;;  %371 = vmatpush.msrb.mxu2 %v6041_v63 }
  0x51   :  { %11473 = vst [vmem:[#allocation76_spill] sm:$0xff] %v6010_v59  ;;  %v114_v59 = vld [vmem:[%s10985_s3 + $0x270] sm:$0xff]  ;;  %394 = vmatpush.msrb.mxu3 %v6048_v58  ;;  %372 = vmatmul.f32.vlgmr.msrb.gmra.mxu2 %v5801_v43 }
  0x52   :  { %11474 = vst [vmem:[#allocation77_spill] sm:$0xff] %v6017_v62  ;;  %395 = vmatmul.f32.vlgmr.msrb.gmra.mxu3 %v5801_v43  ;;  %v110_v62 = vld [vmem:[%s10985_s3 + $0x250] sm:$0xff]  ;;  %402 = vmatpush.msra.mxu0 %v114_v59  ;;  %v64_v59 = vld [vmem:[%s10985_s3 + $0xe0] sm:$0xff] }
  0x53   :  { %11475 = vst [vmem:[#allocation78_spill] sm:$0xff] %v6022_v35  ;;  %v115_v35 = vld [vmem:[%s10985_s3 + $0x278] sm:$0xff]  ;;  %798 = vmatpush.msra.mxu2 %v5267_v0  ;;  %821 = vmatpush.msra.mxu3 %v5272_v1  ;;  %v94_v0 = vld [vmem:[%s10985_s3 + $0x1d0] sm:$0xff] }
  0x54   :  { %11476 = vst [vmem:[#allocation79_spill] sm:$0xff] %v6029_v39  ;;  %425 = vmatpush.msra.mxu1 %v115_v35  ;;  %v105_v39 = vld [vmem:[%s10985_s3 + $0x228] sm:$0xff]  ;;  %v100_v35 = vld [vmem:[%s10985_s3 + $0x200] sm:$0xff]  ;;  %v95_v1 = vld [vmem:[%s10985_s3 + $0x1d8] sm:$0xff] }
  0x55   :  { %11477 = vst [vmem:[#allocation80_spill] sm:$0xff] %v6036_v42  ;;  %v99_v42 = vld [vmem:[%s10985_s3 + $0x1f8] sm:$0xff]  ;;  %799 = vmatpush.msra.mxu2 %v5289_v4  ;;  %822 = vmatpush.msra.mxu3 %v5294_v5  ;;  %v89_v4 = vld [vmem:[%s10985_s3 + $0x1a8] sm:$0xff]  ;;  %v90_v5 = vld [vmem:[%s10985_s3 + $0x1b0] sm:$0xff] }
  0x56   :  { %11478 = vst [vmem:[#allocation81_spill] sm:$0xff] %v6041_v63  ;;  %v109_v63 = vld [vmem:[%s10985_s3 + $0x248] sm:$0xff]  ;;  %426 = vmatpush.msra.mxu1 %v110_v62  ;;  %326 = vmatmul.f32.vlgmr.msrb.gmra.mxu0 %v5840_v34  ;;  %v44_v62 = vld [vmem:[%s10985_s3 + $0x40] sm:$0xff] }
  0x57   :  { %11479 = vst [vmem:[#allocation82_spill] sm:$0xff] %v6048_v58  ;;  %v104_v58 = vld [vmem:[%s10985_s3 + $0x220] sm:$0xff]  ;;  %403 = vmatpush.msra.mxu0 %v109_v63  ;;  %800 = vmatpush.msra.mxu2 %v5311_v8  ;;  %v11515_v63 = vld [vmem:[#allocation61_spill] sm:$0xff] }
  0x58   :  { %427 = vmatpush.msra.mxu1 %v105_v39  ;;  %v84_v8 = vld [vmem:[%s10985_s3 + $0x180] sm:$0xff]  ;;  %823 = vmatpush.msra.mxu3 %v5318_v9  ;;  %v85_v39 = vld [vmem:[%s10985_s3 + $0x188] sm:$0xff]  ;;  %v74_v9 = vld [vmem:[%s10985_s3 + $0x130] sm:$0xff] }
  0x59   :  { %404 = vmatpush.msra.mxu0 %v104_v58  ;;  %352 = vmatmul.f32.gmra.mxu1 %v5902_v46  ;;  %v80_v58 = vld [vmem:[%s10985_s3 + $0x160] sm:$0xff] }
  0x5a   :  { %428 = vmatpush.msra.mxu1 %v100_v35  ;;  %375 = vmatmul.f32.gmra.mxu2 %v5902_v46  ;;  %v11516_v35 = vld [vmem:[#allocation27_spill] sm:$0xff] }
  0x5b   :  { %405 = vmatpush.msra.mxu0 %v99_v42  ;;  %398 = vmatmul.f32.gmra.mxu3 %v5902_v46  ;;  %v79_v42 = vld [vmem:[%s10985_s3 + $0x158] sm:$0xff] }
  0x5c   :  { %429 = vmatpush.msra.mxu1 %v95_v1  ;;  %801 = vmatpush.msra.mxu2 %v5335_v12  ;;  %v75_v12 = vld [vmem:[%s10985_s3 + $0x138] sm:$0xff]  ;;  %v11518_v1 = vld [vmem:[#allocation28_spill] sm:$0xff] }
  0x5d   :  { %406 = vmatpush.msra.mxu0 %v94_v0  ;;  %824 = vmatpush.msra.mxu3 %v5340_v13  ;;  %v69_v13 = vld [vmem:[%s10985_s3 + $0x108] sm:$0xff] }
  0x5e   :  { %430 = vmatpush.msra.mxu1 %v90_v5  ;;  %802 = vmatpush.msra.mxu2 %v5359_v16  ;;  %v70_v16 = vld [vmem:[%s10985_s3 + $0x110] sm:$0xff]  ;;  %v11517_v0 = vld [vmem:[#allocation64_spill] sm:$0xff] }
  0x5f   :  { %407 = vmatpush.msra.mxu0 %v89_v4  ;;  %825 = vmatpush.msra.mxu3 %v5364_v17  ;;  %v65_v17 = vld [vmem:[%s10985_s3 + $0xe8] sm:$0xff]  ;;  %v11520_v5 = vld [vmem:[#allocation30_spill] sm:$0xff] }
  0x60   :  { %431 = vmatpush.msra.mxu1 %v85_v39  ;;  %803 = vmatpush.msra.mxu2 %v5383_v20  ;;  %v59_v20 = vld [vmem:[%s10985_s3 + $0xb8] sm:$0xff]  ;;  %v11519_v4 = vld [vmem:[#allocation65_spill] sm:$0xff] }
  0x61   :  { %408 = vmatpush.msra.mxu0 %v84_v8  ;;  %826 = vmatpush.msra.mxu3 %v5388_v21  ;;  %v60_v21 = vld [vmem:[%s10985_s3 + $0xc0] sm:$0xff] }
  0x62   :  { %432 = vmatpush.msra.mxu1 %v80_v58  ;;  %804 = vmatpush.msra.mxu2 %v5407_v24  ;;  %v54_v24 = vld [vmem:[%s10985_s3 + $0x90] sm:$0xff]  ;;  %v11521_v8 = vld [vmem:[#allocation68_spill] sm:$0xff]  ;;  %v11522_v39 = vld [vmem:[#allocation31_spill] sm:$0xff] }
  0x63   :  { %409 = vmatpush.msra.mxu0 %v79_v42  ;;  %827 = vmatpush.msra.mxu3 %v5412_v25  ;;  %v55_v25 = vld [vmem:[%s10985_s3 + $0x98] sm:$0xff]  ;;  %v11523_v42 = vld [vmem:[#allocation69_spill] sm:$0xff] }
  0x64   :  { %433 = vmatpush.msra.mxu1 %v75_v12  ;;  %805 = vmatpush.msra.mxu2 %v5431_v28  ;;  %v49_v28 = vld [vmem:[%s10985_s3 + $0x68] sm:$0xff]  ;;  %v11524_v58 = vld [vmem:[#allocation34_spill] sm:$0xff]  ;;  %v11526_v12 = vld [vmem:[#allocation35_spill] sm:$0xff] }
  0x65   :  { %410 = vmatpush.msra.mxu0 %v74_v9  ;;  %828 = vmatpush.msra.mxu3 %v5436_v29  ;;  %v50_v29 = vld [vmem:[%s10985_s3 + $0x70] sm:$0xff]  ;;  %v11525_v9 = vld [vmem:[#allocation72_spill] sm:$0xff] }
  0x66   :  { %434 = vmatpush.msra.mxu1 %v70_v16  ;;  %329 = vmatmul.f32.gmra.mxu0 %v5941_v31  ;;  %v11528_v16 = vld [vmem:[#allocation38_spill] sm:$0xff] }
  0x67   :  { %411 = vmatpush.msra.mxu0 %v69_v13  ;;  %806 = vmatpush.msra.mxu2 %v5455_v32  ;;  %v45_v32 = vld [vmem:[%s10985_s3 + $0x48] sm:$0xff] }
  0x68   :  { %435 = vmatpush.msra.mxu1 %v65_v17  ;;  %829 = vmatpush.msra.mxu3 %v5460_v33  ;;  %v39_v33 = vld [vmem:[%s10985_s3 + $0x18] sm:$0xff]  ;;  %v11527_v13 = vld [vmem:[#allocation73_spill] sm:$0xff]  ;;  %v11530_v17 = vld [vmem:[#allocation76_spill] sm:$0xff] }
  0x69   :  { %412 = vmatpush.msra.mxu0 %v64_v59  ;;  %807 = vmatpush.msra.mxu2 %v5479_v36  ;;  %v40_v36 = vld [vmem:[%s10985_s3 + $0x20] sm:$0xff] }
  0x6a   :  { %436 = vmatpush.msra.mxu1 %v60_v21  ;;  %830 = vmatpush.msra.mxu3 %v5484_v37  ;;  %v11495_v37 = vld [vmem:[#allocation44_spill] sm:$0xff]  ;;  %v11529_v59 = vld [vmem:[#allocation39_spill] sm:$0xff] }
  0x6b   :  { %413 = vmatpush.msra.mxu0 %v59_v20  ;;  %808 = vmatpush.msra.mxu2 %v5503_v40  ;;  %v11496_v40 = vld [vmem:[#allocation16_spill] sm:$0xff]  ;;  %v11531_v20 = vld [vmem:[#allocation42_spill] sm:$0xff] }
  0x6c   :  { %437 = vmatpush.msra.mxu1 %v55_v25  ;;  %831 = vmatpush.msra.mxu3 %v5508_v41  ;;  %v11497_v41 = vld [vmem:[#allocation45_spill] sm:$0xff]  ;;  %v11532_v21 = vld [vmem:[#allocation80_spill] sm:$0xff]  ;;  %v11534_v25 = vld [vmem:[#allocation79_spill] sm:$0xff] }
  0x6d   :  { %414 = vmatpush.msra.mxu0 %v54_v24  ;;  %809 = vmatpush.msra.mxu2 %v5527_v44  ;;  %v11499_v44 = vld [vmem:[#allocation48_spill] sm:$0xff]  ;;  %v11533_v24 = vld [vmem:[#allocation43_spill] sm:$0xff] }
  0x6e   :  { %438 = vmatpush.msra.mxu1 %v50_v29  ;;  %832 = vmatpush.msra.mxu3 %v5532_v45  ;;  %v11500_v45 = vld [vmem:[#allocation18_spill] sm:$0xff]  ;;  %v11536_v29 = vld [vmem:[#allocation47_spill] sm:$0xff] }
  0x6f   :  { %415 = vmatpush.msra.mxu0 %v49_v28  ;;  %810 = vmatpush.msra.mxu2 %v5551_v48  ;;  %v11503_v48 = vld [vmem:[#allocation52_spill] sm:$0xff]  ;;  %v11535_v28 = vld [vmem:[#allocation46_spill] sm:$0xff] }
  0x70   :  { %439 = vmatpush.msra.mxu1 %v45_v32  ;;  %833 = vmatpush.msra.mxu3 %v5556_v49  ;;  %v11504_v49 = vld [vmem:[#allocation20_spill] sm:$0xff]  ;;  %v11538_v32 = vld [vmem:[#allocation51_spill] sm:$0xff] }
  0x71   :  { %416 = vmatpush.msra.mxu0 %v44_v62  ;;  %811 = vmatpush.msra.mxu2 %v5575_v52  ;;  %v11507_v52 = vld [vmem:[#allocation56_spill] sm:$0xff]  ;;  %v11537_v62 = vld [vmem:[#allocation50_spill] sm:$0xff] }
  0x72   :  { %440 = vmatpush.msra.mxu1 %v40_v36  ;;  %834 = vmatpush.msra.mxu3 %v5580_v53  ;;  %v11508_v53 = vld [vmem:[#allocation22_spill] sm:$0xff] }
  0x73   :  { %417 = vmatpush.msra.mxu0 %v39_v33  ;;  %441 = vmatmul.f32.vlgmr.msra.gmra.mxu1 %v5801_v43  ;;  %v11540_v33 = vld [vmem:[#allocation55_spill] sm:$0xff]  ;;  %v11541_v36 = vld [vmem:[#allocation58_spill] sm:$0xff] }
  0x74   :  { %418 = vmatmul.f32.vlgmr.msra.gmra.mxu0 %v5801_v43  ;;  %867 = vmatpush.msrb.mxu1 %v5284_v3  ;;  %v11481_v3 = vld [vmem:[#allocation29_spill] sm:$0xff] }
  0x75   :  { %844 = vmatpush.msrb.mxu0 %v5277_v2  ;;  %812 = vmatpush.msra.mxu2 %v5599_v56  ;;  %v11480_v2 = vld [vmem:[#allocation8_spill] sm:$0xff]  ;;  %v11498_v43 = vld [vmem:[#allocation17_spill] sm:$0xff] }
  0x76   :  { %868 = vmatpush.msrb.mxu1 %v5306_v7  ;;  %835 = vmatpush.msra.mxu3 %v5604_v57  ;;  %v11483_v7 = vld [vmem:[#allocation32_spill] sm:$0xff] }
  0x77   :  { %845 = vmatpush.msrb.mxu0 %v5301_v6  ;;  %813 = vmatpush.msra.mxu2 %v5623_v60  ;;  %v11482_v6 = vld [vmem:[#allocation9_spill] sm:$0xff]  ;;  %v11511_v56 = vld [vmem:[#allocation60_spill] sm:$0xff] }
  0x78   :  { %869 = vmatpush.msrb.mxu1 %v5328_v11  ;;  %836 = vmatpush.msra.mxu3 %v5628_v61  ;;  %v11485_v11 = vld [vmem:[#allocation33_spill] sm:$0xff]  ;;  %v11512_v57 = vld [vmem:[#allocation24_spill] sm:$0xff]  ;;  %v11514_v61 = vld [vmem:[#allocation26_spill] sm:$0xff] }
  0x79   :  { %846 = vmatpush.msrb.mxu0 %v5323_v10  ;;  %890 = vmatpush.msrb.mxu2 %v5647_v55  ;;  %v11484_v10 = vld [vmem:[#allocation10_spill] sm:$0xff]  ;;  %v11510_v55 = vld [vmem:[#allocation23_spill] sm:$0xff]  ;;  %v11513_v60 = vld [vmem:[#allocation25_spill] sm:$0xff] }
  0x7a   :  { %870 = vmatpush.msrb.mxu1 %v5352_v15  ;;  %913 = vmatpush.msrb.mxu3 %v5652_v54  ;;  %v11487_v15 = vld [vmem:[#allocation36_spill] sm:$0xff]  ;;  %v11509_v54 = vld [vmem:[#allocation57_spill] sm:$0xff] }
  0x7b   :  { %847 = vmatpush.msrb.mxu0 %v5347_v14  ;;  %444 = vmatmul.f32.gmra.mxu1 %v5902_v46  ;;  %v11486_v14 = vld [vmem:[#allocation11_spill] sm:$0xff] }
  0x7c   :  { %421 = vmatmul.f32.gmra.mxu0 %v5902_v46  ;;  %871 = vmatpush.msrb.mxu1 %v5376_v19  ;;  %v11489_v19 = vld [vmem:[#allocation37_spill] sm:$0xff] }
  0x7d   :  { %848 = vmatpush.msrb.mxu0 %v5371_v18  ;;  %891 = vmatpush.msrb.mxu2 %v5671_v51  ;;  %v11488_v18 = vld [vmem:[#allocation12_spill] sm:$0xff]  ;;  %v11501_v46 = vld [vmem:[#allocation49_spill] sm:$0xff] }
  0x7e   :  { %872 = vmatpush.msrb.mxu1 %v5400_v23  ;;  %914 = vmatpush.msrb.mxu3 %v5676_v50  ;;  %v11491_v23 = vld [vmem:[#allocation40_spill] sm:$0xff]  ;;  %v11505_v50 = vld [vmem:[#allocation53_spill] sm:$0xff] }
  0x7f   :  { %849 = vmatpush.msrb.mxu0 %v5395_v22  ;;  %892 = vmatpush.msrb.mxu2 %v5695_v47  ;;  %v11490_v22 = vld [vmem:[#allocation13_spill] sm:$0xff]  ;;  %v11502_v47 = vld [vmem:[#allocation19_spill] sm:$0xff] }
  0x80   :  { %873 = vmatpush.msrb.mxu1 %v5424_v27  ;;  %915 = vmatpush.msrb.mxu3 %v11481_v3  ;;  %v11493_v27 = vld [vmem:[#allocation41_spill] sm:$0xff]  ;;  %v11543_v3 = vld [vmem:[#allocation62_spill] sm:$0xff] }
  0x81   :  { %850 = vmatpush.msrb.mxu0 %v5419_v26  ;;  %893 = vmatpush.msrb.mxu2 %v11483_v7  ;;  %v11492_v26 = vld [vmem:[#allocation14_spill] sm:$0xff]  ;;  %v11506_v51 = vld [vmem:[#allocation21_spill] sm:$0xff] }
  0x82   :  { %874 = vmatpush.msrb.mxu1 %v11480_v2  ;;  %916 = vmatpush.msrb.mxu3 %v11485_v11  ;;  %v11542_v2 = vld [vmem:[#allocation59_spill] sm:$0xff]  ;;  %v11545_v7 = vld [vmem:[#allocation66_spill] sm:$0xff] }
  0x83   :  { %851 = vmatpush.msrb.mxu0 %v5443_v30  ;;  %894 = vmatpush.msrb.mxu2 %v11487_v15  ;;  %v11494_v30 = vld [vmem:[#allocation15_spill] sm:$0xff]  ;;  %v11547_v11 = vld [vmem:[#allocation70_spill] sm:$0xff] }
  0x84   :  { %875 = vmatpush.msrb.mxu1 %v11484_v10  ;;  %917 = vmatpush.msrb.mxu3 %v11489_v19  ;;  %v11546_v10 = vld [vmem:[#allocation67_spill] sm:$0xff]  ;;  %v11549_v15 = vld [vmem:[#allocation74_spill] sm:$0xff]  ;;  %v11551_v19 = vld [vmem:[#allocation77_spill] sm:$0xff] }
  0x85   :  { %852 = vmatpush.msrb.mxu0 %v11482_v6  ;;  %895 = vmatpush.msrb.mxu2 %v11491_v23  ;;  %v11544_v6 = vld [vmem:[#allocation63_spill] sm:$0xff]  ;;  %v11553_v23 = vld [vmem:[#allocation81_spill] sm:$0xff] }
  0x86   :  { %876 = vmatpush.msrb.mxu1 %v11488_v18  ;;  %918 = vmatpush.msrb.mxu3 %v11493_v27  ;;  %v11550_v18 = vld [vmem:[#allocation75_spill] sm:$0xff] }
  0x87   :  { %853 = vmatpush.msrb.mxu0 %v11486_v14  ;;  %896 = vmatpush.msrb.mxu2 %v11495_v37  ;;  %v11548_v14 = vld [vmem:[#allocation71_spill] sm:$0xff] }
  0x88   :  { %877 = vmatpush.msrb.mxu1 %v11492_v26  ;;  %919 = vmatpush.msrb.mxu3 %v11497_v41  ;;  %v11554_v26 = vld [vmem:[#allocation82_spill] sm:$0xff]  ;;  %v6297_v41 = vld [vmem:[%s10987_s5] sm:$0x1f] }
  0x89   :  { %854 = vmatpush.msrb.mxu0 %v11490_v22  ;;  %897 = vmatpush.msrb.mxu2 %v11499_v44  ;;  %v11552_v22 = vld [vmem:[#allocation78_spill] sm:$0xff] }
  0x8a   :  { %878 = vmatpush.msrb.mxu1 %v11496_v40  ;;  %920 = vmatpush.msrb.mxu3 %v11501_v46  ;;  %v6302_v46 = vperm.slane %v6297_v41, 0 }
  0x8b   :  { %855 = vmatpush.msrb.mxu0 %v11494_v30  ;;  %898 = vmatpush.msrb.mxu2 %v11503_v48 }
  0x8c   :  { %879 = vmatpush.msrb.mxu1 %v11500_v45  ;;  %921 = vmatpush.msrb.mxu3 %v11505_v50  ;;  %11555 = vst [vmem:[#allocation8_spill] sm:$0xff] %v6302_v46 }
  0x8d   :  { %856 = vmatpush.msrb.mxu0 %v11498_v43  ;;  %899 = vmatpush.msrb.mxu2 %v11507_v52  ;;  %v6309_v52 = vperm.slane %v6297_v41, 2 }
  0x8e   :  { %880 = vmatpush.msrb.mxu1 %v11504_v49  ;;  %922 = vmatpush.msrb.mxu3 %v11509_v54 }
  0x8f   :  { %857 = vmatpush.msrb.mxu0 %v11502_v47  ;;  %900 = vmatpush.msrb.mxu2 %v11511_v56  ;;  %11557 = vst [vmem:[#allocation9_spill] sm:$0xff] %v6309_v52 }
  0x90   :  { %881 = vmatpush.msrb.mxu1 %v11508_v53  ;;  %923 = vmatpush.msrb.mxu3 %v11515_v63 }
  0x91   :  { %858 = vmatpush.msrb.mxu0 %v11506_v51  ;;  %901 = vmatpush.msrb.mxu2 %v11517_v0  ;;  %v6306_v51 = vperm.slane %v6297_v41, 1 }
  0x92   :  { %882 = vmatpush.msrb.mxu1 %v11512_v57  ;;  %924 = vmatpush.msrb.mxu3 %v11519_v4 }
  0x93   :  { %859 = vmatpush.msrb.mxu0 %v11510_v55  ;;  %902 = vmatpush.msrb.mxu2 %v11521_v8  ;;  %11556 = vst [vmem:[#allocation29_spill] sm:$0xff] %v6306_v51 }
  0x94   :  { %959 = vmatpush.msra.mxu1 %v11514_v61  ;;  %925 = vmatpush.msrb.mxu3 %v11523_v42 }
  0x95   :  { %936 = vmatpush.msra.mxu0 %v11513_v60  ;;  %903 = vmatpush.msrb.mxu2 %v11525_v9 }
  0x96   :  { %960 = vmatpush.msra.mxu1 %v11518_v1  ;;  %926 = vmatpush.msrb.mxu3 %v11527_v13 }
  0x97   :  { %937 = vmatpush.msra.mxu0 %v11516_v35  ;;  %904 = vmatpush.msrb.mxu2 %v6005_v38  ;;  %v11539_v38 = vld [vmem:[#allocation54_spill] sm:$0xff] }
  0x98   :  { %961 = vmatpush.msra.mxu1 %v11522_v39  ;;  %927 = vmatpush.msrb.mxu3 %v11530_v17 }
  0x99   :  { %938 = vmatpush.msra.mxu0 %v11520_v5  ;;  %905 = vmatpush.msrb.mxu2 %v11532_v21 }
  0x9a   :  { %962 = vmatpush.msra.mxu1 %v11526_v12  ;;  %928 = vmatpush.msrb.mxu3 %v11534_v25 }
  0x9b   :  { %939 = vmatpush.msra.mxu0 %v11524_v58 }
  0x9c   :  { %963 = vmatpush.msra.mxu1 %v11529_v59 }
  0x9d   :  { %940 = vmatpush.msra.mxu0 %v11528_v16 }
  0x9e   :  { %964 = vmatpush.msra.mxu1 %v11533_v24 }
  0x9f   :  { %941 = vmatpush.msra.mxu0 %v11531_v20 }
  0xa0   :  { %965 = vmatpush.msra.mxu1 %v11536_v29 }
  0xa1   :  { %942 = vmatpush.msra.mxu0 %v11535_v28 }
  0xa2   :  { %966 = vmatpush.msra.mxu1 %v11538_v32 }
  0xa3   :  { %943 = vmatpush.msra.mxu0 %v11537_v62 }
  0xa4   :  { %967 = vmatpush.msra.mxu1 %v11540_v33 }
  0xa5   :  { %944 = vmatpush.msra.mxu0 %v11539_v38 }
  0xa6   :  { %968 = vmatpush.msra.mxu1 %v11542_v2 }
  0xa7   :  { %945 = vmatpush.msra.mxu0 %v11541_v36 }
  0xa8   :  { %969 = vmatpush.msra.mxu1 %v11544_v6 }
  0xa9   :  { %946 = vmatpush.msra.mxu0 %v11543_v3 }
  0xaa   :  { %970 = vmatpush.msra.mxu1 %v11546_v10 }
  0xab   :  { %947 = vmatpush.msra.mxu0 %v11545_v7 }
  0xac   :  { %971 = vmatpush.msra.mxu1 %v11548_v14 }
  0xad   :  { %948 = vmatpush.msra.mxu0 %v11547_v11 }
  0xae   :  { %972 = vmatpush.msra.mxu1 %v11550_v18 }
  0xaf   :  { %949 = vmatpush.msra.mxu0 %v11549_v15 }
  0xb0   :  { %973 = vmatpush.msra.mxu1 %v11552_v22  ;;  %v6351_v22 = vld [vmem:[%s10983_s1] sm:$0xff] }
  0xb1   :  { %950 = vmatpush.msra.mxu0 %v11551_v19 }
  0xb2   :  { %974 = vmatpush.msra.mxu1 %v11554_v26 }
  0xb3   :  { %951 = vmatpush.msra.mxu0 %v11553_v23 }
  0xb7   :  { %v258_v27 = vpop.f32.mrf.mxu1 }
  0xbd   :  { %v281_v30 = vpop.f32.mrf.mxu2 }
  0xbe   :  { %v6292_v37 = vpop.f32.mrf.mxu3 }
  0xc0   :  { %v261_v40 = vpop.f32.mrf.mxu1 }
  0xc3   :  { %v235_v45 = vpop.f32.mrf.mxu0 }
  0xc7   :  { %v284_v43 = vpop.f32.mrf.mxu2  ;;  %v6299_v44 = vpop.f32.mrf.mxu3 }
  0xcb   :  { %v238_v57 = vpop.f32.mrf.mxu0 }
  0xcc   :  { %v350_v47 = vpop.f32.mrf.mxu1 }
  0xcd   :  { %v351_v48 = vadd.f32 %v350_v47, %v235_v45  ;;  %v6359_v45 = vperm.slane %v6297_v41, 3  ;;  %v6362_v47 = vperm.slane %v6297_v41, 4 }
  0xcf   :  { %v459_v49 = vadd.f32 %v6302_v46, %v351_v48 }
  0xd1   :  { %v4110_v50 = vmul.f32 -1.442695, %v459_v49 }
  0xd3   :  { %4381 = vpow2.f32 %v4110_v50  ;;  %v327_v9 = vpop.f32.mrf.mxu0 }
  0xd4   :  { %v373_v53 = vpop.f32.mrf.mxu2 }
  0xd5   :  { %v396_v54 = vpop.f32.mrf.mxu3  ;;  %v374_v55 = vadd.f32 %v373_v53, %v258_v27  ;;  %v212_v53 = vrot.slane %v6351_v22, 1 }
  0xd6   :  { %v397_v56 = vadd.f32 %v396_v54, %v281_v30  ;;  %v353_v60 = vpop.f32.mrf.mxu1 }
  0xd7   :  { %v460_v61 = vadd.f32 %v6306_v51, %v374_v55  ;;  %v354_v35 = vadd.f32 %v353_v60, %v238_v57 }
  0xd8   :  { %v461_v63 = vadd.f32 %v6309_v52, %v397_v56 }
  0xd9   :  { %v4106_v0 = vmul.f32 -1.442695, %v460_v61  ;;  %v464_v4 = vadd.f32 %v6302_v46, %v354_v35  ;;  %v4382_v5 = vpop.eup %4381 }
  0xda   :  { %v4108_v1 = vmul.f32 -1.442695, %v461_v63  ;;  %v6314_v12 = vadd.f32 1.0, %v4382_v5 }
  0xdb   :  { %4383 = vpow2.f32 %v4106_v0  ;;  %v4111_v8 = vmul.f32 -1.442695, %v464_v4 }
  0xdc   :  { %4385 = vpow2.f32 %v4108_v1  ;;  %v572_v15 = vand.u32 2147483648, %v6314_v12  ;;  %v570_v48 = vand.u32 2147483647, %v6314_v12  ;;  %vm566_vm2 = vweird.f32 %v6314_v12 }
  0xdd   :  { %v376_v39 = vpop.f32.mrf.mxu2  ;;  %4387 = vpow2.f32 %v4111_v8 }
  0xde   :  { %v377_v42 = vadd.f32 %v376_v39, %v261_v40  ;;  %v399_v58 = vpop.f32.mrf.mxu3  ;;  %4389 = vrcp.f32 %v6314_v12  ;;  %v6365_v49 = vor.u32 1.1754944e-38, %v572_v15  ;;  %vm6407_vm7 = vcmp.eq.f32.partialorder %v570_v48, 8.507059e+37 }
  0xdf   :  { %v400_v13 = vadd.f32 %v399_v58, %v284_v43 }
  0xe0   :  { %v465_v16 = vadd.f32 %v6306_v51, %v377_v42 }
  0xe1   :  { %v466_v59 = vadd.f32 %v6309_v52, %v400_v13  ;;  %v4384_v17 = vpop.eup %4383 }
  0xe2   :  { %v4107_v20 = vmul.f32 -1.442695, %v465_v16  ;;  %v4386_v21 = vpop.eup %4385  ;;  %v6319_v24 = vadd.f32 1.0, %v4384_v17 }
  0xe3   :  { %v4109_v25 = vmul.f32 -1.442695, %v466_v59  ;;  %v6321_v28 = vadd.f32 1.0, %v4386_v21  ;;  %v4388_v29 = vpop.eup %4387  ;;  %v6325_v62 = vpop.f32.mrf.mxu0 }
  0xe4   :  { %4391 = vpow2.f32 %v4107_v20  ;;  %v6327_v32 = vadd.f32 1.0, %v4388_v29  ;;  %v6329_v38 = vpop.eup %4389  ;;  %v488_v23 = vand.u32 2147483648, %v6319_v24  ;;  %vm482_vm0 = vweird.f32 %v6319_v24 }
  0xe5   :  { %4393 = vrcp.f32 %v6319_v24  ;;  %v562_v10 = vmul.f32 %v6329_v38, %v6314_v12  ;;  %v528_v43 = vand.u32 2147483648, %v6321_v28  ;;  %vm522_vm1 = vweird.f32 %v6321_v28 }
  0xe6   :  { %4395 = vrcp.f32 %v6321_v28  ;;  %v489_v57 = vor.u32 1.1754944e-38, %v488_v23  ;;  %vm567_vm3 = vweird.f32 %v6329_v38  ;;  %v486_v4 = vand.u32 2147483647, %v6319_v24 }
  0xe7   :  { %4397 = vpow2.f32 %v4109_v25  ;;  %v563_v40 = vsub.f32 1.0, %v562_v10  ;;  %v529_v63 = vor.u32 1.1754944e-38, %v528_v43  ;;  %v526_v5 = vand.u32 2147483647, %v6321_v28  ;;  %vm6452_vm15 = vmor %vm566_vm2, %vm567_vm3 }
  0xe8   :  { %4399 = vrcp.f32 %v6327_v32  ;;  %v585_v16 = vand.u32 2147483647, %v6327_v32  ;;  %vm581_vm8 = vweird.f32 %v6327_v32  ;;  %vm6412_vm9 = vcmp.eq.f32.partialorder %v486_v4, 8.507059e+37 }
  0xe9   :  { %v564_v35 = vmul.f32 %v6329_v38, %v563_v40  ;;  %vm6416_vm10 = vcmp.eq.f32.partialorder %v526_v5, 8.507059e+37 }
  0xea   :  { %v4392_v33 = vpop.eup %4391 }
  0xeb   :  { %v6331_v36 = vpop.eup %4393  ;;  %v6334_v2 = vadd.f32 1.0, %v4392_v33 }
  0xec   :  { %v6336_v3 = vpop.eup %4395  ;;  %v478_v6 = vmul.f32 %v6331_v36, %v6319_v24  ;;  %vm483_vm4 = vweird.f32 %v6331_v36 }
  0xed   :  { %v4398_v7 = vpop.eup %4397  ;;  %v518_v11 = vmul.f32 %v6336_v3, %v6321_v28  ;;  %4401 = vrcp.f32 %v6334_v2  ;;  %vm523_vm5 = vweird.f32 %v6336_v3  ;;  %vm6401_vm6 = vmor %vm482_vm0, %vm483_vm4  ;;  %vm497_vm12 = vweird.f32 %v6334_v2 }
  0xee   :  { %v6345_v14 = vadd.f32 1.0, %v4398_v7  ;;  %v479_v18 = vsub.f32 1.0, %v478_v6  ;;  %v6355_v30 = vpop.eup %4399  ;;  %v565_v6 = vadd.f32 %v6329_v38, %v564_v35  ;;  %vm6424_vm11 = vmor %vm522_vm1, %vm523_vm5 }
  0xef   :  { %v519_v26 = vsub.f32 1.0, %v518_v11  ;;  %v577_v60 = vmul.f32 %v6355_v30, %v6327_v32  ;;  %vm582_vm3 = vweird.f32 %v6355_v30 }
  0xf0   :  { %4403 = vrcp.f32 %v6345_v14  ;;  %v442_v27 = vpop.f32.mrf.mxu1  ;;  %v480_v55 = vmul.f32 %v6331_v36, %v479_v18  ;;  %v501_v18 = vand.u32 2147483647, %v6334_v2  ;;  %vm537_vm1 = vweird.f32 %v6345_v14 }
  0xf1   :  { %v419_v19 = vpop.f32.mrf.mxu0  ;;  %v443_v50 = vadd.f32 %v442_v27, %v327_v9  ;;  %v520_v41 = vmul.f32 %v6336_v3, %v519_v26  ;;  %v578_v13 = vsub.f32 1.0, %v577_v60  ;;  %v541_v12 = vand.u32 2147483647, %v6345_v14 }
  0xf2   :  { %v420_v56 = vadd.f32 %v419_v19, %v6292_v37  ;;  %v481_v9 = vadd.f32 %v6331_v36, %v480_v55  ;;  %v503_v19 = vand.u32 2147483648, %v6334_v2  ;;  %vm502_vm4 = vcmp.eq.f32.partialorder %v501_v18, 8.507059e+37 }
  0xf3   :  { %v6368_v54 = vpop.eup %4401  ;;  %v463_v0 = vadd.f32 %v6362_v47, %v443_v50  ;;  %v521_v17 = vadd.f32 %v6336_v3, %v520_v41  ;;  %v579_v26 = vmul.f32 %v6355_v30, %v578_v13  ;;  %v543_v50 = vand.u32 2147483648, %v6345_v14 }
  0xf4   :  { %v493_v61 = vmul.f32 %v6368_v54, %v6334_v2  ;;  %v462_v39 = vadd.f32 %v6359_v45, %v420_v56  ;;  %v485_v15 = vsel %vm6401_vm6, %v6331_v36, %v481_v9  ;;  %vm498_vm13 = vweird.f32 %v6368_v54  ;;  %v6461_v56 = vld [vmem:[%s10984_s2] sm:$0x3]  ;;  %vm583_vm6 = vmor %vm581_vm8, %vm582_vm3 }
  0xf5   :  { %v4112_v42 = vmul.f32 -1.442695, %v463_v0  ;;  %v525_v28 = vsel %vm6424_vm11, %v6336_v3, %v521_v17  ;;  %v490_v43 = vsel %vm6412_vm9, %v489_v57, %v485_v15  ;;  %vm6465_vm0 = vmor %vm497_vm12, %vm498_vm13  ;;  %v569_v41 = vsel %vm6452_vm15, %v6329_v38, %v565_v6  ;;  %v6487_v38 = vld [vmem:[%s10983_s1 + $0x8] sm:$0xff] }
  0xf6   :  { %v6383_v1 = vpop.eup %4403  ;;  %v494_v37 = vsub.f32 1.0, %v493_v61  ;;  %v530_v55 = vsel %vm6416_vm10, %v529_v63, %v525_v28  ;;  %v11067_v61 = vmov 0   ;;  %v580_v35 = vadd.f32 %v6355_v30, %v579_v26  ;;  %v4380_v26 = vld [vmem:[%s10988_s6] ss:$0 sm:$0xff] }
  0xf7   :  { %v533_v8 = vmul.f32 %v6383_v1, %v6345_v14  ;;  %4405 = vpow2.f32 %v4112_v42  ;;  %vm538_vm14 = vweird.f32 %v6383_v1  ;;  %4228 = vset.pattern.permute.xlu1 %v11067_v61  ;;  %v507_v14 = vmul.f32 %v490_v43, %v6351_v22 }
  0xf8   :  { %v445_v59 = vpop.f32.mrf.mxu1  ;;  %v495_v33 = vmul.f32 %v6368_v54, %v494_v37  ;;  %4407 = vtanh.f32 %v462_v39  ;;  %vm6477_vm2 = vmor %vm537_vm1, %vm538_vm14  ;;  %648 = vperm.xlu1 %4228, %v6461_v56   ;;  %v547_v0 = vmul.f32 %v530_v55, %v212_v53  ;;  %v504_v5 = vor.u32 1.1754944e-38, %v503_v19 }
  0xf9   :  { %v422_v58 = vpop.f32.mrf.mxu0  ;;  %v534_v20 = vsub.f32 1.0, %v533_v8  ;;  %v446_v25 = vadd.f32 %v445_v59, %v6325_v62  ;;  %v544_v8 = vor.u32 1.1754944e-38, %v543_v50  ;;  %v574_v39 = vsel %vm6407_vm7, %v6365_v49, %v569_v41 }
  0xfa   :  { %v423_v21 = vadd.f32 %v422_v58, %v6299_v44  ;;  %v496_v40 = vadd.f32 %v6368_v54, %v495_v33  ;;  %v587_v42 = vand.u32 2147483648, %v6327_v32  ;;  %vm542_vm5 = vcmp.eq.f32.partialorder %v541_v12, 8.507059e+37 }
  0xfb   :  { %v535_v10 = vmul.f32 %v6383_v1, %v534_v20  ;;  %v468_v11 = vadd.f32 %v6362_v47, %v446_v25  ;;  %v213_v9 = vrot.slane %v6487_v38, 1  ;;  %v584_v59 = vsel %vm583_vm6, %v6355_v30, %v580_v35 }
  0xfc   :  { %v467_v23 = vadd.f32 %v6359_v45, %v423_v21  ;;  %v500_v37 = vsel %vm6465_vm0, %v6368_v54, %v496_v40  ;;  %v549_v20 = vadd.f32 %v547_v0, %v507_v14  ;;  %vm586_vm7 = vcmp.eq.f32.partialorder %v585_v16, 8.507059e+37 }
  0xfd   :  { %v4113_v27 = vmul.f32 -1.442695, %v468_v11  ;;  %v536_v36 = vadd.f32 %v6383_v1, %v535_v10  ;;  %v4406_v48 = vpop.eup %4405  ;;  %v505_v54 = vsel %vm502_vm4, %v504_v5, %v500_v37  ;;  %v588_v21 = vor.u32 1.1754944e-38, %v587_v42 }
  0xfe   :  { %v601_v60 = vadd.f32 1.0, %v4406_v48  ;;  %v4408_v63 = vpop.eup %4407  ;;  %v508_v33 = vmul.f32 %v505_v54, %v6487_v38  ;;  %v198_v14 = vlaneseq  ;;  %vm655_vm0 = vcmask 1041409  }
  0xff   :  { %4409 = vpow2.f32 %v4113_v27  ;;  %v540_v4 = vsel %vm6477_vm2, %v6383_v1, %v536_v36  ;;  %v591_v58 = vmul.f32 %v4408_v63, %v574_v39  ;;  %v589_v7 = vsel %vm586_vm7, %v588_v21, %v584_v59 }
 0x100   :  { %4411 = vtanh.f32 %v467_v23  ;;  %v545_v1 = vsel %vm542_vm5, %v544_v8, %v540_v4  ;;  %v614_v62 = vand.u32 2147483648, %v601_v60  ;;  %v612_v16 = vand.u32 2147483647, %v601_v60 }
 0x101   :  { %4413 = vrcp.f32 %v601_v60  ;;  %v6510_v29 = vadd.f32 %v591_v58, %v549_v20  ;;  %v548_v6 = vmul.f32 %v545_v1, %v213_v9  ;;  %vm608_vm9 = vweird.f32 %v601_v60 }
 0x102   :  { %v615_v28 = vor.u32 1.1754944e-38, %v614_v62  ;;  %vm613_vm11 = vcmp.eq.f32.partialorder %v612_v16, 8.507059e+37  ;;  %v6528_v37 = vand.u32 127, %v198_v14  ;;  %vm659_vm2 = vcmask 58368  }
 0x103   :  { %v550_v10 = vadd.f32 %v548_v6, %v508_v33  ;;  %vm740_vm3 = vcmp.gt.s32.totalorder %v6461_v56, 1  ;;  %v11069_v1 = vmov 0.0   ;;  %v6540_v21 = vshrl.u32 %v198_v14, 7 }
 0x104   :  { %v646_v4 = vadd.s32 1, %v6528_v37  ;;  %v4117_v59 = vsel %vm740_vm3, 1.0, %v11069_v1 }
 0x105   :  { %v4410_v13 = vpop.eup %4409  ;;  %4235 = vset.pattern.permute.xlu0 %v6540_v21  ;;  %4229 = vset.pattern.permute.xlu2 %v6540_v21 }
 0x106   :  { %v602_v17 = vadd.f32 1.0, %v4410_v13  ;;  %v4412_v49 = vpop.eup %4411 }
 0x107   :  { %v4414_v25 = vpop.eup %4413  ;;  %v592_v24 = vmul.f32 %v4412_v49, %v589_v7 }
 0x108   :  { %4415 = vrcp.f32 %v602_v17  ;;  %v604_v44 = vmul.f32 %v4414_v25, %v601_v60  ;;  %vm609_vm8 = vweird.f32 %v4414_v25  ;;  %v629_v43 = vand.u32 2147483648, %v602_v17 }
 0x109   :  { %4417 = vtanh.f32 %v6510_v29  ;;  %v6516_v15 = vadd.f32 %v592_v24, %v550_v10  ;;  %vm610_vm10 = vmor %vm608_vm9, %vm609_vm8  ;;  %v627_v3 = vand.u32 2147483647, %v602_v17  ;;  %vm623_vm13 = vweird.f32 %v602_v17 }
 0x10a   :  { %v605_v30 = vsub.f32 1.0, %v604_v44  ;;  %v630_v12 = vor.u32 1.1754944e-38, %v629_v43 }
 0x10b   :  { %4419 = vtanh.f32 %v6516_v15  ;;  %vm628_vm15 = vcmp.eq.f32.partialorder %v627_v3, 8.507059e+37 }
 0x10c   :  { %v606_v32 = vmul.f32 %v4414_v25, %v605_v30 }
 0x10e   :  { %v4416_v11 = vpop.eup %4415  ;;  %v607_v18 = vadd.f32 %v4414_v25, %v606_v32 }
 0x10f   :  { %v619_v19 = vmul.f32 %v4416_v11, %v602_v17  ;;  %v4418_v40 = vpop.eup %4417  ;;  %vm624_vm12 = vweird.f32 %v4416_v11  ;;  %v744_v17 = vrot.slane %v4117_v59, 1 }
 0x110   :  { %v611_v23 = vsel %vm610_vm10, %v4414_v25, %v607_v18  ;;  %vm625_vm14 = vmor %vm623_vm13, %vm624_vm12  ;;  %v6545_v25 = vcvt.s32.f32 %v6528_v37 }
 0x111   :  { %v620_v27 = vsub.f32 1.0, %v619_v19  ;;  %v616_v36 = vsel %vm613_vm11, %v615_v28, %v611_v23  ;;  %v4420_v60 = vpop.eup %4419  ;;  %v759_v20 = vsub.f32 1.0, %v744_v17  ;;  %v746_v19 = vperm.slane %v4117_v59, 0 }
 0x112   :  { %v6522_v48 = vmul.f32 %v4418_v40, %v616_v36  ;;  %v747_v28 = vperm.slane %v744_v17, 0 }
 0x113   :  { %v621_v50 = vmul.f32 %v4416_v11, %v620_v27  ;;  %v763_v49 = vperm.slane %v759_v20, 0 }
 0x114   :  { %v640_v55 = vmul.f32 %v4380_v26, %v6522_v48  ;;  %v4242_v23 = vpack.i.bf16 %v747_v28, %v746_v19  ;;  %v6608_v28 = vld [vmem:[%s10986_s4 + $0x258] sm:$0xff] }
 0x115   :  { %v622_v57 = vadd.f32 %v4416_v11, %v621_v50 }
 0x116   :  { %642 = vadd.xlane.f32.xlu0 %v640_v55 }
 0x117   :  { %v626_v41 = vsel %vm625_vm14, %v4416_v11, %v622_v57 }
 0x118   :  { %v631_v63 = vsel %vm628_vm15, %v630_v12, %v626_v41 }
 0x119   :  { %v6525_v2 = vmul.f32 %v4420_v60, %v631_v63  ;;  %v4661_v63 = vld [vmem:[%s10982_s0] sm:$0xff] }
 0x11b   :  { %v641_v35 = vmul.f32 %v4380_v26, %v6525_v2  ;;  %v758_v26 = vsub.f32 1.0, %v4117_v59 }
 0x11d   :  { %v762_v27 = vperm.slane %v758_v26, 0  ;;  %v6620_v26 = vld [vmem:[%s10985_s3 + $0x248] sm:$0xff] }
 0x11e   :  { %644 = vadd.xlane.f32.xlu0 %v641_v35 }
 0x16a   :  { %v6531_v5 = vpop.permute.xlu1 %648 }
 0x16b   :  { %vm650_vm1 = vcmp.lt.s32.totalorder %v646_v4, %v6531_v5 }
 0x189   :  { %v643_v0 = vpop.xlane.xlu0 %642 }
 0x18a   :  { %v653_v39 = vperm.slane %v643_v0, %v6528_v37 }
 0x191   :  { %v645_v8 = vpop.xlane.xlu0 %644 }
 0x192   :  { %v654_v42 = vperm.slane %v645_v8, %v6528_v37 }
 0x194   :  { %v656_v58 = vsel %vm655_vm0, %v654_v42, %v653_v39 }
 0x195   :  { %v658_v13 = vsel %vm650_vm1, %v656_v58, -1e+30 }
 0x196   :  { %v660_v54 = vsel %vm659_vm2, %v658_v13, -inf }
 0x197   :  { %661 = vmax.xlane.f32.xlu1 %v660_v54 }
 0x1b0   :  { %769 = vperm.xlu1 %4228, %v763_v49  }
 0x20a   :  { %v662_v33 = vpop.xlane.xlu1 %661 }
 0x20b   :  { %vm663_vm4 = vcmp.eq.f32.partialorder %v658_v13, %v662_v33 }
 0x20c   :  { %v664_v56 = vsel %vm663_vm4, %v6545_v25, 8.0 }
 0x20d   :  { %v665_v6 = vsel %vm659_vm2, %v664_v56, inf }
 0x20e   :  { %666 = vmin.xlane.f32.xlu2 %v665_v6 }
 0x281   :  { %v667_v7 = vpop.xlane.xlu2 %666 }
 0x282   :  { %vm668_vm5 = vcmp.eq.f32.partialorder %v6545_v25, %v667_v7  ;;  %vm671_vm6 = vcmp.lt.f32.partialorder %v6545_v25, %v667_v7  ;;  %vm674_vm7 = vcmp.gt.f32.partialorder %v6545_v25, %v667_v7 }
 0x283   :  { %v4114_v44 = vsel %vm668_vm5, 1.0, %v11069_v1  ;;  %v4115_v24 = vsel %vm671_vm6, 1.0, %v11069_v1  ;;  %v4116_v30 = vsel %vm674_vm7, 1.0, %v11069_v1  ;;  %v6892_v1 = vld [vmem:[%s10986_s4 + $0xc8] sm:$0xff] }
 0x284   :  { %v693_v62 = vperm.slane %v4115_v24, 0  ;;  %v711_v10 = vperm.slane %v4116_v30, 0  ;;  %739 = vst [vmem:[%s10991_s9] sm:$0x3] %v4114_v44  ;;  %v684_v32 = vperm.slane %v4114_v44, 1  ;;  %v677_v16 = vperm.slane %v4114_v44, 0 }
 0x285   :  { %v700_v40 = vperm.slane %v4115_v24, 1  ;;  %v718_v36 = vperm.slane %v4116_v30, 1  ;;  %11604 = vst [vmem:[#allocation25_spill] sm:$0xff] %v6892_v1 }
 0x286   :  { %v4236_v11 = vpack.i.bf16 %v684_v32, %v711_v10  ;;  %v4230_v18 = vpack.i.bf16 %v693_v62, %v677_v16 }
 0x287   :  { %v4248_v43 = vpack.i.bf16 %v718_v36, %v700_v40 }
 0x288   :  { %4237 = vperm.xlu0 %4235, %v4236_v11   ;;  %4231 = vperm.xlu2 %4229, %v4230_v18   ;;  %v6596_v11 = vld [vmem:[%s10985_s3 + $0x270] sm:$0xff] }
 0x290   :  { %4241 = vset.pattern.permute.xlu2 %v11067_v61  ;;  %4258 = vset.pattern.permute.xlu0 %v11067_v61  ;;  %v6886_v61 = vld [vmem:[%s10985_s3 + $0x98] sm:$0xff] }
 0x291   :  { %4243 = vperm.xlu2 %4241, %v4242_v23   ;;  %v6614_v23 = vld [vmem:[%s10986_s4 + $0x260] sm:$0xff]  ;;  %11603 = vst [vmem:[#allocation24_spill] sm:$0xff] %v6886_v61 }
 0x299   :  { %765 = vperm.xlu2 %4241, %v762_v27   ;;  %v6626_v27 = vld [vmem:[%s10985_s3 + $0x250] sm:$0xff] }
 0x2a1   :  { %4247 = vset.pattern.permute.xlu2 %v6540_v21 }
 0x2a9   :  { %4249 = vperm.xlu2 %4247, %v4248_v43  }
 0x2e2   :  { %v4232_v50 = vpop.permute.xlu2 %4231 }
 0x2e3   :  { %v4234_v3 = vunpack.i.h.bf16 %v4232_v50  ;;  %v4233_v55 = vunpack.i.l.bf16 %v4232_v50  ;;  %v6635_v50 = vld [vmem:[%s10986_s4 + $0x230] sm:$0xff] }
 0x2e5   :  { %v731_v57 = vmul.f32 %v4234_v3, %v6351_v22  ;;  %v729_v12 = vmul.f32 %v4233_v55, %v6510_v29  ;;  %v707_v35 = vmul.f32 %v4661_v63, %v4234_v3  ;;  %v691_v14 = vmul.f32 %v4233_v55, %v6522_v48  ;;  %v6641_v3 = vld [vmem:[%s10986_s4 + $0x238] sm:$0xff]  ;;  %v6647_v55 = vld [vmem:[%s10985_s3 + $0x220] sm:$0xff] }
 0x2e7   :  { %v733_v41 = vadd.f32 %v731_v57, %v729_v12  ;;  %v709_v39 = vadd.f32 %v707_v35, %v691_v14  ;;  %v6653_v57 = vld [vmem:[%s10985_s3 + $0x228] sm:$0xff]  ;;  %v6679_v35 = vld [vmem:[%s10985_s3 + $0x200] sm:$0xff] }
 0x2eb   :  { %v4244_v60 = vpop.permute.xlu2 %4243 }
 0x2ec   :  { %v4245_v13 = vunpack.i.l.bf16 %v4244_v60 }
 0x2f3   :  { %v766_v4 = vpop.permute.xlu2 %765 }
 0x2f4   :  { %v772_v59 = vmul.f32 %v4661_v63, %v766_v4  ;;  %v778_v17 = vmul.f32 %v766_v4, %v6351_v22  ;;  %v4662_v22 = vld [vmem:[%s10982_s0 + $0x8] sm:$0xff]  ;;  %v6673_v63 = vld [vmem:[%s10985_s3 + $0x1f8] sm:$0xff]  ;;  %s4088_s0 = sshll.u32 %s10990_s8, 4  ;;  %s4075_s8 = sshll.u32 %s5213_s11, 4  ;;  %s4089_s0 = int_to_ptr.hbm [resolvable:$true] %s4088_s0  ;;  %s4076_s8 = int_to_ptr.vmem [resolvable:$true] %s4075_s8 }
 0x2f5   :  { %v6694_v4 = vld [vmem:[%s10986_s4 + $0x1e8] sm:$0xff] }
 0x2f6   :  { %11575 = vst [vmem:[#allocation10_spill] sm:$0xff] %v6694_v4 }
 0x2fa   :  { %v4238_v0 = vpop.permute.xlu0 %4237 }
 0x2fb   :  { %v4239_v8 = vunpack.i.l.bf16 %v4238_v0  ;;  %v4240_v33 = vunpack.i.h.bf16 %v4238_v0  ;;  %v6688_v0 = vld [vmem:[%s10986_s4 + $0x1e0] sm:$0xff] }
 0x2fc   :  { %11574 = vst [vmem:[#allocation32_spill] sm:$0xff] %v6688_v0 }
 0x2fd   :  { %v725_v42 = vmul.f32 %v4239_v8, %v5840_v34  ;;  %v735_v58 = vmul.f32 %v4239_v8, %v212_v53  ;;  %v692_v53 = vmul.f32 %v4240_v33, %v6525_v2  ;;  %v730_v24 = vmul.f32 %v4240_v33, %v6516_v15  ;;  %v6591_v15 = vpop.permute.xlu1 %769  ;;  %v6700_v8 = vld [vmem:[%s10985_s3 + $0x1d0] sm:$0xff]  ;;  %v6770_v33 = vld [vmem:[%s10985_s3 + $0x160] sm:$0xff] }
 0x2fe   :  { %v773_v40 = vmul.f32 %v4662_v22, %v6591_v15  ;;  %11585 = vst [vmem:[#allocation15_spill] sm:$0xff] %v6770_v33 }
 0x2ff   :  { %v727_v29 = vadd.f32 %v725_v42, %v709_v39  ;;  %v737_v54 = vadd.f32 %v735_v58, %v733_v41  ;;  %v6661_v41 = vld [vmem:[%s10986_s4 + $0x208] sm:$0xff]  ;;  %v6706_v39 = vld [vmem:[%s10985_s3 + $0x1d8] sm:$0xff]  ;;  %v6722_v58 = vld [vmem:[%s10985_s3 + $0x1b0] sm:$0xff] }
 0x300   :  { %v6716_v42 = vld [vmem:[%s10985_s3 + $0x1a8] sm:$0xff]  ;;  %11577 = vst [vmem:[#allocation11_spill] sm:$0xff] %v6722_v58 }
 0x301   :  { %v756_v20 = vmul.f32 %v4245_v13, %v727_v29  ;;  %v776_v49 = vmul.f32 %v4245_v13, %v737_v54  ;;  %11576 = vst [vmem:[#allocation33_spill] sm:$0xff] %v6716_v42  ;;  %v6728_v13 = vld [vmem:[%s10986_s4 + $0x1b8] sm:$0xff]  ;;  %v6734_v29 = vld [vmem:[%s10986_s4 + $0x1c0] sm:$0xff] }
 0x302   :  { %11578 = vst [vmem:[#allocation36_spill] sm:$0xff] %v6728_v13  ;;  %v6740_v54 = vld [vmem:[%s10985_s3 + $0x180] sm:$0xff] }
 0x303   :  { %v6571_v56 = vadd.f32 %v772_v59, %v756_v20  ;;  %v6573_v48 = vadd.f32 %v778_v17, %v776_v49  ;;  %v4250_v6 = vpop.permute.xlu2 %4249  ;;  %11579 = vst [vmem:[#allocation12_spill] sm:$0xff] %v6734_v29  ;;  %v6746_v59 = vld [vmem:[%s10985_s3 + $0x188] sm:$0xff]  ;;  %v6752_v17 = vld [vmem:[%s10986_s4 + $0x190] sm:$0xff]  ;;  %v6758_v20 = vld [vmem:[%s10986_s4 + $0x198] sm:$0xff] }
 0x304   :  { %v4252_v7 = vunpack.i.h.bf16 %v4250_v6  ;;  %v4251_v44 = vunpack.i.l.bf16 %v4250_v6  ;;  %11580 = vst [vmem:[#allocation37_spill] sm:$0xff] %v6740_v54  ;;  %v6764_v49 = vld [vmem:[%s10985_s3 + $0x158] sm:$0xff]  ;;  %v6776_v6 = vld [vmem:[%s10986_s4 + $0x168] sm:$0xff] }
 0x305   :  { %v6576_v34 = vrot.slane %v6571_v56, 1  ;;  %11581 = vst [vmem:[#allocation13_spill] sm:$0xff] %v6746_v59 }
 0x306   :  { %v708_v30 = vmul.f32 %v4662_v22, %v4251_v44  ;;  %v732_v62 = vmul.f32 %v4251_v44, %v6487_v38  ;;  %v726_v10 = vmul.f32 %v4252_v7, %v5941_v31  ;;  %v736_v32 = vmul.f32 %v4252_v7, %v213_v9  ;;  %v6602_v31 = vld [vmem:[%s10985_s3 + $0x278] sm:$0xff]  ;;  %11582 = vst [vmem:[#allocation40_spill] sm:$0xff] %v6752_v17  ;;  %v6782_v7 = vld [vmem:[%s10986_s4 + $0x170] sm:$0xff]  ;;  %v6810_v22 = vld [vmem:[%s10986_s4 + $0x148] sm:$0xff] }
 0x307   :  { %814 = vmatmul.f32.vlgmr.msra.gmra.mxu2 %v6576_v34  ;;  %837 = vmatmul.f32.vlgmr.msra.gmra.mxu3 %v6576_v34  ;;  %v4246_v9 = vunpack.i.h.bf16 %v4244_v60  ;;  %v6667_v60 = vld [vmem:[%s10986_s4 + $0x210] sm:$0xff]  ;;  %11583 = vst [vmem:[#allocation14_spill] sm:$0xff] %v6758_v20 }
 0x308   :  { %v710_v16 = vadd.f32 %v708_v30, %v692_v53  ;;  %v734_v2 = vadd.f32 %v732_v62, %v730_v24  ;;  %860 = vmatmul.f32.vlgmr.msrb.gmra.mxu0 %v6576_v34  ;;  %883 = vmatmul.f32.vlgmr.msrb.gmra.mxu1 %v6576_v34  ;;  %11584 = vst [vmem:[#allocation41_spill] sm:$0xff] %v6764_v49  ;;  %v6792_v44 = vld [vmem:[%s10985_s3 + $0x130] sm:$0xff]  ;;  %v6798_v53 = vld [vmem:[%s10985_s3 + $0x138] sm:$0xff]  ;;  %v6804_v24 = vld [vmem:[%s10986_s4 + $0x140] sm:$0xff] }
 0x309   :  { %982 = vmatpush.msra.mxu2 %v6596_v11  ;;  %1005 = vmatpush.msra.mxu3 %v6602_v31  ;;  %11586 = vst [vmem:[#allocation44_spill] sm:$0xff] %v6776_v6  ;;  %v6816_v30 = vld [vmem:[%s10985_s3 + $0x108] sm:$0xff]  ;;  %v6822_v62 = vld [vmem:[%s10985_s3 + $0x110] sm:$0xff] }
 0x30a   :  { %v728_v18 = vadd.f32 %v726_v10, %v710_v16  ;;  %v738_v19 = vadd.f32 %v736_v32, %v734_v2  ;;  %1360 = vmatpush.msrb.mxu0 %v6608_v28  ;;  %1383 = vmatpush.msrb.mxu1 %v6614_v23  ;;  %11587 = vst [vmem:[#allocation16_spill] sm:$0xff] %v6782_v7  ;;  %v6828_v10 = vld [vmem:[%s10986_s4 + $0x118] sm:$0xff]  ;;  %v6834_v32 = vld [vmem:[%s10986_s4 + $0x120] sm:$0xff]  ;;  %v6846_v2 = vld [vmem:[%s10985_s3 + $0xe8] sm:$0xff] }
 0x30b   :  { %983 = vmatpush.msra.mxu2 %v6620_v26  ;;  %1006 = vmatpush.msra.mxu3 %v6626_v27  ;;  %11588 = vst [vmem:[#allocation45_spill] sm:$0xff] %v6792_v44  ;;  %v6840_v16 = vld [vmem:[%s10985_s3 + $0xe0] sm:$0xff] }
 0x30c   :  { %v757_v36 = vmul.f32 %v4246_v9, %v728_v18  ;;  %v6630_v43 = vmul.f32 %v4246_v9, %v738_v19  ;;  %1361 = vmatpush.msrb.mxu0 %v6635_v50  ;;  %1384 = vmatpush.msrb.mxu1 %v6641_v3  ;;  %11589 = vst [vmem:[#allocation17_spill] sm:$0xff] %v6798_v53  ;;  %v6852_v9 = vld [vmem:[%s10986_s4 + $0xf0] sm:$0xff]  ;;  %v6858_v18 = vld [vmem:[%s10986_s4 + $0xf8] sm:$0xff] }
 0x30d   :  { %984 = vmatpush.msra.mxu2 %v6647_v55  ;;  %1007 = vmatpush.msra.mxu3 %v6653_v57  ;;  %11590 = vst [vmem:[#allocation48_spill] sm:$0xff] %v6804_v24  ;;  %v6864_v19 = vld [vmem:[%s10985_s3 + $0xb8] sm:$0xff] }
 0x30e   :  { %v6656_v12 = vadd.f32 %v773_v40, %v757_v36  ;;  %1362 = vmatpush.msrb.mxu0 %v6661_v41  ;;  %1385 = vmatpush.msrb.mxu1 %v6667_v60  ;;  %11591 = vst [vmem:[#allocation18_spill] sm:$0xff] %v6810_v22  ;;  %v6870_v40 = vld [vmem:[%s10985_s3 + $0xc0] sm:$0xff]  ;;  %v6880_v36 = vld [vmem:[%s10985_s3 + $0x90] sm:$0xff] }
 0x30f   :  { %985 = vmatpush.msra.mxu2 %v6673_v63  ;;  %1008 = vmatpush.msra.mxu3 %v6679_v35  ;;  %11592 = vst [vmem:[#allocation49_spill] sm:$0xff] %v6816_v30 }
 0x310   :  { %v6683_v14 = vrot.slane %v6656_v12, 1  ;;  %1363 = vmatpush.msrb.mxu0 %v6688_v0  ;;  %1386 = vmatpush.msrb.mxu1 %v6694_v4  ;;  %11593 = vst [vmem:[#allocation19_spill] sm:$0xff] %v6822_v62 }
 0x311   :  { %986 = vmatpush.msra.mxu2 %v6700_v8  ;;  %1009 = vmatpush.msra.mxu3 %v6706_v39  ;;  %11594 = vst [vmem:[#allocation52_spill] sm:$0xff] %v6828_v10 }
 0x312   :  { %817 = vmatmul.f32.gmra.mxu2 %v6683_v14  ;;  %840 = vmatmul.f32.gmra.mxu3 %v6683_v14  ;;  %11595 = vst [vmem:[#allocation20_spill] sm:$0xff] %v6834_v32 }
 0x313   :  { %863 = vmatmul.f32.gmra.mxu0 %v6683_v14  ;;  %886 = vmatmul.f32.gmra.mxu1 %v6683_v14  ;;  %11596 = vst [vmem:[#allocation53_spill] sm:$0xff] %v6840_v16 }
 0x314   :  { %987 = vmatpush.msra.mxu2 %v6716_v42  ;;  %1010 = vmatpush.msra.mxu3 %v6722_v58  ;;  %11597 = vst [vmem:[#allocation21_spill] sm:$0xff] %v6846_v2 }
 0x315   :  { %1364 = vmatpush.msrb.mxu0 %v6728_v13  ;;  %1387 = vmatpush.msrb.mxu1 %v6734_v29  ;;  %11598 = vst [vmem:[#allocation56_spill] sm:$0xff] %v6852_v9  ;;  %v11732_v29 = vrot.slane %v6573_v48, 1 }
 0x316   :  { %988 = vmatpush.msra.mxu2 %v6740_v54  ;;  %1011 = vmatpush.msra.mxu3 %v6746_v59  ;;  %11599 = vst [vmem:[#allocation22_spill] sm:$0xff] %v6858_v18 }
 0x317   :  { %1365 = vmatpush.msrb.mxu0 %v6752_v17  ;;  %1388 = vmatpush.msrb.mxu1 %v6758_v20  ;;  %11600 = vst [vmem:[#allocation57_spill] sm:$0xff] %v6864_v19 }
 0x318   :  { %989 = vmatpush.msra.mxu2 %v6764_v49  ;;  %1012 = vmatpush.msra.mxu3 %v6770_v33  ;;  %11601 = vst [vmem:[#allocation23_spill] sm:$0xff] %v6870_v40 }
 0x319   :  { %1366 = vmatpush.msrb.mxu0 %v6776_v6  ;;  %1389 = vmatpush.msrb.mxu1 %v6782_v7  ;;  %11602 = vst [vmem:[#allocation60_spill] sm:$0xff] %v6880_v36 }
 0x31a   :  { %906 = vmatmul.f32.vlgmr.msrb.gmra.mxu2 %v6576_v34  ;;  %929 = vmatmul.f32.vlgmr.msrb.gmra.mxu3 %v6571_v56 }
 0x31b   :  { %952 = vmatmul.f32.vlgmr.msra.gmra.mxu0 %v6571_v56  ;;  %975 = vmatmul.f32.vlgmr.msra.gmra.mxu1 %v6571_v56 }
 0x31c   :  { %990 = vmatpush.msra.mxu2 %v6792_v44  ;;  %1013 = vmatpush.msra.mxu3 %v6798_v53 }
 0x31d   :  { %1367 = vmatpush.msrb.mxu0 %v6804_v24  ;;  %1390 = vmatpush.msrb.mxu1 %v6810_v22 }
 0x31e   :  { %991 = vmatpush.msra.mxu2 %v6816_v30  ;;  %1014 = vmatpush.msra.mxu3 %v6822_v62 }
 0x31f   :  { %1368 = vmatpush.msrb.mxu0 %v6828_v10  ;;  %1391 = vmatpush.msrb.mxu1 %v6834_v32 }
 0x320   :  { %992 = vmatpush.msra.mxu2 %v6840_v16  ;;  %1015 = vmatpush.msra.mxu3 %v6846_v2 }
 0x321   :  { %1369 = vmatpush.msrb.mxu0 %v6852_v9  ;;  %1392 = vmatpush.msrb.mxu1 %v6858_v18  ;;  %v6898_v18 = vld [vmem:[%s10986_s4 + $0xd0] sm:$0xff]  ;;  %v6904_v9 = vld [vmem:[%s10985_s3 + $0x68] sm:$0xff] }
 0x322   :  { %993 = vmatpush.msra.mxu2 %v6864_v19  ;;  %1016 = vmatpush.msra.mxu3 %v6870_v40  ;;  %11605 = vst [vmem:[#allocation26_spill] sm:$0xff] %v6898_v18 }
 0x323   :  { %909 = vmatmul.f32.gmra.mxu2 %v6683_v14  ;;  %932 = vmatmul.f32.gmra.mxu3 %v6656_v12  ;;  %11606 = vst [vmem:[#allocation61_spill] sm:$0xff] %v6904_v9 }
 0x324   :  { %955 = vmatmul.f32.gmra.mxu0 %v6656_v12  ;;  %978 = vmatmul.f32.gmra.mxu1 %v6656_v12 }
 0x325   :  { %994 = vmatpush.msra.mxu2 %v6880_v36  ;;  %1017 = vmatpush.msra.mxu3 %v6886_v61  ;;  %v6910_v61 = vld [vmem:[%s10985_s3 + $0x70] sm:$0xff] }
 0x326   :  { %1370 = vmatpush.msrb.mxu0 %v6892_v1  ;;  %1393 = vmatpush.msrb.mxu1 %v6898_v18  ;;  %11607 = vst [vmem:[#allocation27_spill] sm:$0xff] %v6910_v61  ;;  %v6916_v1 = vld [vmem:[%s10986_s4 + $0xa0] sm:$0xff]  ;;  %v6922_v18 = vld [vmem:[%s10986_s4 + $0xa8] sm:$0xff] }
 0x327   :  { %995 = vmatpush.msra.mxu2 %v6904_v9  ;;  %1018 = vmatpush.msra.mxu3 %v6910_v61  ;;  %11608 = vst [vmem:[#allocation64_spill] sm:$0xff] %v6916_v1  ;;  %v6928_v9 = vld [vmem:[%s10985_s3 + $0x40] sm:$0xff]  ;;  %v6934_v61 = vld [vmem:[%s10985_s3 + $0x48] sm:$0xff] }
 0x328   :  { %1371 = vmatpush.msrb.mxu0 %v6916_v1  ;;  %11609 = vst [vmem:[#allocation28_spill] sm:$0xff] %v6922_v18  ;;  %1394 = vmatpush.msrb.mxu1 %v6922_v18  ;;  %v6940_v1 = vld [vmem:[%s10986_s4 + $0x78] sm:$0xff]  ;;  %v6946_v18 = vld [vmem:[%s10986_s4 + $0x80] sm:$0xff] }
 0x329   :  { %11610 = vst [vmem:[#allocation65_spill] sm:$0xff] %v6928_v9  ;;  %996 = vmatpush.msra.mxu2 %v6928_v9  ;;  %1019 = vmatpush.msra.mxu3 %v6934_v61  ;;  %v6952_v9 = vld [vmem:[%s10985_s3 + $0x18] sm:$0xff] }
 0x32a   :  { %11611 = vst [vmem:[#allocation30_spill] sm:$0xff] %v6934_v61  ;;  %1372 = vmatpush.msrb.mxu0 %v6940_v1  ;;  %1395 = vmatpush.msrb.mxu1 %v6946_v18  ;;  %v6958_v61 = vld [vmem:[%s10985_s3 + $0x20] sm:$0xff] }
 0x32b   :  { %11612 = vst [vmem:[#allocation68_spill] sm:$0xff] %v6940_v1  ;;  %997 = vmatpush.msra.mxu2 %v6952_v9  ;;  %1020 = vmatpush.msra.mxu3 %v6958_v61  ;;  %v6972_v1 = vld [vmem:[%s10986_s4 + $0x270] sm:$0xff] }
 0x32c   :  { %11613 = vst [vmem:[#allocation31_spill] sm:$0xff] %v6946_v18  ;;  %998 = vmatmul.f32.vlgmr.msra.gmra.mxu2 %v6571_v56  ;;  %1021 = vmatmul.f32.vlgmr.msra.gmra.mxu3 %v6571_v56  ;;  %v6966_v18 = vld [vmem:[%s10986_s4 + $0x268] sm:$0xff] }
 0x32d   :  { %11614 = vst [vmem:[#allocation69_spill] sm:$0xff] %v6952_v9  ;;  %1406 = vmatpush.msrb.mxu2 %v6966_v18  ;;  %1429 = vmatpush.msrb.mxu3 %v6972_v1  ;;  %v6984_v9 = vld [vmem:[%s10986_s4 + $0x58] sm:$0xff] }
 0x32e   :  { %11615 = vst [vmem:[#allocation34_spill] sm:$0xff] %v6958_v61  ;;  %v6978_v61 = vld [vmem:[%s10986_s4 + $0x50] sm:$0xff]  ;;  %1396 = vmatpush.msrb.mxu1 %v6984_v9 }
 0x32f   :  { %11616 = vst [vmem:[#allocation72_spill] sm:$0xff] %v6966_v18  ;;  %1373 = vmatpush.msrb.mxu0 %v6978_v61  ;;  %v6990_v18 = vld [vmem:[%s10986_s4 + $0x240] sm:$0xff] }
 0x330   :  { %11617 = vst [vmem:[#allocation35_spill] sm:$0xff] %v6972_v1  ;;  %1407 = vmatpush.msrb.mxu2 %v6990_v18  ;;  %v6996_v1 = vld [vmem:[%s10986_s4 + $0x248] sm:$0xff] }
 0x331   :  { %11618 = vst [vmem:[#allocation73_spill] sm:$0xff] %v6978_v61  ;;  %1430 = vmatpush.msrb.mxu3 %v6996_v1  ;;  %v7002_v61 = vld [vmem:[%s10986_s4 + $0x28] sm:$0xff] }
 0x332   :  { %11619 = vst [vmem:[#allocation38_spill] sm:$0xff] %v6984_v9  ;;  %1374 = vmatpush.msrb.mxu0 %v7002_v61  ;;  %v7008_v9 = vld [vmem:[%s10986_s4 + $0x30] sm:$0xff] }
 0x333   :  { %11620 = vst [vmem:[#allocation39_spill] sm:$0xff] %v6990_v18  ;;  %1397 = vmatpush.msrb.mxu1 %v7008_v9  ;;  %v7014_v18 = vld [vmem:[%s10986_s4 + $0x218] sm:$0xff] }
 0x334   :  { %11621 = vst [vmem:[#allocation76_spill] sm:$0xff] %v6996_v1  ;;  %1408 = vmatpush.msrb.mxu2 %v7014_v18  ;;  %v7020_v1 = vld [vmem:[%s10986_s4 + $0x220] sm:$0xff]  ;;  %1024 = vmatmul.f32.gmra.mxu3 %v6656_v12 }
 0x335   :  { %11622 = vst [vmem:[#allocation42_spill] sm:$0xff] %v7002_v61  ;;  %1431 = vmatpush.msrb.mxu3 %v7020_v1  ;;  %v7026_v61 = vld [vmem:[%s10986_s4] sm:$0xff]  ;;  %1001 = vmatmul.f32.gmra.mxu2 %v6656_v12 }
 0x336   :  { %11623 = vst [vmem:[#allocation80_spill] sm:$0xff] %v7008_v9  ;;  %1375 = vmatpush.msrb.mxu0 %v7026_v61  ;;  %v7032_v9 = vld [vmem:[%s10986_s4 + $0x8] sm:$0xff] }
 0x337   :  { %11624 = vst [vmem:[#allocation43_spill] sm:$0xff] %v7014_v18  ;;  %1398 = vmatpush.msrb.mxu1 %v7032_v9  ;;  %v7038_v18 = vld [vmem:[%s10986_s4 + $0x1f0] sm:$0xff] }
 0x338   :  { %11625 = vst [vmem:[#allocation79_spill] sm:$0xff] %v7020_v1  ;;  %1409 = vmatpush.msrb.mxu2 %v7038_v18  ;;  %v7044_v1 = vld [vmem:[%s10986_s4 + $0x1f8] sm:$0xff] }
 0x339   :  { %11626 = vst [vmem:[#allocation46_spill] sm:$0xff] %v7026_v61  ;;  %1432 = vmatpush.msrb.mxu3 %v7044_v1  ;;  %v7058_v61 = vld [vmem:[%s10986_s4 + $0x1d0] sm:$0xff] }
 0x33a   :  { %11627 = vst [vmem:[#allocation47_spill] sm:$0xff] %v7032_v9  ;;  %v7052_v9 = vld [vmem:[%s10986_s4 + $0x1c8] sm:$0xff] }
 0x33b   :  { %11628 = vst [vmem:[#allocation50_spill] sm:$0xff] %v7038_v18  ;;  %1410 = vmatpush.msrb.mxu2 %v7052_v9  ;;  %1433 = vmatpush.msrb.mxu3 %v7058_v61  ;;  %v7070_v18 = vld [vmem:[%s10985_s3 + $0x258] sm:$0xff] }
 0x33c   :  { %11629 = vst [vmem:[#allocation51_spill] sm:$0xff] %v7044_v1  ;;  %v7064_v1 = vld [vmem:[%s10986_s4 + $0x278] sm:$0xff]  ;;  %1475 = vmatpush.msra.mxu1 %v7070_v18 }
 0x33d   :  { %11630 = vst [vmem:[#allocation54_spill] sm:$0xff] %v7052_v9  ;;  %1452 = vmatpush.msra.mxu0 %v7064_v1  ;;  %v7076_v9 = vld [vmem:[%s10986_s4 + $0x1a0] sm:$0xff] }
 0x33e   :  { %11631 = vst [vmem:[#allocation55_spill] sm:$0xff] %v7058_v61  ;;  %1411 = vmatpush.msrb.mxu2 %v7076_v9  ;;  %v7082_v61 = vld [vmem:[%s10986_s4 + $0x1a8] sm:$0xff] }
 0x33f   :  { %11632 = vst [vmem:[#allocation58_spill] sm:$0xff] %v7064_v1  ;;  %1434 = vmatpush.msrb.mxu3 %v7082_v61  ;;  %v7088_v1 = vld [vmem:[%s10986_s4 + $0x250] sm:$0xff] }
 0x340   :  { %11633 = vst [vmem:[#allocation59_spill] sm:$0xff] %v7070_v18  ;;  %1453 = vmatpush.msra.mxu0 %v7088_v1  ;;  %v7094_v18 = vld [vmem:[%s10985_s3 + $0x230] sm:$0xff] }
 0x341   :  { %11634 = vst [vmem:[#allocation62_spill] sm:$0xff] %v7076_v9  ;;  %1476 = vmatpush.msra.mxu1 %v7094_v18  ;;  %v7100_v9 = vld [vmem:[%s10986_s4 + $0x178] sm:$0xff] }
 0x342   :  { %11635 = vst [vmem:[#allocation63_spill] sm:$0xff] %v7082_v61  ;;  %1412 = vmatpush.msrb.mxu2 %v7100_v9  ;;  %v7106_v61 = vld [vmem:[%s10986_s4 + $0x180] sm:$0xff] }
 0x343   :  { %11636 = vst [vmem:[#allocation66_spill] sm:$0xff] %v7088_v1  ;;  %1435 = vmatpush.msrb.mxu3 %v7106_v61  ;;  %v7112_v1 = vld [vmem:[%s10986_s4 + $0x228] sm:$0xff] }
 0x344   :  { %11637 = vst [vmem:[#allocation67_spill] sm:$0xff] %v7094_v18  ;;  %1454 = vmatpush.msra.mxu0 %v7112_v1  ;;  %v7118_v18 = vld [vmem:[%s10985_s3 + $0x208] sm:$0xff] }
 0x345   :  { %11638 = vst [vmem:[#allocation70_spill] sm:$0xff] %v7100_v9  ;;  %1477 = vmatpush.msra.mxu1 %v7118_v18  ;;  %v7124_v9 = vld [vmem:[%s10986_s4 + $0x150] sm:$0xff] }
 0x346   :  { %11639 = vst [vmem:[#allocation71_spill] sm:$0xff] %v7106_v61  ;;  %1413 = vmatpush.msrb.mxu2 %v7124_v9  ;;  %v7130_v61 = vld [vmem:[%s10986_s4 + $0x158] sm:$0xff] }
 0x347   :  { %11640 = vst [vmem:[#allocation74_spill] sm:$0xff] %v7112_v1  ;;  %1436 = vmatpush.msrb.mxu3 %v7130_v61  ;;  %v7136_v1 = vld [vmem:[%s10986_s4 + $0x200] sm:$0xff] }
 0x348   :  { %11641 = vst [vmem:[#allocation75_spill] sm:$0xff] %v7118_v18  ;;  %1455 = vmatpush.msra.mxu0 %v7136_v1  ;;  %v7142_v18 = vld [vmem:[%s10985_s3 + $0x1e0] sm:$0xff] }
 0x349   :  { %11642 = vst [vmem:[#allocation77_spill] sm:$0xff] %v7124_v9  ;;  %1478 = vmatpush.msra.mxu1 %v7142_v18  ;;  %v7148_v9 = vld [vmem:[%s10986_s4 + $0x128] sm:$0xff] }
 0x34a   :  { %11643 = vst [vmem:[#allocation78_spill] sm:$0xff] %v7130_v61  ;;  %1414 = vmatpush.msrb.mxu2 %v7148_v9  ;;  %v7154_v61 = vld [vmem:[%s10986_s4 + $0x130] sm:$0xff] }
 0x34b   :  { %11644 = vst [vmem:[#allocation81_spill] sm:$0xff] %v7136_v1  ;;  %1437 = vmatpush.msrb.mxu3 %v7154_v61  ;;  %v7160_v1 = vld [vmem:[%s10986_s4 + $0x1d8] sm:$0xff] }
 0x34c   :  { %11645 = vst [vmem:[#allocation82_spill] sm:$0xff] %v7142_v18  ;;  %1456 = vmatpush.msra.mxu0 %v7160_v1  ;;  %v7166_v18 = vld [vmem:[%s10985_s3 + $0x1b8] sm:$0xff] }
 0x34d   :  { %11646 = vst [vmem:[#allocation83_spill] sm:$0xff] %v7148_v9  ;;  %1479 = vmatpush.msra.mxu1 %v7166_v18  ;;  %v7172_v9 = vld [vmem:[%s10986_s4 + $0x100] sm:$0xff] }
 0x34e   :  { %11647 = vst [vmem:[#allocation84_spill] sm:$0xff] %v7154_v61  ;;  %1415 = vmatpush.msrb.mxu2 %v7172_v9  ;;  %v7178_v61 = vld [vmem:[%s10986_s4 + $0x108] sm:$0xff] }
 0x34f   :  { %11648 = vst [vmem:[#allocation85_spill] sm:$0xff] %v7160_v1  ;;  %1438 = vmatpush.msrb.mxu3 %v7178_v61  ;;  %v7184_v1 = vld [vmem:[%s10986_s4 + $0x1b0] sm:$0xff] }
 0x350   :  { %11649 = vst [vmem:[#allocation86_spill] sm:$0xff] %v7166_v18  ;;  %1457 = vmatpush.msra.mxu0 %v7184_v1  ;;  %v7190_v18 = vld [vmem:[%s10985_s3 + $0x190] sm:$0xff] }
 0x351   :  { %11650 = vst [vmem:[#allocation87_spill] sm:$0xff] %v7172_v9  ;;  %1480 = vmatpush.msra.mxu1 %v7190_v18  ;;  %v7196_v9 = vld [vmem:[%s10986_s4 + $0xd8] sm:$0xff] }
 0x352   :  { %11651 = vst [vmem:[#allocation88_spill] sm:$0xff] %v7178_v61  ;;  %1416 = vmatpush.msrb.mxu2 %v7196_v9  ;;  %v7202_v61 = vld [vmem:[%s10986_s4 + $0xe0] sm:$0xff] }
 0x353   :  { %11652 = vst [vmem:[#allocation89_spill] sm:$0xff] %v7184_v1  ;;  %1439 = vmatpush.msrb.mxu3 %v7202_v61  ;;  %v7208_v1 = vld [vmem:[%s10986_s4 + $0x188] sm:$0xff] }
 0x354   :  { %11653 = vst [vmem:[#allocation90_spill] sm:$0xff] %v7190_v18  ;;  %1458 = vmatpush.msra.mxu0 %v7208_v1  ;;  %v7214_v18 = vld [vmem:[%s10985_s3 + $0x168] sm:$0xff] }
 0x355   :  { %11654 = vst [vmem:[#allocation91_spill] sm:$0xff] %v7196_v9  ;;  %1481 = vmatpush.msra.mxu1 %v7214_v18  ;;  %v7220_v9 = vld [vmem:[%s10986_s4 + $0xb0] sm:$0xff] }
 0x356   :  { %11655 = vst [vmem:[#allocation92_spill] sm:$0xff] %v7202_v61  ;;  %1417 = vmatpush.msrb.mxu2 %v7220_v9  ;;  %v7226_v61 = vld [vmem:[%s10986_s4 + $0xb8] sm:$0xff] }
 0x357   :  { %11656 = vst [vmem:[#allocation93_spill] sm:$0xff] %v7208_v1  ;;  %1440 = vmatpush.msrb.mxu3 %v7226_v61  ;;  %v7232_v1 = vld [vmem:[%s10986_s4 + $0x160] sm:$0xff] }
 0x358   :  { %11657 = vst [vmem:[#allocation94_spill] sm:$0xff] %v7214_v18  ;;  %1459 = vmatpush.msra.mxu0 %v7232_v1  ;;  %v7238_v18 = vld [vmem:[%s10985_s3 + $0x140] sm:$0xff] }
 0x359   :  { %11658 = vst [vmem:[#allocation95_spill] sm:$0xff] %v7220_v9  ;;  %1482 = vmatpush.msra.mxu1 %v7238_v18  ;;  %v7244_v9 = vld [vmem:[%s10986_s4 + $0x88] sm:$0xff] }
 0x35a   :  { %11659 = vst [vmem:[#allocation96_spill] sm:$0xff] %v7226_v61  ;;  %1418 = vmatpush.msrb.mxu2 %v7244_v9  ;;  %v7250_v61 = vld [vmem:[%s10986_s4 + $0x90] sm:$0xff] }
 0x35b   :  { %11660 = vst [vmem:[#allocation97_spill] sm:$0xff] %v7232_v1  ;;  %1441 = vmatpush.msrb.mxu3 %v7250_v61  ;;  %v7256_v1 = vld [vmem:[%s10986_s4 + $0x138] sm:$0xff] }
 0x35c   :  { %11661 = vst [vmem:[#allocation98_spill] sm:$0xff] %v7238_v18  ;;  %1460 = vmatpush.msra.mxu0 %v7256_v1  ;;  %v7262_v18 = vld [vmem:[%s10985_s3 + $0x118] sm:$0xff] }
 0x35d   :  { %11662 = vst [vmem:[#allocation99_spill] sm:$0xff] %v7244_v9  ;;  %1483 = vmatpush.msra.mxu1 %v7262_v18  ;;  %v7268_v9 = vld [vmem:[%s10986_s4 + $0x60] sm:$0xff] }
 0x35e   :  { %11663 = vst [vmem:[#allocation100_spill] sm:$0xff] %v7250_v61  ;;  %1419 = vmatpush.msrb.mxu2 %v7268_v9  ;;  %v7274_v61 = vld [vmem:[%s10986_s4 + $0x68] sm:$0xff] }
 0x35f   :  { %11664 = vst [vmem:[#allocation101_spill] sm:$0xff] %v7256_v1  ;;  %1442 = vmatpush.msrb.mxu3 %v7274_v61  ;;  %v7280_v1 = vld [vmem:[%s10986_s4 + $0x110] sm:$0xff] }
 0x360   :  { %11665 = vst [vmem:[#allocation102_spill] sm:$0xff] %v7262_v18  ;;  %1461 = vmatpush.msra.mxu0 %v7280_v1  ;;  %v7286_v18 = vld [vmem:[%s10985_s3 + $0xf0] sm:$0xff] }
 0x361   :  { %11666 = vst [vmem:[#allocation103_spill] sm:$0xff] %v7268_v9  ;;  %1484 = vmatpush.msra.mxu1 %v7286_v18  ;;  %v7292_v9 = vld [vmem:[%s10986_s4 + $0x38] sm:$0xff] }
 0x362   :  { %11667 = vst [vmem:[#allocation104_spill] sm:$0xff] %v7274_v61  ;;  %1420 = vmatpush.msrb.mxu2 %v7292_v9  ;;  %v7298_v61 = vld [vmem:[%s10986_s4 + $0x40] sm:$0xff] }
 0x363   :  { %11668 = vst [vmem:[#allocation105_spill] sm:$0xff] %v7280_v1  ;;  %1443 = vmatpush.msrb.mxu3 %v7298_v61  ;;  %v7304_v1 = vld [vmem:[%s10986_s4 + $0xe8] sm:$0xff] }
 0x364   :  { %11669 = vst [vmem:[#allocation106_spill] sm:$0xff] %v7286_v18  ;;  %1462 = vmatpush.msra.mxu0 %v7304_v1  ;;  %v7310_v18 = vld [vmem:[%s10985_s3 + $0xc8] sm:$0xff] }
 0x365   :  { %11670 = vst [vmem:[#allocation107_spill] sm:$0xff] %v7292_v9  ;;  %1485 = vmatpush.msra.mxu1 %v7310_v18  ;;  %v7316_v9 = vld [vmem:[%s10986_s4 + $0x10] sm:$0xff] }
 0x366   :  { %11671 = vst [vmem:[#allocation108_spill] sm:$0xff] %v7298_v61  ;;  %1421 = vmatpush.msrb.mxu2 %v7316_v9  ;;  %v7322_v61 = vld [vmem:[%s10986_s4 + $0x18] sm:$0xff] }
 0x367   :  { %11672 = vst [vmem:[#allocation109_spill] sm:$0xff] %v7304_v1  ;;  %1444 = vmatpush.msrb.mxu3 %v7322_v61  ;;  %v7328_v1 = vld [vmem:[%s10985_s3 + $0x260] sm:$0xff] }
 0x368   :  { %11673 = vst [vmem:[#allocation110_spill] sm:$0xff] %v7310_v18  ;;  %1498 = vmatpush.msra.mxu2 %v7328_v1  ;;  %v7334_v18 = vld [vmem:[%s10985_s3 + $0x268] sm:$0xff] }
 0x369   :  { %11674 = vst [vmem:[#allocation111_spill] sm:$0xff] %v7316_v9  ;;  %1521 = vmatpush.msra.mxu3 %v7334_v18  ;;  %v7340_v9 = vld [vmem:[%s10986_s4 + $0xc0] sm:$0xff] }
 0x36a   :  { %11675 = vst [vmem:[#allocation112_spill] sm:$0xff] %v7322_v61  ;;  %1463 = vmatpush.msra.mxu0 %v7340_v9  ;;  %v7346_v61 = vld [vmem:[%s10985_s3 + $0xa0] sm:$0xff] }
 0x36b   :  { %11676 = vst [vmem:[#allocation113_spill] sm:$0xff] %v7328_v1  ;;  %1486 = vmatpush.msra.mxu1 %v7346_v61  ;;  %v7352_v1 = vld [vmem:[%s10985_s3 + $0x238] sm:$0xff] }
 0x36c   :  { %11677 = vst [vmem:[#allocation114_spill] sm:$0xff] %v7334_v18  ;;  %1499 = vmatpush.msra.mxu2 %v7352_v1  ;;  %v7358_v18 = vld [vmem:[%s10985_s3 + $0x240] sm:$0xff] }
 0x36d   :  { %11678 = vst [vmem:[#allocation115_spill] sm:$0xff] %v7340_v9  ;;  %1522 = vmatpush.msra.mxu3 %v7358_v18  ;;  %v7364_v9 = vld [vmem:[%s10986_s4 + $0x98] sm:$0xff] }
 0x36e   :  { %11679 = vst [vmem:[#allocation116_spill] sm:$0xff] %v7346_v61  ;;  %1464 = vmatpush.msra.mxu0 %v7364_v9  ;;  %v7370_v61 = vld [vmem:[%s10985_s3 + $0x78] sm:$0xff] }
 0x36f   :  { %11680 = vst [vmem:[#allocation117_spill] sm:$0xff] %v7352_v1  ;;  %1487 = vmatpush.msra.mxu1 %v7370_v61  ;;  %v7376_v1 = vld [vmem:[%s10985_s3 + $0x210] sm:$0xff] }
 0x370   :  { %11681 = vst [vmem:[#allocation118_spill] sm:$0xff] %v7358_v18  ;;  %1500 = vmatpush.msra.mxu2 %v7376_v1  ;;  %v7382_v18 = vld [vmem:[%s10985_s3 + $0x218] sm:$0xff] }
 0x371   :  { %11682 = vst [vmem:[#allocation119_spill] sm:$0xff] %v7364_v9  ;;  %1523 = vmatpush.msra.mxu3 %v7382_v18  ;;  %v7388_v9 = vld [vmem:[%s10986_s4 + $0x70] sm:$0xff] }
 0x372   :  { %11683 = vst [vmem:[#allocation120_spill] sm:$0xff] %v7370_v61  ;;  %1465 = vmatpush.msra.mxu0 %v7388_v9  ;;  %v7394_v61 = vld [vmem:[%s10985_s3 + $0x50] sm:$0xff] }
 0x373   :  { %11684 = vst [vmem:[#allocation121_spill] sm:$0xff] %v7376_v1  ;;  %1488 = vmatpush.msra.mxu1 %v7394_v61  ;;  %v7400_v1 = vld [vmem:[%s10985_s3 + $0x1e8] sm:$0xff] }
 0x374   :  { %11685 = vst [vmem:[#allocation122_spill] sm:$0xff] %v7382_v18  ;;  %1501 = vmatpush.msra.mxu2 %v7400_v1  ;;  %v7406_v18 = vld [vmem:[%s10985_s3 + $0x1f0] sm:$0xff] }
 0x375   :  { %11686 = vst [vmem:[#allocation123_spill] sm:$0xff] %v7388_v9  ;;  %1524 = vmatpush.msra.mxu3 %v7406_v18  ;;  %v7412_v9 = vld [vmem:[%s10986_s4 + $0x48] sm:$0xff] }
 0x376   :  { %11687 = vst [vmem:[#allocation124_spill] sm:$0xff] %v7394_v61  ;;  %1466 = vmatpush.msra.mxu0 %v7412_v9  ;;  %v7418_v61 = vld [vmem:[%s10985_s3 + $0x28] sm:$0xff] }
 0x377   :  { %11688 = vst [vmem:[#allocation125_spill] sm:$0xff] %v7400_v1  ;;  %1489 = vmatpush.msra.mxu1 %v7418_v61  ;;  %v7424_v1 = vld [vmem:[%s10985_s3 + $0x1c0] sm:$0xff] }
 0x378   :  { %11689 = vst [vmem:[#allocation126_spill] sm:$0xff] %v7406_v18  ;;  %1502 = vmatpush.msra.mxu2 %v7424_v1  ;;  %v7430_v18 = vld [vmem:[%s10985_s3 + $0x1c8] sm:$0xff] }
 0x379   :  { %11690 = vst [vmem:[#allocation127_spill] sm:$0xff] %v7412_v9  ;;  %1525 = vmatpush.msra.mxu3 %v7430_v18  ;;  %v7436_v9 = vld [vmem:[%s10986_s4 + $0x20] sm:$0xff] }
 0x37a   :  { %11691 = vst [vmem:[#allocation128_spill] sm:$0xff] %v7418_v61  ;;  %1467 = vmatpush.msra.mxu0 %v7436_v9  ;;  %v7442_v61 = vld [vmem:[%s10985_s3] sm:$0xff] }
 0x37b   :  { %11692 = vst [vmem:[#allocation129_spill] sm:$0xff] %v7424_v1  ;;  %1490 = vmatpush.msra.mxu1 %v7442_v61  ;;  %v7448_v1 = vld [vmem:[%s10985_s3 + $0x198] sm:$0xff] }
 0x37c   :  { %11693 = vst [vmem:[#allocation130_spill] sm:$0xff] %v7430_v18  ;;  %1503 = vmatpush.msra.mxu2 %v7448_v1  ;;  %v7454_v18 = vld [vmem:[%s10985_s3 + $0x1a0] sm:$0xff] }
 0x37d   :  { %11694 = vst [vmem:[#allocation131_spill] sm:$0xff] %v7436_v9  ;;  %1526 = vmatpush.msra.mxu3 %v7454_v18  ;;  %v7460_v9 = vld [vmem:[%s10985_s3 + $0x170] sm:$0xff] }
 0x37e   :  { %11695 = vst [vmem:[#allocation132_spill] sm:$0xff] %v7442_v61  ;;  %1504 = vmatpush.msra.mxu2 %v7460_v9  ;;  %v7466_v61 = vld [vmem:[%s10985_s3 + $0x178] sm:$0xff] }
 0x37f   :  { %11696 = vst [vmem:[#allocation133_spill] sm:$0xff] %v7448_v1  ;;  %1527 = vmatpush.msra.mxu3 %v7466_v61  ;;  %v7472_v1 = vld [vmem:[%s10985_s3 + $0x148] sm:$0xff] }
 0x380   :  { %11697 = vst [vmem:[#allocation134_spill] sm:$0xff] %v7454_v18  ;;  %1505 = vmatpush.msra.mxu2 %v7472_v1  ;;  %v7478_v18 = vld [vmem:[%s10985_s3 + $0x150] sm:$0xff] }
 0x381   :  { %11698 = vst [vmem:[#allocation135_spill] sm:$0xff] %v7460_v9  ;;  %1528 = vmatpush.msra.mxu3 %v7478_v18  ;;  %v7484_v9 = vld [vmem:[%s10985_s3 + $0x120] sm:$0xff] }
 0x382   :  { %11699 = vst [vmem:[#allocation136_spill] sm:$0xff] %v7466_v61  ;;  %1506 = vmatpush.msra.mxu2 %v7484_v9  ;;  %v7490_v61 = vld [vmem:[%s10985_s3 + $0x128] sm:$0xff] }
 0x383   :  { %11700 = vst [vmem:[#allocation137_spill] sm:$0xff] %v7472_v1  ;;  %1529 = vmatpush.msra.mxu3 %v7490_v61  ;;  %v7496_v1 = vld [vmem:[%s10985_s3 + $0xf8] sm:$0xff] }
 0x384   :  { %11701 = vst [vmem:[#allocation138_spill] sm:$0xff] %v7478_v18  ;;  %1507 = vmatpush.msra.mxu2 %v7496_v1  ;;  %v7502_v18 = vld [vmem:[%s10985_s3 + $0x100] sm:$0xff] }
 0x385   :  { %11702 = vst [vmem:[#allocation139_spill] sm:$0xff] %v7484_v9  ;;  %1530 = vmatpush.msra.mxu3 %v7502_v18  ;;  %v7508_v9 = vld [vmem:[%s10985_s3 + $0xd0] sm:$0xff]  ;;  %v7577_v36 = vpop.f32.mrf.mxu1 }
 0x386   :  { %11703 = vst [vmem:[#allocation140_spill] sm:$0xff] %v7490_v61  ;;  %1508 = vmatpush.msra.mxu2 %v7508_v9  ;;  %v7514_v61 = vld [vmem:[%s10985_s3 + $0xd8] sm:$0xff] }
 0x387   :  { %11704 = vst [vmem:[#allocation141_spill] sm:$0xff] %v7496_v1  ;;  %1531 = vmatpush.msra.mxu3 %v7514_v61  ;;  %v7520_v1 = vld [vmem:[%s10985_s3 + $0xa8] sm:$0xff] }
 0x388   :  { %11705 = vst [vmem:[#allocation142_spill] sm:$0xff] %v7502_v18  ;;  %1509 = vmatpush.msra.mxu2 %v7520_v1  ;;  %v7526_v18 = vld [vmem:[%s10985_s3 + $0xb0] sm:$0xff] }
 0x389   :  { %11706 = vst [vmem:[#allocation143_spill] sm:$0xff] %v7508_v9  ;;  %1532 = vmatpush.msra.mxu3 %v7526_v18  ;;  %v7532_v9 = vld [vmem:[%s10985_s3 + $0x80] sm:$0xff] }
 0x38a   :  { %11707 = vst [vmem:[#allocation144_spill] sm:$0xff] %v7514_v61  ;;  %1510 = vmatpush.msra.mxu2 %v7532_v9  ;;  %v7538_v61 = vld [vmem:[%s10985_s3 + $0x88] sm:$0xff]  ;;  %v815_v40 = vpop.f32.mrf.mxu2  ;;  %v838_v19 = vpop.f32.mrf.mxu3 }
 0x38b   :  { %11708 = vst [vmem:[#allocation145_spill] sm:$0xff] %v7520_v1  ;;  %1533 = vmatpush.msra.mxu3 %v7538_v61  ;;  %v7544_v1 = vld [vmem:[%s10985_s3 + $0x58] sm:$0xff] }
 0x38c   :  { %11709 = vst [vmem:[#allocation146_spill] sm:$0xff] %v7526_v18  ;;  %1511 = vmatpush.msra.mxu2 %v7544_v1  ;;  %v7550_v18 = vld [vmem:[%s10985_s3 + $0x60] sm:$0xff] }
 0x38d   :  { %11710 = vst [vmem:[#allocation147_spill] sm:$0xff] %v7532_v9  ;;  %1534 = vmatpush.msra.mxu3 %v7550_v18  ;;  %v7556_v9 = vld [vmem:[%s10985_s3 + $0x30] sm:$0xff] }
 0x38e   :  { %11711 = vst [vmem:[#allocation148_spill] sm:$0xff] %v7538_v61  ;;  %1512 = vmatpush.msra.mxu2 %v7556_v9  ;;  %v7562_v61 = vld [vmem:[%s10985_s3 + $0x38] sm:$0xff] }
 0x38f   :  { %11712 = vst [vmem:[#allocation149_spill] sm:$0xff] %v7544_v1  ;;  %1535 = vmatpush.msra.mxu3 %v7562_v61  ;;  %v7568_v1 = vld [vmem:[%s10985_s3 + $0x8] sm:$0xff] }
 0x390   :  { %11713 = vst [vmem:[#allocation150_spill] sm:$0xff] %v7550_v18  ;;  %1513 = vmatpush.msra.mxu2 %v7568_v1  ;;  %v7574_v18 = vld [vmem:[%s10985_s3 + $0x10] sm:$0xff]  ;;  %v7579_v32 = vpop.f32.mrf.mxu1 }
 0x391   :  { %11714 = vst [vmem:[#allocation151_spill] sm:$0xff] %v7556_v9  ;;  %1536 = vmatpush.msra.mxu3 %v7574_v18  ;;  %v861_v9 = vpop.f32.mrf.mxu0 }
 0x392   :  { %11715 = vst [vmem:[#allocation152_spill] sm:$0xff] %v7562_v61 }
 0x393   :  { %11716 = vst [vmem:[#allocation153_spill] sm:$0xff] %v7568_v1 }
 0x394   :  { %11717 = vst [vmem:[#allocation154_spill] sm:$0xff] %v7574_v18 }
 0x395   :  { %v818_v10 = vpop.f32.mrf.mxu2  ;;  %v841_v2 = vpop.f32.mrf.mxu3 }
 0x398   :  { %v976_v22 = vpop.f32.mrf.mxu1 }
 0x399   :  { %v864_v61 = vpop.f32.mrf.mxu0  ;;  %v977_v24 = vadd.f32 %v976_v22, %v861_v9 }
 0x39b   :  { %v1030_v30 = vadd.f32 %v977_v24, %v6309_v52 }
 0x39d   :  { %v4120_v18 = vmul.f32 -1.442695, %v1030_v30  ;;  %v907_v6 = vpop.f32.mrf.mxu2  ;;  %v930_v53 = vpop.f32.mrf.mxu3 }
 0x39e   :  { %v931_v44 = vadd.f32 %v930_v53, %v815_v40 }
 0x3a0   :  { %v1028_v33 = vadd.f32 %v931_v44, %v6302_v46 }
 0x3a1   :  { %v953_v16 = vpop.f32.mrf.mxu0  ;;  %v979_v20 = vpop.f32.mrf.mxu1 }
 0x3a2   :  { %v954_v1 = vadd.f32 %v953_v16, %v838_v19  ;;  %v4122_v17 = vmul.f32 -1.442695, %v1028_v33  ;;  %v980_v54 = vadd.f32 %v979_v20, %v864_v61 }
 0x3a4   :  { %v1029_v62 = vadd.f32 %v954_v1, %v6306_v51  ;;  %v1035_v1 = vadd.f32 %v980_v54, %v6309_v52 }
 0x3a6   :  { %v4118_v7 = vmul.f32 -1.442695, %v1029_v62  ;;  %v933_v53 = vpop.f32.mrf.mxu3  ;;  %v4121_v9 = vmul.f32 -1.442695, %v1035_v1  ;;  %v7590_v44 = vpop.f32.mrf.mxu2 }
 0x3a8   :  { %4421 = vpow2.f32 %v4118_v7 }
 0x3a9   :  { %4423 = vpow2.f32 %v4120_v18  ;;  %v956_v49 = vpop.f32.mrf.mxu0  ;;  %v934_v18 = vadd.f32 %v933_v53, %v818_v10 }
 0x3aa   :  { %v957_v59 = vadd.f32 %v956_v49, %v841_v2  ;;  %4425 = vpow2.f32 %v4122_v17 }
 0x3ab   :  { %v1033_v54 = vadd.f32 %v934_v18, %v6302_v46 }
 0x3ac   :  { %v1034_v22 = vadd.f32 %v957_v59, %v6306_v51 }
 0x3ad   :  { %v4123_v17 = vmul.f32 -1.442695, %v1033_v54 }
 0x3ae   :  { %v4422_v24 = vpop.eup %4421  ;;  %v4119_v16 = vmul.f32 -1.442695, %v1034_v22 }
 0x3af   :  { %v4424_v62 = vpop.eup %4423  ;;  %v7586_v30 = vadd.f32 1.0, %v4422_v24  ;;  %v1022_v10 = vpop.f32.mrf.mxu3 }
 0x3b0   :  { %v7588_v7 = vadd.f32 1.0, %v4424_v62  ;;  %v4426_v61 = vpop.eup %4425  ;;  %v1023_v40 = vadd.f32 %v1022_v10, %v907_v6  ;;  %v999_v62 = vpop.f32.mrf.mxu2 }
 0x3b1   :  { %4427 = vrcp.f32 %v7586_v30  ;;  %v7595_v59 = vadd.f32 1.0, %v4426_v61  ;;  %v1057_v54 = vand.u32 2147483648, %v7586_v30  ;;  %vm1051_vm8 = vweird.f32 %v7586_v30 }
 0x3b2   :  { %4429 = vrcp.f32 %v7588_v7  ;;  %v1097_v6 = vand.u32 2147483648, %v7588_v7  ;;  %v1095_v10 = vand.u32 2147483647, %v7588_v7  ;;  %vm1091_vm9 = vweird.f32 %v7588_v7 }
 0x3b3   :  { %4431 = vpow2.f32 %v4119_v16  ;;  %v779_v16 = vmul.f32 %v6591_v15, %v6487_v38  ;;  %v1032_v15 = vadd.f32 %v1023_v40, %v6362_v47  ;;  %v1141_v53 = vand.u32 2147483648, %v7595_v59 }
 0x3b4   :  { %4433 = vpow2.f32 %v4121_v9  ;;  %v1055_v9 = vand.u32 2147483647, %v7586_v30  ;;  %v1000_v51 = vadd.f32 %v999_v62, %v7577_v36  ;;  %v1058_v40 = vor.u32 1.1754944e-38, %v1057_v54 }
 0x3b5   :  { %4435 = vrcp.f32 %v7595_v59  ;;  %vm7641_vm12 = vcmp.eq.f32.partialorder %v1095_v10, 8.507059e+37  ;;  %vm1135_vm13 = vweird.f32 %v7595_v59  ;;  %v4124_v36 = vmul.f32 -1.442695, %v1032_v15 }
 0x3b6   :  { %4437 = vpow2.f32 %v4123_v17  ;;  %vm7633_vm10 = vcmp.eq.f32.partialorder %v1055_v9, 8.507059e+37  ;;  %v1031_v10 = vadd.f32 %v1000_v51, %v6359_v45 }
 0x3b7   :  { %v7598_v20 = vpop.eup %4427 }
 0x3b8   :  { %v7600_v49 = vpop.eup %4429  ;;  %v1047_v33 = vmul.f32 %v7598_v20, %v7586_v30  ;;  %vm1052_vm11 = vweird.f32 %v7598_v20 }
 0x3b9   :  { %v4432_v2 = vpop.eup %4431  ;;  %v1087_v19 = vmul.f32 %v7600_v49, %v7588_v7  ;;  %vm1092_vm14 = vweird.f32 %v7600_v49  ;;  %vm7671_vm4 = vmor %vm1051_vm8, %vm1052_vm11 }
 0x3ba   :  { %v4434_v22 = vpop.eup %4433  ;;  %v1048_v1 = vsub.f32 1.0, %v1047_v33  ;;  %v7606_v24 = vadd.f32 1.0, %v4432_v2  ;;  %v7625_v2 = vadd.f32 %v779_v16, %v6630_v43  ;;  %v1098_v16 = vor.u32 1.1754944e-38, %v1097_v6  ;;  %v1025_v6 = vpop.f32.mrf.mxu3  ;;  %vm7682_vm5 = vmor %vm1091_vm9, %vm1092_vm14 }
 0x3bb   :  { %v7612_v18 = vadd.f32 1.0, %v4434_v22  ;;  %v7614_v61 = vpop.eup %4435  ;;  %v1088_v17 = vsub.f32 1.0, %v1087_v19  ;;  %v1139_v19 = vand.u32 2147483647, %v7595_v59  ;;  %v1026_v58 = vadd.f32 %v1025_v6, %v7590_v44 }
 0x3bc   :  { %4439 = vrcp.f32 %v7606_v24  ;;  %v4438_v33 = vpop.eup %4437  ;;  %v1131_v38 = vmul.f32 %v7614_v61, %v7595_v59  ;;  %v1049_v22 = vmul.f32 %v7598_v20, %v1048_v1  ;;  %vm1066_vm1 = vweird.f32 %v7606_v24 }
 0x3bd   :  { %4441 = vrcp.f32 %v7612_v18  ;;  %v1089_v43 = vmul.f32 %v7600_v49, %v1088_v17  ;;  %v7638_v1 = vadd.f32 1.0, %v4438_v33  ;;  %vm7652_vm15 = vcmp.eq.f32.partialorder %v1139_v19, 8.507059e+37 }
 0x3be   :  { %v1132_v52 = vsub.f32 1.0, %v1131_v38  ;;  %v1050_v9 = vadd.f32 %v7598_v20, %v1049_v22  ;;  %v1142_v17 = vor.u32 1.1754944e-38, %v1141_v53  ;;  %vm1136_vm3 = vweird.f32 %v7614_v61  ;;  %v1002_v53 = vpop.f32.mrf.mxu2 }
 0x3bf   :  { %4443 = vrcp.f32 %v7638_v1  ;;  %v1090_v15 = vadd.f32 %v7600_v49, %v1089_v43  ;;  %v1072_v43 = vand.u32 2147483648, %v7606_v24  ;;  %vm1106_vm6 = vweird.f32 %v7612_v18  ;;  %vm7694_vm7 = vmor %vm1135_vm13, %vm1136_vm3 }
 0x3c0   :  { %v1133_v38 = vmul.f32 %v7614_v61, %v1132_v52  ;;  %4445 = vpow2.f32 %v4124_v36  ;;  %v1070_v36 = vand.u32 2147483647, %v7606_v24  ;;  %v1112_v42 = vand.u32 2147483648, %v7612_v18 }
 0x3c1   :  { %4447 = vtanh.f32 %v1031_v10  ;;  %v1003_v44 = vadd.f32 %v1002_v53, %v7579_v32  ;;  %v1037_v6 = vadd.f32 %v1026_v58, %v6362_v47  ;;  %v1094_v59 = vsel %vm7682_vm5, %v7600_v49, %v1090_v15 }
 0x3c2   :  { %v7647_v62 = vpop.eup %4439  ;;  %v1134_v19 = vadd.f32 %v7614_v61, %v1133_v38  ;;  %v1073_v54 = vor.u32 1.1754944e-38, %v1072_v43  ;;  %v1156_v38 = vand.u32 2147483648, %v7638_v1  ;;  %vm1150_vm13 = vweird.f32 %v7638_v1 }
 0x3c3   :  { %v7656_v33 = vpop.eup %4441  ;;  %v1062_v52 = vmul.f32 %v7647_v62, %v7606_v24  ;;  %vm1067_vm8 = vweird.f32 %v7647_v62  ;;  %v1036_v15 = vadd.f32 %v1003_v44, %v6359_v45  ;;  %vm1071_vm14 = vcmp.eq.f32.partialorder %v1070_v36, 8.507059e+37 }
 0x3c4   :  { %v1102_v22 = vmul.f32 %v7656_v33, %v7612_v18  ;;  %v1138_v13 = vsel %vm7694_vm7, %v7614_v61, %v1134_v19  ;;  %vm1107_vm9 = vweird.f32 %v7656_v33  ;;  %v1099_v61 = vsel %vm7641_vm12, %v1098_v16, %v1094_v59 }
 0x3c5   :  { %v1063_v51 = vsub.f32 1.0, %v1062_v52  ;;  %v1054_v52 = vsel %vm7671_vm4, %v7598_v20, %v1050_v9  ;;  %v4125_v9 = vmul.f32 -1.442695, %v1037_v6  ;;  %v1143_v49 = vsel %vm7652_vm15, %v1142_v17, %v1138_v13  ;;  %vm7735_vm11 = vmor %vm1106_vm6, %vm1107_vm9 }
 0x3c6   :  { %v1103_v30 = vsub.f32 1.0, %v1102_v22  ;;  %v4444_v22 = vpop.eup %4443  ;;  %v1059_v58 = vsel %vm7633_vm10, %v1058_v40, %v1054_v52  ;;  %vm7723_vm10 = vmor %vm1066_vm1, %vm1067_vm8  ;;  %v1116_v40 = vmul.f32 %v1099_v61, %v11732_v29  ;;  %v1154_v52 = vand.u32 2147483647, %v7638_v1 }
 0x3c7   :  { %v1064_v4 = vmul.f32 %v7647_v62, %v1063_v51  ;;  %v4446_v20 = vpop.eup %4445  ;;  %v1146_v32 = vmul.f32 %v4444_v22, %v7638_v1  ;;  %4449 = vpow2.f32 %v4125_v9  ;;  %vm1151_vm12 = vweird.f32 %v4444_v22 }
 0x3c8   :  { %v1104_v0 = vmul.f32 %v7656_v33, %v1103_v30  ;;  %v1170_v51 = vadd.f32 1.0, %v4446_v20  ;;  %v4448_v16 = vpop.eup %4447  ;;  %vm1152_vm1 = vmor %vm1150_vm13, %vm1151_vm12  ;;  %v1157_v20 = vor.u32 1.1754944e-38, %v1156_v38  ;;  %vm1155_vm3 = vcmp.eq.f32.partialorder %v1154_v52, 8.507059e+37 }
 0x3c9   :  { %v1065_v10 = vadd.f32 %v7647_v62, %v1064_v4  ;;  %v1147_v19 = vsub.f32 1.0, %v1146_v32  ;;  %v1076_v4 = vmul.f32 %v1059_v58, %v6573_v48  ;;  %v1160_v30 = vmul.f32 %v4448_v16, %v1143_v49 }
 0x3ca   :  { %v1105_v53 = vadd.f32 %v7656_v33, %v1104_v0  ;;  %v1110_v0 = vand.u32 2147483647, %v7612_v18  ;;  %4451 = vrcp.f32 %v1170_v51  ;;  %v1113_v18 = vor.u32 1.1754944e-38, %v1112_v42 }
 0x3cb   :  { %v1148_v17 = vmul.f32 %v4444_v22, %v1147_v19  ;;  %v1069_v7 = vsel %vm7723_vm10, %v7647_v62, %v1065_v10  ;;  %4453 = vtanh.f32 %v1036_v15  ;;  %v1118_v6 = vadd.f32 %v1116_v40, %v1076_v4 }
 0x3cc   :  { %v1109_v43 = vsel %vm7735_vm11, %v7656_v33, %v1105_v53  ;;  %vm1111_vm15 = vcmp.eq.f32.partialorder %v1110_v0, 8.507059e+37  ;;  %v1074_v32 = vsel %vm1071_vm14, %v1073_v54, %v1069_v7  ;;  %v793_v62 = vrot.slane %v7625_v2, 1 }
 0x3cd   :  { %v1149_v44 = vadd.f32 %v4444_v22, %v1148_v17  ;;  %v4450_v13 = vpop.eup %4449  ;;  %v1114_v9 = vsel %vm1111_vm15, %v1113_v18, %v1109_v43  ;;  %v7749_v33 = vadd.f32 %v1160_v30, %v1118_v6  ;;  %v1077_v1 = vmul.f32 %v1074_v32, %v7625_v2 }
 0x3ce   :  { %v1171_v10 = vadd.f32 1.0, %v4450_v13  ;;  %v1117_v36 = vmul.f32 %v1114_v9, %v793_v62  ;;  %v1183_v49 = vand.u32 2147483648, %v1170_v51  ;;  %v1181_v46 = vand.u32 2147483647, %v1170_v51 }
 0x3cf   :  { %v1153_v59 = vsel %vm1152_vm1, %v4444_v22, %v1149_v44  ;;  %vm1177_vm5 = vweird.f32 %v1170_v51 }
 0x3d0   :  { %v4452_v58 = vpop.eup %4451  ;;  %v1158_v42 = vsel %vm1155_vm3, %v1157_v20, %v1153_v59  ;;  %4455 = vrcp.f32 %v1171_v10  ;;  %v1119_v0 = vadd.f32 %v1117_v36, %v1077_v1  ;;  %v1184_v40 = vor.u32 1.1754944e-38, %v1183_v49 }
 0x3d1   :  { %v1173_v53 = vmul.f32 %v4452_v58, %v1170_v51  ;;  %v4454_v61 = vpop.eup %4453  ;;  %4457 = vtanh.f32 %v7749_v33  ;;  %vm1178_vm4 = vweird.f32 %v4452_v58  ;;  %vm1182_vm7 = vcmp.eq.f32.partialorder %v1181_v46, 8.507059e+37  ;;  %v7763_v51 = vld [vmem:[%s10988_s6] ss:$0 sm:$0xff] }
 0x3d2   :  { %v1161_v19 = vmul.f32 %v4454_v61, %v1158_v42  ;;  %vm1179_vm6 = vmor %vm1177_vm5, %vm1178_vm4  ;;  %v1198_v7 = vand.u32 2147483648, %v1171_v10  ;;  %v1196_v44 = vand.u32 2147483647, %v1171_v10  ;;  %vm1192_vm9 = vweird.f32 %v1171_v10  ;;  %v4824_v42 = vld [vmem:[%s10984_s2] sm:$0x3] }
 0x3d3   :  { %v1174_v22 = vsub.f32 1.0, %v1173_v53  ;;  %vm1302_vm12 = vcmp.gt.s32.totalorder %v4824_v42, 2  ;;  %v11735_v53 = vmov 0.0  }
 0x3d4   :  { %v7755_v16 = vadd.f32 %v1161_v19, %v1119_v0  ;;  %v1199_v13 = vor.u32 1.1754944e-38, %v1198_v7  ;;  %vm1197_vm11 = vcmp.eq.f32.partialorder %v1196_v44, 8.507059e+37  ;;  %v4130_v1 = vsel %vm1302_vm12, 1.0, %v11735_v53 }
 0x3d5   :  { %v1175_v15 = vmul.f32 %v4452_v58, %v1174_v22  ;;  %v1212_v22 = vadd.s32 2, %v6528_v37 }
 0x3d6   :  { %v4456_v29 = vpop.eup %4455  ;;  %4459 = vtanh.f32 %v7755_v16 }
 0x3d7   :  { %v1176_v4 = vadd.f32 %v4452_v58, %v1175_v15  ;;  %v1188_v24 = vmul.f32 %v4456_v29, %v1171_v10  ;;  %v4458_v17 = vpop.eup %4457  ;;  %vm1193_vm8 = vweird.f32 %v4456_v29  ;;  %v1320_v10 = vsub.f32 1.0, %v4130_v1 }
 0x3d8   :  { %vm1194_vm10 = vmor %vm1192_vm9, %vm1193_vm8  ;;  %vm1213_vm13 = vcmp.lt.s32.totalorder %v1212_v22, %v6531_v5  ;;  %v11736_v22 = vmov 0  }
 0x3d9   :  { %v1180_v54 = vsel %vm1179_vm6, %v4452_v58, %v1176_v4  ;;  %v1189_v52 = vsub.f32 1.0, %v1188_v24  ;;  %v1324_v36 = vperm.slane %v1320_v10, 0 }
 0x3da   :  { %v1185_v38 = vsel %vm1182_vm7, %v1184_v40, %v1180_v54  ;;  %v1308_v40 = vperm.slane %v4130_v1, 0 }
 0x3db   :  { %v7757_v30 = vmul.f32 %v4458_v17, %v1185_v38  ;;  %v1190_v18 = vmul.f32 %v4456_v29, %v1189_v52 }
 0x3dc   :  { %v4460_v20 = vpop.eup %4459 }
 0x3dd   :  { %v1206_v43 = vmul.f32 %v7763_v51, %v7757_v30  ;;  %v1191_v6 = vadd.f32 %v4456_v29, %v1190_v18 }
 0x3df   :  { %1208 = vadd.xlane.f32.xlu0 %v1206_v43  ;;  %v1195_v59 = vsel %vm1194_vm10, %v4456_v29, %v1191_v6  ;;  %v1306_v29 = vrot.slane %v4130_v1, 1 }
 0x3e0   :  { %v1200_v32 = vsel %vm1197_vm11, %v1199_v13, %v1195_v59 }
 0x3e1   :  { %v7767_v9 = vmul.f32 %v4460_v20, %v1200_v32  ;;  %v1309_v54 = vperm.slane %v1306_v29, 0  ;;  %v1321_v42 = vsub.f32 1.0, %v1306_v29 }
 0x3e3   :  { %v1207_v58 = vmul.f32 %v7763_v51, %v7767_v9  ;;  %v4253_v24 = vpack.i.bf16 %v1309_v54, %v1308_v40 }
 0x3e5   :  { %1210 = vadd.xlane.f32.xlu2 %v1207_v58 }
 0x3f3   :  { %1327 = vperm.xlu0 %4258, %v1324_v36   ;;  %v1325_v36 = vperm.slane %v1321_v42, 0 }
 0x3fb   :  { %4259 = vset.pattern.permute.xlu0 %v6540_v21 }
 0x452   :  { %v1209_v61 = vpop.xlane.xlu0 %1208 }
 0x453   :  { %v1216_v49 = vperm.slane %v1209_v61, %v6528_v37 }
 0x458   :  { %v1211_v19 = vpop.xlane.xlu2 %1210 }
 0x459   :  { %v1217_v15 = vperm.slane %v1211_v19, %v6528_v37 }
 0x45b   :  { %v1218_v46 = vsel %vm655_vm0, %v1217_v15, %v1216_v49 }
 0x45c   :  { %v1220_v0 = vsel %vm1213_vm13, %v1218_v46, -1e+30 }
 0x45d   :  { %v1221_v4 = vsel %vm659_vm2, %v1220_v0, -inf }
 0x45e   :  { %1222 = vmax.xlane.f32.xlu1 %v1221_v4 }
 0x477   :  { %4254 = vperm.xlu1 %4228, %v4253_v24  }
 0x47f   :  { %4288 = vset.pattern.permute.xlu1 %v6540_v21 }
 0x4d1   :  { %v1223_v17 = vpop.xlane.xlu1 %1222 }
 0x4d2   :  { %vm1224_vm14 = vcmp.eq.f32.partialorder %v1220_v0, %v1223_v17 }
 0x4d3   :  { %v1225_v38 = vsel %vm1224_vm14, %v6545_v25, 8.0 }
 0x4d4   :  { %v1226_v52 = vsel %vm659_vm2, %v1225_v38, inf }
 0x4d5   :  { %1227 = vmin.xlane.f32.xlu2 %v1226_v52  ;;  %v7801_v52 = vpop.permute.xlu0 %1327 }
 0x4e9   :  { %v4255_v40 = vpop.permute.xlu1 %4254 }
 0x4ea   :  { %v4257_v17 = vunpack.i.h.bf16 %v4255_v40 }
 0x548   :  { %v1228_v7 = vpop.xlane.xlu2 %1227 }
 0x549   :  { %vm1229_vm15 = vcmp.eq.f32.partialorder %v6545_v25, %v1228_v7  ;;  %vm1232_vm1 = vcmp.lt.f32.partialorder %v6545_v25, %v1228_v7  ;;  %vm1235_vm3 = vcmp.gt.f32.partialorder %v6545_v25, %v1228_v7 }
 0x54a   :  { %v4126_v43 = vsel %vm1229_vm15, 1.0, %v11735_v53  ;;  %v4127_v18 = vsel %vm1232_vm1, 1.0, %v11735_v53  ;;  %v4128_v44 = vsel %vm1235_vm3, 1.0, %v11735_v53 }
 0x54b   :  { %v1254_v6 = vperm.slane %v4127_v18, 0  ;;  %v1272_v13 = vperm.slane %v4128_v44, 0  ;;  %4129 = vst [vmem:[%s10991_s9 + $0x2] sm:$0x3] %v4126_v43  ;;  %v1245_v59 = vperm.slane %v4126_v43, 1  ;;  %v1238_v20 = vperm.slane %v4126_v43, 0 }
 0x54c   :  { %v1261_v1 = vperm.slane %v4127_v18, 1  ;;  %v1279_v10 = vperm.slane %v4128_v44, 1 }
 0x54d   :  { %v4265_v32 = vpack.i.bf16 %v1245_v59, %v1272_v13  ;;  %v4260_v58 = vpack.i.bf16 %v1254_v6, %v1238_v20 }
 0x54e   :  { %v4270_v61 = vpack.i.bf16 %v1279_v10, %v1261_v1 }
 0x54f   :  { %4266 = vperm.xlu2 %4247, %v4265_v32   ;;  %4261 = vperm.xlu0 %4259, %v4260_v58   ;;  %v11737_v58 = vrot.slane %v6573_v48, 1 }
 0x557   :  { %4271 = vperm.xlu2 %4247, %v4270_v61   ;;  %4275 = vset.pattern.permute.xlu0 %v11736_v22  ;;  %v4256_v61 = vunpack.i.l.bf16 %v4255_v40  ;;  %v11756_v40 = vld [vmem:[#allocation48_spill] sm:$0xff] }
 0x558   :  { %1331 = vperm.xlu0 %4275, %v1325_v36  }
 0x55f   :  { %4282 = vset.pattern.permute.xlu2 %v11736_v22 }
 0x560   :  { %4276 = vset.pattern.permute.xlu0 %v6540_v21 }
 0x5a9   :  { %v4267_v19 = vpop.permute.xlu2 %4266 }
 0x5aa   :  { %v4269_v49 = vunpack.i.h.bf16 %v4267_v19  ;;  %v4268_v18 = vunpack.i.l.bf16 %v4267_v19 }
 0x5ac   :  { %v1291_v4 = vmul.f32 %v4269_v49, %v7755_v16  ;;  %v1286_v32 = vmul.f32 %v4268_v18, %v6576_v34  ;;  %v1296_v42 = vmul.f32 %v4268_v18, %v11737_v58  ;;  %v1253_v36 = vmul.f32 %v4269_v49, %v7767_v9  ;;  %v11754_v49 = vld [vmem:[#allocation49_spill] sm:$0xff] }
 0x5ad   :  { %v11759_v18 = vld [vmem:[#allocation21_spill] sm:$0xff] }
 0x5ae   :  { %v11768_v58 = vld [vmem:[#allocation61_spill] sm:$0xff] }
 0x5b1   :  { %v4272_v15 = vpop.permute.xlu2 %4271 }
 0x5b2   :  { %v4274_v46 = vunpack.i.h.bf16 %v4272_v15  ;;  %v4273_v0 = vunpack.i.l.bf16 %v4272_v15 }
 0x5b4   :  { %v1293_v29 = vmul.f32 %v4273_v0, %v7625_v2  ;;  %v1297_v54 = vmul.f32 %v4274_v46, %v793_v62  ;;  %v1269_v62 = vmul.f32 %v4273_v0, %v6656_v12  ;;  %v1287_v0 = vmul.f32 %v4274_v46, %v6683_v14  ;;  %v11755_v46 = vld [vmem:[#allocation19_spill] sm:$0xff] }
 0x5b6   :  { %v1295_v24 = vadd.f32 %v1293_v29, %v1291_v4  ;;  %v1271_v4 = vadd.f32 %v1269_v62, %v1253_v36  ;;  %v11766_v62 = vld [vmem:[#allocation56_spill] sm:$0xff]  ;;  %v11772_v36 = vld [vmem:[#allocation65_spill] sm:$0xff] }
 0x5b8   :  { %v1299_v38 = vadd.f32 %v1297_v54, %v1295_v24  ;;  %v1289_v24 = vadd.f32 %v1287_v0, %v1271_v4  ;;  %v11776_v4 = vld [vmem:[#allocation69_spill] sm:$0xff]  ;;  %v11779_v0 = vld [vmem:[#allocation35_spill] sm:$0xff] }
 0x5ba   :  { %v7803_v7 = vmul.f32 %v4257_v17, %v1299_v38 }
 0x5c1   :  { %v4262_v43 = vpop.permute.xlu0 %4261 }
 0x5c2   :  { %v4264_v44 = vunpack.i.h.bf16 %v4262_v43  ;;  %v4263_v6 = vunpack.i.l.bf16 %v4262_v43  ;;  %v11758_v43 = vld [vmem:[#allocation53_spill] sm:$0xff] }
 0x5c4   :  { %v1268_v13 = vmul.f32 %v4264_v44, %v6571_v56  ;;  %v1292_v16 = vmul.f32 %v4264_v44, %v6573_v48  ;;  %v1252_v59 = vmul.f32 %v4263_v6, %v7757_v30  ;;  %v1290_v20 = vmul.f32 %v4263_v6, %v7749_v33  ;;  %v11760_v44 = vld [vmem:[#allocation52_spill] sm:$0xff] }
 0x5c5   :  { %v1334_v30 = vmul.f32 %v7801_v52, %v6571_v56  ;;  %v1319_v56 = vmul.f32 %v4257_v17, %v1289_v24  ;;  %v11757_v17 = vld [vmem:[#allocation18_spill] sm:$0xff]  ;;  %v11761_v6 = vld [vmem:[#allocation20_spill] sm:$0xff] }
 0x5c6   :  { %v1270_v1 = vadd.f32 %v1268_v13, %v1252_v59  ;;  %v1294_v10 = vadd.f32 %v1292_v16, %v1290_v20  ;;  %v11762_v13 = vld [vmem:[#allocation57_spill] sm:$0xff]  ;;  %v11763_v16 = vld [vmem:[#allocation23_spill] sm:$0xff]  ;;  %v11764_v59 = vld [vmem:[#allocation60_spill] sm:$0xff] }
 0x5c7   :  { %v11765_v20 = vld [vmem:[#allocation24_spill] sm:$0xff] }
 0x5c8   :  { %v1288_v19 = vadd.f32 %v1286_v32, %v1270_v1  ;;  %v1298_v15 = vadd.f32 %v1296_v42, %v1294_v10  ;;  %v11767_v32 = vld [vmem:[#allocation22_spill] sm:$0xff]  ;;  %v11769_v42 = vld [vmem:[#allocation27_spill] sm:$0xff]  ;;  %v11770_v1 = vld [vmem:[#allocation25_spill] sm:$0xff] }
 0x5c9   :  { %v11771_v10 = vld [vmem:[#allocation26_spill] sm:$0xff]  ;;  %v11780_v24 = vld [vmem:[#allocation68_spill] sm:$0xff] }
 0x5ca   :  { %v1318_v29 = vmul.f32 %v4256_v61, %v1288_v19  ;;  %v7816_v33 = vmul.f32 %v4256_v61, %v1298_v15  ;;  %v7821_v54 = vpop.permute.xlu0 %1331  ;;  %v11773_v61 = vld [vmem:[#allocation30_spill] sm:$0xff]  ;;  %v11774_v19 = vld [vmem:[#allocation64_spill] sm:$0xff] }
 0x5cb   :  { %v1335_v9 = vmul.f32 %v7821_v54, %v6656_v12  ;;  %v11747_v12 = vld [vmem:[#allocation14_spill] sm:$0xff]  ;;  %v11775_v15 = vld [vmem:[#allocation28_spill] sm:$0xff] }
 0x5cc   :  { %v7819_v34 = vadd.f32 %v1334_v30, %v1318_v29  ;;  %v11777_v30 = vld [vmem:[#allocation34_spill] sm:$0xff]  ;;  %v11778_v29 = vld [vmem:[#allocation72_spill] sm:$0xff] }
 0x5cd   :  { %v7834_v14 = vadd.f32 %v1335_v9, %v1319_v56  ;;  %v11781_v9 = vld [vmem:[#allocation31_spill] sm:$0xff] }
 0x5ce   :  { %v7824_v38 = vrot.slane %v7819_v34, 1  ;;  %v11782_v56 = vld [vmem:[#allocation39_spill] sm:$0xff] }
 0x5d0   :  { %1376 = vmatmul.f32.vlgmr.msrb.gmra.mxu0 %v7824_v38  ;;  %1399 = vmatmul.f32.vlgmr.msrb.gmra.mxu1 %v7824_v38 }
 0x5d1   :  { %1422 = vmatmul.f32.vlgmr.msrb.gmra.mxu2 %v7824_v38  ;;  %1445 = vmatmul.f32.vlgmr.msrb.gmra.mxu3 %v7824_v38 }
 0x5d2   :  { %1544 = vmatpush.msrb.mxu0 %v6596_v11  ;;  %1567 = vmatpush.msrb.mxu1 %v6602_v31  ;;  %v7845_v11 = vrot.slane %v7834_v14, 1  ;;  %v11738_v31 = vld [vmem:[#allocation32_spill] sm:$0xff] }
 0x5d3   :  { %1922 = vmatpush.msrb.mxu2 %v6608_v28  ;;  %1945 = vmatpush.msrb.mxu3 %v6614_v23  ;;  %v11739_v28 = vld [vmem:[#allocation10_spill] sm:$0xff]  ;;  %v11740_v23 = vld [vmem:[#allocation33_spill] sm:$0xff] }
 0x5d4   :  { %1545 = vmatpush.msrb.mxu0 %v6620_v26  ;;  %1568 = vmatpush.msrb.mxu1 %v6626_v27  ;;  %v11741_v26 = vld [vmem:[#allocation11_spill] sm:$0xff]  ;;  %v11742_v27 = vld [vmem:[#allocation36_spill] sm:$0xff] }
 0x5d5   :  { %1923 = vmatpush.msrb.mxu2 %v6635_v50  ;;  %1946 = vmatpush.msrb.mxu3 %v6641_v3  ;;  %v11743_v50 = vld [vmem:[#allocation12_spill] sm:$0xff]  ;;  %v11744_v3 = vld [vmem:[#allocation37_spill] sm:$0xff] }
 0x5d6   :  { %1546 = vmatpush.msrb.mxu0 %v6647_v55  ;;  %1569 = vmatpush.msrb.mxu1 %v6653_v57  ;;  %v11745_v55 = vld [vmem:[#allocation13_spill] sm:$0xff]  ;;  %v11746_v57 = vld [vmem:[#allocation40_spill] sm:$0xff] }
 0x5d7   :  { %1924 = vmatpush.msrb.mxu2 %v6661_v41  ;;  %1947 = vmatpush.msrb.mxu3 %v6667_v60  ;;  %v11748_v41 = vld [vmem:[#allocation41_spill] sm:$0xff]  ;;  %v11749_v60 = vld [vmem:[#allocation15_spill] sm:$0xff] }
 0x5d8   :  { %1547 = vmatpush.msrb.mxu0 %v6673_v63  ;;  %1570 = vmatpush.msrb.mxu1 %v6679_v35  ;;  %v11750_v63 = vld [vmem:[#allocation45_spill] sm:$0xff] }
 0x5d9   :  { %1379 = vmatmul.f32.gmra.mxu0 %v7845_v11  ;;  %1402 = vmatmul.f32.gmra.mxu1 %v7845_v11  ;;  %v11751_v35 = vld [vmem:[#allocation17_spill] sm:$0xff] }
 0x5da   :  { %1425 = vmatmul.f32.gmra.mxu2 %v7845_v11  ;;  %1448 = vmatmul.f32.gmra.mxu3 %v7845_v11 }
 0x5db   :  { %1548 = vmatpush.msrb.mxu0 %v6700_v8  ;;  %1571 = vmatpush.msrb.mxu1 %v6706_v39  ;;  %v11752_v8 = vld [vmem:[#allocation44_spill] sm:$0xff] }
 0x5dc   :  { %1925 = vmatpush.msrb.mxu2 %v11738_v31  ;;  %1948 = vmatpush.msrb.mxu3 %v11739_v28  ;;  %v11753_v39 = vld [vmem:[#allocation16_spill] sm:$0xff]  ;;  %v11784_v28 = vld [vmem:[#allocation73_spill] sm:$0xff] }
 0x5dd   :  { %1549 = vmatpush.msrb.mxu0 %v11740_v23  ;;  %1572 = vmatpush.msrb.mxu1 %v11741_v26  ;;  %v11783_v31 = vld [vmem:[#allocation76_spill] sm:$0xff]  ;;  %v11785_v23 = vld [vmem:[#allocation38_spill] sm:$0xff]  ;;  %v11786_v26 = vld [vmem:[#allocation43_spill] sm:$0xff] }
 0x5de   :  { %1926 = vmatpush.msrb.mxu2 %v11742_v27  ;;  %1949 = vmatpush.msrb.mxu3 %v11743_v50  ;;  %v11787_v27 = vld [vmem:[#allocation79_spill] sm:$0xff]  ;;  %v11788_v50 = vld [vmem:[#allocation42_spill] sm:$0xff] }
 0x5df   :  { %1550 = vmatpush.msrb.mxu0 %v11744_v3  ;;  %1573 = vmatpush.msrb.mxu1 %v11745_v55  ;;  %v11789_v3 = vld [vmem:[#allocation80_spill] sm:$0xff]  ;;  %v11790_v55 = vld [vmem:[#allocation50_spill] sm:$0xff] }
 0x5e0   :  { %1927 = vmatpush.msrb.mxu2 %v11746_v57  ;;  %1950 = vmatpush.msrb.mxu3 %v11747_v12  ;;  %v11791_v57 = vld [vmem:[#allocation51_spill] sm:$0xff]  ;;  %v11792_v12 = vld [vmem:[#allocation54_spill] sm:$0xff] }
 0x5e1   :  { %1551 = vmatpush.msrb.mxu0 %v11748_v41  ;;  %1574 = vmatpush.msrb.mxu1 %v11749_v60  ;;  %v11793_v41 = vld [vmem:[#allocation55_spill] sm:$0xff]  ;;  %v11794_v60 = vld [vmem:[#allocation46_spill] sm:$0xff] }
 0x5e2   :  { %1468 = vmatmul.f32.vlgmr.msra.gmra.mxu0 %v7824_v38  ;;  %1491 = vmatmul.f32.vlgmr.msra.gmra.mxu1 %v7819_v34 }
 0x5e3   :  { %1514 = vmatmul.f32.vlgmr.msra.gmra.mxu2 %v7819_v34  ;;  %1537 = vmatmul.f32.vlgmr.msra.gmra.mxu3 %v7819_v34 }
 0x5e4   :  { %1552 = vmatpush.msrb.mxu0 %v11750_v63  ;;  %1575 = vmatpush.msrb.mxu1 %v11751_v35  ;;  %v11795_v63 = vld [vmem:[#allocation47_spill] sm:$0xff]  ;;  %v11796_v35 = vld [vmem:[#allocation62_spill] sm:$0xff] }
 0x5e5   :  { %1928 = vmatpush.msrb.mxu2 %v11752_v8  ;;  %1951 = vmatpush.msrb.mxu3 %v11753_v39  ;;  %v11797_v8 = vld [vmem:[#allocation63_spill] sm:$0xff]  ;;  %v11798_v39 = vld [vmem:[#allocation58_spill] sm:$0xff] }
 0x5e6   :  { %1553 = vmatpush.msrb.mxu0 %v11754_v49  ;;  %1576 = vmatpush.msrb.mxu1 %v11755_v46  ;;  %v11799_v49 = vld [vmem:[#allocation59_spill] sm:$0xff]  ;;  %v11800_v46 = vld [vmem:[#allocation70_spill] sm:$0xff] }
 0x5e7   :  { %1929 = vmatpush.msrb.mxu2 %v11756_v40  ;;  %1952 = vmatpush.msrb.mxu3 %v11757_v17  ;;  %v11801_v40 = vld [vmem:[#allocation71_spill] sm:$0xff]  ;;  %v11802_v17 = vld [vmem:[#allocation66_spill] sm:$0xff] }
 0x5e8   :  { %1554 = vmatpush.msrb.mxu0 %v11758_v43  ;;  %1577 = vmatpush.msrb.mxu1 %v11759_v18  ;;  %v11803_v43 = vld [vmem:[#allocation67_spill] sm:$0xff]  ;;  %v11804_v18 = vld [vmem:[#allocation77_spill] sm:$0xff] }
 0x5e9   :  { %1930 = vmatpush.msrb.mxu2 %v11760_v44  ;;  %1953 = vmatpush.msrb.mxu3 %v11761_v6  ;;  %v11805_v44 = vld [vmem:[#allocation78_spill] sm:$0xff] }
 0x5ea   :  { %1555 = vmatpush.msrb.mxu0 %v11762_v13  ;;  %1578 = vmatpush.msrb.mxu1 %v11763_v16  ;;  %v11806_v6 = vld [vmem:[#allocation74_spill] sm:$0xff]  ;;  %v11807_v13 = vld [vmem:[#allocation75_spill] sm:$0xff] }
 0x5eb   :  { %1471 = vmatmul.f32.gmra.mxu0 %v7845_v11  ;;  %1494 = vmatmul.f32.gmra.mxu1 %v7834_v14  ;;  %v11808_v16 = vld [vmem:[#allocation83_spill] sm:$0xff] }
 0x5ec   :  { %1517 = vmatmul.f32.gmra.mxu2 %v7834_v14  ;;  %1540 = vmatmul.f32.gmra.mxu3 %v7834_v14 }
 0x5ed   :  { %1556 = vmatpush.msrb.mxu0 %v11764_v59  ;;  %1579 = vmatpush.msrb.mxu1 %v11765_v20  ;;  %v11809_v59 = vld [vmem:[#allocation84_spill] sm:$0xff]  ;;  %v11810_v20 = vld [vmem:[#allocation81_spill] sm:$0xff] }
 0x5ee   :  { %1931 = vmatpush.msrb.mxu2 %v11766_v62  ;;  %1954 = vmatpush.msrb.mxu3 %v11767_v32  ;;  %v11811_v62 = vld [vmem:[#allocation82_spill] sm:$0xff]  ;;  %v11812_v32 = vld [vmem:[#allocation87_spill] sm:$0xff] }
 0x5ef   :  { %1557 = vmatpush.msrb.mxu0 %v11768_v58  ;;  %1580 = vmatpush.msrb.mxu1 %v11769_v42  ;;  %v11813_v58 = vld [vmem:[#allocation88_spill] sm:$0xff]  ;;  %v11814_v42 = vld [vmem:[#allocation85_spill] sm:$0xff] }
 0x5f0   :  { %1932 = vmatpush.msrb.mxu2 %v11770_v1  ;;  %1955 = vmatpush.msrb.mxu3 %v11771_v10  ;;  %v11815_v1 = vld [vmem:[#allocation86_spill] sm:$0xff]  ;;  %v11816_v10 = vld [vmem:[#allocation91_spill] sm:$0xff] }
 0x5f1   :  { %1558 = vmatpush.msrb.mxu0 %v11772_v36  ;;  %1581 = vmatpush.msrb.mxu1 %v11773_v61  ;;  %v11817_v36 = vld [vmem:[#allocation92_spill] sm:$0xff]  ;;  %v11818_v61 = vld [vmem:[#allocation89_spill] sm:$0xff] }
 0x5f2   :  { %1933 = vmatpush.msrb.mxu2 %v11774_v19  ;;  %1956 = vmatpush.msrb.mxu3 %v11775_v15  ;;  %v11819_v19 = vld [vmem:[#allocation90_spill] sm:$0xff]  ;;  %v11820_v15 = vld [vmem:[#allocation95_spill] sm:$0xff] }
 0x5f3   :  { %1559 = vmatpush.msrb.mxu0 %v11776_v4  ;;  %1582 = vmatpush.msrb.mxu1 %v11777_v30  ;;  %v11821_v4 = vld [vmem:[#allocation96_spill] sm:$0xff]  ;;  %v11822_v30 = vld [vmem:[#allocation93_spill] sm:$0xff] }
 0x5f4   :  { %1560 = vmatmul.f32.vlgmr.msrb.gmra.mxu0 %v7819_v34  ;;  %1583 = vmatmul.f32.vlgmr.msrb.gmra.mxu1 %v7819_v34 }
 0x5f5   :  { %1968 = vmatpush.msra.mxu0 %v11778_v29  ;;  %1991 = vmatpush.msra.mxu1 %v11779_v0  ;;  %v11823_v29 = vld [vmem:[#allocation94_spill] sm:$0xff]  ;;  %v11824_v0 = vld [vmem:[#allocation99_spill] sm:$0xff] }
 0x5f6   :  { %1934 = vmatpush.msrb.mxu2 %v11780_v24  ;;  %1957 = vmatpush.msrb.mxu3 %v11781_v9  ;;  %v11825_v24 = vld [vmem:[#allocation100_spill] sm:$0xff]  ;;  %v11826_v9 = vld [vmem:[#allocation97_spill] sm:$0xff] }
 0x5f7   :  { %1969 = vmatpush.msra.mxu0 %v11782_v56  ;;  %1992 = vmatpush.msra.mxu1 %v11783_v31  ;;  %v11827_v56 = vld [vmem:[#allocation98_spill] sm:$0xff]  ;;  %v11828_v31 = vld [vmem:[#allocation103_spill] sm:$0xff] }
 0x5f8   :  { %1935 = vmatpush.msrb.mxu2 %v11784_v28  ;;  %1958 = vmatpush.msrb.mxu3 %v11785_v23  ;;  %v11829_v28 = vld [vmem:[#allocation104_spill] sm:$0xff]  ;;  %v11830_v23 = vld [vmem:[#allocation101_spill] sm:$0xff] }
 0x5f9   :  { %1970 = vmatpush.msra.mxu0 %v11786_v26  ;;  %1993 = vmatpush.msra.mxu1 %v11787_v27  ;;  %v11831_v26 = vld [vmem:[#allocation102_spill] sm:$0xff]  ;;  %v11832_v27 = vld [vmem:[#allocation107_spill] sm:$0xff] }
 0x5fa   :  { %1936 = vmatpush.msrb.mxu2 %v11788_v50  ;;  %1959 = vmatpush.msrb.mxu3 %v11789_v3  ;;  %v11833_v50 = vld [vmem:[#allocation108_spill] sm:$0xff]  ;;  %v11834_v3 = vld [vmem:[#allocation105_spill] sm:$0xff] }
 0x5fb   :  { %1971 = vmatpush.msra.mxu0 %v11790_v55  ;;  %1994 = vmatpush.msra.mxu1 %v11791_v57  ;;  %v11835_v55 = vld [vmem:[#allocation106_spill] sm:$0xff]  ;;  %v11836_v57 = vld [vmem:[#allocation111_spill] sm:$0xff] }
 0x5fc   :  { %1563 = vmatmul.f32.gmra.mxu0 %v7834_v14  ;;  %1586 = vmatmul.f32.gmra.mxu1 %v7834_v14 }
 0x5fd   :  { %1972 = vmatpush.msra.mxu0 %v11792_v12  ;;  %1995 = vmatpush.msra.mxu1 %v11793_v41  ;;  %v11837_v12 = vld [vmem:[#allocation112_spill] sm:$0xff]  ;;  %v11838_v41 = vld [vmem:[#allocation113_spill] sm:$0xff] }
 0x5fe   :  { %1937 = vmatpush.msrb.mxu2 %v11794_v60  ;;  %1960 = vmatpush.msrb.mxu3 %v11795_v63  ;;  %v11839_v60 = vld [vmem:[#allocation114_spill] sm:$0xff]  ;;  %v11840_v63 = vld [vmem:[#allocation109_spill] sm:$0xff] }
 0x5ff   :  { %1973 = vmatpush.msra.mxu0 %v11796_v35  ;;  %1996 = vmatpush.msra.mxu1 %v11797_v8  ;;  %v11841_v35 = vld [vmem:[#allocation110_spill] sm:$0xff]  ;;  %v11842_v8 = vld [vmem:[#allocation117_spill] sm:$0xff] }
 0x600   :  { %2014 = vmatpush.msra.mxu2 %v11798_v39  ;;  %2037 = vmatpush.msra.mxu3 %v11799_v49  ;;  %v11843_v39 = vld [vmem:[#allocation118_spill] sm:$0xff]  ;;  %v11844_v49 = vld [vmem:[#allocation115_spill] sm:$0xff] }
 0x601   :  { %1974 = vmatpush.msra.mxu0 %v11800_v46  ;;  %1997 = vmatpush.msra.mxu1 %v11801_v40  ;;  %v11845_v46 = vld [vmem:[#allocation116_spill] sm:$0xff]  ;;  %v11846_v40 = vld [vmem:[#allocation121_spill] sm:$0xff] }
 0x602   :  { %2015 = vmatpush.msra.mxu2 %v11802_v17  ;;  %2038 = vmatpush.msra.mxu3 %v11803_v43  ;;  %v11847_v17 = vld [vmem:[#allocation122_spill] sm:$0xff]  ;;  %v11848_v43 = vld [vmem:[#allocation119_spill] sm:$0xff] }
 0x603   :  { %1975 = vmatpush.msra.mxu0 %v11804_v18  ;;  %1998 = vmatpush.msra.mxu1 %v11805_v44  ;;  %v11849_v18 = vld [vmem:[#allocation120_spill] sm:$0xff]  ;;  %v11850_v44 = vld [vmem:[#allocation125_spill] sm:$0xff] }
 0x604   :  { %2016 = vmatpush.msra.mxu2 %v11806_v6  ;;  %2039 = vmatpush.msra.mxu3 %v11807_v13  ;;  %v11851_v6 = vld [vmem:[#allocation126_spill] sm:$0xff]  ;;  %v11852_v13 = vld [vmem:[#allocation123_spill] sm:$0xff] }
 0x605   :  { %1976 = vmatpush.msra.mxu0 %v11808_v16  ;;  %1999 = vmatpush.msra.mxu1 %v11809_v59  ;;  %v11853_v16 = vld [vmem:[#allocation124_spill] sm:$0xff]  ;;  %v11854_v59 = vld [vmem:[#allocation129_spill] sm:$0xff] }
 0x606   :  { %2017 = vmatpush.msra.mxu2 %v11810_v20  ;;  %2040 = vmatpush.msra.mxu3 %v11811_v62  ;;  %v11855_v20 = vld [vmem:[#allocation130_spill] sm:$0xff]  ;;  %v11856_v62 = vld [vmem:[#allocation127_spill] sm:$0xff] }
 0x607   :  { %1977 = vmatpush.msra.mxu0 %v11812_v32  ;;  %2000 = vmatpush.msra.mxu1 %v11813_v58  ;;  %v11857_v32 = vld [vmem:[#allocation128_spill] sm:$0xff]  ;;  %v11858_v58 = vld [vmem:[#allocation133_spill] sm:$0xff] }
 0x608   :  { %2018 = vmatpush.msra.mxu2 %v11814_v42  ;;  %2041 = vmatpush.msra.mxu3 %v11815_v1  ;;  %v11859_v42 = vld [vmem:[#allocation134_spill] sm:$0xff]  ;;  %v11860_v1 = vld [vmem:[#allocation131_spill] sm:$0xff] }
 0x609   :  { %1978 = vmatpush.msra.mxu0 %v11816_v10  ;;  %2001 = vmatpush.msra.mxu1 %v11817_v36  ;;  %v11861_v10 = vld [vmem:[#allocation132_spill] sm:$0xff]  ;;  %v11862_v36 = vld [vmem:[#allocation135_spill] sm:$0xff] }
 0x60a   :  { %2019 = vmatpush.msra.mxu2 %v11818_v61  ;;  %2042 = vmatpush.msra.mxu3 %v11819_v19  ;;  %v11863_v61 = vld [vmem:[#allocation136_spill] sm:$0xff]  ;;  %v11864_v19 = vld [vmem:[#allocation137_spill] sm:$0xff] }
 0x60b   :  { %1979 = vmatpush.msra.mxu0 %v11820_v15  ;;  %2002 = vmatpush.msra.mxu1 %v11821_v4  ;;  %v11865_v15 = vld [vmem:[#allocation138_spill] sm:$0xff]  ;;  %v11866_v4 = vld [vmem:[#allocation139_spill] sm:$0xff] }
 0x60c   :  { %2020 = vmatpush.msra.mxu2 %v11822_v30  ;;  %2043 = vmatpush.msra.mxu3 %v11823_v29  ;;  %v11867_v30 = vld [vmem:[#allocation140_spill] sm:$0xff]  ;;  %v11868_v29 = vld [vmem:[#allocation141_spill] sm:$0xff] }
 0x60d   :  { %1980 = vmatpush.msra.mxu0 %v11824_v0  ;;  %2003 = vmatpush.msra.mxu1 %v11825_v24  ;;  %v11869_v0 = vld [vmem:[#allocation142_spill] sm:$0xff]  ;;  %v11870_v24 = vld [vmem:[#allocation143_spill] sm:$0xff] }
 0x60e   :  { %2021 = vmatpush.msra.mxu2 %v11826_v9  ;;  %2044 = vmatpush.msra.mxu3 %v11827_v56  ;;  %v11871_v9 = vld [vmem:[#allocation144_spill] sm:$0xff]  ;;  %v11872_v56 = vld [vmem:[#allocation145_spill] sm:$0xff] }
 0x60f   :  { %1981 = vmatpush.msra.mxu0 %v11828_v31  ;;  %2004 = vmatpush.msra.mxu1 %v11829_v28  ;;  %v11873_v31 = vld [vmem:[#allocation146_spill] sm:$0xff]  ;;  %v11874_v28 = vld [vmem:[#allocation147_spill] sm:$0xff] }
 0x610   :  { %2022 = vmatpush.msra.mxu2 %v11830_v23  ;;  %2045 = vmatpush.msra.mxu3 %v11831_v26  ;;  %v11875_v23 = vld [vmem:[#allocation148_spill] sm:$0xff]  ;;  %v11876_v26 = vld [vmem:[#allocation149_spill] sm:$0xff] }
 0x611   :  { %1982 = vmatpush.msra.mxu0 %v11832_v27  ;;  %2005 = vmatpush.msra.mxu1 %v11833_v50  ;;  %v11877_v27 = vld [vmem:[#allocation150_spill] sm:$0xff]  ;;  %v11878_v50 = vld [vmem:[#allocation151_spill] sm:$0xff] }
 0x612   :  { %2023 = vmatpush.msra.mxu2 %v11834_v3  ;;  %2046 = vmatpush.msra.mxu3 %v11835_v55  ;;  %v11879_v3 = vld [vmem:[#allocation152_spill] sm:$0xff]  ;;  %v11880_v55 = vld [vmem:[#allocation153_spill] sm:$0xff] }
 0x613   :  { %1983 = vmatpush.msra.mxu0 %v11836_v57  ;;  %2006 = vmatpush.msra.mxu1 %v11837_v12  ;;  %v11881_v57 = vld [vmem:[#allocation154_spill] sm:$0xff] }
 0x614   :  { %2024 = vmatpush.msra.mxu2 %v11840_v63  ;;  %2047 = vmatpush.msra.mxu3 %v11841_v35 }
 0x615   :  { %2060 = vmatpush.msrb.mxu0 %v11838_v41  ;;  %2083 = vmatpush.msrb.mxu1 %v11839_v60 }
 0x616   :  { %2025 = vmatpush.msra.mxu2 %v11844_v49  ;;  %2048 = vmatpush.msra.mxu3 %v11845_v46 }
 0x617   :  { %2061 = vmatpush.msrb.mxu0 %v11842_v8  ;;  %2084 = vmatpush.msrb.mxu1 %v11843_v39 }
 0x618   :  { %2026 = vmatpush.msra.mxu2 %v11848_v43  ;;  %2049 = vmatpush.msra.mxu3 %v11849_v18  ;;  %v11882_v43 = vld [vmem:[#allocation8_spill] sm:$0xff] }
 0x619   :  { %2062 = vmatpush.msrb.mxu0 %v11846_v40  ;;  %2085 = vmatpush.msrb.mxu1 %v11847_v17 }
 0x61a   :  { %2027 = vmatpush.msra.mxu2 %v11852_v13  ;;  %2050 = vmatpush.msra.mxu3 %v11853_v16 }
 0x61b   :  { %2063 = vmatpush.msrb.mxu0 %v11850_v44  ;;  %2086 = vmatpush.msrb.mxu1 %v11851_v6 }
 0x61c   :  { %2028 = vmatpush.msra.mxu2 %v11856_v62  ;;  %2051 = vmatpush.msra.mxu3 %v11857_v32  ;;  %v11883_v62 = vld [vmem:[#allocation29_spill] sm:$0xff] }
 0x61d   :  { %2064 = vmatpush.msrb.mxu0 %v11854_v59  ;;  %2087 = vmatpush.msrb.mxu1 %v11855_v20 }
 0x61e   :  { %2029 = vmatpush.msra.mxu2 %v11860_v1  ;;  %2052 = vmatpush.msra.mxu3 %v11861_v10 }
 0x61f   :  { %2065 = vmatpush.msrb.mxu0 %v11858_v58  ;;  %2088 = vmatpush.msrb.mxu1 %v11859_v42  ;;  %v11884_v58 = vld [vmem:[#allocation9_spill] sm:$0xff] }
 0x621   :  { %2066 = vmatpush.msrb.mxu0 %v11862_v36  ;;  %2089 = vmatpush.msrb.mxu1 %v11863_v61 }
 0x623   :  { %2067 = vmatpush.msrb.mxu0 %v11864_v19  ;;  %2090 = vmatpush.msrb.mxu1 %v11865_v15 }
 0x625   :  { %2068 = vmatpush.msrb.mxu0 %v11866_v4  ;;  %2091 = vmatpush.msrb.mxu1 %v11867_v30 }
 0x627   :  { %2069 = vmatpush.msrb.mxu0 %v11868_v29  ;;  %2092 = vmatpush.msrb.mxu1 %v11869_v0 }
 0x629   :  { %2070 = vmatpush.msrb.mxu0 %v11870_v24  ;;  %2093 = vmatpush.msrb.mxu1 %v11871_v9 }
 0x62b   :  { %2071 = vmatpush.msrb.mxu0 %v11872_v56  ;;  %2094 = vmatpush.msrb.mxu1 %v11873_v31 }
 0x62d   :  { %2072 = vmatpush.msrb.mxu0 %v11874_v28  ;;  %2095 = vmatpush.msrb.mxu1 %v11875_v23 }
 0x62f   :  { %2073 = vmatpush.msrb.mxu0 %v11876_v26  ;;  %2096 = vmatpush.msrb.mxu1 %v11877_v27 }
 0x631   :  { %2074 = vmatpush.msrb.mxu0 %v11878_v50  ;;  %2097 = vmatpush.msrb.mxu1 %v11879_v3 }
 0x633   :  { %2075 = vmatpush.msrb.mxu0 %v11880_v55  ;;  %2098 = vmatpush.msrb.mxu1 %v11881_v57 }
 0x64d   :  { %v1400_v12 = vpop.f32.mrf.mxu1  ;;  %v1377_v41 = vpop.f32.mrf.mxu0 }
 0x654   :  { %v1423_v60 = vpop.f32.mrf.mxu2  ;;  %v1446_v63 = vpop.f32.mrf.mxu3 }
 0x656   :  { %v1403_v35 = vpop.f32.mrf.mxu1  ;;  %v1380_v8 = vpop.f32.mrf.mxu0 }
 0x65d   :  { %v1426_v39 = vpop.f32.mrf.mxu2  ;;  %v8013_v49 = vpop.f32.mrf.mxu3 }
 0x65f   :  { %v1492_v46 = vpop.f32.mrf.mxu1  ;;  %v1469_v17 = vpop.f32.mrf.mxu0 }
 0x660   :  { %v1493_v40 = vadd.f32 %v1492_v46, %v1377_v41  ;;  %v1340_v41 = vmul.f32 %v7801_v52, %v6573_v48 }
 0x662   :  { %v1590_v18 = vadd.f32 %v1493_v40, %v11882_v43  ;;  %v8040_v46 = vadd.f32 %v1340_v41, %v7816_v33  ;;  %v1341_v40 = vmul.f32 %v7821_v54, %v7625_v2 }
 0x664   :  { %v4135_v44 = vmul.f32 -1.442695, %v1590_v18  ;;  %v1354_v2 = vrot.slane %v8040_v46, 1 }
 0x666   :  { %4461 = vpow2.f32 %v4135_v44  ;;  %v1515_v6 = vpop.f32.mrf.mxu2  ;;  %v1538_v13 = vpop.f32.mrf.mxu3 }
 0x667   :  { %v1516_v16 = vadd.f32 %v1515_v6, %v1400_v12  ;;  %v1539_v59 = vadd.f32 %v1538_v13, %v1423_v60 }
 0x668   :  { %v1495_v20 = vpop.f32.mrf.mxu1  ;;  %v8019_v15 = vpop.f32.mrf.mxu0 }
 0x669   :  { %v1591_v32 = vadd.f32 %v1516_v16, %v11883_v62  ;;  %v1592_v42 = vadd.f32 %v1539_v59, %v11884_v58  ;;  %v1496_v1 = vadd.f32 %v1495_v20, %v1380_v8  ;;  %v8051_v16 = vadd.f32 %v1341_v40, %v7803_v7 }
 0x66b   :  { %v4131_v10 = vmul.f32 -1.442695, %v1591_v32  ;;  %v4133_v36 = vmul.f32 -1.442695, %v1592_v42  ;;  %v1595_v61 = vadd.f32 %v1496_v1, %v11882_v43 }
 0x66c   :  { %v4462_v19 = vpop.eup %4461 }
 0x66d   :  { %v8021_v4 = vadd.f32 1.0, %v4462_v19  ;;  %4463 = vpow2.f32 %v4131_v10  ;;  %v4136_v30 = vmul.f32 -1.442695, %v1595_v61 }
 0x66e   :  { %4465 = vpow2.f32 %v4133_v36 }
 0x66f   :  { %4467 = vrcp.f32 %v8021_v4  ;;  %v1518_v29 = vpop.f32.mrf.mxu2  ;;  %v1541_v0 = vpop.f32.mrf.mxu3  ;;  %v1703_v48 = vand.u32 2147483648, %v8021_v4  ;;  %v1701_v44 = vand.u32 2147483647, %v8021_v4  ;;  %vm1697_vm4 = vweird.f32 %v8021_v4 }
 0x670   :  { %4469 = vpow2.f32 %v4136_v30  ;;  %v1519_v24 = vadd.f32 %v1518_v29, %v1403_v35  ;;  %v1542_v9 = vadd.f32 %v1541_v0, %v1426_v39 }
 0x671   :  { %v1584_v56 = vpop.f32.mrf.mxu1  ;;  %v1561_v35 = vpop.f32.mrf.mxu0  ;;  %v1704_v32 = vor.u32 1.1754944e-38, %v1703_v48  ;;  %vm8062_vm7 = vcmp.eq.f32.partialorder %v1701_v44, 8.507059e+37 }
 0x672   :  { %v1596_v31 = vadd.f32 %v1519_v24, %v11883_v62  ;;  %v1585_v28 = vadd.f32 %v1584_v56, %v1469_v17  ;;  %v1597_v26 = vadd.f32 %v1542_v9, %v11884_v58  ;;  %v1562_v52 = vadd.f32 %v1561_v35, %v1446_v63 }
 0x673   :  { %v4464_v23 = vpop.eup %4463 }
 0x674   :  { %v4466_v27 = vpop.eup %4465  ;;  %v8026_v50 = vadd.f32 1.0, %v4464_v23  ;;  %v4132_v57 = vmul.f32 -1.442695, %v1596_v31  ;;  %v1594_v8 = vadd.f32 %v1585_v28, %v6362_v47  ;;  %v4134_v39 = vmul.f32 -1.442695, %v1597_v26 }
 0x675   :  { %v8028_v3 = vpop.eup %4467  ;;  %v8030_v55 = vadd.f32 1.0, %v4466_v27  ;;  %v1593_v7 = vadd.f32 %v1562_v52, %v6359_v45 }
 0x676   :  { %v4470_v12 = vpop.eup %4469  ;;  %v1693_v60 = vmul.f32 %v8028_v3, %v8021_v4  ;;  %4471 = vrcp.f32 %v8026_v50  ;;  %v4137_v6 = vmul.f32 -1.442695, %v1594_v8  ;;  %v1617_v13 = vand.u32 2147483647, %v8026_v50 }
 0x677   :  { %4473 = vrcp.f32 %v8030_v55  ;;  %v8044_v18 = vadd.f32 1.0, %v4470_v12  ;;  %v1619_v63 = vand.u32 2147483648, %v8026_v50  ;;  %vm1613_vm5 = vweird.f32 %v8026_v50 }
 0x678   :  { %v1694_v17 = vsub.f32 1.0, %v1693_v60  ;;  %4475 = vpow2.f32 %v4132_v57  ;;  %vm1653_vm6 = vweird.f32 %v8030_v55  ;;  %vm8066_vm8 = vcmp.eq.f32.partialorder %v1617_v13, 8.507059e+37 }
 0x679   :  { %4477 = vrcp.f32 %v8044_v18  ;;  %v1587_v42 = vpop.f32.mrf.mxu1  ;;  %v1657_v30 = vand.u32 2147483647, %v8030_v55  ;;  %vm1698_vm9 = vweird.f32 %v8028_v3  ;;  %v1564_v56 = vpop.f32.mrf.mxu0  ;;  %v1620_v26 = vor.u32 1.1754944e-38, %v1619_v63 }
 0x67a   :  { %4479 = vpow2.f32 %v4134_v39  ;;  %v1695_v54 = vmul.f32 %v8028_v3, %v1694_v17  ;;  %v1588_v31 = vadd.f32 %v1587_v42, %v8019_v15  ;;  %v1659_v27 = vand.u32 2147483648, %v8030_v55  ;;  %vm8088_vm12 = vmor %vm1697_vm4, %vm1698_vm9 }
 0x67b   :  { %4481 = vpow2.f32 %v4137_v6  ;;  %v1565_v8 = vadd.f32 %v1564_v56, %v8013_v49  ;;  %vm1658_vm15 = vcmp.eq.f32.partialorder %v1657_v30, 8.507059e+37  ;;  %v1718_v49 = vand.u32 2147483648, %v8044_v18 }
 0x67c   :  { %v4472_v33 = vpop.eup %4471  ;;  %v1696_v9 = vadd.f32 %v8028_v3, %v1695_v54  ;;  %v1599_v48 = vadd.f32 %v1588_v31, %v6362_v47  ;;  %v1660_v4 = vor.u32 1.1754944e-38, %v1659_v27  ;;  %vm1712_vm1 = vweird.f32 %v8044_v18 }
 0x67d   :  { %v4474_v59 = vpop.eup %4473  ;;  %v1609_v20 = vmul.f32 %v4472_v33, %v8026_v50  ;;  %vm1614_vm10 = vweird.f32 %v4472_v33 }
 0x67e   :  { %v1649_v1 = vmul.f32 %v4474_v59, %v8030_v55  ;;  %v4476_v36 = vpop.eup %4475  ;;  %vm1654_vm11 = vweird.f32 %v4474_v59  ;;  %vm1615_vm13 = vmor %vm1613_vm5, %vm1614_vm10  ;;  %v1700_v40 = vsel %vm8088_vm12, %v8028_v3, %v1696_v9  ;;  %v1598_v55 = vadd.f32 %v1565_v8, %v6359_v45 }
 0x67f   :  { %v1610_v61 = vsub.f32 1.0, %v1609_v20  ;;  %v8072_v29 = vpop.eup %4477  ;;  %v8074_v24 = vadd.f32 1.0, %v4476_v36  ;;  %vm1655_vm14 = vmor %vm1653_vm6, %vm1654_vm11  ;;  %v1705_v13 = vsel %vm8062_vm7, %v1704_v32, %v1700_v40  ;;  %v1719_v9 = vor.u32 1.1754944e-38, %v1718_v49 }
 0x680   :  { %v1650_v0 = vsub.f32 1.0, %v1649_v1  ;;  %v4480_v28 = vpop.eup %4479  ;;  %v1708_v12 = vmul.f32 %v8072_v29, %v8044_v18  ;;  %v1355_v1 = vrot.slane %v8051_v16, 1  ;;  %vm1713_vm4 = vweird.f32 %v8072_v29 }
 0x681   :  { %v1611_v23 = vmul.f32 %v4472_v33, %v1610_v61  ;;  %4483 = vrcp.f32 %v8074_v24  ;;  %v4482_v41 = vpop.eup %4481  ;;  %v8082_v35 = vadd.f32 1.0, %v4480_v28  ;;  %v1632_v36 = vand.u32 2147483647, %v8074_v24  ;;  %vm8147_vm10 = vmor %vm1712_vm1, %vm1713_vm4 }
 0x682   :  { %v1651_v57 = vmul.f32 %v4474_v59, %v1650_v0  ;;  %4485 = vtanh.f32 %v1593_v7  ;;  %v8098_v17 = vadd.f32 1.0, %v4482_v41  ;;  %v1709_v50 = vsub.f32 1.0, %v1708_v12 }
 0x683   :  { %v1612_v60 = vadd.f32 %v4472_v33, %v1611_v23  ;;  %4487 = vrcp.f32 %v8082_v35  ;;  %v1634_v32 = vand.u32 2147483648, %v8074_v24  ;;  %vm1628_vm3 = vweird.f32 %v8074_v24 }
 0x684   :  { %v1652_v39 = vadd.f32 %v4474_v59, %v1651_v57  ;;  %4489 = vrcp.f32 %v8098_v17  ;;  %v1710_v19 = vmul.f32 %v8072_v29, %v1709_v50  ;;  %vm8130_vm7 = vcmp.eq.f32.partialorder %v1632_v36, 8.507059e+37 }
 0x685   :  { %v1616_v52 = vsel %vm1615_vm13, %v4472_v33, %v1612_v60  ;;  %v1716_v33 = vand.u32 2147483647, %v8044_v18  ;;  %v1635_v12 = vor.u32 1.1754944e-38, %v1634_v32  ;;  %v1672_v8 = vand.u32 2147483647, %v8082_v35 }
 0x686   :  { %v1656_v44 = vsel %vm1655_vm14, %v4474_v59, %v1652_v39  ;;  %v1621_v3 = vsel %vm8066_vm8, %v1620_v26, %v1616_v52  ;;  %v4138_v59 = vmul.f32 -1.442695, %v1599_v48  ;;  %v1711_v60 = vadd.f32 %v8072_v29, %v1710_v19 }
 0x687   :  { %v1661_v6 = vsel %vm1658_vm15, %v1660_v4, %v1656_v44  ;;  %v4484_v54 = vpop.eup %4483  ;;  %v1638_v20 = vmul.f32 %v1621_v3, %v8040_v46  ;;  %vm8126_vm5 = vcmp.eq.f32.partialorder %v1716_v33, 8.507059e+37  ;;  %v1674_v39 = vand.u32 2147483648, %v8082_v35 }
 0x688   :  { %v1678_v63 = vmul.f32 %v1661_v6, %v1354_v2  ;;  %v4486_v42 = vpop.eup %4485  ;;  %v1624_v7 = vmul.f32 %v4484_v54, %v8074_v24  ;;  %4491 = vpow2.f32 %v4138_v59  ;;  %vm1629_vm6 = vweird.f32 %v4484_v54 }
 0x689   :  { %v1722_v61 = vmul.f32 %v4486_v42, %v1705_v13  ;;  %v4488_v30 = vpop.eup %4487  ;;  %4493 = vtanh.f32 %v1598_v55  ;;  %vm1630_vm8 = vmor %vm1628_vm3, %vm1629_vm6  ;;  %v1743_v49 = vand.u32 2147483647, %v8098_v17  ;;  %v1745_v50 = vand.u32 2147483648, %v8098_v17 }
 0x68a   :  { %v1680_v10 = vadd.f32 %v1678_v63, %v1638_v20  ;;  %v1625_v0 = vsub.f32 1.0, %v1624_v7  ;;  %v4490_v56 = vpop.eup %4489  ;;  %v1664_v31 = vmul.f32 %v4488_v30, %v8082_v35  ;;  %vm1669_vm9 = vweird.f32 %v4488_v30 }
 0x68b   :  { %v1735_v57 = vmul.f32 %v4490_v56, %v8098_v17  ;;  %vm1740_vm11 = vweird.f32 %v4490_v56  ;;  %vm1668_vm12 = vweird.f32 %v8082_v35  ;;  %v1675_v20 = vor.u32 1.1754944e-38, %v1674_v39 }
 0x68c   :  { %v8123_v28 = vadd.f32 %v1722_v61, %v1680_v10  ;;  %v1626_v26 = vmul.f32 %v4484_v54, %v1625_v0  ;;  %v1665_v41 = vsub.f32 1.0, %v1664_v31  ;;  %vm1670_vm13 = vmor %vm1668_vm12, %vm1669_vm9  ;;  %vm1739_vm14 = vweird.f32 %v8098_v17 }
 0x68d   :  { %v1736_v40 = vsub.f32 1.0, %v1735_v57  ;;  %vm1673_vm15 = vcmp.eq.f32.partialorder %v1672_v8, 8.507059e+37  ;;  %vm1741_vm1 = vmor %vm1739_vm14, %vm1740_vm11  ;;  %v1746_v35 = vor.u32 1.1754944e-38, %v1745_v50  ;;  %vm1744_vm3 = vcmp.eq.f32.partialorder %v1743_v49, 8.507059e+37 }
 0x68e   :  { %4495 = vtanh.f32 %v8123_v28  ;;  %v1627_v15 = vadd.f32 %v4484_v54, %v1626_v26  ;;  %v4492_v48 = vpop.eup %4491  ;;  %v1666_v4 = vmul.f32 %v4488_v30, %v1665_v41 }
 0x68f   :  { %v4494_v52 = vpop.eup %4493  ;;  %v1733_v6 = vadd.f32 1.0, %v4492_v48  ;;  %v1737_v13 = vmul.f32 %v4490_v56, %v1736_v40  ;;  %v1774_v40 = vadd.s32 3, %v6528_v37 }
 0x690   :  { %v1631_v44 = vsel %vm1630_vm8, %v4484_v54, %v1627_v15  ;;  %v1667_v24 = vadd.f32 %v4488_v30, %v1666_v4  ;;  %v1715_v54 = vsel %vm8147_vm10, %v8072_v29, %v1711_v60  ;;  %v8175_v15 = vld [vmem:[%s10988_s6] ss:$0 sm:$0xff] }
 0x691   :  { %v1636_v55 = vsel %vm8130_vm7, %v1635_v12, %v1631_v44  ;;  %4497 = vrcp.f32 %v1733_v6  ;;  %v1738_v18 = vadd.f32 %v4490_v56, %v1737_v13  ;;  %v1720_v7 = vsel %vm8126_vm5, %v1719_v9, %v1715_v54 }
 0x692   :  { %v1639_v33 = vmul.f32 %v1636_v55, %v8051_v16  ;;  %v1671_v59 = vsel %vm1670_vm13, %v4488_v30, %v1667_v24  ;;  %v1723_v61 = vmul.f32 %v4494_v52, %v1720_v7  ;;  %v1760_v9 = vand.u32 2147483648, %v1733_v6  ;;  %v8190_v24 = vld [vmem:[%s10984_s2] sm:$0x3] }
 0x693   :  { %v1676_v42 = vsel %vm1673_vm15, %v1675_v20, %v1671_v59  ;;  %v1742_v36 = vsel %vm1741_vm1, %v4490_v56, %v1738_v18  ;;  %v1758_v26 = vand.u32 2147483647, %v1733_v6  ;;  %vm1754_vm5 = vweird.f32 %v1733_v6 }
 0x694   :  { %v4496_v63 = vpop.eup %4495  ;;  %v1679_v29 = vmul.f32 %v1676_v42, %v1355_v1  ;;  %v1747_v32 = vsel %vm1744_vm3, %v1746_v35, %v1742_v36  ;;  %v1761_v57 = vor.u32 1.1754944e-38, %v1760_v9  ;;  %vm1775_vm8 = vcmp.lt.s32.totalorder %v1774_v40, %v6531_v5 }
 0x695   :  { %v8163_v10 = vmul.f32 %v4496_v63, %v1747_v32  ;;  %vm1759_vm7 = vcmp.eq.f32.partialorder %v1758_v26, 8.507059e+37  ;;  %vm1864_vm10 = vcmp.gt.s32.totalorder %v8190_v24, 3 }
 0x696   :  { %v1681_v17 = vadd.f32 %v1679_v29, %v1639_v33  ;;  %v4143_v55 = vsel %vm1864_vm10, 1.0, %v11735_v53 }
 0x697   :  { %v4498_v19 = vpop.eup %4497  ;;  %v1768_v30 = vmul.f32 %v7763_v51, %v8163_v10  ;;  %v1868_v54 = vrot.slane %v4143_v55, 1  ;;  %v1870_v20 = vperm.slane %v4143_v55, 0 }
 0x698   :  { %v8167_v0 = vadd.f32 %v1723_v61, %v1681_v17  ;;  %v1750_v31 = vmul.f32 %v4498_v19, %v1733_v6  ;;  %vm1755_vm4 = vweird.f32 %v4498_v19 }
 0x699   :  { %1770 = vadd.xlane.f32.xlu2 %v1768_v30  ;;  %vm1756_vm6 = vmor %vm1754_vm5, %vm1755_vm4  ;;  %v1871_v18 = vperm.slane %v1868_v54, 0 }
 0x69a   :  { %v1751_v23 = vsub.f32 1.0, %v1750_v31  ;;  %4499 = vtanh.f32 %v8167_v0 }
 0x69b   :  { %v4283_v63 = vpack.i.bf16 %v1871_v18, %v1870_v20 }
 0x69c   :  { %v1752_v56 = vmul.f32 %v4498_v19, %v1751_v23  ;;  %v1882_v23 = vsub.f32 1.0, %v4143_v55 }
 0x69e   :  { %v1753_v27 = vadd.f32 %v4498_v19, %v1752_v56  ;;  %v1886_v9 = vperm.slane %v1882_v23, 0  ;;  %v1883_v56 = vsub.f32 1.0, %v1868_v54  ;;  %v8249_v23 = vld [vmem:[%s10985_s3 + $0x278] sm:$0xff] }
 0x6a0   :  { %v4500_v12 = vpop.eup %4499  ;;  %v1757_v41 = vsel %vm1756_vm6, %v4498_v19, %v1753_v27  ;;  %v1887_v26 = vperm.slane %v1883_v56, 0 }
 0x6a1   :  { %v1762_v60 = vsel %vm1759_vm7, %v1761_v57, %v1757_v41 }
 0x6a2   :  { %v8170_v51 = vmul.f32 %v4500_v12, %v1762_v60 }
 0x6a4   :  { %v1769_v8 = vmul.f32 %v8175_v15, %v8170_v51 }
 0x6a6   :  { %1772 = vadd.xlane.f32.xlu0 %v1769_v8 }
 0x70c   :  { %v1771_v39 = vpop.xlane.xlu2 %1770 }
 0x70d   :  { %v1778_v4 = vperm.slane %v1771_v39, %v6528_v37 }
 0x719   :  { %v1773_v48 = vpop.xlane.xlu0 %1772 }
 0x71a   :  { %v1779_v49 = vperm.slane %v1773_v48, %v6528_v37 }
 0x71c   :  { %v1780_v50 = vsel %vm655_vm0, %v1779_v49, %v1778_v4 }
 0x71d   :  { %v1782_v52 = vsel %vm1775_vm8, %v1780_v50, -1e+30 }
 0x71e   :  { %v1783_v44 = vsel %vm659_vm2, %v1782_v52, -inf }
 0x71f   :  { %1784 = vmax.xlane.f32.xlu1 %v1783_v44 }
 0x792   :  { %v1785_v3 = vpop.xlane.xlu1 %1784 }
 0x793   :  { %vm1786_vm9 = vcmp.eq.f32.partialorder %v1782_v52, %v1785_v3 }
 0x794   :  { %v1787_v6 = vsel %vm1786_vm9, %v6545_v25, 8.0 }
 0x795   :  { %v1788_v13 = vsel %vm659_vm2, %v1787_v6, inf }
 0x796   :  { %1789 = vmin.xlane.f32.xlu2 %v1788_v13 }
 0x7ae   :  { %4284 = vperm.xlu2 %4282, %v4283_v63  }
 0x7b6   :  { %4295 = vset.pattern.permute.xlu2 %v6540_v21 }
 0x809   :  { %v1790_v33 = vpop.xlane.xlu2 %1789 }
 0x80a   :  { %vm1791_vm11 = vcmp.eq.f32.partialorder %v6545_v25, %v1790_v33  ;;  %vm1794_vm12 = vcmp.lt.f32.partialorder %v6545_v25, %v1790_v33  ;;  %vm1797_vm13 = vcmp.gt.f32.partialorder %v6545_v25, %v1790_v33 }
 0x80b   :  { %v4139_v59 = vsel %vm1791_vm11, 1.0, %v11735_v53  ;;  %v4140_v35 = vsel %vm1794_vm12, 1.0, %v11735_v53  ;;  %v4141_v42 = vsel %vm1797_vm13, 1.0, %v11735_v53 }
 0x80c   :  { %v1816_v7 = vperm.slane %v4140_v35, 0  ;;  %v1823_v36 = vperm.slane %v4140_v35, 1  ;;  %v1834_v29 = vperm.slane %v4141_v42, 0  ;;  %v1841_v32 = vperm.slane %v4141_v42, 1  ;;  %4142 = vst [vmem:[%s10991_s9 + $0x4] sm:$0x3] %v4139_v59 }
 0x80d   :  { %v1807_v17 = vperm.slane %v4139_v59, 1  ;;  %v1800_v61 = vperm.slane %v4139_v59, 0 }
 0x80e   :  { %v4296_v19 = vpack.i.bf16 %v1841_v32, %v1823_v36 }
 0x80f   :  { %v4289_v30 = vpack.i.bf16 %v1807_v17, %v1834_v29  ;;  %v4277_v31 = vpack.i.bf16 %v1816_v7, %v1800_v61 }
 0x810   :  { %4297 = vperm.xlu2 %4295, %v4296_v19  }
 0x811   :  { %4290 = vperm.xlu1 %4288, %v4289_v30   ;;  %4278 = vperm.xlu0 %4276, %v4277_v31   ;;  %v4285_v27 = vpop.permute.xlu2 %4284  ;;  %v8243_v31 = vld [vmem:[%s10985_s3 + $0x270] sm:$0xff] }
 0x812   :  { %v4287_v33 = vunpack.i.h.bf16 %v4285_v27 }
 0x818   :  { %4312 = vset.pattern.permute.xlu2 %v11736_v22 }
 0x819   :  { %4294 = vset.pattern.permute.xlu1 %v11736_v22 }
 0x81a   :  { %1889 = vperm.xlu1 %4294, %v1886_v9   ;;  %v8255_v9 = vld [vmem:[%s10986_s4 + $0x258] sm:$0xff] }
 0x822   :  { %1893 = vperm.xlu1 %4294, %v1887_v26   ;;  %v8269_v26 = vld [vmem:[%s10985_s3 + $0x248] sm:$0xff] }
 0x82a   :  { %4306 = vset.pattern.permute.xlu1 %v6540_v21 }
 0x86a   :  { %v4298_v57 = vpop.permute.xlu2 %4297 }
 0x86b   :  { %v4299_v12 = vunpack.i.l.bf16 %v4298_v57  ;;  %v4300_v8 = vunpack.i.h.bf16 %v4298_v57  ;;  %v8281_v57 = vld [vmem:[%s10986_s4 + $0x230] sm:$0xff] }
 0x86d   :  { %v1855_v49 = vmul.f32 %v4299_v12, %v8051_v16  ;;  %v1859_v13 = vmul.f32 %v4300_v8, %v1355_v1  ;;  %v1831_v59 = vmul.f32 %v4299_v12, %v7834_v14  ;;  %v8287_v12 = vld [vmem:[%s10986_s4 + $0x238] sm:$0xff] }
 0x883   :  { %v4291_v41 = vpop.permute.xlu1 %4290  ;;  %v4279_v60 = vpop.permute.xlu0 %4278 }
 0x884   :  { %v4293_v39 = vunpack.i.h.bf16 %v4291_v41  ;;  %v4281_v40 = vunpack.i.h.bf16 %v4279_v60  ;;  %v4280_v48 = vunpack.i.l.bf16 %v4279_v60  ;;  %v4292_v4 = vunpack.i.l.bf16 %v4291_v41  ;;  %v8293_v41 = vld [vmem:[%s10985_s3 + $0x220] sm:$0xff]  ;;  %v8299_v60 = vld [vmem:[%s10985_s3 + $0x228] sm:$0xff] }
 0x886   :  { %v1853_v50 = vmul.f32 %v4293_v39, %v8167_v0  ;;  %v1830_v52 = vmul.f32 %v4281_v40, %v7819_v34  ;;  %v1854_v44 = vmul.f32 %v4281_v40, %v8040_v46  ;;  %v1814_v3 = vmul.f32 %v4280_v48, %v8163_v10  ;;  %v8314_v40 = vld [vmem:[%s10986_s4 + $0x210] sm:$0xff] }
 0x887   :  { %v1852_v6 = vmul.f32 %v4280_v48, %v8123_v28  ;;  %v1815_v55 = vmul.f32 %v4293_v39, %v8170_v51  ;;  %v1848_v20 = vmul.f32 %v4292_v4, %v7824_v38  ;;  %v1858_v18 = vmul.f32 %v4292_v4, %v1354_v2  ;;  %v8308_v39 = vld [vmem:[%s10986_s4 + $0x208] sm:$0xff]  ;;  %11898 = vst [vmem:[#allocation10_spill] sm:$0xff] %v8314_v40  ;;  %v8320_v48 = vld [vmem:[%s10985_s3 + $0x1f8] sm:$0xff]  ;;  %v8326_v4 = vld [vmem:[%s10985_s3 + $0x200] sm:$0xff] }
 0x888   :  { %v1857_v54 = vadd.f32 %v1855_v49, %v1853_v50  ;;  %v1832_v0 = vadd.f32 %v1830_v52, %v1814_v3  ;;  %v4286_v10 = vunpack.i.l.bf16 %v4285_v27  ;;  %v1849_v2 = vmul.f32 %v4300_v8, %v7845_v11  ;;  %v8275_v27 = vld [vmem:[%s10985_s3 + $0x250] sm:$0xff]  ;;  %11897 = vst [vmem:[#allocation32_spill] sm:$0xff] %v8308_v39  ;;  %v8342_v50 = vld [vmem:[%s10985_s3 + $0x1d8] sm:$0xff]  ;;  %v8348_v52 = vld [vmem:[%s10986_s4 + $0x1e0] sm:$0xff] }
 0x889   :  { %v1856_v63 = vadd.f32 %v1854_v44, %v1852_v6  ;;  %v1833_v7 = vadd.f32 %v1831_v59, %v1815_v55  ;;  %11899 = vst [vmem:[#allocation33_spill] sm:$0xff] %v8320_v48  ;;  %v8336_v49 = vld [vmem:[%s10985_s3 + $0x1d0] sm:$0xff]  ;;  %v8354_v44 = vld [vmem:[%s10986_s4 + $0x1e8] sm:$0xff]  ;;  %v8378_v55 = vld [vmem:[%s10986_s4 + $0x1c0] sm:$0xff] }
 0x88a   :  { %v1861_v35 = vadd.f32 %v1859_v13, %v1857_v54  ;;  %v1850_v42 = vadd.f32 %v1848_v20, %v1832_v0  ;;  %11900 = vst [vmem:[#allocation11_spill] sm:$0xff] %v8326_v4  ;;  %v8360_v3 = vld [vmem:[%s10985_s3 + $0x1a8] sm:$0xff]  ;;  %v8366_v6 = vld [vmem:[%s10985_s3 + $0x1b0] sm:$0xff]  ;;  %v8372_v13 = vld [vmem:[%s10986_s4 + $0x1b8] sm:$0xff] }
 0x88b   :  { %v1860_v28 = vadd.f32 %v1858_v18, %v1856_v63  ;;  %v1851_v30 = vadd.f32 %v1849_v2, %v1833_v7  ;;  %11901 = vst [vmem:[#allocation36_spill] sm:$0xff] %v8336_v49  ;;  %v8384_v54 = vld [vmem:[%s10985_s3 + $0x180] sm:$0xff]  ;;  %v8390_v20 = vld [vmem:[%s10985_s3 + $0x188] sm:$0xff]  ;;  %v8396_v18 = vld [vmem:[%s10986_s4 + $0x190] sm:$0xff] }
 0x88c   :  { %v1890_v36 = vpop.permute.xlu1 %1889  ;;  %v8220_v1 = vmul.f32 %v4287_v33, %v1861_v35  ;;  %v1880_v51 = vmul.f32 %v4286_v10, %v1850_v42  ;;  %11902 = vst [vmem:[#allocation12_spill] sm:$0xff] %v8342_v50  ;;  %v8402_v0 = vld [vmem:[%s10986_s4 + $0x198] sm:$0xff]  ;;  %v8424_v59 = vld [vmem:[%s10985_s3 + $0x130] sm:$0xff]  ;;  %v8490_v2 = vld [vmem:[%s10986_s4 + $0x120] sm:$0xff] }
 0x88d   :  { %v1896_v29 = vmul.f32 %v1890_v36, %v7819_v34  ;;  %v1900_v38 = vmul.f32 %v4286_v10, %v1860_v28  ;;  %v1902_v32 = vmul.f32 %v1890_v36, %v8040_v46  ;;  %v1881_v46 = vmul.f32 %v4287_v33, %v1851_v30  ;;  %11903 = vst [vmem:[#allocation37_spill] sm:$0xff] %v8348_v52  ;;  %v8408_v63 = vld [vmem:[%s10985_s3 + $0x158] sm:$0xff]  ;;  %v8414_v33 = vld [vmem:[%s10985_s3 + $0x160] sm:$0xff]  ;;  %v8436_v10 = vld [vmem:[%s10986_s4 + $0x168] sm:$0xff] }
 0x88e   :  { %11904 = vst [vmem:[#allocation13_spill] sm:$0xff] %v8354_v44  ;;  %v8430_v35 = vld [vmem:[%s10985_s3 + $0x138] sm:$0xff]  ;;  %v8442_v42 = vld [vmem:[%s10986_s4 + $0x170] sm:$0xff]  ;;  %v8448_v28 = vld [vmem:[%s10985_s3 + $0x108] sm:$0xff] }
 0x88f   :  { %v8225_v17 = vadd.f32 %v1896_v29, %v1880_v51  ;;  %v8227_v61 = vadd.f32 %v1902_v32, %v1900_v38  ;;  %11905 = vst [vmem:[#allocation40_spill] sm:$0xff] %v8360_v3  ;;  %v8454_v7 = vld [vmem:[%s10985_s3 + $0x110] sm:$0xff]  ;;  %v8460_v36 = vld [vmem:[%s10986_s4 + $0x140] sm:$0xff]  ;;  %v8466_v51 = vld [vmem:[%s10986_s4 + $0x148] sm:$0xff] }
 0x890   :  { %11906 = vst [vmem:[#allocation14_spill] sm:$0xff] %v8366_v6  ;;  %v8472_v29 = vld [vmem:[%s10985_s3 + $0xe0] sm:$0xff]  ;;  %v8478_v38 = vld [vmem:[%s10985_s3 + $0xe8] sm:$0xff]  ;;  %v8484_v32 = vld [vmem:[%s10986_s4 + $0x118] sm:$0xff] }
 0x891   :  { %v8230_v19 = vrot.slane %v8225_v17, 1  ;;  %11907 = vst [vmem:[#allocation41_spill] sm:$0xff] %v8372_v13  ;;  %v8496_v30 = vld [vmem:[%s10985_s3 + $0xb8] sm:$0xff] }
 0x892   :  { %11908 = vst [vmem:[#allocation15_spill] sm:$0xff] %v8378_v55 }
 0x893   :  { %1938 = vmatmul.f32.vlgmr.msrb.gmra.mxu2 %v8230_v19  ;;  %1961 = vmatmul.f32.vlgmr.msrb.gmra.mxu3 %v8230_v19  ;;  %11909 = vst [vmem:[#allocation45_spill] sm:$0xff] %v8384_v54 }
 0x894   :  { %1984 = vmatmul.f32.vlgmr.msra.gmra.mxu0 %v8230_v19  ;;  %2007 = vmatmul.f32.vlgmr.msra.gmra.mxu1 %v8230_v19  ;;  %v8236_v34 = vpop.permute.xlu1 %1893  ;;  %11910 = vst [vmem:[#allocation17_spill] sm:$0xff] %v8390_v20 }
 0x895   :  { %v1897_v11 = vmul.f32 %v8236_v34, %v7834_v14  ;;  %2106 = vmatpush.msrb.mxu2 %v8243_v31  ;;  %2129 = vmatpush.msrb.mxu3 %v8249_v23  ;;  %v8261_v14 = vld [vmem:[%s10986_s4 + $0x260] sm:$0xff]  ;;  %11911 = vst [vmem:[#allocation44_spill] sm:$0xff] %v8396_v18 }
 0x896   :  { %2484 = vmatpush.msra.mxu0 %v8255_v9  ;;  %2507 = vmatpush.msra.mxu1 %v8261_v14  ;;  %11912 = vst [vmem:[#allocation16_spill] sm:$0xff] %v8402_v0 }
 0x897   :  { %v8264_v56 = vadd.f32 %v1897_v11, %v1881_v46  ;;  %2107 = vmatpush.msrb.mxu2 %v8269_v26  ;;  %2130 = vmatpush.msrb.mxu3 %v8275_v27  ;;  %11913 = vst [vmem:[#allocation49_spill] sm:$0xff] %v8408_v63  ;;  %v8502_v46 = vld [vmem:[%s10985_s3 + $0xc0] sm:$0xff]  ;;  %v8512_v11 = vld [vmem:[%s10985_s3 + $0x90] sm:$0xff] }
 0x898   :  { %2485 = vmatpush.msra.mxu0 %v8281_v57  ;;  %2508 = vmatpush.msra.mxu1 %v8287_v12  ;;  %11914 = vst [vmem:[#allocation19_spill] sm:$0xff] %v8414_v33 }
 0x899   :  { %2108 = vmatpush.msrb.mxu2 %v8293_v41  ;;  %2131 = vmatpush.msrb.mxu3 %v8299_v60  ;;  %v8303_v8 = vrot.slane %v8264_v56, 1  ;;  %11915 = vst [vmem:[#allocation48_spill] sm:$0xff] %v8424_v59 }
 0x89a   :  { %2486 = vmatpush.msra.mxu0 %v8308_v39  ;;  %2509 = vmatpush.msra.mxu1 %v8314_v40  ;;  %11916 = vst [vmem:[#allocation18_spill] sm:$0xff] %v8430_v35 }
 0x89b   :  { %2109 = vmatpush.msrb.mxu2 %v8320_v48  ;;  %2132 = vmatpush.msrb.mxu3 %v8326_v4  ;;  %11917 = vst [vmem:[#allocation53_spill] sm:$0xff] %v8436_v10 }
 0x89c   :  { %1941 = vmatmul.f32.gmra.mxu2 %v8303_v8  ;;  %1964 = vmatmul.f32.gmra.mxu3 %v8303_v8  ;;  %11918 = vst [vmem:[#allocation21_spill] sm:$0xff] %v8442_v42 }
 0x89d   :  { %1987 = vmatmul.f32.gmra.mxu0 %v8303_v8  ;;  %2010 = vmatmul.f32.gmra.mxu1 %v8303_v8  ;;  %11919 = vst [vmem:[#allocation52_spill] sm:$0xff] %v8448_v28 }
 0x89e   :  { %2110 = vmatpush.msrb.mxu2 %v8336_v49  ;;  %2133 = vmatpush.msrb.mxu3 %v8342_v50  ;;  %11920 = vst [vmem:[#allocation20_spill] sm:$0xff] %v8454_v7 }
 0x89f   :  { %2487 = vmatpush.msra.mxu0 %v8348_v52  ;;  %2510 = vmatpush.msra.mxu1 %v8354_v44  ;;  %11921 = vst [vmem:[#allocation57_spill] sm:$0xff] %v8460_v36 }
 0x8a0   :  { %2111 = vmatpush.msrb.mxu2 %v8360_v3  ;;  %2134 = vmatpush.msrb.mxu3 %v8366_v6  ;;  %11922 = vst [vmem:[#allocation23_spill] sm:$0xff] %v8466_v51 }
 0x8a1   :  { %2488 = vmatpush.msra.mxu0 %v8372_v13  ;;  %2511 = vmatpush.msra.mxu1 %v8378_v55  ;;  %11923 = vst [vmem:[#allocation60_spill] sm:$0xff] %v8472_v29 }
 0x8a2   :  { %2112 = vmatpush.msrb.mxu2 %v8384_v54  ;;  %2135 = vmatpush.msrb.mxu3 %v8390_v20  ;;  %11924 = vst [vmem:[#allocation24_spill] sm:$0xff] %v8478_v38 }
 0x8a3   :  { %2489 = vmatpush.msra.mxu0 %v8396_v18  ;;  %2512 = vmatpush.msra.mxu1 %v8402_v0  ;;  %11925 = vst [vmem:[#allocation56_spill] sm:$0xff] %v8484_v32 }
 0x8a4   :  { %2113 = vmatpush.msrb.mxu2 %v8408_v63  ;;  %2136 = vmatpush.msrb.mxu3 %v8414_v33  ;;  %11926 = vst [vmem:[#allocation22_spill] sm:$0xff] %v8490_v2 }
 0x8a5   :  { %2030 = vmatmul.f32.vlgmr.msra.gmra.mxu2 %v8230_v19  ;;  %2053 = vmatmul.f32.vlgmr.msra.gmra.mxu3 %v8225_v17  ;;  %11927 = vst [vmem:[#allocation61_spill] sm:$0xff] %v8496_v30 }
 0x8a6   :  { %2076 = vmatmul.f32.vlgmr.msrb.gmra.mxu0 %v8225_v17  ;;  %2099 = vmatmul.f32.vlgmr.msrb.gmra.mxu1 %v8225_v17  ;;  %11928 = vst [vmem:[#allocation27_spill] sm:$0xff] %v8502_v46 }
 0x8a7   :  { %2114 = vmatpush.msrb.mxu2 %v8424_v59  ;;  %2137 = vmatpush.msrb.mxu3 %v8430_v35  ;;  %11929 = vst [vmem:[#allocation25_spill] sm:$0xff] %v8512_v11 }
 0x8a8   :  { %2490 = vmatpush.msra.mxu0 %v8436_v10  ;;  %2513 = vmatpush.msra.mxu1 %v8442_v42 }
 0x8a9   :  { %2115 = vmatpush.msrb.mxu2 %v8448_v28  ;;  %2138 = vmatpush.msrb.mxu3 %v8454_v7 }
 0x8aa   :  { %2491 = vmatpush.msra.mxu0 %v8460_v36  ;;  %2514 = vmatpush.msra.mxu1 %v8466_v51 }
 0x8ab   :  { %2116 = vmatpush.msrb.mxu2 %v8472_v29  ;;  %2139 = vmatpush.msrb.mxu3 %v8478_v38 }
 0x8ac   :  { %2492 = vmatpush.msra.mxu0 %v8484_v32  ;;  %2515 = vmatpush.msra.mxu1 %v8490_v2  ;;  %v8530_v2 = vld [vmem:[%s10986_s4 + $0xf8] sm:$0xff] }
 0x8ad   :  { %2117 = vmatpush.msrb.mxu2 %v8496_v30  ;;  %2140 = vmatpush.msrb.mxu3 %v8502_v46  ;;  %v8518_v30 = vld [vmem:[%s10985_s3 + $0x98] sm:$0xff]  ;;  %v8524_v46 = vld [vmem:[%s10986_s4 + $0xf0] sm:$0xff]  ;;  %11932 = vst [vmem:[#allocation30_spill] sm:$0xff] %v8530_v2 }
 0x8ae   :  { %2033 = vmatmul.f32.gmra.mxu2 %v8303_v8  ;;  %2056 = vmatmul.f32.gmra.mxu3 %v8264_v56  ;;  %11930 = vst [vmem:[#allocation26_spill] sm:$0xff] %v8518_v30 }
 0x8af   :  { %2079 = vmatmul.f32.gmra.mxu0 %v8264_v56  ;;  %2102 = vmatmul.f32.gmra.mxu1 %v8264_v56  ;;  %11931 = vst [vmem:[#allocation65_spill] sm:$0xff] %v8524_v46 }
 0x8b0   :  { %2118 = vmatpush.msrb.mxu2 %v8512_v11  ;;  %2141 = vmatpush.msrb.mxu3 %v8518_v30  ;;  %v8536_v11 = vld [vmem:[%s10985_s3 + $0x68] sm:$0xff]  ;;  %v8542_v30 = vld [vmem:[%s10985_s3 + $0x70] sm:$0xff] }
 0x8b1   :  { %2493 = vmatpush.msra.mxu0 %v8524_v46  ;;  %2516 = vmatpush.msra.mxu1 %v8530_v2  ;;  %11933 = vst [vmem:[#allocation64_spill] sm:$0xff] %v8536_v11  ;;  %v8548_v46 = vld [vmem:[%s10986_s4 + $0xc8] sm:$0xff]  ;;  %v8554_v2 = vld [vmem:[%s10986_s4 + $0xd0] sm:$0xff] }
 0x8b2   :  { %2119 = vmatpush.msrb.mxu2 %v8536_v11  ;;  %11934 = vst [vmem:[#allocation28_spill] sm:$0xff] %v8542_v30  ;;  %2142 = vmatpush.msrb.mxu3 %v8542_v30  ;;  %v8560_v11 = vld [vmem:[%s10985_s3 + $0x40] sm:$0xff]  ;;  %v8566_v30 = vld [vmem:[%s10985_s3 + $0x48] sm:$0xff] }
 0x8b3   :  { %11935 = vst [vmem:[#allocation69_spill] sm:$0xff] %v8548_v46  ;;  %2494 = vmatpush.msra.mxu0 %v8548_v46  ;;  %2517 = vmatpush.msra.mxu1 %v8554_v2  ;;  %v8572_v46 = vld [vmem:[%s10986_s4 + $0xa0] sm:$0xff] }
 0x8b4   :  { %11936 = vst [vmem:[#allocation34_spill] sm:$0xff] %v8554_v2  ;;  %2120 = vmatpush.msrb.mxu2 %v8560_v11  ;;  %2143 = vmatpush.msrb.mxu3 %v8566_v30  ;;  %v8578_v2 = vld [vmem:[%s10986_s4 + $0xa8] sm:$0xff] }
 0x8b5   :  { %11937 = vst [vmem:[#allocation72_spill] sm:$0xff] %v8560_v11  ;;  %2495 = vmatpush.msra.mxu0 %v8572_v46  ;;  %2518 = vmatpush.msra.mxu1 %v8578_v2  ;;  %v8584_v11 = vld [vmem:[%s10985_s3 + $0x18] sm:$0xff] }
 0x8b6   :  { %11938 = vst [vmem:[#allocation35_spill] sm:$0xff] %v8566_v30  ;;  %2121 = vmatpush.msrb.mxu2 %v8584_v11  ;;  %v8590_v30 = vld [vmem:[%s10985_s3 + $0x20] sm:$0xff] }
 0x8b7   :  { %11939 = vst [vmem:[#allocation68_spill] sm:$0xff] %v8572_v46  ;;  %2144 = vmatpush.msrb.mxu3 %v8590_v30  ;;  %2122 = vmatmul.f32.vlgmr.msrb.gmra.mxu2 %v8225_v17  ;;  %v8616_v46 = vld [vmem:[%s10986_s4 + $0x80] sm:$0xff] }
 0x8b8   :  { %11940 = vst [vmem:[#allocation31_spill] sm:$0xff] %v8578_v2  ;;  %2145 = vmatmul.f32.vlgmr.msrb.gmra.mxu3 %v8225_v17  ;;  %v8598_v2 = vld [vmem:[%s10986_s4 + $0x268] sm:$0xff]  ;;  %2519 = vmatpush.msra.mxu1 %v8616_v46 }
 0x8b9   :  { %11941 = vst [vmem:[#allocation39_spill] sm:$0xff] %v8584_v11  ;;  %2530 = vmatpush.msra.mxu2 %v8598_v2  ;;  %v8604_v11 = vld [vmem:[%s10986_s4 + $0x270] sm:$0xff] }
 0x8ba   :  { %11942 = vst [vmem:[#allocation76_spill] sm:$0xff] %v8590_v30  ;;  %2553 = vmatpush.msra.mxu3 %v8604_v11  ;;  %v8610_v30 = vld [vmem:[%s10986_s4 + $0x78] sm:$0xff] }
 0x8bb   :  { %11943 = vst [vmem:[#allocation73_spill] sm:$0xff] %v8598_v2  ;;  %2496 = vmatpush.msra.mxu0 %v8610_v30  ;;  %v8622_v2 = vld [vmem:[%s10986_s4 + $0x240] sm:$0xff] }
 0x8bc   :  { %11944 = vst [vmem:[#allocation38_spill] sm:$0xff] %v8604_v11  ;;  %2531 = vmatpush.msra.mxu2 %v8622_v2  ;;  %v8628_v11 = vld [vmem:[%s10986_s4 + $0x248] sm:$0xff] }
 0x8bd   :  { %11945 = vst [vmem:[#allocation43_spill] sm:$0xff] %v8610_v30  ;;  %2554 = vmatpush.msra.mxu3 %v8628_v11  ;;  %v8634_v30 = vld [vmem:[%s10986_s4 + $0x50] sm:$0xff] }
 0x8be   :  { %11946 = vst [vmem:[#allocation79_spill] sm:$0xff] %v8616_v46  ;;  %2497 = vmatpush.msra.mxu0 %v8634_v30  ;;  %v8640_v46 = vld [vmem:[%s10986_s4 + $0x58] sm:$0xff] }
 0x8bf   :  { %11947 = vst [vmem:[#allocation42_spill] sm:$0xff] %v8622_v2  ;;  %2520 = vmatpush.msra.mxu1 %v8640_v46  ;;  %v8646_v2 = vld [vmem:[%s10986_s4 + $0x218] sm:$0xff]  ;;  %2125 = vmatmul.f32.gmra.mxu2 %v8264_v56 }
 0x8c0   :  { %11948 = vst [vmem:[#allocation80_spill] sm:$0xff] %v8628_v11  ;;  %2532 = vmatpush.msra.mxu2 %v8646_v2  ;;  %v8652_v11 = vld [vmem:[%s10986_s4 + $0x220] sm:$0xff]  ;;  %2148 = vmatmul.f32.gmra.mxu3 %v8264_v56 }
 0x8c1   :  { %11949 = vst [vmem:[#allocation50_spill] sm:$0xff] %v8634_v30  ;;  %2555 = vmatpush.msra.mxu3 %v8652_v11  ;;  %v8658_v30 = vld [vmem:[%s10986_s4 + $0x28] sm:$0xff] }
 0x8c2   :  { %11950 = vst [vmem:[#allocation51_spill] sm:$0xff] %v8640_v46  ;;  %2498 = vmatpush.msra.mxu0 %v8658_v30  ;;  %v8664_v46 = vld [vmem:[%s10986_s4 + $0x30] sm:$0xff] }
 0x8c3   :  { %11951 = vst [vmem:[#allocation54_spill] sm:$0xff] %v8646_v2  ;;  %2521 = vmatpush.msra.mxu1 %v8664_v46  ;;  %v8670_v2 = vld [vmem:[%s10986_s4 + $0x1f0] sm:$0xff] }
 0x8c4   :  { %11952 = vst [vmem:[#allocation55_spill] sm:$0xff] %v8652_v11  ;;  %2533 = vmatpush.msra.mxu2 %v8670_v2  ;;  %v8676_v11 = vld [vmem:[%s10986_s4 + $0x1f8] sm:$0xff] }
 0x8c5   :  { %11953 = vst [vmem:[#allocation46_spill] sm:$0xff] %v8658_v30  ;;  %2556 = vmatpush.msra.mxu3 %v8676_v11  ;;  %v8702_v30 = vld [vmem:[%s10986_s4 + $0x8] sm:$0xff] }
 0x8c6   :  { %11954 = vst [vmem:[#allocation47_spill] sm:$0xff] %v8664_v46  ;;  %v8684_v46 = vld [vmem:[%s10986_s4 + $0x1c8] sm:$0xff]  ;;  %2522 = vmatpush.msra.mxu1 %v8702_v30 }
 0x8c7   :  { %11955 = vst [vmem:[#allocation62_spill] sm:$0xff] %v8670_v2  ;;  %2534 = vmatpush.msra.mxu2 %v8684_v46  ;;  %v8690_v2 = vld [vmem:[%s10986_s4 + $0x1d0] sm:$0xff] }
 0x8c8   :  { %11956 = vst [vmem:[#allocation63_spill] sm:$0xff] %v8676_v11  ;;  %2557 = vmatpush.msra.mxu3 %v8690_v2  ;;  %v8696_v11 = vld [vmem:[%s10986_s4] sm:$0xff] }
 0x8c9   :  { %11957 = vst [vmem:[#allocation58_spill] sm:$0xff] %v8684_v46  ;;  %2499 = vmatpush.msra.mxu0 %v8696_v11  ;;  %v8708_v46 = vld [vmem:[%s10986_s4 + $0x1a0] sm:$0xff] }
 0x8ca   :  { %11958 = vst [vmem:[#allocation59_spill] sm:$0xff] %v8690_v2  ;;  %2535 = vmatpush.msra.mxu2 %v8708_v46  ;;  %v8714_v2 = vld [vmem:[%s10986_s4 + $0x1a8] sm:$0xff] }
 0x8cb   :  { %11959 = vst [vmem:[#allocation70_spill] sm:$0xff] %v8696_v11  ;;  %2558 = vmatpush.msra.mxu3 %v8714_v2  ;;  %v8720_v11 = vld [vmem:[%s10986_s4 + $0x278] sm:$0xff] }
 0x8cc   :  { %11960 = vst [vmem:[#allocation71_spill] sm:$0xff] %v8702_v30  ;;  %2576 = vmatpush.msrb.mxu0 %v8720_v11  ;;  %v8726_v30 = vld [vmem:[%s10985_s3 + $0x258] sm:$0xff] }
 0x8cd   :  { %11961 = vst [vmem:[#allocation66_spill] sm:$0xff] %v8708_v46  ;;  %2599 = vmatpush.msrb.mxu1 %v8726_v30  ;;  %v8732_v46 = vld [vmem:[%s10986_s4 + $0x178] sm:$0xff] }
 0x8ce   :  { %11962 = vst [vmem:[#allocation67_spill] sm:$0xff] %v8714_v2  ;;  %2536 = vmatpush.msra.mxu2 %v8732_v46  ;;  %v8738_v2 = vld [vmem:[%s10986_s4 + $0x180] sm:$0xff] }
 0x8cf   :  { %11963 = vst [vmem:[#allocation77_spill] sm:$0xff] %v8720_v11  ;;  %2559 = vmatpush.msra.mxu3 %v8738_v2  ;;  %v8744_v11 = vld [vmem:[%s10986_s4 + $0x250] sm:$0xff] }
 0x8d0   :  { %11964 = vst [vmem:[#allocation78_spill] sm:$0xff] %v8726_v30  ;;  %2577 = vmatpush.msrb.mxu0 %v8744_v11  ;;  %v8750_v30 = vld [vmem:[%s10985_s3 + $0x230] sm:$0xff] }
 0x8d1   :  { %11965 = vst [vmem:[#allocation74_spill] sm:$0xff] %v8732_v46  ;;  %2600 = vmatpush.msrb.mxu1 %v8750_v30  ;;  %v8756_v46 = vld [vmem:[%s10986_s4 + $0x150] sm:$0xff] }
 0x8d2   :  { %11966 = vst [vmem:[#allocation75_spill] sm:$0xff] %v8738_v2  ;;  %2537 = vmatpush.msra.mxu2 %v8756_v46  ;;  %v8762_v2 = vld [vmem:[%s10986_s4 + $0x158] sm:$0xff] }
 0x8d3   :  { %11967 = vst [vmem:[#allocation83_spill] sm:$0xff] %v8744_v11  ;;  %2560 = vmatpush.msra.mxu3 %v8762_v2  ;;  %v8768_v11 = vld [vmem:[%s10986_s4 + $0x228] sm:$0xff] }
 0x8d4   :  { %11968 = vst [vmem:[#allocation84_spill] sm:$0xff] %v8750_v30  ;;  %2578 = vmatpush.msrb.mxu0 %v8768_v11  ;;  %v8774_v30 = vld [vmem:[%s10985_s3 + $0x208] sm:$0xff] }
 0x8d5   :  { %11969 = vst [vmem:[#allocation81_spill] sm:$0xff] %v8756_v46  ;;  %2601 = vmatpush.msrb.mxu1 %v8774_v30  ;;  %v8780_v46 = vld [vmem:[%s10986_s4 + $0x128] sm:$0xff] }
 0x8d6   :  { %11970 = vst [vmem:[#allocation82_spill] sm:$0xff] %v8762_v2  ;;  %2538 = vmatpush.msra.mxu2 %v8780_v46  ;;  %v8786_v2 = vld [vmem:[%s10986_s4 + $0x130] sm:$0xff] }
 0x8d7   :  { %11971 = vst [vmem:[#allocation87_spill] sm:$0xff] %v8768_v11  ;;  %2561 = vmatpush.msra.mxu3 %v8786_v2  ;;  %v8792_v11 = vld [vmem:[%s10986_s4 + $0x200] sm:$0xff] }
 0x8d8   :  { %11972 = vst [vmem:[#allocation88_spill] sm:$0xff] %v8774_v30  ;;  %2579 = vmatpush.msrb.mxu0 %v8792_v11  ;;  %v8798_v30 = vld [vmem:[%s10985_s3 + $0x1e0] sm:$0xff] }
 0x8d9   :  { %11973 = vst [vmem:[#allocation85_spill] sm:$0xff] %v8780_v46  ;;  %2602 = vmatpush.msrb.mxu1 %v8798_v30  ;;  %v8804_v46 = vld [vmem:[%s10986_s4 + $0x100] sm:$0xff] }
 0x8da   :  { %11974 = vst [vmem:[#allocation86_spill] sm:$0xff] %v8786_v2  ;;  %2539 = vmatpush.msra.mxu2 %v8804_v46  ;;  %v8810_v2 = vld [vmem:[%s10986_s4 + $0x108] sm:$0xff] }
 0x8db   :  { %11975 = vst [vmem:[#allocation91_spill] sm:$0xff] %v8792_v11  ;;  %2562 = vmatpush.msra.mxu3 %v8810_v2  ;;  %v8816_v11 = vld [vmem:[%s10986_s4 + $0x1d8] sm:$0xff] }
 0x8dc   :  { %11976 = vst [vmem:[#allocation92_spill] sm:$0xff] %v8798_v30  ;;  %2580 = vmatpush.msrb.mxu0 %v8816_v11  ;;  %v8822_v30 = vld [vmem:[%s10985_s3 + $0x1b8] sm:$0xff] }
 0x8dd   :  { %11977 = vst [vmem:[#allocation89_spill] sm:$0xff] %v8804_v46  ;;  %2603 = vmatpush.msrb.mxu1 %v8822_v30  ;;  %v8828_v46 = vld [vmem:[%s10986_s4 + $0xd8] sm:$0xff] }
 0x8de   :  { %11978 = vst [vmem:[#allocation90_spill] sm:$0xff] %v8810_v2  ;;  %2540 = vmatpush.msra.mxu2 %v8828_v46  ;;  %v8834_v2 = vld [vmem:[%s10986_s4 + $0xe0] sm:$0xff] }
 0x8df   :  { %11979 = vst [vmem:[#allocation95_spill] sm:$0xff] %v8816_v11  ;;  %2563 = vmatpush.msra.mxu3 %v8834_v2  ;;  %v8840_v11 = vld [vmem:[%s10986_s4 + $0x1b0] sm:$0xff] }
 0x8e0   :  { %11980 = vst [vmem:[#allocation96_spill] sm:$0xff] %v8822_v30  ;;  %2581 = vmatpush.msrb.mxu0 %v8840_v11  ;;  %v8846_v30 = vld [vmem:[%s10985_s3 + $0x190] sm:$0xff] }
 0x8e1   :  { %11981 = vst [vmem:[#allocation93_spill] sm:$0xff] %v8828_v46  ;;  %2604 = vmatpush.msrb.mxu1 %v8846_v30  ;;  %v8852_v46 = vld [vmem:[%s10986_s4 + $0xb0] sm:$0xff] }
 0x8e2   :  { %11982 = vst [vmem:[#allocation94_spill] sm:$0xff] %v8834_v2  ;;  %2541 = vmatpush.msra.mxu2 %v8852_v46  ;;  %v8858_v2 = vld [vmem:[%s10986_s4 + $0xb8] sm:$0xff] }
 0x8e3   :  { %11983 = vst [vmem:[#allocation99_spill] sm:$0xff] %v8840_v11  ;;  %2564 = vmatpush.msra.mxu3 %v8858_v2  ;;  %v8864_v11 = vld [vmem:[%s10986_s4 + $0x188] sm:$0xff] }
 0x8e4   :  { %11984 = vst [vmem:[#allocation100_spill] sm:$0xff] %v8846_v30  ;;  %2582 = vmatpush.msrb.mxu0 %v8864_v11  ;;  %v8870_v30 = vld [vmem:[%s10985_s3 + $0x168] sm:$0xff] }
 0x8e5   :  { %11985 = vst [vmem:[#allocation97_spill] sm:$0xff] %v8852_v46  ;;  %2605 = vmatpush.msrb.mxu1 %v8870_v30  ;;  %v8876_v46 = vld [vmem:[%s10986_s4 + $0x88] sm:$0xff] }
 0x8e6   :  { %11986 = vst [vmem:[#allocation98_spill] sm:$0xff] %v8858_v2  ;;  %2542 = vmatpush.msra.mxu2 %v8876_v46  ;;  %v8882_v2 = vld [vmem:[%s10986_s4 + $0x90] sm:$0xff] }
 0x8e7   :  { %11987 = vst [vmem:[#allocation103_spill] sm:$0xff] %v8864_v11  ;;  %2565 = vmatpush.msra.mxu3 %v8882_v2  ;;  %v8888_v11 = vld [vmem:[%s10986_s4 + $0x160] sm:$0xff] }
 0x8e8   :  { %11988 = vst [vmem:[#allocation104_spill] sm:$0xff] %v8870_v30  ;;  %2583 = vmatpush.msrb.mxu0 %v8888_v11  ;;  %v8894_v30 = vld [vmem:[%s10985_s3 + $0x140] sm:$0xff] }
 0x8e9   :  { %11989 = vst [vmem:[#allocation101_spill] sm:$0xff] %v8876_v46  ;;  %2606 = vmatpush.msrb.mxu1 %v8894_v30  ;;  %v8900_v46 = vld [vmem:[%s10986_s4 + $0x60] sm:$0xff] }
 0x8ea   :  { %11990 = vst [vmem:[#allocation102_spill] sm:$0xff] %v8882_v2  ;;  %2543 = vmatpush.msra.mxu2 %v8900_v46  ;;  %v8906_v2 = vld [vmem:[%s10986_s4 + $0x68] sm:$0xff] }
 0x8eb   :  { %11991 = vst [vmem:[#allocation107_spill] sm:$0xff] %v8888_v11  ;;  %2566 = vmatpush.msra.mxu3 %v8906_v2  ;;  %v8912_v11 = vld [vmem:[%s10986_s4 + $0x138] sm:$0xff] }
 0x8ec   :  { %11992 = vst [vmem:[#allocation108_spill] sm:$0xff] %v8894_v30  ;;  %2584 = vmatpush.msrb.mxu0 %v8912_v11  ;;  %v8918_v30 = vld [vmem:[%s10985_s3 + $0x118] sm:$0xff] }
 0x8ed   :  { %11993 = vst [vmem:[#allocation105_spill] sm:$0xff] %v8900_v46  ;;  %2607 = vmatpush.msrb.mxu1 %v8918_v30  ;;  %v8924_v46 = vld [vmem:[%s10986_s4 + $0x38] sm:$0xff] }
 0x8ee   :  { %11994 = vst [vmem:[#allocation106_spill] sm:$0xff] %v8906_v2  ;;  %2544 = vmatpush.msra.mxu2 %v8924_v46  ;;  %v8930_v2 = vld [vmem:[%s10986_s4 + $0x40] sm:$0xff] }
 0x8ef   :  { %11995 = vst [vmem:[#allocation111_spill] sm:$0xff] %v8912_v11  ;;  %2567 = vmatpush.msra.mxu3 %v8930_v2  ;;  %v8936_v11 = vld [vmem:[%s10986_s4 + $0x110] sm:$0xff] }
 0x8f0   :  { %11996 = vst [vmem:[#allocation112_spill] sm:$0xff] %v8918_v30  ;;  %2585 = vmatpush.msrb.mxu0 %v8936_v11  ;;  %v8942_v30 = vld [vmem:[%s10985_s3 + $0xf0] sm:$0xff] }
 0x8f1   :  { %11997 = vst [vmem:[#allocation113_spill] sm:$0xff] %v8924_v46  ;;  %2608 = vmatpush.msrb.mxu1 %v8942_v30  ;;  %v8948_v46 = vld [vmem:[%s10986_s4 + $0x10] sm:$0xff] }
 0x8f2   :  { %11998 = vst [vmem:[#allocation114_spill] sm:$0xff] %v8930_v2  ;;  %2545 = vmatpush.msra.mxu2 %v8948_v46  ;;  %v8954_v2 = vld [vmem:[%s10986_s4 + $0x18] sm:$0xff] }
 0x8f3   :  { %11999 = vst [vmem:[#allocation109_spill] sm:$0xff] %v8936_v11  ;;  %2568 = vmatpush.msra.mxu3 %v8954_v2  ;;  %v8960_v11 = vld [vmem:[%s10985_s3 + $0x260] sm:$0xff] }
 0x8f4   :  { %12000 = vst [vmem:[#allocation110_spill] sm:$0xff] %v8942_v30  ;;  %2622 = vmatpush.msrb.mxu2 %v8960_v11  ;;  %v8966_v30 = vld [vmem:[%s10985_s3 + $0x268] sm:$0xff] }
 0x8f5   :  { %12001 = vst [vmem:[#allocation117_spill] sm:$0xff] %v8948_v46  ;;  %2645 = vmatpush.msrb.mxu3 %v8966_v30  ;;  %v8972_v46 = vld [vmem:[%s10986_s4 + $0xe8] sm:$0xff] }
 0x8f6   :  { %12002 = vst [vmem:[#allocation118_spill] sm:$0xff] %v8954_v2  ;;  %2586 = vmatpush.msrb.mxu0 %v8972_v46  ;;  %v8978_v2 = vld [vmem:[%s10985_s3 + $0xc8] sm:$0xff] }
 0x8f7   :  { %12003 = vst [vmem:[#allocation115_spill] sm:$0xff] %v8960_v11  ;;  %2609 = vmatpush.msrb.mxu1 %v8978_v2  ;;  %v8984_v11 = vld [vmem:[%s10985_s3 + $0x238] sm:$0xff] }
 0x8f8   :  { %12004 = vst [vmem:[#allocation116_spill] sm:$0xff] %v8966_v30  ;;  %2623 = vmatpush.msrb.mxu2 %v8984_v11  ;;  %v8990_v30 = vld [vmem:[%s10985_s3 + $0x240] sm:$0xff] }
 0x8f9   :  { %12005 = vst [vmem:[#allocation121_spill] sm:$0xff] %v8972_v46  ;;  %2646 = vmatpush.msrb.mxu3 %v8990_v30  ;;  %v8996_v46 = vld [vmem:[%s10986_s4 + $0xc0] sm:$0xff] }
 0x8fa   :  { %12006 = vst [vmem:[#allocation122_spill] sm:$0xff] %v8978_v2  ;;  %2587 = vmatpush.msrb.mxu0 %v8996_v46  ;;  %v9002_v2 = vld [vmem:[%s10985_s3 + $0xa0] sm:$0xff] }
 0x8fb   :  { %12007 = vst [vmem:[#allocation119_spill] sm:$0xff] %v8984_v11  ;;  %2610 = vmatpush.msrb.mxu1 %v9002_v2  ;;  %v9008_v11 = vld [vmem:[%s10985_s3 + $0x210] sm:$0xff] }
 0x8fc   :  { %12008 = vst [vmem:[#allocation120_spill] sm:$0xff] %v8990_v30  ;;  %2624 = vmatpush.msrb.mxu2 %v9008_v11  ;;  %v9014_v30 = vld [vmem:[%s10985_s3 + $0x218] sm:$0xff] }
 0x8fd   :  { %12009 = vst [vmem:[#allocation125_spill] sm:$0xff] %v8996_v46  ;;  %2647 = vmatpush.msrb.mxu3 %v9014_v30  ;;  %v9020_v46 = vld [vmem:[%s10986_s4 + $0x98] sm:$0xff] }
 0x8fe   :  { %12010 = vst [vmem:[#allocation126_spill] sm:$0xff] %v9002_v2  ;;  %2588 = vmatpush.msrb.mxu0 %v9020_v46  ;;  %v9026_v2 = vld [vmem:[%s10985_s3 + $0x78] sm:$0xff] }
 0x8ff   :  { %12011 = vst [vmem:[#allocation123_spill] sm:$0xff] %v9008_v11  ;;  %2611 = vmatpush.msrb.mxu1 %v9026_v2  ;;  %v9032_v11 = vld [vmem:[%s10985_s3 + $0x1e8] sm:$0xff] }
 0x900   :  { %12012 = vst [vmem:[#allocation124_spill] sm:$0xff] %v9014_v30  ;;  %2625 = vmatpush.msrb.mxu2 %v9032_v11  ;;  %v9038_v30 = vld [vmem:[%s10985_s3 + $0x1f0] sm:$0xff] }
 0x901   :  { %12013 = vst [vmem:[#allocation129_spill] sm:$0xff] %v9020_v46  ;;  %2648 = vmatpush.msrb.mxu3 %v9038_v30  ;;  %v9044_v46 = vld [vmem:[%s10986_s4 + $0x70] sm:$0xff] }
 0x902   :  { %12014 = vst [vmem:[#allocation130_spill] sm:$0xff] %v9026_v2  ;;  %2589 = vmatpush.msrb.mxu0 %v9044_v46  ;;  %v9050_v2 = vld [vmem:[%s10985_s3 + $0x50] sm:$0xff] }
 0x903   :  { %12015 = vst [vmem:[#allocation127_spill] sm:$0xff] %v9032_v11  ;;  %2612 = vmatpush.msrb.mxu1 %v9050_v2  ;;  %v9056_v11 = vld [vmem:[%s10985_s3 + $0x1c0] sm:$0xff] }
 0x904   :  { %12016 = vst [vmem:[#allocation128_spill] sm:$0xff] %v9038_v30  ;;  %2626 = vmatpush.msrb.mxu2 %v9056_v11  ;;  %v9062_v30 = vld [vmem:[%s10985_s3 + $0x1c8] sm:$0xff] }
 0x905   :  { %12017 = vst [vmem:[#allocation133_spill] sm:$0xff] %v9044_v46  ;;  %2649 = vmatpush.msrb.mxu3 %v9062_v30  ;;  %v9068_v46 = vld [vmem:[%s10986_s4 + $0x48] sm:$0xff] }
 0x906   :  { %12018 = vst [vmem:[#allocation134_spill] sm:$0xff] %v9050_v2  ;;  %2590 = vmatpush.msrb.mxu0 %v9068_v46  ;;  %v9074_v2 = vld [vmem:[%s10985_s3 + $0x28] sm:$0xff] }
 0x907   :  { %12019 = vst [vmem:[#allocation131_spill] sm:$0xff] %v9056_v11  ;;  %2613 = vmatpush.msrb.mxu1 %v9074_v2  ;;  %v9080_v11 = vld [vmem:[%s10985_s3 + $0x198] sm:$0xff] }
 0x908   :  { %12020 = vst [vmem:[#allocation132_spill] sm:$0xff] %v9062_v30  ;;  %2627 = vmatpush.msrb.mxu2 %v9080_v11  ;;  %v9086_v30 = vld [vmem:[%s10985_s3 + $0x1a0] sm:$0xff] }
 0x909   :  { %12021 = vst [vmem:[#allocation135_spill] sm:$0xff] %v9068_v46  ;;  %2650 = vmatpush.msrb.mxu3 %v9086_v30  ;;  %v9092_v46 = vld [vmem:[%s10986_s4 + $0x20] sm:$0xff] }
 0x90a   :  { %12022 = vst [vmem:[#allocation136_spill] sm:$0xff] %v9074_v2  ;;  %2591 = vmatpush.msrb.mxu0 %v9092_v46  ;;  %v9098_v2 = vld [vmem:[%s10985_s3] sm:$0xff] }
 0x90b   :  { %12023 = vst [vmem:[#allocation137_spill] sm:$0xff] %v9080_v11  ;;  %2614 = vmatpush.msrb.mxu1 %v9098_v2  ;;  %v9104_v11 = vld [vmem:[%s10985_s3 + $0x170] sm:$0xff] }
 0x90c   :  { %12024 = vst [vmem:[#allocation138_spill] sm:$0xff] %v9086_v30  ;;  %2628 = vmatpush.msrb.mxu2 %v9104_v11  ;;  %v9110_v30 = vld [vmem:[%s10985_s3 + $0x178] sm:$0xff] }
 0x90d   :  { %12025 = vst [vmem:[#allocation139_spill] sm:$0xff] %v9092_v46  ;;  %2651 = vmatpush.msrb.mxu3 %v9110_v30  ;;  %v9116_v46 = vld [vmem:[%s10985_s3 + $0x148] sm:$0xff] }
 0x90e   :  { %12026 = vst [vmem:[#allocation140_spill] sm:$0xff] %v9098_v2  ;;  %2629 = vmatpush.msrb.mxu2 %v9116_v46  ;;  %v9122_v2 = vld [vmem:[%s10985_s3 + $0x150] sm:$0xff] }
 0x90f   :  { %12027 = vst [vmem:[#allocation141_spill] sm:$0xff] %v9104_v11  ;;  %2652 = vmatpush.msrb.mxu3 %v9122_v2  ;;  %v9128_v11 = vld [vmem:[%s10985_s3 + $0x120] sm:$0xff] }
 0x910   :  { %12028 = vst [vmem:[#allocation142_spill] sm:$0xff] %v9110_v30  ;;  %2630 = vmatpush.msrb.mxu2 %v9128_v11  ;;  %v9134_v30 = vld [vmem:[%s10985_s3 + $0x128] sm:$0xff] }
 0x911   :  { %12029 = vst [vmem:[#allocation143_spill] sm:$0xff] %v9116_v46  ;;  %2653 = vmatpush.msrb.mxu3 %v9134_v30  ;;  %v9140_v46 = vld [vmem:[%s10985_s3 + $0xf8] sm:$0xff]  ;;  %v9221_v32 = vpop.f32.mrf.mxu1 }
 0x912   :  { %12030 = vst [vmem:[#allocation144_spill] sm:$0xff] %v9122_v2  ;;  %2631 = vmatpush.msrb.mxu2 %v9140_v46  ;;  %v9146_v2 = vld [vmem:[%s10985_s3 + $0x100] sm:$0xff] }
 0x913   :  { %12031 = vst [vmem:[#allocation145_spill] sm:$0xff] %v9128_v11  ;;  %2654 = vmatpush.msrb.mxu3 %v9146_v2  ;;  %v9152_v11 = vld [vmem:[%s10985_s3 + $0xd0] sm:$0xff] }
 0x914   :  { %12032 = vst [vmem:[#allocation146_spill] sm:$0xff] %v9134_v30  ;;  %2632 = vmatpush.msrb.mxu2 %v9152_v11  ;;  %v9158_v30 = vld [vmem:[%s10985_s3 + $0xd8] sm:$0xff] }
 0x915   :  { %12033 = vst [vmem:[#allocation147_spill] sm:$0xff] %v9140_v46  ;;  %2655 = vmatpush.msrb.mxu3 %v9158_v30  ;;  %v9164_v46 = vld [vmem:[%s10985_s3 + $0xa8] sm:$0xff] }
 0x916   :  { %12034 = vst [vmem:[#allocation148_spill] sm:$0xff] %v9146_v2  ;;  %2633 = vmatpush.msrb.mxu2 %v9164_v46  ;;  %v9170_v2 = vld [vmem:[%s10985_s3 + $0xb0] sm:$0xff]  ;;  %v1962_v38 = vpop.f32.mrf.mxu3  ;;  %v1939_v29 = vpop.f32.mrf.mxu2 }
 0x917   :  { %12035 = vst [vmem:[#allocation149_spill] sm:$0xff] %v9152_v11  ;;  %2656 = vmatpush.msrb.mxu3 %v9170_v2  ;;  %v9176_v11 = vld [vmem:[%s10985_s3 + $0x80] sm:$0xff] }
 0x918   :  { %12036 = vst [vmem:[#allocation150_spill] sm:$0xff] %v9158_v30  ;;  %2634 = vmatpush.msrb.mxu2 %v9176_v11  ;;  %v9182_v30 = vld [vmem:[%s10985_s3 + $0x88] sm:$0xff] }
 0x919   :  { %12037 = vst [vmem:[#allocation151_spill] sm:$0xff] %v9164_v46  ;;  %2657 = vmatpush.msrb.mxu3 %v9182_v30  ;;  %v9188_v46 = vld [vmem:[%s10985_s3 + $0x58] sm:$0xff] }
 0x91a   :  { %12038 = vst [vmem:[#allocation152_spill] sm:$0xff] %v9170_v2  ;;  %2635 = vmatpush.msrb.mxu2 %v9188_v46  ;;  %v9194_v2 = vld [vmem:[%s10985_s3 + $0x60] sm:$0xff]  ;;  %v9223_v51 = vpop.f32.mrf.mxu1 }
 0x91b   :  { %12039 = vst [vmem:[#allocation153_spill] sm:$0xff] %v9176_v11  ;;  %2658 = vmatpush.msrb.mxu3 %v9194_v2  ;;  %v9200_v11 = vld [vmem:[%s10985_s3 + $0x30] sm:$0xff] }
 0x91c   :  { %12040 = vst [vmem:[#allocation154_spill] sm:$0xff] %v9182_v30  ;;  %2636 = vmatpush.msrb.mxu2 %v9200_v11  ;;  %v9206_v30 = vld [vmem:[%s10985_s3 + $0x38] sm:$0xff] }
 0x91d   :  { %12041 = vst [vmem:[#allocation155_spill] sm:$0xff] %v9188_v46  ;;  %2659 = vmatpush.msrb.mxu3 %v9206_v30  ;;  %v9212_v46 = vld [vmem:[%s10985_s3 + $0x8] sm:$0xff] }
 0x91e   :  { %12042 = vst [vmem:[#allocation156_spill] sm:$0xff] %v9194_v2  ;;  %2637 = vmatpush.msrb.mxu2 %v9212_v46  ;;  %v9218_v2 = vld [vmem:[%s10985_s3 + $0x10] sm:$0xff] }
 0x91f   :  { %12043 = vst [vmem:[#allocation157_spill] sm:$0xff] %v9200_v11  ;;  %2660 = vmatpush.msrb.mxu3 %v9218_v2  ;;  %v1985_v11 = vpop.f32.mrf.mxu0  ;;  %v1965_v36 = vpop.f32.mrf.mxu3 }
 0x920   :  { %12044 = vst [vmem:[#allocation158_spill] sm:$0xff] %v9206_v30  ;;  %v1942_v7 = vpop.f32.mrf.mxu2 }
 0x921   :  { %12045 = vst [vmem:[#allocation159_spill] sm:$0xff] %v9212_v46 }
 0x922   :  { %12046 = vst [vmem:[#allocation160_spill] sm:$0xff] %v9218_v2 }
 0x923   :  { %v2100_v42 = vpop.f32.mrf.mxu1 }
 0x924   :  { %v2101_v10 = vadd.f32 %v2100_v42, %v1985_v11 }
 0x926   :  { %v2154_v59 = vadd.f32 %v2101_v10, %v11884_v58 }
 0x927   :  { %v1988_v30 = vpop.f32.mrf.mxu0 }
 0x928   :  { %v4146_v2 = vmul.f32 -1.442695, %v2154_v59  ;;  %v2054_v63 = vpop.f32.mrf.mxu3  ;;  %v2031_v18 = vpop.f32.mrf.mxu2 }
 0x929   :  { %v2055_v0 = vadd.f32 %v2054_v63, %v1939_v29 }
 0x92b   :  { %v2152_v20 = vadd.f32 %v2055_v0, %v11882_v43 }
 0x92c   :  { %v2103_v55 = vpop.f32.mrf.mxu1 }
 0x92d   :  { %v4148_v13 = vmul.f32 -1.442695, %v2152_v20  ;;  %v2104_v3 = vadd.f32 %v2103_v55, %v1988_v30 }
 0x92f   :  { %v2077_v28 = vpop.f32.mrf.mxu0 }
 0x930   :  { %v2078_v46 = vadd.f32 %v2077_v28, %v1962_v38  ;;  %v2159_v28 = vadd.f32 %v2104_v3, %v11884_v58 }
 0x932   :  { %v2153_v35 = vadd.f32 %v2078_v46, %v11883_v62  ;;  %v4147_v38 = vmul.f32 -1.442695, %v2159_v28 }
 0x934   :  { %v4144_v33 = vmul.f32 -1.442695, %v2153_v35 }
 0x936   :  { %4501 = vpow2.f32 %v4144_v33  ;;  %v2057_v33 = vpop.f32.mrf.mxu3 }
 0x937   :  { %4503 = vpow2.f32 %v4146_v2  ;;  %v2080_v54 = vpop.f32.mrf.mxu0  ;;  %v2058_v0 = vadd.f32 %v2057_v33, %v1942_v7 }
 0x938   :  { %v2081_v6 = vadd.f32 %v2080_v54, %v1965_v36  ;;  %4505 = vpow2.f32 %v4148_v13  ;;  %v9236_v13 = vpop.f32.mrf.mxu2 }
 0x939   :  { %v2157_v3 = vadd.f32 %v2058_v0, %v11882_v43 }
 0x93a   :  { %v2158_v42 = vadd.f32 %v2081_v6, %v11883_v62 }
 0x93b   :  { %v4149_v54 = vmul.f32 -1.442695, %v2157_v3 }
 0x93c   :  { %v4502_v10 = vpop.eup %4501  ;;  %v4145_v63 = vmul.f32 -1.442695, %v2158_v42 }
 0x93d   :  { %v4504_v35 = vpop.eup %4503  ;;  %v9230_v59 = vadd.f32 1.0, %v4502_v10 }
 0x93e   :  { %v9232_v29 = vadd.f32 1.0, %v4504_v35  ;;  %v4506_v55 = vpop.eup %4505  ;;  %v2146_v46 = vpop.f32.mrf.mxu3 }
 0x93f   :  { %4507 = vrcp.f32 %v9230_v59  ;;  %v9239_v6 = vadd.f32 1.0, %v4506_v55  ;;  %v2179_v3 = vand.u32 2147483647, %v9230_v59  ;;  %vm2175_vm14 = vweird.f32 %v9230_v59 }
 0x940   :  { %4509 = vrcp.f32 %v9232_v29  ;;  %v2123_v55 = vpop.f32.mrf.mxu2  ;;  %vm2215_vm15 = vweird.f32 %v9232_v29 }
 0x941   :  { %4511 = vpow2.f32 %v4145_v63  ;;  %v2147_v63 = vadd.f32 %v2146_v46, %v2031_v18  ;;  %v9267_v18 = vmul.f32 %v8236_v34, %v8051_v16  ;;  %vm9279_vm1 = vcmp.eq.f32.partialorder %v2179_v3, 8.507059e+37 }
 0x942   :  { %4513 = vpow2.f32 %v4147_v38  ;;  %v2124_v34 = vadd.f32 %v2123_v55, %v9221_v32  ;;  %vm2259_vm4 = vweird.f32 %v9239_v6 }
 0x943   :  { %4515 = vrcp.f32 %v9239_v6  ;;  %v2156_v62 = vadd.f32 %v2147_v63, %v6362_v47  ;;  %v9378_v50 = vadd.f32 %v9267_v18, %v8220_v1 }
 0x944   :  { %4517 = vpow2.f32 %v4149_v54  ;;  %v2181_v54 = vand.u32 2147483648, %v9230_v59  ;;  %v2155_v4 = vadd.f32 %v2124_v34, %v6359_v45 }
 0x945   :  { %v9242_v20 = vpop.eup %4507  ;;  %v4150_v55 = vmul.f32 -1.442695, %v2156_v62 }
 0x946   :  { %v9244_v7 = vpop.eup %4509  ;;  %v2171_v36 = vmul.f32 %v9242_v20, %v9230_v59  ;;  %v2182_v16 = vor.u32 1.1754944e-38, %v2181_v54  ;;  %vm2176_vm5 = vweird.f32 %v9242_v20 }
 0x947   :  { %v4512_v2 = vpop.eup %4511  ;;  %v2211_v30 = vmul.f32 %v9244_v7, %v9232_v29  ;;  %vm2216_vm6 = vweird.f32 %v9244_v7  ;;  %vm9309_vm8 = vmor %vm2175_vm14, %vm2176_vm5 }
 0x948   :  { %v4514_v11 = vpop.eup %4513  ;;  %v9250_v42 = vadd.f32 1.0, %v4512_v2  ;;  %v2172_v35 = vsub.f32 1.0, %v2171_v36  ;;  %v2221_v36 = vand.u32 2147483648, %v9232_v29  ;;  %v2263_v2 = vand.u32 2147483647, %v9239_v6  ;;  %vm9323_vm11 = vmor %vm2215_vm15, %vm2216_vm6 }
 0x949   :  { %v9252_v28 = vadd.f32 1.0, %v4514_v11  ;;  %v9254_v10 = vpop.eup %4515  ;;  %v2212_v38 = vsub.f32 1.0, %v2211_v30  ;;  %v2219_v11 = vand.u32 2147483647, %v9232_v29 }
 0x94a   :  { %4519 = vrcp.f32 %v9250_v42  ;;  %v4518_v33 = vpop.eup %4517  ;;  %v2255_v0 = vmul.f32 %v9254_v10, %v9239_v6  ;;  %v2173_v30 = vmul.f32 %v9242_v20, %v2172_v35  ;;  %v2265_v35 = vand.u32 2147483648, %v9239_v6 }
 0x94b   :  { %4521 = vrcp.f32 %v9252_v28  ;;  %v9270_v46 = vadd.f32 1.0, %v4518_v33  ;;  %v2213_v43 = vmul.f32 %v9244_v7, %v2212_v38  ;;  %vm9288_vm3 = vcmp.eq.f32.partialorder %v2219_v11, 8.507059e+37 }
 0x94c   :  { %v2256_v58 = vsub.f32 1.0, %v2255_v0  ;;  %v2222_v38 = vor.u32 1.1754944e-38, %v2221_v36  ;;  %v2174_v54 = vadd.f32 %v9242_v20, %v2173_v30  ;;  %vm9302_vm7 = vcmp.eq.f32.partialorder %v2263_v2, 8.507059e+37  ;;  %v2126_v2 = vpop.f32.mrf.mxu2 }
 0x94d   :  { %4523 = vrcp.f32 %v9270_v46  ;;  %v2214_v11 = vadd.f32 %v9244_v7, %v2213_v43  ;;  %v2266_v30 = vor.u32 1.1754944e-38, %v2265_v35  ;;  %vm2190_vm9 = vweird.f32 %v9250_v42 }
 0x94e   :  { %v2257_v52 = vmul.f32 %v9254_v10, %v2256_v58  ;;  %v2149_v58 = vpop.f32.mrf.mxu3  ;;  %4525 = vpow2.f32 %v4150_v55  ;;  %v2194_v43 = vand.u32 2147483647, %v9250_v42  ;;  %vm2260_vm10 = vweird.f32 %v9254_v10 }
 0x94f   :  { %v2196_v34 = vand.u32 2147483648, %v9250_v42  ;;  %vm2230_vm12 = vweird.f32 %v9252_v28  ;;  %v2150_v35 = vadd.f32 %v2149_v58, %v9236_v13  ;;  %v2218_v40 = vsel %vm9323_vm11, %v9244_v7, %v2214_v11  ;;  %vm9343_vm13 = vmor %vm2259_vm4, %vm2260_vm10 }
 0x950   :  { %v9277_v44 = vpop.eup %4519  ;;  %v2258_v62 = vadd.f32 %v9254_v10, %v2257_v52  ;;  %v2178_v52 = vsel %vm9309_vm8, %v9242_v20, %v2174_v54  ;;  %v2234_v39 = vand.u32 2147483647, %v9252_v28  ;;  %4527 = vtanh.f32 %v2155_v4 }
 0x951   :  { %v9286_v63 = vpop.eup %4521  ;;  %v2186_v3 = vmul.f32 %v9277_v44, %v9250_v42  ;;  %v2127_v13 = vadd.f32 %v2126_v2, %v9223_v51  ;;  %v2236_v20 = vand.u32 2147483648, %v9252_v28  ;;  %vm2191_vm14 = vweird.f32 %v9277_v44 }
 0x952   :  { %v2226_v32 = vmul.f32 %v9286_v63, %v9252_v28  ;;  %v2262_v4 = vsel %vm9343_vm13, %v9254_v10, %v2258_v62  ;;  %vm2231_vm15 = vweird.f32 %v9286_v63  ;;  %v2223_v51 = vsel %vm9288_vm3, %v2222_v38, %v2218_v40 }
 0x953   :  { %v2187_v36 = vsub.f32 1.0, %v2186_v3  ;;  %v9317_v3 = vpop.eup %4523  ;;  %v2267_v10 = vsel %vm9302_vm7, %v2266_v30, %v2262_v4  ;;  %v2160_v62 = vadd.f32 %v2127_v13, %v6359_v45  ;;  %v12061_v33 = vrot.slane %v8227_v61, 1  ;;  %vm9384_vm4 = vmor %vm2230_vm12, %vm2231_vm15 }
 0x954   :  { %v2227_v49 = vsub.f32 1.0, %v2226_v32  ;;  %v2270_v29 = vmul.f32 %v9317_v3, %v9270_v46  ;;  %v4526_v7 = vpop.eup %4525  ;;  %vm2275_vm3 = vweird.f32 %v9317_v3  ;;  %vm2274_vm5 = vweird.f32 %v9270_v46 }
 0x955   :  { %v2188_v32 = vmul.f32 %v9277_v44, %v2187_v36  ;;  %v2183_v36 = vsel %vm9279_vm1, %v2182_v16, %v2178_v52  ;;  %v2294_v2 = vadd.f32 1.0, %v4526_v7  ;;  %vm9368_vm1 = vmor %vm2190_vm9, %vm2191_vm14  ;;  %v2240_v38 = vmul.f32 %v2223_v51, %v12061_v33 }
 0x956   :  { %v2228_v55 = vmul.f32 %v9286_v63, %v2227_v49  ;;  %v2161_v49 = vadd.f32 %v2150_v35, %v6362_v47  ;;  %v2271_v54 = vsub.f32 1.0, %v2270_v29  ;;  %v2200_v16 = vmul.f32 %v2183_v36, %v8227_v61  ;;  %v4528_v52 = vpop.eup %4527  ;;  %vm2276_vm6 = vmor %vm2274_vm5, %vm2275_vm3 }
 0x957   :  { %v2189_v11 = vadd.f32 %v9277_v44, %v2188_v32  ;;  %v2280_v30 = vand.u32 2147483648, %v9270_v46  ;;  %v2284_v35 = vmul.f32 %v4528_v52, %v2267_v10  ;;  %v2278_v18 = vand.u32 2147483647, %v9270_v46 }
 0x958   :  { %v4151_v6 = vmul.f32 -1.442695, %v2161_v49  ;;  %v2229_v58 = vadd.f32 %v9286_v63, %v2228_v55  ;;  %v2272_v0 = vmul.f32 %v9317_v3, %v2271_v54  ;;  %v2197_v28 = vor.u32 1.1754944e-38, %v2196_v34 }
 0x959   :  { %v2193_v32 = vsel %vm9368_vm1, %v9277_v44, %v2189_v11  ;;  %v2237_v55 = vor.u32 1.1754944e-38, %v2236_v20  ;;  %vm2195_vm7 = vcmp.eq.f32.partialorder %v2194_v43, 8.507059e+37  ;;  %vm2235_vm8 = vcmp.eq.f32.partialorder %v2234_v39, 8.507059e+37 }
 0x95a   :  { %4529 = vpow2.f32 %v4151_v6  ;;  %v2273_v59 = vadd.f32 %v9317_v3, %v2272_v0  ;;  %v2233_v1 = vsel %vm9384_vm4, %v9286_v63, %v2229_v58  ;;  %v2242_v29 = vadd.f32 %v2240_v38, %v2200_v16 }
 0x95b   :  { %4531 = vrcp.f32 %v2294_v2  ;;  %v2198_v49 = vsel %vm2195_vm7, %v2197_v28, %v2193_v32  ;;  %v2238_v54 = vsel %vm2235_vm8, %v2237_v55, %v2233_v1  ;;  %v2281_v36 = vor.u32 1.1754944e-38, %v2280_v30 }
 0x95c   :  { %4533 = vtanh.f32 %v2160_v62  ;;  %v2277_v48 = vsel %vm2276_vm6, %v9317_v3, %v2273_v59  ;;  %v1917_v4 = vrot.slane %v9378_v50, 1  ;;  %v9399_v7 = vadd.f32 %v2284_v35, %v2242_v29 }
 0x95d   :  { %vm2279_vm9 = vcmp.eq.f32.partialorder %v2278_v18, 8.507059e+37  ;;  %v2201_v20 = vmul.f32 %v2198_v49, %v9378_v50  ;;  %v2307_v6 = vand.u32 2147483648, %v2294_v2  ;;  %v2305_v58 = vand.u32 2147483647, %v2294_v2 }
 0x95e   :  { %v2282_v63 = vsel %vm2279_vm9, %v2281_v36, %v2277_v48  ;;  %v2241_v39 = vmul.f32 %v2238_v54, %v1917_v4  ;;  %vm2301_vm11 = vweird.f32 %v2294_v2  ;;  %v2336_v36 = vadd.s32 4, %v6528_v37 }
 0x95f   :  { %v2308_v40 = vor.u32 1.1754944e-38, %v2307_v6  ;;  %vm2306_vm13 = vcmp.eq.f32.partialorder %v2305_v58, 8.507059e+37  ;;  %vm2426_vm6 = vcmp.gt.s32.totalorder %v8190_v24, 4 }
 0x960   :  { %v4530_v13 = vpop.eup %4529  ;;  %v2243_v0 = vadd.f32 %v2241_v39, %v2201_v20  ;;  %vm2337_vm4 = vcmp.lt.s32.totalorder %v2336_v36, %v6531_v5 }
 0x961   :  { %v4532_v44 = vpop.eup %4531  ;;  %v2295_v46 = vadd.f32 1.0, %v4530_v13 }
 0x962   :  { %v2297_v34 = vmul.f32 %v4532_v44, %v2294_v2  ;;  %v4534_v43 = vpop.eup %4533  ;;  %vm2302_vm10 = vweird.f32 %v4532_v44 }
 0x963   :  { %4535 = vrcp.f32 %v2295_v46  ;;  %v2285_v51 = vmul.f32 %v4534_v43, %v2282_v63  ;;  %vm2303_vm12 = vmor %vm2301_vm11, %vm2302_vm10  ;;  %v2322_v35 = vand.u32 2147483648, %v2295_v46  ;;  %v2320_v1 = vand.u32 2147483647, %v2295_v46 }
 0x964   :  { %v2298_v3 = vsub.f32 1.0, %v2297_v34  ;;  %4537 = vtanh.f32 %v9399_v7  ;;  %vm2316_vm15 = vweird.f32 %v2295_v46 }
 0x965   :  { %v9405_v62 = vadd.f32 %v2285_v51, %v2243_v0  ;;  %v2323_v28 = vor.u32 1.1754944e-38, %v2322_v35  ;;  %vm2321_vm3 = vcmp.eq.f32.partialorder %v2320_v1, 8.507059e+37  ;;  %v4156_v51 = vsel %vm2426_vm6, 1.0, %v11735_v53 }
 0x966   :  { %v2299_v11 = vmul.f32 %v4532_v44, %v2298_v3  ;;  %v2430_v6 = vrot.slane %v4156_v51, 1 }
 0x967   :  { %4539 = vtanh.f32 %v9405_v62 }
 0x968   :  { %v2300_v16 = vadd.f32 %v4532_v44, %v2299_v11  ;;  %v2432_v11 = vperm.slane %v4156_v51, 0  ;;  %v2433_v58 = vperm.slane %v2430_v6, 0 }
 0x969   :  { %v4536_v10 = vpop.eup %4535 }
 0x96a   :  { %v2304_v33 = vsel %vm2303_vm12, %v4532_v44, %v2300_v16  ;;  %v2312_v38 = vmul.f32 %v4536_v10, %v2295_v46  ;;  %v4538_v59 = vpop.eup %4537  ;;  %vm2317_vm14 = vweird.f32 %v4536_v10  ;;  %v4313_v0 = vpack.i.bf16 %v2433_v58, %v2432_v11 }
 0x96b   :  { %v2309_v52 = vsel %vm2306_vm13, %v2308_v40, %v2304_v33  ;;  %vm2318_vm1 = vmor %vm2316_vm15, %vm2317_vm14 }
 0x96c   :  { %v9407_v42 = vmul.f32 %v4538_v59, %v2309_v52  ;;  %v2313_v30 = vsub.f32 1.0, %v2312_v38 }
 0x96d   :  { %v4540_v29 = vpop.eup %4539 }
 0x96e   :  { %v2330_v32 = vmul.f32 %v8175_v15, %v9407_v42  ;;  %v2314_v2 = vmul.f32 %v4536_v10, %v2313_v30 }
 0x970   :  { %2332 = vadd.xlane.f32.xlu2 %v2330_v32  ;;  %v2315_v18 = vadd.f32 %v4536_v10, %v2314_v2 }
 0x972   :  { %v2319_v55 = vsel %vm2318_vm1, %v4536_v10, %v2315_v18  ;;  %v2445_v18 = vsub.f32 1.0, %v2430_v6 }
 0x973   :  { %v2324_v48 = vsel %vm2321_vm3, %v2323_v28, %v2319_v55  ;;  %v2444_v28 = vsub.f32 1.0, %v4156_v51 }
 0x974   :  { %v9412_v13 = vmul.f32 %v4540_v29, %v2324_v48  ;;  %v2449_v55 = vperm.slane %v2445_v18, 0 }
 0x975   :  { %v2448_v29 = vperm.slane %v2444_v28, 0 }
 0x976   :  { %v2331_v49 = vmul.f32 %v8175_v15, %v9412_v13 }
 0x978   :  { %2334 = vadd.xlane.f32.xlu0 %v2331_v49 }
 0x9e3   :  { %v2333_v54 = vpop.xlane.xlu2 %2332 }
 0x9e4   :  { %v2340_v63 = vperm.slane %v2333_v54, %v6528_v37 }
 0x9eb   :  { %v2335_v44 = vpop.xlane.xlu0 %2334 }
 0x9ec   :  { %v2341_v46 = vperm.slane %v2335_v44, %v6528_v37 }
 0x9ee   :  { %v2342_v34 = vsel %vm655_vm0, %v2341_v46, %v2340_v63 }
 0x9ef   :  { %v2344_v20 = vsel %vm2337_vm4, %v2342_v34, -1e+30 }
 0x9f0   :  { %v2345_v39 = vsel %vm659_vm2, %v2344_v20, -inf }
 0x9f1   :  { %2346 = vmax.xlane.f32.xlu1 %v2345_v39 }
 0xa64   :  { %v2347_v43 = vpop.xlane.xlu1 %2346 }
 0xa65   :  { %vm2348_vm5 = vcmp.eq.f32.partialorder %v2344_v20, %v2347_v43 }
 0xa66   :  { %v2349_v15 = vsel %vm2348_vm5, %v6545_v25, 8.0 }
 0xa67   :  { %v2350_v3 = vsel %vm659_vm2, %v2349_v15, inf }
 0xa68   :  { %2351 = vmin.xlane.f32.xlu2 %v2350_v3 }
 0xa80   :  { %4314 = vperm.xlu2 %4312, %v4313_v0  }
 0xa88   :  { %4319 = vset.pattern.permute.xlu2 %v6540_v21 }
 0xadb   :  { %v2352_v16 = vpop.xlane.xlu2 %2351 }
 0xadc   :  { %vm2353_vm7 = vcmp.eq.f32.partialorder %v6545_v25, %v2352_v16  ;;  %vm2356_vm8 = vcmp.lt.f32.partialorder %v6545_v25, %v2352_v16  ;;  %vm2359_vm9 = vcmp.gt.f32.partialorder %v6545_v25, %v2352_v16 }
 0xadd   :  { %v4152_v10 = vsel %vm2353_vm7, 1.0, %v11735_v53  ;;  %v4153_v24 = vsel %vm2356_vm8, 1.0, %v11735_v53  ;;  %v4154_v40 = vsel %vm2359_vm9, 1.0, %v11735_v53 }
 0xade   :  { %v2378_v33 = vperm.slane %v4153_v24, 0  ;;  %v2385_v38 = vperm.slane %v4153_v24, 1  ;;  %v2396_v59 = vperm.slane %v4154_v40, 0  ;;  %v2403_v52 = vperm.slane %v4154_v40, 1  ;;  %4155 = vst [vmem:[%s10991_s9 + $0x6] sm:$0x3] %v4152_v10 }
 0xadf   :  { %v2369_v30 = vperm.slane %v4152_v10, 1  ;;  %v2362_v35 = vperm.slane %v4152_v10, 0 }
 0xae0   :  { %v4320_v32 = vpack.i.bf16 %v2403_v52, %v2385_v38 }
 0xae1   :  { %v4307_v2 = vpack.i.bf16 %v2369_v30, %v2396_v59  ;;  %v4301_v1 = vpack.i.bf16 %v2378_v33, %v2362_v35 }
 0xae2   :  { %4321 = vperm.xlu2 %4319, %v4320_v32  }
 0xae3   :  { %4308 = vperm.xlu1 %4306, %v4307_v2   ;;  %4302 = vperm.xlu0 %4276, %v4301_v1   ;;  %v4315_v48 = vpop.permute.xlu2 %4314 }
 0xae4   :  { %v4317_v38 = vunpack.i.h.bf16 %v4315_v48  ;;  %v4316_v30 = vunpack.i.l.bf16 %v4315_v48 }
 0xaea   :  { %4338 = vset.pattern.permute.xlu2 %v11736_v22 }
 0xaeb   :  { %4325 = vset.pattern.permute.xlu1 %v11736_v22  ;;  %4318 = vset.pattern.permute.xlu0 %v11736_v22 }
 0xaec   :  { %2455 = vperm.xlu1 %4325, %v2449_v55   ;;  %2451 = vperm.xlu0 %4318, %v2448_v29  }
 0xaf4   :  { %4326 = vset.pattern.permute.xlu1 %v6540_v21  ;;  %4332 = vset.pattern.permute.xlu0 %v6540_v21 }
 0xb3c   :  { %v4322_v49 = vpop.permute.xlu2 %4321 }
 0xb3d   :  { %v4323_v54 = vunpack.i.l.bf16 %v4322_v49  ;;  %v4324_v63 = vunpack.i.h.bf16 %v4322_v49  ;;  %v12075_v49 = vld [vmem:[#allocation41_spill] sm:$0xff] }
 0xb3f   :  { %v2417_v43 = vmul.f32 %v4323_v54, %v9378_v50  ;;  %v2421_v0 = vmul.f32 %v4324_v63, %v1917_v4  ;;  %v2393_v16 = vmul.f32 %v4323_v54, %v8264_v56  ;;  %v12076_v54 = vld [vmem:[#allocation15_spill] sm:$0xff] }
 0xb55   :  { %v4309_v36 = vpop.permute.xlu1 %4308  ;;  %v4303_v44 = vpop.permute.xlu0 %4302 }
 0xb56   :  { %v4311_v46 = vunpack.i.h.bf16 %v4309_v36  ;;  %v4305_v34 = vunpack.i.h.bf16 %v4303_v44  ;;  %v4304_v20 = vunpack.i.l.bf16 %v4303_v44  ;;  %v4310_v39 = vunpack.i.l.bf16 %v4309_v36  ;;  %v12077_v36 = vld [vmem:[#allocation45_spill] sm:$0xff] }
 0xb57   :  { %v12078_v44 = vld [vmem:[#allocation17_spill] sm:$0xff] }
 0xb58   :  { %v2377_v15 = vmul.f32 %v4311_v46, %v9412_v13  ;;  %v2415_v3 = vmul.f32 %v4311_v46, %v9405_v62  ;;  %v2392_v51 = vmul.f32 %v4305_v34, %v8225_v17  ;;  %v2416_v6 = vmul.f32 %v4305_v34, %v8227_v61  ;;  %v12080_v46 = vld [vmem:[#allocation16_spill] sm:$0xff]  ;;  %v12081_v34 = vld [vmem:[#allocation49_spill] sm:$0xff] }
 0xb59   :  { %v2376_v11 = vmul.f32 %v4304_v20, %v9407_v42  ;;  %v2414_v58 = vmul.f32 %v4304_v20, %v9399_v7  ;;  %v2410_v24 = vmul.f32 %v4310_v39, %v8230_v19  ;;  %v12064_v13 = vrot.slane %v8227_v61, 1  ;;  %v12082_v20 = vld [vmem:[#allocation19_spill] sm:$0xff] }
 0xb5a   :  { %v2419_v10 = vadd.f32 %v2417_v43, %v2415_v3  ;;  %v2395_v59 = vadd.f32 %v2393_v16, %v2377_v15  ;;  %v2411_v7 = vmul.f32 %v4324_v63, %v8303_v8  ;;  %v12079_v63 = vld [vmem:[#allocation44_spill] sm:$0xff]  ;;  %v12084_v43 = vld [vmem:[#allocation18_spill] sm:$0xff]  ;;  %v12085_v15 = vld [vmem:[#allocation53_spill] sm:$0xff] }
 0xb5b   :  { %v2420_v40 = vmul.f32 %v4310_v39, %v12064_v13  ;;  %v2394_v62 = vadd.f32 %v2392_v51, %v2376_v11  ;;  %v2418_v33 = vadd.f32 %v2416_v6, %v2414_v58  ;;  %v12083_v39 = vld [vmem:[#allocation48_spill] sm:$0xff]  ;;  %v12086_v3 = vld [vmem:[#allocation21_spill] sm:$0xff]  ;;  %v12090_v58 = vld [vmem:[#allocation23_spill] sm:$0xff] }
 0xb5c   :  { %v2423_v52 = vadd.f32 %v2421_v0, %v2419_v10  ;;  %v2413_v1 = vadd.f32 %v2411_v7, %v2395_v59  ;;  %v12087_v51 = vld [vmem:[#allocation52_spill] sm:$0xff]  ;;  %v12089_v11 = vld [vmem:[#allocation57_spill] sm:$0xff]  ;;  %v12100_v59 = vld [vmem:[#allocation30_spill] sm:$0xff] }
 0xb5d   :  { %v2412_v42 = vadd.f32 %v2410_v24, %v2394_v62  ;;  %v2422_v35 = vadd.f32 %v2420_v40, %v2418_v33  ;;  %v12088_v6 = vld [vmem:[#allocation20_spill] sm:$0xff]  ;;  %v12094_v24 = vld [vmem:[#allocation22_spill] sm:$0xff]  ;;  %v12095_v13 = vld [vmem:[#allocation61_spill] sm:$0xff] }
 0xb5e   :  { %v9455_v32 = vmul.f32 %v4317_v38, %v2423_v52  ;;  %v9457_v4 = vpop.permute.xlu0 %2451  ;;  %v9463_v28 = vpop.permute.xlu1 %2455  ;;  %v2443_v48 = vmul.f32 %v4317_v38, %v2413_v1  ;;  %v12091_v0 = vld [vmem:[#allocation60_spill] sm:$0xff]  ;;  %v12096_v40 = vld [vmem:[#allocation27_spill] sm:$0xff]  ;;  %v12097_v62 = vld [vmem:[#allocation25_spill] sm:$0xff] }
 0xb5f   :  { %v2442_v2 = vmul.f32 %v4316_v30, %v2412_v42  ;;  %v2458_v19 = vmul.f32 %v9457_v4, %v8225_v17  ;;  %v9461_v18 = vmul.f32 %v4316_v30, %v2422_v35  ;;  %v2459_v8 = vmul.f32 %v9463_v28, %v8264_v56  ;;  %v12068_v56 = vld [vmem:[#allocation11_spill] sm:$0xff]  ;;  %v12092_v16 = vld [vmem:[#allocation24_spill] sm:$0xff]  ;;  %v12098_v33 = vld [vmem:[#allocation26_spill] sm:$0xff] }
 0xb60   :  { %v12093_v10 = vld [vmem:[#allocation56_spill] sm:$0xff]  ;;  %v12099_v38 = vld [vmem:[#allocation65_spill] sm:$0xff]  ;;  %v12104_v35 = vld [vmem:[#allocation34_spill] sm:$0xff] }
 0xb61   :  { %v9465_v55 = vadd.f32 %v2458_v19, %v2442_v2  ;;  %v9478_v17 = vadd.f32 %v2459_v8, %v2443_v48  ;;  %v12101_v52 = vld [vmem:[#allocation64_spill] sm:$0xff]  ;;  %v12103_v42 = vld [vmem:[#allocation69_spill] sm:$0xff]  ;;  %v12106_v2 = vld [vmem:[#allocation35_spill] sm:$0xff] }
 0xb62   :  { %v12102_v30 = vld [vmem:[#allocation28_spill] sm:$0xff]  ;;  %v12108_v1 = vld [vmem:[#allocation31_spill] sm:$0xff] }
 0xb63   :  { %v9468_v29 = vrot.slane %v9465_v55, 1  ;;  %v12105_v7 = vld [vmem:[#allocation72_spill] sm:$0xff]  ;;  %v12109_v48 = vld [vmem:[#allocation39_spill] sm:$0xff] }
 0xb64   :  { %v12107_v19 = vld [vmem:[#allocation68_spill] sm:$0xff] }
 0xb65   :  { %2500 = vmatmul.f32.vlgmr.msra.gmra.mxu0 %v9468_v29  ;;  %2523 = vmatmul.f32.vlgmr.msra.gmra.mxu1 %v9468_v29  ;;  %v12110_v8 = vld [vmem:[#allocation76_spill] sm:$0xff] }
 0xb66   :  { %2546 = vmatmul.f32.vlgmr.msra.gmra.mxu2 %v9468_v29  ;;  %2569 = vmatmul.f32.vlgmr.msra.gmra.mxu3 %v9468_v29 }
 0xb67   :  { %2668 = vmatpush.msra.mxu0 %v8243_v31  ;;  %2691 = vmatpush.msra.mxu1 %v8249_v23  ;;  %v9489_v31 = vrot.slane %v9478_v17, 1  ;;  %v12065_v23 = vld [vmem:[#allocation32_spill] sm:$0xff] }
 0xb68   :  { %3046 = vmatpush.msra.mxu2 %v8255_v9  ;;  %3069 = vmatpush.msra.mxu3 %v8261_v14  ;;  %v12066_v9 = vld [vmem:[#allocation10_spill] sm:$0xff]  ;;  %v12067_v14 = vld [vmem:[#allocation33_spill] sm:$0xff] }
 0xb69   :  { %2669 = vmatpush.msra.mxu0 %v8269_v26  ;;  %2692 = vmatpush.msra.mxu1 %v8275_v27  ;;  %v12069_v26 = vld [vmem:[#allocation36_spill] sm:$0xff] }
 0xb6a   :  { %3047 = vmatpush.msra.mxu2 %v8281_v57  ;;  %3070 = vmatpush.msra.mxu3 %v8287_v12  ;;  %v12070_v27 = vld [vmem:[#allocation12_spill] sm:$0xff]  ;;  %v12071_v57 = vld [vmem:[#allocation37_spill] sm:$0xff] }
 0xb6b   :  { %2670 = vmatpush.msra.mxu0 %v8293_v41  ;;  %2693 = vmatpush.msra.mxu1 %v8299_v60  ;;  %v12072_v12 = vld [vmem:[#allocation13_spill] sm:$0xff]  ;;  %v12073_v41 = vld [vmem:[#allocation40_spill] sm:$0xff]  ;;  %v12074_v60 = vld [vmem:[#allocation14_spill] sm:$0xff] }
 0xb6c   :  { %3048 = vmatpush.msra.mxu2 %v12065_v23  ;;  %3071 = vmatpush.msra.mxu3 %v12066_v9  ;;  %v12111_v23 = vld [vmem:[#allocation73_spill] sm:$0xff]  ;;  %v12112_v9 = vld [vmem:[#allocation38_spill] sm:$0xff] }
 0xb6d   :  { %2671 = vmatpush.msra.mxu0 %v12067_v14  ;;  %2694 = vmatpush.msra.mxu1 %v12068_v56  ;;  %v12113_v14 = vld [vmem:[#allocation43_spill] sm:$0xff] }
 0xb6e   :  { %2503 = vmatmul.f32.gmra.mxu0 %v9489_v31  ;;  %2526 = vmatmul.f32.gmra.mxu1 %v9489_v31  ;;  %v12114_v56 = vld [vmem:[#allocation79_spill] sm:$0xff] }
 0xb6f   :  { %2549 = vmatmul.f32.gmra.mxu2 %v9489_v31  ;;  %2572 = vmatmul.f32.gmra.mxu3 %v9489_v31 }
 0xb70   :  { %2672 = vmatpush.msra.mxu0 %v12069_v26  ;;  %2695 = vmatpush.msra.mxu1 %v12070_v27  ;;  %v12115_v26 = vld [vmem:[#allocation42_spill] sm:$0xff]  ;;  %v12116_v27 = vld [vmem:[#allocation80_spill] sm:$0xff] }
 0xb71   :  { %3049 = vmatpush.msra.mxu2 %v12071_v57  ;;  %3072 = vmatpush.msra.mxu3 %v12072_v12  ;;  %v12117_v57 = vld [vmem:[#allocation50_spill] sm:$0xff]  ;;  %v12118_v12 = vld [vmem:[#allocation51_spill] sm:$0xff] }
 0xb72   :  { %2673 = vmatpush.msra.mxu0 %v12073_v41  ;;  %2696 = vmatpush.msra.mxu1 %v12074_v60  ;;  %v12119_v41 = vld [vmem:[#allocation54_spill] sm:$0xff]  ;;  %v12120_v60 = vld [vmem:[#allocation55_spill] sm:$0xff] }
 0xb73   :  { %3050 = vmatpush.msra.mxu2 %v12075_v49  ;;  %3073 = vmatpush.msra.mxu3 %v12076_v54  ;;  %v12121_v49 = vld [vmem:[#allocation46_spill] sm:$0xff]  ;;  %v12122_v54 = vld [vmem:[#allocation47_spill] sm:$0xff] }
 0xb74   :  { %2674 = vmatpush.msra.mxu0 %v12077_v36  ;;  %2697 = vmatpush.msra.mxu1 %v12078_v44  ;;  %v12123_v36 = vld [vmem:[#allocation62_spill] sm:$0xff]  ;;  %v12124_v44 = vld [vmem:[#allocation63_spill] sm:$0xff] }
 0xb75   :  { %3051 = vmatpush.msra.mxu2 %v12079_v63  ;;  %3074 = vmatpush.msra.mxu3 %v12080_v46  ;;  %v12125_v63 = vld [vmem:[#allocation58_spill] sm:$0xff]  ;;  %v12126_v46 = vld [vmem:[#allocation59_spill] sm:$0xff] }
 0xb76   :  { %2675 = vmatpush.msra.mxu0 %v12081_v34  ;;  %2698 = vmatpush.msra.mxu1 %v12082_v20  ;;  %v12127_v34 = vld [vmem:[#allocation70_spill] sm:$0xff]  ;;  %v12128_v20 = vld [vmem:[#allocation71_spill] sm:$0xff] }
 0xb77   :  { %2592 = vmatmul.f32.vlgmr.msrb.gmra.mxu0 %v9468_v29  ;;  %2615 = vmatmul.f32.vlgmr.msrb.gmra.mxu1 %v9465_v55 }
 0xb78   :  { %2638 = vmatmul.f32.vlgmr.msrb.gmra.mxu2 %v9465_v55  ;;  %2661 = vmatmul.f32.vlgmr.msrb.gmra.mxu3 %v9465_v55 }
 0xb79   :  { %2676 = vmatpush.msra.mxu0 %v12083_v39  ;;  %2699 = vmatpush.msra.mxu1 %v12084_v43  ;;  %v12129_v39 = vld [vmem:[#allocation66_spill] sm:$0xff]  ;;  %v12130_v43 = vld [vmem:[#allocation67_spill] sm:$0xff] }
 0xb7a   :  { %3052 = vmatpush.msra.mxu2 %v12085_v15  ;;  %3075 = vmatpush.msra.mxu3 %v12086_v3  ;;  %v12131_v15 = vld [vmem:[#allocation77_spill] sm:$0xff]  ;;  %v12132_v3 = vld [vmem:[#allocation78_spill] sm:$0xff] }
 0xb7b   :  { %2677 = vmatpush.msra.mxu0 %v12087_v51  ;;  %2700 = vmatpush.msra.mxu1 %v12088_v6  ;;  %v12133_v51 = vld [vmem:[#allocation74_spill] sm:$0xff]  ;;  %v12134_v6 = vld [vmem:[#allocation75_spill] sm:$0xff] }
 0xb7c   :  { %3053 = vmatpush.msra.mxu2 %v12089_v11  ;;  %3076 = vmatpush.msra.mxu3 %v12090_v58  ;;  %v12135_v11 = vld [vmem:[#allocation83_spill] sm:$0xff]  ;;  %v12136_v58 = vld [vmem:[#allocation84_spill] sm:$0xff] }
 0xb7d   :  { %2678 = vmatpush.msra.mxu0 %v12091_v0  ;;  %2701 = vmatpush.msra.mxu1 %v12092_v16  ;;  %v12137_v0 = vld [vmem:[#allocation81_spill] sm:$0xff]  ;;  %v12138_v16 = vld [vmem:[#allocation82_spill] sm:$0xff] }
 0xb7e   :  { %3054 = vmatpush.msra.mxu2 %v12093_v10  ;;  %3077 = vmatpush.msra.mxu3 %v12094_v24  ;;  %v12139_v10 = vld [vmem:[#allocation87_spill] sm:$0xff]  ;;  %v12140_v24 = vld [vmem:[#allocation88_spill] sm:$0xff] }
 0xb7f   :  { %2679 = vmatpush.msra.mxu0 %v12095_v13  ;;  %2702 = vmatpush.msra.mxu1 %v12096_v40  ;;  %v12141_v13 = vld [vmem:[#allocation85_spill] sm:$0xff]  ;;  %v12142_v40 = vld [vmem:[#allocation86_spill] sm:$0xff] }
 0xb80   :  { %2595 = vmatmul.f32.gmra.mxu0 %v9489_v31  ;;  %2618 = vmatmul.f32.gmra.mxu1 %v9478_v17 }
 0xb81   :  { %2641 = vmatmul.f32.gmra.mxu2 %v9478_v17  ;;  %2664 = vmatmul.f32.gmra.mxu3 %v9478_v17 }
 0xb82   :  { %2680 = vmatpush.msra.mxu0 %v12097_v62  ;;  %2703 = vmatpush.msra.mxu1 %v12098_v33  ;;  %v12143_v62 = vld [vmem:[#allocation91_spill] sm:$0xff]  ;;  %v12144_v33 = vld [vmem:[#allocation92_spill] sm:$0xff] }
 0xb83   :  { %3055 = vmatpush.msra.mxu2 %v12099_v38  ;;  %3078 = vmatpush.msra.mxu3 %v12100_v59  ;;  %v12145_v38 = vld [vmem:[#allocation89_spill] sm:$0xff]  ;;  %v12146_v59 = vld [vmem:[#allocation90_spill] sm:$0xff] }
 0xb84   :  { %2681 = vmatpush.msra.mxu0 %v12101_v52  ;;  %2704 = vmatpush.msra.mxu1 %v12102_v30  ;;  %v12147_v52 = vld [vmem:[#allocation95_spill] sm:$0xff]  ;;  %v12148_v30 = vld [vmem:[#allocation96_spill] sm:$0xff] }
 0xb85   :  { %3056 = vmatpush.msra.mxu2 %v12103_v42  ;;  %3079 = vmatpush.msra.mxu3 %v12104_v35  ;;  %v12149_v42 = vld [vmem:[#allocation93_spill] sm:$0xff]  ;;  %v12150_v35 = vld [vmem:[#allocation94_spill] sm:$0xff] }
 0xb86   :  { %2682 = vmatpush.msra.mxu0 %v12105_v7  ;;  %2705 = vmatpush.msra.mxu1 %v12106_v2  ;;  %v12151_v7 = vld [vmem:[#allocation99_spill] sm:$0xff]  ;;  %v12152_v2 = vld [vmem:[#allocation100_spill] sm:$0xff] }
 0xb87   :  { %3057 = vmatpush.msra.mxu2 %v12107_v19  ;;  %3080 = vmatpush.msra.mxu3 %v12108_v1  ;;  %v12153_v19 = vld [vmem:[#allocation97_spill] sm:$0xff]  ;;  %v12154_v1 = vld [vmem:[#allocation98_spill] sm:$0xff] }
 0xb88   :  { %2683 = vmatpush.msra.mxu0 %v12109_v48  ;;  %2706 = vmatpush.msra.mxu1 %v12110_v8  ;;  %v12155_v48 = vld [vmem:[#allocation103_spill] sm:$0xff]  ;;  %v12156_v8 = vld [vmem:[#allocation104_spill] sm:$0xff] }
 0xb89   :  { %2684 = vmatmul.f32.vlgmr.msra.gmra.mxu0 %v9465_v55  ;;  %2707 = vmatmul.f32.vlgmr.msra.gmra.mxu1 %v9465_v55 }
 0xb8a   :  { %3092 = vmatpush.msrb.mxu0 %v12111_v23  ;;  %3115 = vmatpush.msrb.mxu1 %v12112_v9  ;;  %v12157_v23 = vld [vmem:[#allocation101_spill] sm:$0xff]  ;;  %v12158_v9 = vld [vmem:[#allocation102_spill] sm:$0xff] }
 0xb8b   :  { %3058 = vmatpush.msra.mxu2 %v12113_v14  ;;  %3081 = vmatpush.msra.mxu3 %v12114_v56  ;;  %v12159_v14 = vld [vmem:[#allocation107_spill] sm:$0xff]  ;;  %v12160_v56 = vld [vmem:[#allocation108_spill] sm:$0xff] }
 0xb8c   :  { %3093 = vmatpush.msrb.mxu0 %v12115_v26  ;;  %3116 = vmatpush.msrb.mxu1 %v12116_v27  ;;  %v12161_v26 = vld [vmem:[#allocation105_spill] sm:$0xff]  ;;  %v12162_v27 = vld [vmem:[#allocation106_spill] sm:$0xff] }
 0xb8d   :  { %3059 = vmatpush.msra.mxu2 %v12117_v57  ;;  %3082 = vmatpush.msra.mxu3 %v12118_v12  ;;  %v12163_v57 = vld [vmem:[#allocation111_spill] sm:$0xff]  ;;  %v12164_v12 = vld [vmem:[#allocation112_spill] sm:$0xff] }
 0xb8e   :  { %3094 = vmatpush.msrb.mxu0 %v12119_v41  ;;  %3117 = vmatpush.msrb.mxu1 %v12120_v60  ;;  %v12165_v41 = vld [vmem:[#allocation113_spill] sm:$0xff]  ;;  %v12166_v60 = vld [vmem:[#allocation114_spill] sm:$0xff] }
 0xb8f   :  { %3060 = vmatpush.msra.mxu2 %v12121_v49  ;;  %3083 = vmatpush.msra.mxu3 %v12122_v54  ;;  %v12167_v49 = vld [vmem:[#allocation109_spill] sm:$0xff]  ;;  %v12168_v54 = vld [vmem:[#allocation110_spill] sm:$0xff] }
 0xb90   :  { %3095 = vmatpush.msrb.mxu0 %v12123_v36  ;;  %3118 = vmatpush.msrb.mxu1 %v12124_v44  ;;  %v12169_v36 = vld [vmem:[#allocation117_spill] sm:$0xff]  ;;  %v12170_v44 = vld [vmem:[#allocation118_spill] sm:$0xff] }
 0xb91   :  { %2687 = vmatmul.f32.gmra.mxu0 %v9478_v17  ;;  %2710 = vmatmul.f32.gmra.mxu1 %v9478_v17 }
 0xb92   :  { %3096 = vmatpush.msrb.mxu0 %v12125_v63  ;;  %3119 = vmatpush.msrb.mxu1 %v12126_v46  ;;  %v12171_v63 = vld [vmem:[#allocation115_spill] sm:$0xff]  ;;  %v12172_v46 = vld [vmem:[#allocation116_spill] sm:$0xff] }
 0xb93   :  { %3061 = vmatpush.msra.mxu2 %v12127_v34  ;;  %3084 = vmatpush.msra.mxu3 %v12128_v20  ;;  %v12173_v34 = vld [vmem:[#allocation121_spill] sm:$0xff]  ;;  %v12174_v20 = vld [vmem:[#allocation122_spill] sm:$0xff] }
 0xb94   :  { %3097 = vmatpush.msrb.mxu0 %v12129_v39  ;;  %3120 = vmatpush.msrb.mxu1 %v12130_v43  ;;  %v12175_v39 = vld [vmem:[#allocation119_spill] sm:$0xff]  ;;  %v12176_v43 = vld [vmem:[#allocation120_spill] sm:$0xff] }
 0xb95   :  { %3138 = vmatpush.msrb.mxu2 %v12131_v15  ;;  %3161 = vmatpush.msrb.mxu3 %v12132_v3  ;;  %v12177_v15 = vld [vmem:[#allocation125_spill] sm:$0xff]  ;;  %v12178_v3 = vld [vmem:[#allocation126_spill] sm:$0xff] }
 0xb96   :  { %3098 = vmatpush.msrb.mxu0 %v12133_v51  ;;  %3121 = vmatpush.msrb.mxu1 %v12134_v6  ;;  %v12179_v51 = vld [vmem:[#allocation123_spill] sm:$0xff]  ;;  %v12180_v6 = vld [vmem:[#allocation124_spill] sm:$0xff] }
 0xb97   :  { %3139 = vmatpush.msrb.mxu2 %v12135_v11  ;;  %3162 = vmatpush.msrb.mxu3 %v12136_v58  ;;  %v12181_v11 = vld [vmem:[#allocation129_spill] sm:$0xff]  ;;  %v12182_v58 = vld [vmem:[#allocation130_spill] sm:$0xff] }
 0xb98   :  { %3099 = vmatpush.msrb.mxu0 %v12137_v0  ;;  %3122 = vmatpush.msrb.mxu1 %v12138_v16  ;;  %v12183_v0 = vld [vmem:[#allocation127_spill] sm:$0xff]  ;;  %v12184_v16 = vld [vmem:[#allocation128_spill] sm:$0xff] }
 0xb99   :  { %3140 = vmatpush.msrb.mxu2 %v12139_v10  ;;  %3163 = vmatpush.msrb.mxu3 %v12140_v24  ;;  %v12185_v10 = vld [vmem:[#allocation133_spill] sm:$0xff]  ;;  %v12186_v24 = vld [vmem:[#allocation134_spill] sm:$0xff] }
 0xb9a   :  { %3100 = vmatpush.msrb.mxu0 %v12141_v13  ;;  %3123 = vmatpush.msrb.mxu1 %v12142_v40  ;;  %v12187_v13 = vld [vmem:[#allocation131_spill] sm:$0xff]  ;;  %v12188_v40 = vld [vmem:[#allocation132_spill] sm:$0xff] }
 0xb9b   :  { %3141 = vmatpush.msrb.mxu2 %v12143_v62  ;;  %3164 = vmatpush.msrb.mxu3 %v12144_v33  ;;  %v12189_v62 = vld [vmem:[#allocation135_spill] sm:$0xff]  ;;  %v12190_v33 = vld [vmem:[#allocation136_spill] sm:$0xff] }
 0xb9c   :  { %3101 = vmatpush.msrb.mxu0 %v12145_v38  ;;  %3124 = vmatpush.msrb.mxu1 %v12146_v59  ;;  %v12191_v38 = vld [vmem:[#allocation137_spill] sm:$0xff]  ;;  %v12192_v59 = vld [vmem:[#allocation138_spill] sm:$0xff] }
 0xb9d   :  { %3142 = vmatpush.msrb.mxu2 %v12147_v52  ;;  %3165 = vmatpush.msrb.mxu3 %v12148_v30  ;;  %v12193_v52 = vld [vmem:[#allocation139_spill] sm:$0xff]  ;;  %v12194_v30 = vld [vmem:[#allocation140_spill] sm:$0xff] }
 0xb9e   :  { %3102 = vmatpush.msrb.mxu0 %v12149_v42  ;;  %3125 = vmatpush.msrb.mxu1 %v12150_v35  ;;  %v12195_v42 = vld [vmem:[#allocation141_spill] sm:$0xff]  ;;  %v12196_v35 = vld [vmem:[#allocation142_spill] sm:$0xff] }
 0xb9f   :  { %3143 = vmatpush.msrb.mxu2 %v12151_v7  ;;  %3166 = vmatpush.msrb.mxu3 %v12152_v2  ;;  %v12197_v7 = vld [vmem:[#allocation143_spill] sm:$0xff]  ;;  %v12198_v2 = vld [vmem:[#allocation144_spill] sm:$0xff] }
 0xba0   :  { %3103 = vmatpush.msrb.mxu0 %v12153_v19  ;;  %3126 = vmatpush.msrb.mxu1 %v12154_v1  ;;  %v12199_v19 = vld [vmem:[#allocation145_spill] sm:$0xff]  ;;  %v12200_v1 = vld [vmem:[#allocation146_spill] sm:$0xff] }
 0xba1   :  { %3144 = vmatpush.msrb.mxu2 %v12155_v48  ;;  %3167 = vmatpush.msrb.mxu3 %v12156_v8  ;;  %v12201_v48 = vld [vmem:[#allocation147_spill] sm:$0xff]  ;;  %v12202_v8 = vld [vmem:[#allocation148_spill] sm:$0xff] }
 0xba2   :  { %3104 = vmatpush.msrb.mxu0 %v12157_v23  ;;  %3127 = vmatpush.msrb.mxu1 %v12158_v9  ;;  %v12203_v23 = vld [vmem:[#allocation149_spill] sm:$0xff]  ;;  %v12204_v9 = vld [vmem:[#allocation150_spill] sm:$0xff] }
 0xba3   :  { %3145 = vmatpush.msrb.mxu2 %v12159_v14  ;;  %3168 = vmatpush.msrb.mxu3 %v12160_v56  ;;  %v12205_v14 = vld [vmem:[#allocation151_spill] sm:$0xff]  ;;  %v12206_v56 = vld [vmem:[#allocation152_spill] sm:$0xff] }
 0xba4   :  { %3105 = vmatpush.msrb.mxu0 %v12161_v26  ;;  %3128 = vmatpush.msrb.mxu1 %v12162_v27  ;;  %v12207_v26 = vld [vmem:[#allocation153_spill] sm:$0xff]  ;;  %v12208_v27 = vld [vmem:[#allocation154_spill] sm:$0xff] }
 0xba5   :  { %3146 = vmatpush.msrb.mxu2 %v12163_v57  ;;  %3169 = vmatpush.msrb.mxu3 %v12164_v12  ;;  %v12209_v57 = vld [vmem:[#allocation155_spill] sm:$0xff]  ;;  %v12210_v12 = vld [vmem:[#allocation156_spill] sm:$0xff] }
 0xba6   :  { %3106 = vmatpush.msrb.mxu0 %v12165_v41  ;;  %3129 = vmatpush.msrb.mxu1 %v12166_v60  ;;  %v12211_v41 = vld [vmem:[#allocation157_spill] sm:$0xff]  ;;  %v12212_v60 = vld [vmem:[#allocation158_spill] sm:$0xff] }
 0xba7   :  { %3147 = vmatpush.msrb.mxu2 %v12167_v49  ;;  %3170 = vmatpush.msrb.mxu3 %v12168_v54  ;;  %v12213_v49 = vld [vmem:[#allocation159_spill] sm:$0xff]  ;;  %v12214_v54 = vld [vmem:[#allocation160_spill] sm:$0xff] }
 0xba8   :  { %3107 = vmatpush.msrb.mxu0 %v12169_v36  ;;  %3130 = vmatpush.msrb.mxu1 %v12170_v44 }
 0xba9   :  { %3148 = vmatpush.msrb.mxu2 %v12173_v34  ;;  %3171 = vmatpush.msrb.mxu3 %v12174_v20 }
 0xbaa   :  { %3184 = vmatpush.msra.mxu0 %v12171_v63  ;;  %3207 = vmatpush.msra.mxu1 %v12172_v46 }
 0xbab   :  { %3149 = vmatpush.msrb.mxu2 %v12177_v15  ;;  %3172 = vmatpush.msrb.mxu3 %v12178_v3 }
 0xbac   :  { %3185 = vmatpush.msra.mxu0 %v12175_v39  ;;  %3208 = vmatpush.msra.mxu1 %v12176_v43 }
 0xbad   :  { %3150 = vmatpush.msrb.mxu2 %v12181_v11  ;;  %3173 = vmatpush.msrb.mxu3 %v12182_v58 }
 0xbae   :  { %3186 = vmatpush.msra.mxu0 %v12179_v51  ;;  %3209 = vmatpush.msra.mxu1 %v12180_v6  ;;  %v12215_v6 = vld [vmem:[#allocation8_spill] sm:$0xff] }
 0xbaf   :  { %3151 = vmatpush.msrb.mxu2 %v12185_v10  ;;  %3174 = vmatpush.msrb.mxu3 %v12186_v24 }
 0xbb0   :  { %3187 = vmatpush.msra.mxu0 %v12183_v0  ;;  %3210 = vmatpush.msra.mxu1 %v12184_v16 }
 0xbb1   :  { %3152 = vmatpush.msrb.mxu2 %v12189_v62  ;;  %3175 = vmatpush.msrb.mxu3 %v12190_v33  ;;  %v12217_v33 = vld [vmem:[#allocation9_spill] sm:$0xff] }
 0xbb2   :  { %3188 = vmatpush.msra.mxu0 %v12187_v13  ;;  %3211 = vmatpush.msra.mxu1 %v12188_v40  ;;  %v12216_v40 = vld [vmem:[#allocation29_spill] sm:$0xff] }
 0xbb3   :  { %3153 = vmatpush.msrb.mxu2 %v12193_v52  ;;  %3176 = vmatpush.msrb.mxu3 %v12194_v30 }
 0xbb4   :  { %3189 = vmatpush.msra.mxu0 %v12191_v38  ;;  %3212 = vmatpush.msra.mxu1 %v12192_v59 }
 0xbb6   :  { %3190 = vmatpush.msra.mxu0 %v12195_v42  ;;  %3213 = vmatpush.msra.mxu1 %v12196_v35 }
 0xbb8   :  { %3191 = vmatpush.msra.mxu0 %v12197_v7  ;;  %3214 = vmatpush.msra.mxu1 %v12198_v2 }
 0xbba   :  { %3192 = vmatpush.msra.mxu0 %v12199_v19  ;;  %3215 = vmatpush.msra.mxu1 %v12200_v1 }
 0xbbc   :  { %3193 = vmatpush.msra.mxu0 %v12201_v48  ;;  %3216 = vmatpush.msra.mxu1 %v12202_v8 }
 0xbbe   :  { %3194 = vmatpush.msra.mxu0 %v12203_v23  ;;  %3217 = vmatpush.msra.mxu1 %v12204_v9 }
 0xbc0   :  { %3195 = vmatpush.msra.mxu0 %v12205_v14  ;;  %3218 = vmatpush.msra.mxu1 %v12206_v56 }
 0xbc2   :  { %3196 = vmatpush.msra.mxu0 %v12207_v26  ;;  %3219 = vmatpush.msra.mxu1 %v12208_v27 }
 0xbc4   :  { %3197 = vmatpush.msra.mxu0 %v12209_v57  ;;  %3220 = vmatpush.msra.mxu1 %v12210_v12  ;;  %v2464_v12 = vmul.f32 %v9457_v4, %v8227_v61  ;;  %v2465_v61 = vmul.f32 %v9463_v28, %v9378_v50 }
 0xbc6   :  { %3198 = vmatpush.msra.mxu0 %v12211_v41  ;;  %3221 = vmatpush.msra.mxu1 %v12212_v60  ;;  %v9686_v4 = vadd.f32 %v2464_v12, %v9461_v18  ;;  %v9695_v50 = vadd.f32 %v2465_v61, %v9455_v32 }
 0xbc8   :  { %3199 = vmatpush.msra.mxu0 %v12213_v49  ;;  %3222 = vmatpush.msra.mxu1 %v12214_v54  ;;  %v2478_v18 = vrot.slane %v9686_v4, 1 }
 0xbe2   :  { %v2524_v36 = vpop.f32.mrf.mxu1  ;;  %v2501_v44 = vpop.f32.mrf.mxu0 }
 0xbe9   :  { %v2547_v63 = vpop.f32.mrf.mxu2  ;;  %v2570_v46 = vpop.f32.mrf.mxu3 }
 0xbeb   :  { %v2527_v34 = vpop.f32.mrf.mxu1  ;;  %v2504_v20 = vpop.f32.mrf.mxu0 }
 0xbf2   :  { %v2550_v39 = vpop.f32.mrf.mxu2  ;;  %v9657_v43 = vpop.f32.mrf.mxu3 }
 0xbf4   :  { %v2616_v15 = vpop.f32.mrf.mxu1  ;;  %v2593_v51 = vpop.f32.mrf.mxu0 }
 0xbf5   :  { %v2617_v3 = vadd.f32 %v2616_v15, %v2501_v44 }
 0xbf7   :  { %v2714_v11 = vadd.f32 %v2617_v3, %v12215_v6 }
 0xbf9   :  { %v4161_v58 = vmul.f32 -1.442695, %v2714_v11 }
 0xbfb   :  { %4541 = vpow2.f32 %v4161_v58  ;;  %v2639_v0 = vpop.f32.mrf.mxu2  ;;  %v2662_v16 = vpop.f32.mrf.mxu3 }
 0xbfc   :  { %v2640_v10 = vadd.f32 %v2639_v0, %v2524_v36  ;;  %v2663_v24 = vadd.f32 %v2662_v16, %v2547_v63 }
 0xbfd   :  { %v2619_v13 = vpop.f32.mrf.mxu1  ;;  %v9663_v7 = vpop.f32.mrf.mxu0 }
 0xbfe   :  { %v2715_v62 = vadd.f32 %v2640_v10, %v12216_v40  ;;  %v2716_v38 = vadd.f32 %v2663_v24, %v12217_v33  ;;  %v2620_v59 = vadd.f32 %v2619_v13, %v2504_v20 }
 0xc00   :  { %v4157_v52 = vmul.f32 -1.442695, %v2715_v62  ;;  %v4159_v30 = vmul.f32 -1.442695, %v2716_v38  ;;  %v2719_v42 = vadd.f32 %v2620_v59, %v12215_v6 }
 0xc01   :  { %v4542_v35 = vpop.eup %4541 }
 0xc02   :  { %v9665_v2 = vadd.f32 1.0, %v4542_v35  ;;  %4543 = vpow2.f32 %v4157_v52  ;;  %v4162_v19 = vmul.f32 -1.442695, %v2719_v42 }
 0xc03   :  { %4545 = vpow2.f32 %v4159_v30 }
 0xc04   :  { %4547 = vrcp.f32 %v9665_v2  ;;  %v2642_v1 = vpop.f32.mrf.mxu2  ;;  %v2665_v48 = vpop.f32.mrf.mxu3  ;;  %v2827_v3 = vand.u32 2147483648, %v9665_v2  ;;  %v2825_v11 = vand.u32 2147483647, %v9665_v2  ;;  %vm2821_vm10 = vweird.f32 %v9665_v2 }
 0xc05   :  { %4549 = vpow2.f32 %v4162_v19  ;;  %v2643_v8 = vadd.f32 %v2642_v1, %v2527_v34  ;;  %v2666_v23 = vadd.f32 %v2665_v48, %v2550_v39 }
 0xc06   :  { %v2708_v9 = vpop.f32.mrf.mxu1  ;;  %v2685_v63 = vpop.f32.mrf.mxu0  ;;  %v2828_v13 = vor.u32 1.1754944e-38, %v2827_v3  ;;  %vm9706_vm13 = vcmp.eq.f32.partialorder %v2825_v11, 8.507059e+37 }
 0xc07   :  { %v2720_v14 = vadd.f32 %v2643_v8, %v12216_v40  ;;  %v2709_v56 = vadd.f32 %v2708_v9, %v2593_v51  ;;  %v2721_v27 = vadd.f32 %v2666_v23, %v12217_v33  ;;  %v2686_v51 = vadd.f32 %v2685_v63, %v2570_v46 }
 0xc08   :  { %v4544_v26 = vpop.eup %4543 }
 0xc09   :  { %v4546_v57 = vpop.eup %4545  ;;  %v9672_v41 = vadd.f32 1.0, %v4544_v26  ;;  %v4158_v54 = vmul.f32 -1.442695, %v2720_v14  ;;  %v2718_v34 = vadd.f32 %v2709_v56, %v6362_v47  ;;  %v4160_v20 = vmul.f32 -1.442695, %v2721_v27 }
 0xc0a   :  { %v9674_v60 = vpop.eup %4547  ;;  %v9676_v49 = vadd.f32 1.0, %v4546_v57  ;;  %v2717_v32 = vadd.f32 %v2686_v51, %v6359_v45 }
 0xc0b   :  { %v4550_v36 = vpop.eup %4549  ;;  %v2817_v44 = vmul.f32 %v9674_v60, %v9665_v2  ;;  %4551 = vrcp.f32 %v9672_v41  ;;  %v4163_v58 = vmul.f32 -1.442695, %v2718_v34  ;;  %v2741_v0 = vand.u32 2147483647, %v9672_v41 }
 0xc0c   :  { %4553 = vrcp.f32 %v9676_v49  ;;  %v9688_v15 = vadd.f32 1.0, %v4550_v36  ;;  %v2743_v46 = vand.u32 2147483648, %v9672_v41  ;;  %vm2737_vm11 = vweird.f32 %v9672_v41 }
 0xc0d   :  { %v2818_v39 = vsub.f32 1.0, %v2817_v44  ;;  %4555 = vpow2.f32 %v4158_v54  ;;  %vm2777_vm12 = vweird.f32 %v9676_v49  ;;  %vm9710_vm14 = vcmp.eq.f32.partialorder %v2741_v0, 8.507059e+37 }
 0xc0e   :  { %4557 = vrcp.f32 %v9688_v15  ;;  %v2711_v62 = vpop.f32.mrf.mxu1  ;;  %v2781_v35 = vand.u32 2147483647, %v9676_v49  ;;  %vm2822_vm15 = vweird.f32 %v9674_v60  ;;  %v2688_v23 = vpop.f32.mrf.mxu0  ;;  %v2744_v26 = vor.u32 1.1754944e-38, %v2743_v46 }
 0xc0f   :  { %4559 = vpow2.f32 %v4160_v20  ;;  %v2819_v28 = vmul.f32 %v9674_v60, %v2818_v39  ;;  %v2712_v9 = vadd.f32 %v2711_v62, %v9663_v7  ;;  %v2783_v27 = vand.u32 2147483648, %v9676_v49  ;;  %vm9732_vm4 = vmor %vm2821_vm10, %vm2822_vm15 }
 0xc10   :  { %4561 = vpow2.f32 %v4163_v58  ;;  %v2689_v63 = vadd.f32 %v2688_v23, %v9657_v43  ;;  %vm2782_vm7 = vcmp.eq.f32.partialorder %v2781_v35, 8.507059e+37  ;;  %v2842_v43 = vand.u32 2147483648, %v9688_v15 }
 0xc11   :  { %v4552_v16 = vpop.eup %4551  ;;  %v2820_v8 = vadd.f32 %v9674_v60, %v2819_v28  ;;  %v2723_v39 = vadd.f32 %v2712_v9, %v6362_v47  ;;  %v2784_v2 = vor.u32 1.1754944e-38, %v2783_v27  ;;  %v2479_v62 = vrot.slane %v9695_v50, 1 }
 0xc12   :  { %v4554_v10 = vpop.eup %4553  ;;  %v2733_v24 = vmul.f32 %v4552_v16, %v9672_v41  ;;  %vm2738_vm1 = vweird.f32 %v4552_v16  ;;  %vm2836_vm8 = vweird.f32 %v9688_v15 }
 0xc13   :  { %v2773_v38 = vmul.f32 %v4554_v10, %v9676_v49  ;;  %v4556_v52 = vpop.eup %4555  ;;  %vm2778_vm3 = vweird.f32 %v4554_v10  ;;  %vm2739_vm5 = vmor %vm2737_vm11, %vm2738_vm1  ;;  %v2824_v20 = vsel %vm9732_vm4, %v9674_v60, %v2820_v8  ;;  %v2722_v49 = vadd.f32 %v2689_v63, %v6359_v45 }
 0xc14   :  { %v2734_v30 = vsub.f32 1.0, %v2733_v24  ;;  %v9716_v19 = vpop.eup %4557  ;;  %v9718_v48 = vadd.f32 1.0, %v4556_v52  ;;  %vm2779_vm6 = vmor %vm2777_vm12, %vm2778_vm3  ;;  %v2829_v58 = vsel %vm9706_vm13, %v2828_v13, %v2824_v20 }
 0xc15   :  { %v2774_v1 = vsub.f32 1.0, %v2773_v38  ;;  %v4560_v14 = vpop.eup %4559  ;;  %v2832_v12 = vmul.f32 %v9716_v19, %v9688_v15  ;;  %vm2837_vm10 = vweird.f32 %v9716_v19 }
 0xc16   :  { %v2735_v56 = vmul.f32 %v4552_v16, %v2734_v30  ;;  %4563 = vrcp.f32 %v9718_v48  ;;  %v4562_v54 = vpop.eup %4561  ;;  %v9726_v44 = vadd.f32 1.0, %v4560_v14  ;;  %v2758_v13 = vand.u32 2147483648, %v9718_v48  ;;  %vm9791_vm1 = vmor %vm2836_vm8, %vm2837_vm10 }
 0xc17   :  { %v2775_v57 = vmul.f32 %v4554_v10, %v2774_v1  ;;  %4565 = vtanh.f32 %v2717_v32  ;;  %v9742_v61 = vadd.f32 1.0, %v4562_v54  ;;  %v2833_v41 = vsub.f32 1.0, %v2832_v12 }
 0xc18   :  { %v2736_v36 = vadd.f32 %v4552_v16, %v2735_v56  ;;  %4567 = vrcp.f32 %v9726_v44  ;;  %v2756_v32 = vand.u32 2147483647, %v9718_v48  ;;  %v2843_v1 = vor.u32 1.1754944e-38, %v2842_v43 }
 0xc19   :  { %v2776_v34 = vadd.f32 %v4554_v10, %v2775_v57  ;;  %4569 = vrcp.f32 %v9742_v61  ;;  %v2834_v30 = vmul.f32 %v9716_v19, %v2833_v41  ;;  %vm2752_vm9 = vweird.f32 %v9718_v48 }
 0xc1a   :  { %v2740_v3 = vsel %vm2739_vm5, %v4552_v16, %v2736_v36  ;;  %v2840_v16 = vand.u32 2147483647, %v9688_v15  ;;  %vm9774_vm13 = vcmp.eq.f32.partialorder %v2756_v32, 8.507059e+37  ;;  %v2759_v57 = vor.u32 1.1754944e-38, %v2758_v13 }
 0xc1b   :  { %v2780_v51 = vsel %vm2779_vm6, %v4554_v10, %v2776_v34  ;;  %v2745_v60 = vsel %vm9710_vm14, %v2744_v26, %v2740_v3  ;;  %v4164_v10 = vmul.f32 -1.442695, %v2723_v39  ;;  %v2835_v54 = vadd.f32 %v9716_v19, %v2834_v30  ;;  %v9812_v30 = vld [vmem:[%s10988_s6] ss:$0 sm:$0xff] }
 0xc1c   :  { %v2785_v11 = vsel %vm2782_vm7, %v2784_v2, %v2780_v51  ;;  %v4564_v0 = vpop.eup %4563  ;;  %v2762_v28 = vmul.f32 %v2745_v60, %v9686_v4  ;;  %vm9770_vm11 = vcmp.eq.f32.partialorder %v2840_v16, 8.507059e+37  ;;  %v2796_v7 = vand.u32 2147483647, %v9726_v44 }
 0xc1d   :  { %v2802_v24 = vmul.f32 %v2785_v11, %v2478_v18  ;;  %v4566_v46 = vpop.eup %4565  ;;  %v2748_v38 = vmul.f32 %v4564_v0, %v9718_v48  ;;  %4571 = vpow2.f32 %v4164_v10  ;;  %vm2753_vm12 = vweird.f32 %v4564_v0 }
 0xc1e   :  { %v2846_v52 = vmul.f32 %v4566_v46, %v2829_v58  ;;  %v4568_v42 = vpop.eup %4567  ;;  %4573 = vtanh.f32 %v2722_v49  ;;  %v2798_v63 = vand.u32 2147483648, %v9726_v44  ;;  %vm2754_vm14 = vmor %vm2752_vm9, %vm2753_vm12  ;;  %v2867_v2 = vand.u32 2147483647, %v9742_v61 }
 0xc1f   :  { %v2804_v59 = vadd.f32 %v2802_v24, %v2762_v28  ;;  %v2749_v35 = vsub.f32 1.0, %v2748_v38  ;;  %v4570_v8 = vpop.eup %4569  ;;  %v2788_v23 = vmul.f32 %v4568_v42, %v9726_v44  ;;  %vm2793_vm15 = vweird.f32 %v4568_v42 }
 0xc20   :  { %v2859_v27 = vmul.f32 %v4570_v8, %v9742_v61  ;;  %v2869_v43 = vand.u32 2147483648, %v9742_v61  ;;  %vm2864_vm3 = vweird.f32 %v4570_v8  ;;  %vm2792_vm4 = vweird.f32 %v9726_v44 }
 0xc21   :  { %v9767_v9 = vadd.f32 %v2846_v52, %v2804_v59  ;;  %v2750_v56 = vmul.f32 %v4564_v0, %v2749_v35  ;;  %v2789_v12 = vsub.f32 1.0, %v2788_v23  ;;  %v2839_v49 = vsel %vm9791_vm1, %v9716_v19, %v2835_v54  ;;  %vm2794_vm5 = vmor %vm2792_vm4, %vm2793_vm15 }
 0xc22   :  { %v2860_v34 = vsub.f32 1.0, %v2859_v27  ;;  %vm2863_vm6 = vweird.f32 %v9742_v61  ;;  %vm2797_vm7 = vcmp.eq.f32.partialorder %v2796_v7, 8.507059e+37  ;;  %v2870_v44 = vor.u32 1.1754944e-38, %v2869_v43 }
 0xc23   :  { %4575 = vtanh.f32 %v9767_v9  ;;  %v2751_v36 = vadd.f32 %v4564_v0, %v2750_v56  ;;  %v4572_v20 = vpop.eup %4571  ;;  %v2790_v39 = vmul.f32 %v4568_v42, %v2789_v12  ;;  %vm2865_vm8 = vmor %vm2863_vm6, %vm2864_vm3  ;;  %v2844_v46 = vsel %vm9770_vm11, %v2843_v1, %v2839_v49 }
 0xc24   :  { %v4574_v41 = vpop.eup %4573  ;;  %v2857_v60 = vadd.f32 1.0, %v4572_v20  ;;  %v2861_v11 = vmul.f32 %v4570_v8, %v2860_v34  ;;  %vm2868_vm9 = vcmp.eq.f32.partialorder %v2867_v2, 8.507059e+37  ;;  %v2898_v34 = vadd.s32 5, %v6528_v37 }
 0xc25   :  { %v2755_v3 = vsel %vm2754_vm14, %v4564_v0, %v2751_v36  ;;  %v2791_v48 = vadd.f32 %v4568_v42, %v2790_v39  ;;  %v2799_v0 = vor.u32 1.1754944e-38, %v2798_v63  ;;  %v2847_v59 = vmul.f32 %v4574_v41, %v2844_v46 }
 0xc26   :  { %v2760_v58 = vsel %vm9774_vm13, %v2759_v57, %v2755_v3  ;;  %4577 = vrcp.f32 %v2857_v60  ;;  %v2862_v15 = vadd.f32 %v4570_v8, %v2861_v11  ;;  %v2884_v23 = vand.u32 2147483648, %v2857_v60 }
 0xc27   :  { %v2763_v24 = vmul.f32 %v2760_v58, %v9695_v50  ;;  %v2795_v16 = vsel %vm2794_vm5, %v4568_v42, %v2791_v48  ;;  %v2882_v56 = vand.u32 2147483647, %v2857_v60  ;;  %vm2878_vm11 = vweird.f32 %v2857_v60  ;;  %v9834_v48 = vld [vmem:[%s10984_s2] sm:$0x3] }
 0xc28   :  { %v2800_v10 = vsel %vm2797_vm7, %v2799_v0, %v2795_v16  ;;  %v2866_v38 = vsel %vm2865_vm8, %v4570_v8, %v2862_v15  ;;  %v2885_v27 = vor.u32 1.1754944e-38, %v2884_v23  ;;  %vm2899_vm14 = vcmp.lt.s32.totalorder %v2898_v34, %v6531_v5 }
 0xc29   :  { %v4576_v28 = vpop.eup %4575  ;;  %v2803_v19 = vmul.f32 %v2800_v10, %v2479_v62  ;;  %v2871_v32 = vsel %vm2868_vm9, %v2870_v44, %v2866_v38  ;;  %vm2883_vm13 = vcmp.eq.f32.partialorder %v2882_v56, 8.507059e+37  ;;  %vm2988_vm1 = vcmp.gt.s32.totalorder %v9834_v48, 5 }
 0xc2a   :  { %v9807_v13 = vmul.f32 %v4576_v28, %v2871_v32  ;;  %v4169_v58 = vsel %vm2988_vm1, 1.0, %v11735_v53 }
 0xc2b   :  { %v2805_v61 = vadd.f32 %v2803_v19, %v2763_v24  ;;  %v2992_v49 = vrot.slane %v4169_v58, 1  ;;  %v2994_v0 = vperm.slane %v4169_v58, 0 }
 0xc2c   :  { %v4578_v52 = vpop.eup %4577  ;;  %v2892_v42 = vmul.f32 %v9812_v30, %v9807_v13 }
 0xc2d   :  { %v9816_v35 = vadd.f32 %v2847_v59, %v2805_v61  ;;  %v2874_v1 = vmul.f32 %v4578_v52, %v2857_v60  ;;  %vm2879_vm10 = vweird.f32 %v4578_v52  ;;  %v2995_v15 = vperm.slane %v2992_v49, 0 }
 0xc2e   :  { %2894 = vadd.xlane.f32.xlu2 %v2892_v42  ;;  %vm2880_vm12 = vmor %vm2878_vm11, %vm2879_vm10 }
 0xc2f   :  { %v2875_v8 = vsub.f32 1.0, %v2874_v1  ;;  %4579 = vtanh.f32 %v9816_v35  ;;  %v4339_v28 = vpack.i.bf16 %v2995_v15, %v2994_v0 }
 0xc31   :  { %v2876_v14 = vmul.f32 %v4578_v52, %v2875_v8  ;;  %v3006_v8 = vsub.f32 1.0, %v4169_v58 }
 0xc33   :  { %v2877_v26 = vadd.f32 %v4578_v52, %v2876_v14  ;;  %v3010_v23 = vperm.slane %v3006_v8, 0  ;;  %v3007_v14 = vsub.f32 1.0, %v2992_v49  ;;  %v4991_v8 = vld [vmem:[%s10986_s4 + $0x258] sm:$0xff] }
 0xc35   :  { %v4580_v57 = vpop.eup %4579  ;;  %v2881_v12 = vsel %vm2880_vm12, %v4578_v52, %v2877_v26  ;;  %v3011_v56 = vperm.slane %v3007_v14, 0  ;;  %v9907_v14 = vld [vmem:[%s10985_s3 + $0x248] sm:$0xff] }
 0xc36   :  { %v2886_v54 = vsel %vm2883_vm13, %v2885_v27, %v2881_v12 }
 0xc37   :  { %v9819_v36 = vmul.f32 %v4580_v57, %v2886_v54 }
 0xc39   :  { %v2893_v7 = vmul.f32 %v9812_v30, %v9819_v36 }
 0xc3b   :  { %2896 = vadd.xlane.f32.xlu1 %v2893_v7 }
 0xca1   :  { %v2895_v63 = vpop.xlane.xlu2 %2894 }
 0xca2   :  { %v2902_v39 = vperm.slane %v2895_v63, %v6528_v37 }
 0xcae   :  { %v2897_v20 = vpop.xlane.xlu1 %2896 }
 0xcaf   :  { %v2903_v2 = vperm.slane %v2897_v20, %v6528_v37 }
 0xcb1   :  { %v2904_v43 = vsel %vm655_vm0, %v2903_v2, %v2902_v39 }
 0xcb2   :  { %v2906_v41 = vsel %vm2899_vm14, %v2904_v43, -1e+30 }
 0xcb3   :  { %v2907_v3 = vsel %vm659_vm2, %v2906_v41, -inf }
 0xcb4   :  { %2908 = vmax.xlane.f32.xlu0 %v2907_v3 }
 0xd27   :  { %v2909_v51 = vpop.xlane.xlu0 %2908 }
 0xd28   :  { %vm2910_vm15 = vcmp.eq.f32.partialorder %v2906_v41, %v2909_v51 }
 0xd29   :  { %v2911_v60 = vsel %vm2910_vm15, %v6545_v25, 8.0 }
 0xd2a   :  { %v2912_v11 = vsel %vm659_vm2, %v2911_v60, inf }
 0xd2b   :  { %2913 = vmin.xlane.f32.xlu2 %v2912_v11 }
 0xd43   :  { %4340 = vperm.xlu2 %4338, %v4339_v28  }
 0xd4b   :  { %4345 = vset.pattern.permute.xlu2 %v6540_v21 }
 0xd9e   :  { %v2914_v24 = vpop.xlane.xlu2 %2913 }
 0xd9f   :  { %vm2915_vm3 = vcmp.eq.f32.partialorder %v6545_v25, %v2914_v24  ;;  %vm2918_vm4 = vcmp.lt.f32.partialorder %v6545_v25, %v2914_v24  ;;  %vm2921_vm5 = vcmp.gt.f32.partialorder %v6545_v25, %v2914_v24 }
 0xda0   :  { %v4165_v16 = vsel %vm2915_vm3, 1.0, %v11735_v53  ;;  %v4166_v44 = vsel %vm2918_vm4, 1.0, %v11735_v53  ;;  %v4167_v10 = vsel %vm2921_vm5, 1.0, %v11735_v53 }
 0xda1   :  { %v2940_v46 = vperm.slane %v4166_v44, 0  ;;  %v2947_v38 = vperm.slane %v4166_v44, 1  ;;  %v2958_v19 = vperm.slane %v4167_v10, 0  ;;  %v2965_v32 = vperm.slane %v4167_v10, 1  ;;  %4168 = vst [vmem:[%s10991_s9 + $0x8] sm:$0x3] %v4165_v16 }
 0xda2   :  { %v2931_v61 = vperm.slane %v4165_v16, 1  ;;  %v2924_v59 = vperm.slane %v4165_v16, 0 }
 0xda3   :  { %v4346_v52 = vpack.i.bf16 %v2965_v32, %v2947_v38 }
 0xda4   :  { %v4333_v42 = vpack.i.bf16 %v2931_v61, %v2958_v19  ;;  %v4327_v1 = vpack.i.bf16 %v2940_v46, %v2924_v59 }
 0xda5   :  { %4347 = vperm.xlu2 %4345, %v4346_v52  }
 0xda6   :  { %4334 = vperm.xlu0 %4332, %v4333_v42   ;;  %4328 = vperm.xlu1 %4326, %v4327_v1   ;;  %v4341_v26 = vpop.permute.xlu2 %4340  ;;  %v9887_v42 = vld [vmem:[%s10985_s3 + $0x270] sm:$0xff]  ;;  %v9893_v1 = vld [vmem:[%s10985_s3 + $0x278] sm:$0xff] }
 0xda7   :  { %v4343_v28 = vunpack.i.h.bf16 %v4341_v26 }
 0xdad   :  { %4351 = vset.pattern.permute.xlu2 %v11736_v22 }
 0xdae   :  { %4344 = vset.pattern.permute.xlu1 %v11736_v22 }
 0xdaf   :  { %3013 = vperm.xlu1 %4344, %v3010_v23  }
 0xdb7   :  { %3017 = vperm.xlu1 %4344, %v3011_v56   ;;  %v9913_v56 = vld [vmem:[%s10985_s3 + $0x250] sm:$0xff] }
 0xdbf   :  { %4357 = vset.pattern.permute.xlu1 %v6540_v21 }
 0xdff   :  { %v4348_v27 = vpop.permute.xlu2 %4347 }
 0xe00   :  { %v4349_v57 = vunpack.i.l.bf16 %v4348_v27  ;;  %v4350_v7 = vunpack.i.h.bf16 %v4348_v27  ;;  %v4996_v27 = vld [vmem:[%s10986_s4 + $0x238] sm:$0xff] }
 0xe02   :  { %v2979_v2 = vmul.f32 %v4349_v57, %v9695_v50  ;;  %v2983_v60 = vmul.f32 %v4350_v7, %v2479_v62  ;;  %v2955_v24 = vmul.f32 %v4349_v57, %v9478_v17  ;;  %v9925_v57 = vld [vmem:[%s10985_s3 + $0x220] sm:$0xff] }
 0xe18   :  { %v4335_v12 = vpop.permute.xlu0 %4334  ;;  %v4329_v54 = vpop.permute.xlu1 %4328 }
 0xe19   :  { %v4337_v63 = vunpack.i.h.bf16 %v4335_v12  ;;  %v4331_v34 = vunpack.i.h.bf16 %v4329_v54  ;;  %v4330_v20 = vunpack.i.l.bf16 %v4329_v54  ;;  %v4336_v39 = vunpack.i.l.bf16 %v4335_v12  ;;  %v9931_v12 = vld [vmem:[%s10985_s3 + $0x228] sm:$0xff] }
 0xe1b   :  { %v2977_v43 = vmul.f32 %v4337_v63, %v9816_v35  ;;  %v2954_v41 = vmul.f32 %v4331_v34, %v9465_v55  ;;  %v2978_v3 = vmul.f32 %v4331_v34, %v9686_v4  ;;  %v2938_v21 = vmul.f32 %v4330_v20, %v9807_v13  ;;  %v9946_v34 = vld [vmem:[%s10985_s3 + $0x1f8] sm:$0xff] }
 0xe1c   :  { %v2976_v51 = vmul.f32 %v4330_v20, %v9767_v9  ;;  %v2939_v11 = vmul.f32 %v4337_v63, %v9819_v36  ;;  %v2972_v49 = vmul.f32 %v4336_v39, %v9468_v29  ;;  %v2982_v0 = vmul.f32 %v4336_v39, %v2478_v18  ;;  %v5000_v63 = vld [vmem:[%s10986_s4 + $0x210] sm:$0xff]  ;;  %v9952_v20 = vld [vmem:[%s10985_s3 + $0x200] sm:$0xff] }
 0xe1d   :  { %v2981_v58 = vadd.f32 %v2979_v2, %v2977_v43  ;;  %v2956_v35 = vadd.f32 %v2954_v41, %v2938_v21  ;;  %v4342_v13 = vunpack.i.l.bf16 %v4341_v26  ;;  %v2973_v18 = vmul.f32 %v4350_v7, %v9489_v31  ;;  %v4995_v26 = vld [vmem:[%s10986_s4 + $0x230] sm:$0xff]  ;;  %v4999_v7 = vld [vmem:[%s10986_s4 + $0x208] sm:$0xff]  ;;  %v9968_v2 = vld [vmem:[%s10985_s3 + $0x1d8] sm:$0xff] }
 0xe1e   :  { %v2980_v15 = vadd.f32 %v2978_v3, %v2976_v51  ;;  %v2957_v10 = vadd.f32 %v2955_v24, %v2939_v11  ;;  %v9962_v39 = vld [vmem:[%s10985_s3 + $0x1d0] sm:$0xff]  ;;  %v5005_v43 = vld [vmem:[%s10986_s4 + $0x1e0] sm:$0xff]  ;;  %v5006_v41 = vld [vmem:[%s10986_s4 + $0x1e8] sm:$0xff] }
 0xe1f   :  { %v2985_v16 = vadd.f32 %v2983_v60, %v2981_v58  ;;  %v2974_v44 = vadd.f32 %v2972_v49, %v2956_v35  ;;  %v9980_v3 = vld [vmem:[%s10985_s3 + $0x1a8] sm:$0xff]  ;;  %v9986_v21 = vld [vmem:[%s10985_s3 + $0x1b0] sm:$0xff]  ;;  %v5009_v51 = vld [vmem:[%s10986_s4 + $0x1b8] sm:$0xff] }
 0xe20   :  { %v2984_v9 = vadd.f32 %v2982_v0, %v2980_v15  ;;  %v2975_v52 = vadd.f32 %v2973_v18, %v2957_v10  ;;  %12230 = vst [vmem:[#allocation32_spill] sm:$0xff] %v9986_v21  ;;  %v5010_v60 = vld [vmem:[%s10986_s4 + $0x1c0] sm:$0xff]  ;;  %v10004_v58 = vld [vmem:[%s10985_s3 + $0x188] sm:$0xff]  ;;  %v5013_v49 = vld [vmem:[%s10986_s4 + $0x190] sm:$0xff] }
 0xe21   :  { %v3014_v46 = vpop.permute.xlu1 %3013  ;;  %v9864_v62 = vmul.f32 %v4343_v28, %v2985_v16  ;;  %v3004_v36 = vmul.f32 %v4342_v13, %v2974_v44  ;;  %v9998_v11 = vld [vmem:[%s10985_s3 + $0x180] sm:$0xff]  ;;  %12232 = vst [vmem:[#allocation33_spill] sm:$0xff] %v10004_v58  ;;  %v5014_v0 = vld [vmem:[%s10986_s4 + $0x198] sm:$0xff]  ;;  %v5019_v16 = vld [vmem:[%s10986_s4 + $0x168] sm:$0xff] }
 0xe22   :  { %v3020_v38 = vmul.f32 %v3014_v46, %v9465_v55  ;;  %v3024_v29 = vmul.f32 %v4342_v13, %v2984_v9  ;;  %v3026_v19 = vmul.f32 %v3014_v46, %v9686_v4  ;;  %v3005_v4 = vmul.f32 %v4343_v28, %v2975_v52  ;;  %12231 = vst [vmem:[#allocation10_spill] sm:$0xff] %v9998_v11  ;;  %v10016_v35 = vld [vmem:[%s10985_s3 + $0x158] sm:$0xff]  ;;  %v10022_v15 = vld [vmem:[%s10985_s3 + $0x160] sm:$0xff]  ;;  %v10032_v28 = vld [vmem:[%s10985_s3 + $0x130] sm:$0xff] }
 0xe23   :  { %12233 = vst [vmem:[#allocation11_spill] sm:$0xff] %v10016_v35  ;;  %v10038_v24 = vld [vmem:[%s10985_s3 + $0x138] sm:$0xff]  ;;  %v5020_v13 = vld [vmem:[%s10986_s4 + $0x170] sm:$0xff]  ;;  %v10050_v44 = vld [vmem:[%s10985_s3 + $0x108] sm:$0xff] }
 0xe24   :  { %v9869_v32 = vadd.f32 %v3020_v38, %v3004_v36  ;;  %v9871_v61 = vadd.f32 %v3026_v19, %v3024_v29  ;;  %12234 = vst [vmem:[#allocation36_spill] sm:$0xff] %v10022_v15  ;;  %v10056_v9 = vld [vmem:[%s10985_s3 + $0x110] sm:$0xff]  ;;  %v5023_v10 = vld [vmem:[%s10986_s4 + $0x140] sm:$0xff]  ;;  %v5024_v46 = vld [vmem:[%s10986_s4 + $0x148] sm:$0xff] }
 0xe25   :  { %12235 = vst [vmem:[#allocation12_spill] sm:$0xff] %v10032_v28  ;;  %v10068_v36 = vld [vmem:[%s10985_s3 + $0xe0] sm:$0xff]  ;;  %v10074_v38 = vld [vmem:[%s10985_s3 + $0xe8] sm:$0xff]  ;;  %v5027_v29 = vld [vmem:[%s10986_s4 + $0x118] sm:$0xff] }
 0xe26   :  { %v9874_v59 = vrot.slane %v9869_v32, 1  ;;  %12236 = vst [vmem:[#allocation37_spill] sm:$0xff] %v10038_v24  ;;  %v5028_v19 = vld [vmem:[%s10986_s4 + $0x120] sm:$0xff]  ;;  %v10086_v18 = vld [vmem:[%s10985_s3 + $0xb8] sm:$0xff] }
 0xe27   :  { %12237 = vst [vmem:[#allocation13_spill] sm:$0xff] %v10050_v44  ;;  %v10092_v52 = vld [vmem:[%s10985_s3 + $0xc0] sm:$0xff] }
 0xe28   :  { %3062 = vmatmul.f32.vlgmr.msra.gmra.mxu2 %v9874_v59  ;;  %3085 = vmatmul.f32.vlgmr.msra.gmra.mxu3 %v9874_v59  ;;  %12238 = vst [vmem:[#allocation40_spill] sm:$0xff] %v10056_v9 }
 0xe29   :  { %3108 = vmatmul.f32.vlgmr.msrb.gmra.mxu0 %v9874_v59  ;;  %3131 = vmatmul.f32.vlgmr.msrb.gmra.mxu1 %v9874_v59  ;;  %v9880_v55 = vpop.permute.xlu1 %3017  ;;  %12239 = vst [vmem:[#allocation14_spill] sm:$0xff] %v10068_v36 }
 0xe2a   :  { %v3021_v31 = vmul.f32 %v9880_v55, %v9478_v17  ;;  %3230 = vmatpush.msra.mxu2 %v9887_v42  ;;  %3253 = vmatpush.msra.mxu3 %v9893_v1  ;;  %v4992_v17 = vld [vmem:[%s10986_s4 + $0x260] sm:$0xff]  ;;  %12240 = vst [vmem:[#allocation41_spill] sm:$0xff] %v10074_v38 }
 0xe2b   :  { %3608 = vmatpush.msrb.mxu0 %v4991_v8  ;;  %3631 = vmatpush.msrb.mxu1 %v4992_v17  ;;  %12241 = vst [vmem:[#allocation15_spill] sm:$0xff] %v10086_v18  ;;  %v5033_v8 = vld [vmem:[%s10986_s4 + $0xf0] sm:$0xff]  ;;  %v5034_v17 = vld [vmem:[%s10986_s4 + $0xf8] sm:$0xff] }
 0xe2c   :  { %v9902_v23 = vadd.f32 %v3021_v31, %v3005_v4  ;;  %3231 = vmatpush.msra.mxu2 %v9907_v14  ;;  %3254 = vmatpush.msra.mxu3 %v9913_v56  ;;  %12242 = vst [vmem:[#allocation45_spill] sm:$0xff] %v10092_v52  ;;  %v10102_v4 = vld [vmem:[%s10985_s3 + $0x90] sm:$0xff]  ;;  %v5032_v31 = vld [vmem:[%s10985_s3 + $0x98] sm:$0xff] }
 0xe2d   :  { %3609 = vmatpush.msrb.mxu0 %v4995_v26  ;;  %3632 = vmatpush.msrb.mxu1 %v4996_v27  ;;  %12243 = vst [vmem:[#allocation17_spill] sm:$0xff] %v10102_v4  ;;  %v10117_v26 = vld [vmem:[%s10985_s3 + $0x68] sm:$0xff]  ;;  %v5036_v27 = vld [vmem:[%s10985_s3 + $0x70] sm:$0xff] }
 0xe2e   :  { %3232 = vmatpush.msra.mxu2 %v9925_v57  ;;  %3255 = vmatpush.msra.mxu3 %v9931_v12  ;;  %v9935_v54 = vrot.slane %v9902_v23, 1  ;;  %12244 = vst [vmem:[#allocation44_spill] sm:$0xff] %v10117_v26 }
 0xe2f   :  { %3610 = vmatpush.msrb.mxu0 %v4999_v7  ;;  %3633 = vmatpush.msrb.mxu1 %v5000_v63  ;;  %v5037_v7 = vld [vmem:[%s10986_s4 + $0xc8] sm:$0xff]  ;;  %v5038_v63 = vld [vmem:[%s10986_s4 + $0xd0] sm:$0xff] }
 0xe30   :  { %3233 = vmatpush.msra.mxu2 %v9946_v34  ;;  %3256 = vmatpush.msra.mxu3 %v9952_v20 }
 0xe31   :  { %3065 = vmatmul.f32.gmra.mxu2 %v9935_v54  ;;  %3088 = vmatmul.f32.gmra.mxu3 %v9935_v54 }
 0xe32   :  { %3111 = vmatmul.f32.gmra.mxu0 %v9935_v54  ;;  %3134 = vmatmul.f32.gmra.mxu1 %v9935_v54 }
 0xe33   :  { %3234 = vmatpush.msra.mxu2 %v9962_v39  ;;  %3257 = vmatpush.msra.mxu3 %v9968_v2 }
 0xe34   :  { %3611 = vmatpush.msrb.mxu0 %v5005_v43  ;;  %3634 = vmatpush.msrb.mxu1 %v5006_v41  ;;  %v5039_v43 = vld [vmem:[%s10985_s3 + $0x40] sm:$0xff]  ;;  %v5040_v41 = vld [vmem:[%s10985_s3 + $0x48] sm:$0xff] }
 0xe35   :  { %3235 = vmatpush.msra.mxu2 %v9980_v3  ;;  %3258 = vmatpush.msra.mxu3 %v9986_v21 }
 0xe36   :  { %3612 = vmatpush.msrb.mxu0 %v5009_v51  ;;  %3635 = vmatpush.msrb.mxu1 %v5010_v60  ;;  %v5041_v51 = vld [vmem:[%s10986_s4 + $0xa0] sm:$0xff]  ;;  %v5042_v60 = vld [vmem:[%s10986_s4 + $0xa8] sm:$0xff] }
 0xe37   :  { %3236 = vmatpush.msra.mxu2 %v9998_v11  ;;  %3259 = vmatpush.msra.mxu3 %v10004_v58 }
 0xe38   :  { %3613 = vmatpush.msrb.mxu0 %v5013_v49  ;;  %3636 = vmatpush.msrb.mxu1 %v5014_v0  ;;  %v5043_v49 = vld [vmem:[%s10985_s3 + $0x18] sm:$0xff]  ;;  %v5044_v0 = vld [vmem:[%s10985_s3 + $0x20] sm:$0xff] }
 0xe39   :  { %3237 = vmatpush.msra.mxu2 %v10016_v35  ;;  %3260 = vmatpush.msra.mxu3 %v10022_v15 }
 0xe3a   :  { %3154 = vmatmul.f32.vlgmr.msrb.gmra.mxu2 %v9874_v59  ;;  %3177 = vmatmul.f32.vlgmr.msrb.gmra.mxu3 %v9869_v32 }
 0xe3b   :  { %3200 = vmatmul.f32.vlgmr.msra.gmra.mxu0 %v9869_v32  ;;  %3223 = vmatmul.f32.vlgmr.msra.gmra.mxu1 %v9869_v32 }
 0xe3c   :  { %3238 = vmatpush.msra.mxu2 %v10032_v28  ;;  %3261 = vmatpush.msra.mxu3 %v10038_v24 }
 0xe3d   :  { %3614 = vmatpush.msrb.mxu0 %v5019_v16  ;;  %3637 = vmatpush.msrb.mxu1 %v5020_v13  ;;  %v5045_v16 = vld [vmem:[%s10986_s4 + $0x268] sm:$0xff]  ;;  %v5046_v13 = vld [vmem:[%s10986_s4 + $0x270] sm:$0xff] }
 0xe3e   :  { %3239 = vmatpush.msra.mxu2 %v10050_v44  ;;  %3262 = vmatpush.msra.mxu3 %v10056_v9 }
 0xe3f   :  { %3615 = vmatpush.msrb.mxu0 %v5023_v10  ;;  %3638 = vmatpush.msrb.mxu1 %v5024_v46  ;;  %v5047_v10 = vld [vmem:[%s10986_s4 + $0x78] sm:$0xff]  ;;  %v5048_v46 = vld [vmem:[%s10986_s4 + $0x80] sm:$0xff] }
 0xe40   :  { %3240 = vmatpush.msra.mxu2 %v10068_v36  ;;  %3263 = vmatpush.msra.mxu3 %v10074_v38 }
 0xe41   :  { %3616 = vmatpush.msrb.mxu0 %v5027_v29  ;;  %3639 = vmatpush.msrb.mxu1 %v5028_v19  ;;  %v5049_v29 = vld [vmem:[%s10986_s4 + $0x240] sm:$0xff]  ;;  %v5050_v19 = vld [vmem:[%s10986_s4 + $0x248] sm:$0xff] }
 0xe42   :  { %3241 = vmatpush.msra.mxu2 %v10086_v18  ;;  %3264 = vmatpush.msra.mxu3 %v10092_v52 }
 0xe43   :  { %3157 = vmatmul.f32.gmra.mxu2 %v9935_v54  ;;  %3180 = vmatmul.f32.gmra.mxu3 %v9902_v23 }
 0xe44   :  { %3203 = vmatmul.f32.gmra.mxu0 %v9902_v23  ;;  %3226 = vmatmul.f32.gmra.mxu1 %v9902_v23 }
 0xe45   :  { %3242 = vmatpush.msra.mxu2 %v10102_v4  ;;  %3265 = vmatpush.msra.mxu3 %v5032_v31  ;;  %v5051_v31 = vld [vmem:[%s10986_s4 + $0x50] sm:$0xff] }
 0xe46   :  { %3617 = vmatpush.msrb.mxu0 %v5033_v8  ;;  %3640 = vmatpush.msrb.mxu1 %v5034_v17  ;;  %v5052_v8 = vld [vmem:[%s10986_s4 + $0x58] sm:$0xff] }
 0xe47   :  { %3243 = vmatpush.msra.mxu2 %v10117_v26  ;;  %3266 = vmatpush.msra.mxu3 %v5036_v27  ;;  %v5053_v17 = vld [vmem:[%s10986_s4 + $0x218] sm:$0xff]  ;;  %v5054_v27 = vld [vmem:[%s10986_s4 + $0x220] sm:$0xff] }
 0xe48   :  { %3618 = vmatpush.msrb.mxu0 %v5037_v7  ;;  %3641 = vmatpush.msrb.mxu1 %v5038_v63  ;;  %v5055_v7 = vld [vmem:[%s10986_s4 + $0x28] sm:$0xff]  ;;  %v5056_v63 = vld [vmem:[%s10986_s4 + $0x30] sm:$0xff] }
 0xe49   :  { %3244 = vmatpush.msra.mxu2 %v5039_v43  ;;  %3267 = vmatpush.msra.mxu3 %v5040_v41  ;;  %v5057_v43 = vld [vmem:[%s10986_s4 + $0x1f0] sm:$0xff]  ;;  %v5058_v41 = vld [vmem:[%s10986_s4 + $0x1f8] sm:$0xff] }
 0xe4a   :  { %3619 = vmatpush.msrb.mxu0 %v5041_v51  ;;  %3642 = vmatpush.msrb.mxu1 %v5042_v60  ;;  %v5059_v51 = vld [vmem:[%s10986_s4 + $0x1c8] sm:$0xff]  ;;  %v5060_v60 = vld [vmem:[%s10986_s4 + $0x1d0] sm:$0xff] }
 0xe4b   :  { %3245 = vmatpush.msra.mxu2 %v5043_v49  ;;  %3268 = vmatpush.msra.mxu3 %v5044_v0  ;;  %v5061_v49 = vld [vmem:[%s10986_s4] sm:$0xff]  ;;  %v5062_v0 = vld [vmem:[%s10986_s4 + $0x8] sm:$0xff] }
 0xe4c   :  { %3246 = vmatmul.f32.vlgmr.msra.gmra.mxu2 %v9869_v32  ;;  %3269 = vmatmul.f32.vlgmr.msra.gmra.mxu3 %v9869_v32 }
 0xe4d   :  { %3654 = vmatpush.msrb.mxu2 %v5045_v16  ;;  %3677 = vmatpush.msrb.mxu3 %v5046_v13  ;;  %v5063_v16 = vld [vmem:[%s10986_s4 + $0x1a0] sm:$0xff]  ;;  %v5064_v13 = vld [vmem:[%s10986_s4 + $0x1a8] sm:$0xff] }
 0xe4e   :  { %3620 = vmatpush.msrb.mxu0 %v5047_v10  ;;  %3643 = vmatpush.msrb.mxu1 %v5048_v46  ;;  %v5065_v10 = vld [vmem:[%s10986_s4 + $0x278] sm:$0xff] }
 0xe4f   :  { %3655 = vmatpush.msrb.mxu2 %v5049_v29  ;;  %3678 = vmatpush.msrb.mxu3 %v5050_v19  ;;  %v5066_v46 = vld [vmem:[%s10985_s3 + $0x258] sm:$0xff]  ;;  %v5068_v19 = vld [vmem:[%s10986_s4 + $0x180] sm:$0xff] }
 0xe50   :  { %3621 = vmatpush.msrb.mxu0 %v5051_v31  ;;  %3644 = vmatpush.msrb.mxu1 %v5052_v8  ;;  %v5067_v29 = vld [vmem:[%s10986_s4 + $0x178] sm:$0xff]  ;;  %v5069_v31 = vld [vmem:[%s10986_s4 + $0x250] sm:$0xff] }
 0xe51   :  { %3656 = vmatpush.msrb.mxu2 %v5053_v17  ;;  %3679 = vmatpush.msrb.mxu3 %v5054_v27  ;;  %v5070_v8 = vld [vmem:[%s10985_s3 + $0x230] sm:$0xff]  ;;  %v5072_v27 = vld [vmem:[%s10986_s4 + $0x158] sm:$0xff] }
 0xe52   :  { %3622 = vmatpush.msrb.mxu0 %v5055_v7  ;;  %3645 = vmatpush.msrb.mxu1 %v5056_v63  ;;  %v5071_v17 = vld [vmem:[%s10986_s4 + $0x150] sm:$0xff]  ;;  %v5073_v7 = vld [vmem:[%s10986_s4 + $0x228] sm:$0xff] }
 0xe53   :  { %3657 = vmatpush.msrb.mxu2 %v5057_v43  ;;  %3680 = vmatpush.msrb.mxu3 %v5058_v41  ;;  %v5074_v63 = vld [vmem:[%s10985_s3 + $0x208] sm:$0xff]  ;;  %v5076_v41 = vld [vmem:[%s10986_s4 + $0x130] sm:$0xff] }
 0xe54   :  { %3249 = vmatmul.f32.gmra.mxu2 %v9902_v23  ;;  %3272 = vmatmul.f32.gmra.mxu3 %v9902_v23  ;;  %v5075_v43 = vld [vmem:[%s10986_s4 + $0x128] sm:$0xff] }
 0xe55   :  { %3658 = vmatpush.msrb.mxu2 %v5059_v51  ;;  %3681 = vmatpush.msrb.mxu3 %v5060_v60  ;;  %v5077_v51 = vld [vmem:[%s10986_s4 + $0x200] sm:$0xff] }
 0xe56   :  { %3623 = vmatpush.msrb.mxu0 %v5061_v49  ;;  %3646 = vmatpush.msrb.mxu1 %v5062_v0  ;;  %v5078_v60 = vld [vmem:[%s10985_s3 + $0x1e0] sm:$0xff]  ;;  %v5080_v0 = vld [vmem:[%s10986_s4 + $0x108] sm:$0xff] }
 0xe57   :  { %3659 = vmatpush.msrb.mxu2 %v5063_v16  ;;  %3682 = vmatpush.msrb.mxu3 %v5064_v13  ;;  %v5079_v49 = vld [vmem:[%s10986_s4 + $0x100] sm:$0xff]  ;;  %v5081_v16 = vld [vmem:[%s10986_s4 + $0x1d8] sm:$0xff] }
 0xe58   :  { %3700 = vmatpush.msra.mxu0 %v5065_v10  ;;  %3723 = vmatpush.msra.mxu1 %v5066_v46  ;;  %v5082_v13 = vld [vmem:[%s10985_s3 + $0x1b8] sm:$0xff]  ;;  %v5084_v46 = vld [vmem:[%s10986_s4 + $0xe0] sm:$0xff] }
 0xe59   :  { %3660 = vmatpush.msrb.mxu2 %v5067_v29  ;;  %3683 = vmatpush.msrb.mxu3 %v5068_v19  ;;  %v5083_v10 = vld [vmem:[%s10986_s4 + $0xd8] sm:$0xff]  ;;  %v5085_v29 = vld [vmem:[%s10986_s4 + $0x1b0] sm:$0xff] }
 0xe5a   :  { %3701 = vmatpush.msra.mxu0 %v5069_v31  ;;  %3724 = vmatpush.msra.mxu1 %v5070_v8  ;;  %v5086_v19 = vld [vmem:[%s10985_s3 + $0x190] sm:$0xff]  ;;  %v5088_v8 = vld [vmem:[%s10986_s4 + $0xb8] sm:$0xff] }
 0xe5b   :  { %3661 = vmatpush.msrb.mxu2 %v5071_v17  ;;  %3684 = vmatpush.msrb.mxu3 %v5072_v27  ;;  %v5087_v31 = vld [vmem:[%s10986_s4 + $0xb0] sm:$0xff]  ;;  %v5089_v17 = vld [vmem:[%s10986_s4 + $0x188] sm:$0xff] }
 0xe5c   :  { %3702 = vmatpush.msra.mxu0 %v5073_v7  ;;  %3725 = vmatpush.msra.mxu1 %v5074_v63  ;;  %v5090_v27 = vld [vmem:[%s10985_s3 + $0x168] sm:$0xff]  ;;  %v5092_v63 = vld [vmem:[%s10986_s4 + $0x90] sm:$0xff] }
 0xe5d   :  { %3662 = vmatpush.msrb.mxu2 %v5075_v43  ;;  %3685 = vmatpush.msrb.mxu3 %v5076_v41  ;;  %v5091_v7 = vld [vmem:[%s10986_s4 + $0x88] sm:$0xff]  ;;  %v5093_v43 = vld [vmem:[%s10986_s4 + $0x160] sm:$0xff] }
 0xe5e   :  { %3703 = vmatpush.msra.mxu0 %v5077_v51  ;;  %3726 = vmatpush.msra.mxu1 %v5078_v60  ;;  %v5094_v41 = vld [vmem:[%s10985_s3 + $0x140] sm:$0xff]  ;;  %v5096_v60 = vld [vmem:[%s10986_s4 + $0x68] sm:$0xff] }
 0xe5f   :  { %3663 = vmatpush.msrb.mxu2 %v5079_v49  ;;  %3686 = vmatpush.msrb.mxu3 %v5080_v0  ;;  %v5095_v51 = vld [vmem:[%s10986_s4 + $0x60] sm:$0xff]  ;;  %v5097_v49 = vld [vmem:[%s10986_s4 + $0x138] sm:$0xff] }
 0xe60   :  { %3704 = vmatpush.msra.mxu0 %v5081_v16  ;;  %3727 = vmatpush.msra.mxu1 %v5082_v13  ;;  %v5098_v0 = vld [vmem:[%s10985_s3 + $0x118] sm:$0xff]  ;;  %v5100_v13 = vld [vmem:[%s10986_s4 + $0x40] sm:$0xff] }
 0xe61   :  { %3664 = vmatpush.msrb.mxu2 %v5083_v10  ;;  %3687 = vmatpush.msrb.mxu3 %v5084_v46  ;;  %v5099_v16 = vld [vmem:[%s10986_s4 + $0x38] sm:$0xff]  ;;  %v5101_v10 = vld [vmem:[%s10986_s4 + $0x110] sm:$0xff] }
 0xe62   :  { %3705 = vmatpush.msra.mxu0 %v5085_v29  ;;  %3728 = vmatpush.msra.mxu1 %v5086_v19  ;;  %v5102_v46 = vld [vmem:[%s10985_s3 + $0xf0] sm:$0xff]  ;;  %v5104_v19 = vld [vmem:[%s10986_s4 + $0x18] sm:$0xff] }
 0xe63   :  { %3665 = vmatpush.msrb.mxu2 %v5087_v31  ;;  %3688 = vmatpush.msrb.mxu3 %v5088_v8  ;;  %v5103_v29 = vld [vmem:[%s10986_s4 + $0x10] sm:$0xff]  ;;  %v5105_v31 = vld [vmem:[%s10985_s3 + $0x260] sm:$0xff]  ;;  %v5106_v8 = vld [vmem:[%s10985_s3 + $0x268] sm:$0xff] }
 0xe64   :  { %3706 = vmatpush.msra.mxu0 %v5089_v17  ;;  %3729 = vmatpush.msra.mxu1 %v5090_v27  ;;  %v5107_v17 = vld [vmem:[%s10986_s4 + $0xe8] sm:$0xff] }
 0xe65   :  { %3666 = vmatpush.msrb.mxu2 %v5091_v7  ;;  %3689 = vmatpush.msrb.mxu3 %v5092_v63  ;;  %v5108_v27 = vld [vmem:[%s10985_s3 + $0xc8] sm:$0xff]  ;;  %v5109_v7 = vld [vmem:[%s10985_s3 + $0x238] sm:$0xff]  ;;  %v5110_v63 = vld [vmem:[%s10985_s3 + $0x240] sm:$0xff] }
 0xe66   :  { %3707 = vmatpush.msra.mxu0 %v5093_v43  ;;  %3730 = vmatpush.msra.mxu1 %v5094_v41  ;;  %v5111_v43 = vld [vmem:[%s10986_s4 + $0xc0] sm:$0xff] }
 0xe67   :  { %3667 = vmatpush.msrb.mxu2 %v5095_v51  ;;  %3690 = vmatpush.msrb.mxu3 %v5096_v60  ;;  %v5112_v41 = vld [vmem:[%s10985_s3 + $0xa0] sm:$0xff]  ;;  %v5113_v51 = vld [vmem:[%s10985_s3 + $0x210] sm:$0xff]  ;;  %v5114_v60 = vld [vmem:[%s10985_s3 + $0x218] sm:$0xff] }
 0xe68   :  { %3708 = vmatpush.msra.mxu0 %v5097_v49  ;;  %3731 = vmatpush.msra.mxu1 %v5098_v0  ;;  %v5115_v49 = vld [vmem:[%s10986_s4 + $0x98] sm:$0xff] }
 0xe69   :  { %3668 = vmatpush.msrb.mxu2 %v5099_v16  ;;  %3691 = vmatpush.msrb.mxu3 %v5100_v13  ;;  %v5116_v0 = vld [vmem:[%s10985_s3 + $0x78] sm:$0xff]  ;;  %v5117_v16 = vld [vmem:[%s10985_s3 + $0x1e8] sm:$0xff]  ;;  %v5118_v13 = vld [vmem:[%s10985_s3 + $0x1f0] sm:$0xff] }
 0xe6a   :  { %3709 = vmatpush.msra.mxu0 %v5101_v10  ;;  %3732 = vmatpush.msra.mxu1 %v5102_v46  ;;  %v5119_v10 = vld [vmem:[%s10986_s4 + $0x70] sm:$0xff] }
 0xe6b   :  { %3669 = vmatpush.msrb.mxu2 %v5103_v29  ;;  %3692 = vmatpush.msrb.mxu3 %v5104_v19  ;;  %v5120_v46 = vld [vmem:[%s10985_s3 + $0x50] sm:$0xff]  ;;  %v5121_v29 = vld [vmem:[%s10985_s3 + $0x1c0] sm:$0xff]  ;;  %v5122_v19 = vld [vmem:[%s10985_s3 + $0x1c8] sm:$0xff] }
 0xe6c   :  { %3710 = vmatpush.msra.mxu0 %v5107_v17  ;;  %3733 = vmatpush.msra.mxu1 %v5108_v27  ;;  %v5125_v17 = vld [vmem:[%s10985_s3 + $0x198] sm:$0xff]  ;;  %v5126_v27 = vld [vmem:[%s10985_s3 + $0x1a0] sm:$0xff] }
 0xe6d   :  { %3746 = vmatpush.msra.mxu2 %v5105_v31  ;;  %3769 = vmatpush.msra.mxu3 %v5106_v8  ;;  %v5123_v31 = vld [vmem:[%s10986_s4 + $0x48] sm:$0xff] }
 0xe6e   :  { %3711 = vmatpush.msra.mxu0 %v5111_v43  ;;  %3734 = vmatpush.msra.mxu1 %v5112_v41  ;;  %v5124_v8 = vld [vmem:[%s10985_s3 + $0x28] sm:$0xff]  ;;  %v5129_v43 = vld [vmem:[%s10985_s3 + $0x170] sm:$0xff]  ;;  %v5130_v41 = vld [vmem:[%s10985_s3 + $0x178] sm:$0xff] }
 0xe6f   :  { %3747 = vmatpush.msra.mxu2 %v5109_v7  ;;  %3770 = vmatpush.msra.mxu3 %v5110_v63  ;;  %v5127_v7 = vld [vmem:[%s10986_s4 + $0x20] sm:$0xff] }
 0xe70   :  { %3712 = vmatpush.msra.mxu0 %v5115_v49  ;;  %3735 = vmatpush.msra.mxu1 %v5116_v0  ;;  %v5128_v63 = vld [vmem:[%s10985_s3] sm:$0xff]  ;;  %v5134_v0 = vld [vmem:[%s10985_s3 + $0x128] sm:$0xff] }
 0xe71   :  { %3748 = vmatpush.msra.mxu2 %v5113_v51  ;;  %3771 = vmatpush.msra.mxu3 %v5114_v60  ;;  %v5131_v51 = vld [vmem:[%s10985_s3 + $0x148] sm:$0xff]  ;;  %v5132_v60 = vld [vmem:[%s10985_s3 + $0x150] sm:$0xff]  ;;  %v5133_v49 = vld [vmem:[%s10985_s3 + $0x120] sm:$0xff] }
 0xe72   :  { %3713 = vmatpush.msra.mxu0 %v5119_v10  ;;  %3736 = vmatpush.msra.mxu1 %v5120_v46  ;;  %v5137_v10 = vld [vmem:[%s10985_s3 + $0xd0] sm:$0xff]  ;;  %v5138_v46 = vld [vmem:[%s10985_s3 + $0xd8] sm:$0xff] }
 0xe73   :  { %3749 = vmatpush.msra.mxu2 %v5117_v16  ;;  %3772 = vmatpush.msra.mxu3 %v5118_v13  ;;  %v5135_v16 = vld [vmem:[%s10985_s3 + $0xf8] sm:$0xff]  ;;  %v5136_v13 = vld [vmem:[%s10985_s3 + $0x100] sm:$0xff] }
 0xe74   :  { %3714 = vmatpush.msra.mxu0 %v5123_v31  ;;  %3737 = vmatpush.msra.mxu1 %v5124_v8  ;;  %v5141_v31 = vld [vmem:[%s10985_s3 + $0x80] sm:$0xff]  ;;  %v5142_v8 = vld [vmem:[%s10985_s3 + $0x88] sm:$0xff] }
 0xe75   :  { %3750 = vmatpush.msra.mxu2 %v5121_v29  ;;  %3773 = vmatpush.msra.mxu3 %v5122_v19  ;;  %v5139_v29 = vld [vmem:[%s10985_s3 + $0xa8] sm:$0xff]  ;;  %v5140_v19 = vld [vmem:[%s10985_s3 + $0xb0] sm:$0xff] }
 0xe76   :  { %3715 = vmatpush.msra.mxu0 %v5127_v7  ;;  %3738 = vmatpush.msra.mxu1 %v5128_v63  ;;  %v5145_v7 = vld [vmem:[%s10985_s3 + $0x30] sm:$0xff]  ;;  %v5146_v63 = vld [vmem:[%s10985_s3 + $0x38] sm:$0xff] }
 0xe77   :  { %3751 = vmatpush.msra.mxu2 %v5125_v17  ;;  %3774 = vmatpush.msra.mxu3 %v5126_v27  ;;  %v5143_v17 = vld [vmem:[%s10985_s3 + $0x58] sm:$0xff]  ;;  %v5144_v27 = vld [vmem:[%s10985_s3 + $0x60] sm:$0xff] }
 0xe79   :  { %3752 = vmatpush.msra.mxu2 %v5129_v43  ;;  %3775 = vmatpush.msra.mxu3 %v5130_v41  ;;  %v5147_v43 = vld [vmem:[%s10985_s3 + $0x8] sm:$0xff]  ;;  %v5148_v41 = vld [vmem:[%s10985_s3 + $0x10] sm:$0xff] }
 0xe7b   :  { %3753 = vmatpush.msra.mxu2 %v5131_v51  ;;  %3776 = vmatpush.msra.mxu3 %v5132_v60 }
 0xe7d   :  { %3754 = vmatpush.msra.mxu2 %v5133_v49  ;;  %3777 = vmatpush.msra.mxu3 %v5134_v0 }
 0xe7f   :  { %3755 = vmatpush.msra.mxu2 %v5135_v16  ;;  %3778 = vmatpush.msra.mxu3 %v5136_v13 }
 0xe81   :  { %3756 = vmatpush.msra.mxu2 %v5137_v10  ;;  %3779 = vmatpush.msra.mxu3 %v5138_v46 }
 0xe83   :  { %3757 = vmatpush.msra.mxu2 %v5139_v29  ;;  %3780 = vmatpush.msra.mxu3 %v5140_v19 }
 0xe85   :  { %3758 = vmatpush.msra.mxu2 %v5141_v31  ;;  %3781 = vmatpush.msra.mxu3 %v5142_v8 }
 0xe87   :  { %3759 = vmatpush.msra.mxu2 %v5143_v17  ;;  %3782 = vmatpush.msra.mxu3 %v5144_v27 }
 0xe89   :  { %3760 = vmatpush.msra.mxu2 %v5145_v7  ;;  %3783 = vmatpush.msra.mxu3 %v5146_v63 }
 0xe8b   :  { %3761 = vmatpush.msra.mxu2 %v5147_v43  ;;  %3784 = vmatpush.msra.mxu3 %v5148_v41 }
 0xea6   :  { %v3109_v51 = vpop.f32.mrf.mxu0  ;;  %v10463_v60 = vpop.f32.mrf.mxu1 }
 0xeab   :  { %v3086_v49 = vpop.f32.mrf.mxu3  ;;  %v3063_v0 = vpop.f32.mrf.mxu2 }
 0xeaf   :  { %v3112_v16 = vpop.f32.mrf.mxu0  ;;  %v10465_v13 = vpop.f32.mrf.mxu1 }
 0xeb4   :  { %v3089_v10 = vpop.f32.mrf.mxu3  ;;  %v3066_v46 = vpop.f32.mrf.mxu2 }
 0xeb8   :  { %v3201_v29 = vpop.f32.mrf.mxu0  ;;  %v3224_v19 = vpop.f32.mrf.mxu1 }
 0xeb9   :  { %v3202_v31 = vadd.f32 %v3201_v29, %v3086_v49  ;;  %v3225_v8 = vadd.f32 %v3224_v19, %v3109_v51 }
 0xebb   :  { %v3277_v17 = vadd.f32 %v3202_v31, %v12216_v40  ;;  %v3278_v27 = vadd.f32 %v3225_v8, %v12217_v33 }
 0xebd   :  { %v4170_v7 = vmul.f32 -1.442695, %v3277_v17  ;;  %v4172_v63 = vmul.f32 -1.442695, %v3278_v27  ;;  %v3178_v43 = vpop.f32.mrf.mxu3  ;;  %v3155_v26 = vpop.f32.mrf.mxu2 }
 0xebe   :  { %v3179_v41 = vadd.f32 %v3178_v43, %v3063_v0 }
 0xebf   :  { %4581 = vpow2.f32 %v4170_v7 }
 0xec0   :  { %4583 = vpow2.f32 %v4172_v63  ;;  %v3276_v4 = vadd.f32 %v3179_v41, %v12215_v6 }
 0xec1   :  { %v3204_v52 = vpop.f32.mrf.mxu0  ;;  %v3227_v18 = vpop.f32.mrf.mxu1 }
 0xec2   :  { %v4174_v38 = vmul.f32 -1.442695, %v3276_v4  ;;  %v3205_v36 = vadd.f32 %v3204_v52, %v3089_v10  ;;  %v3228_v9 = vadd.f32 %v3227_v18, %v3112_v16 }
 0xec4   :  { %4585 = vpow2.f32 %v4174_v38  ;;  %v3282_v51 = vadd.f32 %v3205_v36, %v12216_v40  ;;  %v3283_v49 = vadd.f32 %v3228_v9, %v12217_v33 }
 0xec5   :  { %v4582_v29 = vpop.eup %4581 }
 0xec6   :  { %v4584_v19 = vpop.eup %4583  ;;  %v10472_v31 = vadd.f32 1.0, %v4582_v29  ;;  %v4171_v0 = vmul.f32 -1.442695, %v3282_v51  ;;  %v3181_v8 = vpop.f32.mrf.mxu3  ;;  %v4173_v27 = vmul.f32 -1.442695, %v3283_v49 }
 0xec7   :  { %v10474_v17 = vadd.f32 1.0, %v4584_v19  ;;  %v3182_v7 = vadd.f32 %v3181_v8, %v3066_v46  ;;  %v10478_v38 = vpop.f32.mrf.mxu2 }
 0xec8   :  { %4587 = vrcp.f32 %v10472_v31  ;;  %vm3299_vm6 = vweird.f32 %v10472_v31 }
 0xec9   :  { %4589 = vrcp.f32 %v10474_v17  ;;  %v3281_v9 = vadd.f32 %v3182_v7, %v12215_v6  ;;  %vm3339_vm7 = vweird.f32 %v10474_v17 }
 0xeca   :  { %v4586_v18 = vpop.eup %4585  ;;  %4591 = vpow2.f32 %v4171_v0 }
 0xecb   :  { %v10481_v36 = vadd.f32 1.0, %v4586_v18  ;;  %4593 = vpow2.f32 %v4173_v27  ;;  %v4175_v52 = vmul.f32 -1.442695, %v3281_v9  ;;  %v3303_v9 = vand.u32 2147483647, %v10472_v31 }
 0xecd   :  { %4595 = vrcp.f32 %v10481_v36  ;;  %vm10521_vm8 = vcmp.eq.f32.partialorder %v3303_v9, 8.507059e+37  ;;  %vm3383_vm10 = vweird.f32 %v10481_v36 }
 0xece   :  { %v10484_v4 = vpop.eup %4587  ;;  %4597 = vpow2.f32 %v4175_v52  ;;  %v3305_v52 = vand.u32 2147483648, %v10472_v31 }
 0xecf   :  { %v10486_v16 = vpop.eup %4589  ;;  %v3295_v10 = vmul.f32 %v10484_v4, %v10472_v31  ;;  %v3270_v43 = vpop.f32.mrf.mxu3  ;;  %vm3300_vm11 = vweird.f32 %v10484_v4 }
 0xed0   :  { %v4592_v46 = vpop.eup %4591  ;;  %v3335_v63 = vmul.f32 %v10486_v16, %v10474_v17  ;;  %v3271_v0 = vadd.f32 %v3270_v43, %v3155_v26  ;;  %v3247_v18 = vpop.f32.mrf.mxu2  ;;  %v10509_v26 = vmul.f32 %v9880_v55, %v9695_v50  ;;  %v3306_v50 = vor.u32 1.1754944e-38, %v3305_v52  ;;  %vm10551_vm14 = vmor %vm3299_vm6, %vm3300_vm11 }
 0xed1   :  { %v4594_v41 = vpop.eup %4593  ;;  %v10492_v51 = vadd.f32 1.0, %v4592_v46  ;;  %v3296_v19 = vsub.f32 1.0, %v3295_v10  ;;  %v3345_v10 = vand.u32 2147483648, %v10474_v17  ;;  %v3387_v46 = vand.u32 2147483647, %v10481_v36 }
 0xed2   :  { %v10494_v49 = vadd.f32 1.0, %v4594_v41  ;;  %v3336_v27 = vsub.f32 1.0, %v3335_v63  ;;  %v3343_v41 = vand.u32 2147483647, %v10474_v17  ;;  %v3280_v40 = vadd.f32 %v3271_v0, %v6362_v47 }
 0xed3   :  { %v10496_v29 = vpop.eup %4595  ;;  %4599 = vrcp.f32 %v10492_v51  ;;  %v3297_v63 = vmul.f32 %v10484_v4, %v3296_v19  ;;  %v3248_v55 = vadd.f32 %v3247_v18, %v10463_v60  ;;  %v3389_v19 = vand.u32 2147483648, %v10481_v36 }
 0xed4   :  { %v4598_v8 = vpop.eup %4597  ;;  %v3379_v7 = vmul.f32 %v10496_v29, %v10481_v36  ;;  %4601 = vrcp.f32 %v10494_v49  ;;  %v3337_v6 = vmul.f32 %v10486_v16, %v3336_v27  ;;  %vm10530_vm9 = vcmp.eq.f32.partialorder %v3343_v41, 8.507059e+37 }
 0xed5   :  { %v10512_v43 = vadd.f32 1.0, %v4598_v8  ;;  %v3346_v27 = vor.u32 1.1754944e-38, %v3345_v10  ;;  %v3298_v52 = vadd.f32 %v10484_v4, %v3297_v63  ;;  %v4176_v18 = vmul.f32 -1.442695, %v3280_v40 }
 0xed6   :  { %v3380_v33 = vsub.f32 1.0, %v3379_v7  ;;  %v3338_v41 = vadd.f32 %v10486_v16, %v3337_v6  ;;  %vm3340_vm12 = vweird.f32 %v10486_v16  ;;  %vm10544_vm13 = vcmp.eq.f32.partialorder %v3387_v46, 8.507059e+37 }
 0xed7   :  { %4603 = vrcp.f32 %v10512_v43  ;;  %v3279_v35 = vadd.f32 %v3248_v55, %v6359_v45  ;;  %v3390_v63 = vor.u32 1.1754944e-38, %v3389_v19  ;;  %vm3314_vm15 = vweird.f32 %v10492_v51  ;;  %vm10565_vm3 = vmor %vm3339_vm7, %vm3340_vm12 }
 0xed8   :  { %v3381_v24 = vmul.f32 %v10496_v29, %v3380_v33  ;;  %v3273_v33 = vpop.f32.mrf.mxu3  ;;  %4605 = vpow2.f32 %v4176_v18  ;;  %v3318_v6 = vand.u32 2147483647, %v10492_v51  ;;  %vm3384_vm1 = vweird.f32 %v10496_v29  ;;  %v3250_v46 = vpop.f32.mrf.mxu2 }
 0xed9   :  { %v10519_v44 = vpop.eup %4599  ;;  %v3320_v55 = vand.u32 2147483648, %v10492_v51  ;;  %vm3354_vm4 = vweird.f32 %v10494_v49  ;;  %v3274_v19 = vadd.f32 %v3273_v33, %v10478_v38  ;;  %v3342_v11 = vsel %vm10565_vm3, %v10486_v16, %v3338_v41  ;;  %vm10585_vm5 = vmor %vm3383_vm10, %vm3384_vm1 }
 0xeda   :  { %v10528_v0 = vpop.eup %4601  ;;  %v3310_v9 = vmul.f32 %v10519_v44, %v10492_v51  ;;  %v3382_v40 = vadd.f32 %v10496_v29, %v3381_v24  ;;  %v3302_v24 = vsel %vm10551_vm14, %v10484_v4, %v3298_v52  ;;  %v3358_v21 = vand.u32 2147483647, %v10494_v49 }
 0xedb   :  { %v3350_v60 = vmul.f32 %v10528_v0, %v10494_v49  ;;  %4607 = vtanh.f32 %v3279_v35  ;;  %v3251_v38 = vadd.f32 %v3250_v46, %v10465_v13  ;;  %v3360_v4 = vand.u32 2147483648, %v10494_v49 }
 0xedc   :  { %v3311_v10 = vsub.f32 1.0, %v3310_v9  ;;  %v3386_v35 = vsel %vm10585_vm5, %v10496_v29, %v3382_v40  ;;  %vm3315_vm6 = vweird.f32 %v10519_v44  ;;  %vm3355_vm7 = vweird.f32 %v10528_v0 }
 0xedd   :  { %v3351_v15 = vsub.f32 1.0, %v3350_v60  ;;  %v10559_v9 = vpop.eup %4603  ;;  %v3347_v13 = vsel %vm10530_vm9, %v3346_v27, %v3342_v11  ;;  %v3391_v29 = vsel %vm10544_vm13, %v3390_v63, %v3386_v35  ;;  %v3284_v40 = vadd.f32 %v3251_v38, %v6359_v45  ;;  %vm10626_vm10 = vmor %vm3354_vm4, %vm3355_vm7 }
 0xede   :  { %v3312_v60 = vmul.f32 %v10519_v44, %v3311_v10  ;;  %v3394_v17 = vmul.f32 %v10559_v9, %v10512_v43  ;;  %v3307_v10 = vsel %vm10521_vm8, %v3306_v50, %v3302_v24  ;;  %v4606_v16 = vpop.eup %4605  ;;  %vm10610_vm8 = vmor %vm3314_vm15, %vm3315_vm6  ;;  %v12259_v8 = vrot.slane %v9871_v61, 1 }
 0xedf   :  { %v3352_v18 = vmul.f32 %v10528_v0, %v3351_v15  ;;  %v3285_v15 = vadd.f32 %v3274_v19, %v6362_v47  ;;  %v3418_v46 = vadd.f32 1.0, %v4606_v16  ;;  %v3324_v50 = vmul.f32 %v3307_v10, %v9871_v61 }
 0xee0   :  { %v3395_v52 = vsub.f32 1.0, %v3394_v17  ;;  %v3313_v41 = vadd.f32 %v10519_v44, %v3312_v60  ;;  %v3364_v27 = vmul.f32 %v3347_v13, %v12259_v8  ;;  %vm3399_vm9 = vweird.f32 %v10559_v9 }
 0xee1   :  { %v4177_v36 = vmul.f32 -1.442695, %v3285_v15  ;;  %v3353_v33 = vadd.f32 %v10528_v0, %v3352_v18  ;;  %v4608_v24 = vpop.eup %4607  ;;  %v10620_v28 = vadd.f32 %v10509_v26, %v9864_v62  ;;  %vm3398_vm11 = vweird.f32 %v10512_v43 }
 0xee2   :  { %v3396_v7 = vmul.f32 %v10559_v9, %v3395_v52  ;;  %v3404_v63 = vand.u32 2147483648, %v10512_v43  ;;  %v3408_v19 = vmul.f32 %v4608_v24, %v3391_v29  ;;  %v3317_v60 = vsel %vm10610_vm8, %v10519_v44, %v3313_v41  ;;  %vm3400_vm12 = vmor %vm3398_vm11, %vm3399_vm9 }
 0xee3   :  { %4609 = vpow2.f32 %v4177_v36  ;;  %v3357_v62 = vsel %vm10626_vm10, %v10528_v0, %v3353_v33  ;;  %v3402_v26 = vand.u32 2147483647, %v10512_v43  ;;  %v3321_v49 = vor.u32 1.1754944e-38, %v3320_v55 }
 0xee4   :  { %4611 = vrcp.f32 %v3418_v46  ;;  %v3397_v31 = vadd.f32 %v10559_v9, %v3396_v7  ;;  %v3361_v18 = vor.u32 1.1754944e-38, %v3360_v4  ;;  %vm3319_vm13 = vcmp.eq.f32.partialorder %v3318_v6, 8.507059e+37 }
 0xee5   :  { %4613 = vtanh.f32 %v3284_v40  ;;  %vm3359_vm14 = vcmp.eq.f32.partialorder %v3358_v21, 8.507059e+37  ;;  %v3366_v17 = vadd.f32 %v3364_v27, %v3324_v50  ;;  %v3322_v15 = vsel %vm3319_vm13, %v3321_v49, %v3317_v60 }
 0xee6   :  { %v3401_v58 = vsel %vm3400_vm12, %v10559_v9, %v3397_v31  ;;  %v3362_v52 = vsel %vm3359_vm14, %v3361_v18, %v3357_v62  ;;  %v3405_v10 = vor.u32 1.1754944e-38, %v3404_v63  ;;  %v3041_v35 = vrot.slane %v10620_v28, 1 }
 0xee7   :  { %v10641_v16 = vadd.f32 %v3408_v19, %v3366_v17  ;;  %vm3403_vm15 = vcmp.eq.f32.partialorder %v3402_v26, 8.507059e+37  ;;  %v3325_v4 = vmul.f32 %v3322_v15, %v10620_v28  ;;  %v3431_v36 = vand.u32 2147483648, %v3418_v46  ;;  %v5149_v15 = vld [vmem:[%s10988_s6] ss:$0 sm:$0xff] }
 0xee8   :  { %v3406_v0 = vsel %vm3403_vm15, %v3405_v10, %v3401_v58  ;;  %v3365_v21 = vmul.f32 %v3362_v52, %v3041_v35  ;;  %v3429_v33 = vand.u32 2147483647, %v3418_v46  ;;  %vm3425_vm3 = vweird.f32 %v3418_v46 }
 0xee9   :  { %v4610_v38 = vpop.eup %4609  ;;  %v3432_v11 = vor.u32 1.1754944e-38, %v3431_v36  ;;  %v3460_v10 = vadd.s32 6, %v6528_v37  ;;  %vm3550_vm12 = vcmp.gt.s32.totalorder %v9834_v48, 6  ;;  %vm4016_vm13 = vcmp.gt.s32.totalorder %v9834_v48, 7 }
 0xeea   :  { %v4612_v44 = vpop.eup %4611  ;;  %v3419_v43 = vadd.f32 1.0, %v4610_v38  ;;  %v3367_v7 = vadd.f32 %v3365_v21, %v3325_v4  ;;  %vm3430_vm5 = vcmp.eq.f32.partialorder %v3429_v33, 8.507059e+37  ;;  %v4182_v36 = vsel %vm3550_vm12, 1.0, %v11735_v53 }
 0xeeb   :  { %v3421_v55 = vmul.f32 %v4612_v44, %v3418_v46  ;;  %v4614_v6 = vpop.eup %4613  ;;  %vm3426_vm1 = vweird.f32 %v4612_v44  ;;  %vm3461_vm10 = vcmp.lt.s32.totalorder %v3460_v10, %v6531_v5 }
 0xeec   :  { %4615 = vrcp.f32 %v3419_v43  ;;  %v3409_v13 = vmul.f32 %v4614_v6, %v3406_v0  ;;  %vm3427_vm4 = vmor %vm3425_vm3, %vm3426_vm1  ;;  %v3446_v19 = vand.u32 2147483648, %v3419_v43  ;;  %v3444_v62 = vand.u32 2147483647, %v3419_v43 }
 0xeed   :  { %v3422_v9 = vsub.f32 1.0, %v3421_v55  ;;  %4617 = vtanh.f32 %v10641_v16  ;;  %vm3440_vm7 = vweird.f32 %v3419_v43 }
 0xeee   :  { %v10647_v40 = vadd.f32 %v3409_v13, %v3367_v7  ;;  %v3447_v49 = vor.u32 1.1754944e-38, %v3446_v19  ;;  %vm3445_vm9 = vcmp.eq.f32.partialorder %v3444_v62, 8.507059e+37 }
 0xeef   :  { %v3423_v41 = vmul.f32 %v4612_v44, %v3422_v9 }
 0xef0   :  { %4619 = vtanh.f32 %v10647_v40 }
 0xef1   :  { %v3424_v50 = vadd.f32 %v4612_v44, %v3423_v41  ;;  %v3556_v41 = vperm.slane %v4182_v36, 0 }
 0xef2   :  { %v4616_v29 = vpop.eup %4615 }
 0xef3   :  { %v3428_v8 = vsel %vm3427_vm4, %v4612_v44, %v3424_v50  ;;  %v3436_v27 = vmul.f32 %v4616_v29, %v3419_v43  ;;  %v4618_v31 = vpop.eup %4617  ;;  %vm3441_vm6 = vweird.f32 %v4616_v29 }
 0xef4   :  { %v3433_v24 = vsel %vm3430_vm5, %v3432_v11, %v3428_v8  ;;  %vm3442_vm8 = vmor %vm3440_vm7, %vm3441_vm6 }
 0xef5   :  { %v10649_v51 = vmul.f32 %v4618_v31, %v3433_v24  ;;  %v3437_v63 = vsub.f32 1.0, %v3436_v27 }
 0xef6   :  { %v4620_v17 = vpop.eup %4619 }
 0xef7   :  { %v3454_v60 = vmul.f32 %v9812_v30, %v10649_v51  ;;  %v3438_v46 = vmul.f32 %v4616_v29, %v3437_v63 }
 0xef9   :  { %3456 = vadd.xlane.f32.xlu2 %v3454_v60  ;;  %v3439_v26 = vadd.f32 %v4616_v29, %v3438_v46 }
 0xefb   :  { %v3443_v18 = vsel %vm3442_vm8, %v4616_v29, %v3439_v26  ;;  %v10672_v29 = vsel %vm4016_vm13, 1.0, %v11735_v53 }
 0xefc   :  { %v3448_v58 = vsel %vm3445_vm9, %v3447_v49, %v3443_v18  ;;  %v4020_v11 = vrot.slane %v10672_v29, 1  ;;  %v3568_v18 = vsub.f32 1.0, %v4182_v36 }
 0xefd   :  { %v10654_v38 = vmul.f32 %v4620_v17, %v3448_v58 }
 0xefe   :  { %v4035_v8 = vsub.f32 1.0, %v4020_v11  ;;  %v3572_v58 = vperm.slane %v3568_v18, 0 }
 0xeff   :  { %v3455_v30 = vmul.f32 %v5149_v15, %v10654_v38 }
 0xf00   :  { %v4039_v27 = vperm.slane %v4035_v8, 0 }
 0xf01   :  { %3458 = vadd.xlane.f32.xlu1 %v3455_v30 }
 0xf6c   :  { %v3457_v52 = vpop.xlane.xlu2 %3456 }
 0xf6d   :  { %v3464_v43 = vperm.slane %v3457_v52, %v6528_v37 }
 0xf74   :  { %v3459_v44 = vpop.xlane.xlu1 %3458 }
 0xf75   :  { %v3465_v0 = vperm.slane %v3459_v44, %v6528_v37  ;;  %v3554_v37 = vrot.slane %v4182_v36, 1 }
 0xf77   :  { %v3466_v55 = vsel %vm655_vm0, %v3465_v0, %v3464_v43  ;;  %v3557_v5 = vperm.slane %v3554_v37, 0  ;;  %v3569_v7 = vsub.f32 1.0, %v3554_v37 }
 0xf78   :  { %v3468_v4 = vsel %vm3461_vm10, %v3466_v55, -1e+30 }
 0xf79   :  { %v3469_v21 = vsel %vm659_vm2, %v3468_v4, -inf  ;;  %v4352_v33 = vpack.i.bf16 %v3557_v5, %v3556_v41  ;;  %v3573_v50 = vperm.slane %v3569_v7, 0 }
 0xf7a   :  { %3470 = vmax.xlane.f32.xlu0 %v3469_v21 }
 0xfed   :  { %v3471_v6 = vpop.xlane.xlu0 %3470 }
 0xfee   :  { %vm3472_vm11 = vcmp.eq.f32.partialorder %v3468_v4, %v3471_v6 }
 0xfef   :  { %v3473_v9 = vsel %vm3472_vm11, %v6545_v25, 8.0 }
 0xff0   :  { %v3474_v13 = vsel %vm659_vm2, %v3473_v9, inf }
 0xff1   :  { %3475 = vmin.xlane.f32.xlu2 %v3474_v13 }
0x1009   :  { %4353 = vperm.xlu2 %4351, %v4352_v33  }
0x1011   :  { %3579 = vperm.xlu2 %4351, %v3573_v50  }
0x1019   :  { %4045 = vperm.xlu2 %4351, %v4039_v27  }
0x1064   :  { %v3476_v31 = vpop.xlane.xlu2 %3475 }
0x1065   :  { %vm3477_vm2 = vcmp.eq.f32.partialorder %v6545_v25, %v3476_v31  ;;  %vm3480_vm14 = vcmp.lt.f32.partialorder %v6545_v25, %v3476_v31  ;;  %vm3483_vm15 = vcmp.gt.f32.partialorder %v6545_v25, %v3476_v31 }
0x1066   :  { %v4178_v24 = vsel %vm3477_vm2, 1.0, %v11735_v53  ;;  %v4179_v48 = vsel %vm3480_vm14, 1.0, %v11735_v53  ;;  %v4180_v63 = vsel %vm3483_vm15, 1.0, %v11735_v53  ;;  %v4034_v53 = vsub.f32 1.0, %v10672_v29 }
0x1067   :  { %v3502_v19 = vperm.slane %v4179_v48, 0  ;;  %v3520_v60 = vperm.slane %v4180_v63, 0  ;;  %4181 = vst [vmem:[%s10991_s9 + $0xa] sm:$0x3] %v4178_v24  ;;  %v3493_v46 = vperm.slane %v4178_v24, 1  ;;  %v3486_v62 = vperm.slane %v4178_v24, 0 }
0x1068   :  { %v3509_v25 = vperm.slane %v4179_v48, 1  ;;  %v3527_v17 = vperm.slane %v4180_v63, 1  ;;  %v4038_v30 = vperm.slane %v4034_v53, 0 }
0x1069   :  { %v4363_v26 = vpack.i.bf16 %v3493_v46, %v3520_v60  ;;  %v4358_v49 = vpack.i.bf16 %v3502_v19, %v3486_v62 }
0x106a   :  { %v4369_v15 = vpack.i.bf16 %v3527_v17, %v3509_v25 }
0x106b   :  { %4364 = vperm.xlu0 %4332, %v4363_v26   ;;  %4359 = vperm.xlu1 %4357, %v4358_v49  }
0x106c   :  { %v4354_v55 = vpop.permute.xlu2 %4353 }
0x106d   :  { %v4355_v13 = vunpack.i.l.bf16 %v4354_v55 }
0x1073   :  { %4368 = vset.pattern.permute.xlu0 %v11736_v22  ;;  %4370 = vperm.xlu1 %4357, %v4369_v15  }
0x1074   :  { %3575 = vperm.xlu0 %4368, %v3572_v58  }
0x107b   :  { %4374 = vset.pattern.permute.xlu1 %v11736_v22  ;;  %v12262_v22 = vrot.slane %v9871_v61, 1 }
0x107c   :  { %4041 = vperm.xlu0 %4368, %v4038_v30  }
0x10dd   :  { %v4365_v52 = vpop.permute.xlu0 %4364  ;;  %v4360_v10 = vpop.permute.xlu1 %4359 }
0x10de   :  { %v4362_v44 = vunpack.i.h.bf16 %v4360_v10  ;;  %v4361_v43 = vunpack.i.l.bf16 %v4360_v10  ;;  %v4366_v0 = vunpack.i.l.bf16 %v4365_v52  ;;  %v4367_v33 = vunpack.i.h.bf16 %v4365_v52  ;;  %v12275_v52 = vld [vmem:[#allocation45_spill] sm:$0xff] }
0x10df   :  { %v12276_v10 = vld [vmem:[#allocation17_spill] sm:$0xff] }
0x10e0   :  { %v3516_v4 = vmul.f32 %v4362_v44, %v9869_v32  ;;  %v3540_v21 = vmul.f32 %v4362_v44, %v9871_v61  ;;  %v3500_v6 = vmul.f32 %v4361_v43, %v10649_v51  ;;  %v3538_v9 = vmul.f32 %v4361_v43, %v10641_v16  ;;  %v5150_v44 = vld [vmem:[%s10985_s3 + $0x90] sm:$0xff]  ;;  %v5151_v43 = vld [vmem:[%s10985_s3 + $0x98] sm:$0xff] }
0x10e1   :  { %v3534_v36 = vmul.f32 %v4366_v0, %v9874_v59  ;;  %v3544_v37 = vmul.f32 %v4366_v0, %v12262_v22  ;;  %v3501_v59 = vmul.f32 %v4367_v33, %v10654_v38  ;;  %v3539_v19 = vmul.f32 %v4367_v33, %v10647_v40  ;;  %v12277_v0 = vld [vmem:[#allocation44_spill] sm:$0xff] }
0x10e2   :  { %v3518_v41 = vadd.f32 %v3516_v4, %v3500_v6  ;;  %v3542_v5 = vadd.f32 %v3540_v21, %v3538_v9  ;;  %v4356_v40 = vunpack.i.h.bf16 %v4354_v55  ;;  %v5152_v55 = vld [vmem:[%s10985_s3 + $0x68] sm:$0xff]  ;;  %v4022_v4 = vperm.slane %v10672_v29, 0  ;;  %v5153_v6 = vld [vmem:[%s10985_s3 + $0x70] sm:$0xff]  ;;  %v5154_v9 = vld [vmem:[%s10985_s3 + $0x40] sm:$0xff] }
0x10e3   :  { %v4023_v21 = vperm.slane %v4020_v11, 0  ;;  %v5156_v29 = vld [vmem:[%s10985_s3 + $0x18] sm:$0xff] }
0x10e4   :  { %v3536_v50 = vadd.f32 %v3534_v36, %v3518_v41  ;;  %v3546_v8 = vadd.f32 %v3544_v37, %v3542_v5  ;;  %v5157_v36 = vld [vmem:[%s10985_s3 + $0x20] sm:$0xff] }
0x10e5   :  { %v4371_v7 = vpop.permute.xlu1 %4370  ;;  %v4375_v11 = vpack.i.bf16 %v4022_v4, %v4023_v21 }
0x10e6   :  { %v4373_v27 = vunpack.i.h.bf16 %v4371_v7  ;;  %v4372_v31 = vunpack.i.l.bf16 %v4371_v7  ;;  %v3576_v24 = vpop.permute.xlu0 %3575  ;;  %v3566_v48 = vmul.f32 %v4355_v13, %v3536_v50  ;;  %v3586_v63 = vmul.f32 %v4355_v13, %v3546_v8  ;;  %v5155_v13 = vld [vmem:[%s10985_s3 + $0x48] sm:$0xff]  ;;  %s5212_s3 = smov [#allocation4]  }
0x10e7   :  { %v3582_v51 = vmul.f32 %v3576_v24, %v9869_v32  ;;  %v3588_v16 = vmul.f32 %v3576_v24, %v9871_v61  ;;  %v10709_v61 = vpop.permute.xlu2 %3579  ;;  %4376 = vperm.xlu1 %4374, %v4375_v11   ;;  %s4086_s4 = sshll.u32 %s5212_s3, 4  ;;  %s4087_s4 = int_to_ptr.vmem [resolvable:$true] %s4086_s4 }
0x10e8   :  { %v3517_v60 = vmul.f32 %v4372_v31, %v9902_v23  ;;  %v3541_v46 = vmul.f32 %v4372_v31, %v10620_v28  ;;  %v3535_v49 = vmul.f32 %v4373_v27, %v9935_v54  ;;  %v3545_v32 = vmul.f32 %v4373_v27, %v3041_v35  ;;  %v12274_v35 = vld [vmem:[#allocation15_spill] sm:$0xff] }
0x10e9   :  { %v10702_v62 = vadd.f32 %v3582_v51, %v3566_v48  ;;  %v10704_v26 = vadd.f32 %v3588_v16, %v3586_v63  ;;  %v3583_v15 = vmul.f32 %v10709_v61, %v9902_v23  ;;  %v12264_v23 = vld [vmem:[#allocation10_spill] sm:$0xff]  ;;  %v12278_v48 = vld [vmem:[#allocation8_spill] sm:$0xff] }
0x10ea   :  { %v3519_v18 = vadd.f32 %v3517_v60, %v3501_v59  ;;  %v3543_v25 = vadd.f32 %v3541_v46, %v3539_v19  ;;  %v12279_v46 = vld [vmem:[#allocation29_spill] sm:$0xff] }
0x10eb   :  { %v3594_v38 = vrot.slane %v10702_v62, 1 }
0x10ec   :  { %v3537_v17 = vadd.f32 %v3535_v49, %v3519_v18  ;;  %v3547_v58 = vadd.f32 %v3545_v32, %v3543_v25  ;;  %v12280_v32 = vld [vmem:[#allocation9_spill] sm:$0xff] }
0x10ed   :  { %3624 = vmatmul.f32.vlgmr.msrb.gmra.mxu0 %v3594_v38  ;;  %3647 = vmatmul.f32.vlgmr.msrb.gmra.mxu1 %v3594_v38 }
0x10ee   :  { %v3567_v53 = vmul.f32 %v4356_v40, %v3537_v17  ;;  %v10714_v30 = vmul.f32 %v4356_v40, %v3547_v58  ;;  %3670 = vmatmul.f32.vlgmr.msrb.gmra.mxu2 %v3594_v38  ;;  %3693 = vmatmul.f32.vlgmr.msrb.gmra.mxu3 %v3594_v38 }
0x10ef   :  { %3792 = vmatpush.msrb.mxu0 %v9887_v42  ;;  %4192 = vmatpush.msrb.mxu2 %v9887_v42 }
0x10f0   :  { %v10718_v54 = vadd.f32 %v3583_v15, %v3567_v53  ;;  %3815 = vmatpush.msrb.mxu1 %v9893_v1  ;;  %4208 = vmatpush.msrb.mxu3 %v9893_v1  ;;  %v12263_v1 = vld [vmem:[#allocation32_spill] sm:$0xff] }
0x10f1   :  { %3793 = vmatpush.msrb.mxu0 %v9907_v14  ;;  %4193 = vmatpush.msrb.mxu2 %v9907_v14  ;;  %v12265_v14 = vld [vmem:[#allocation33_spill] sm:$0xff] }
0x10f2   :  { %3816 = vmatpush.msrb.mxu1 %v9913_v56  ;;  %4209 = vmatpush.msrb.mxu3 %v9913_v56  ;;  %v3595_v42 = vrot.slane %v10718_v54, 1  ;;  %v12266_v56 = vld [vmem:[#allocation11_spill] sm:$0xff] }
0x10f3   :  { %3794 = vmatpush.msrb.mxu0 %v9925_v57  ;;  %4194 = vmatpush.msrb.mxu2 %v9925_v57  ;;  %v12267_v57 = vld [vmem:[#allocation36_spill] sm:$0xff] }
0x10f4   :  { %3817 = vmatpush.msrb.mxu1 %v9931_v12  ;;  %4210 = vmatpush.msrb.mxu3 %v9931_v12  ;;  %v12268_v12 = vld [vmem:[#allocation12_spill] sm:$0xff] }
0x10f5   :  { %3795 = vmatpush.msrb.mxu0 %v9946_v34  ;;  %4195 = vmatpush.msrb.mxu2 %v9946_v34  ;;  %v12269_v34 = vld [vmem:[#allocation37_spill] sm:$0xff] }
0x10f6   :  { %3818 = vmatpush.msrb.mxu1 %v9952_v20  ;;  %4211 = vmatpush.msrb.mxu3 %v9952_v20  ;;  %v12270_v20 = vld [vmem:[#allocation13_spill] sm:$0xff] }
0x10f7   :  { %3627 = vmatmul.f32.gmra.mxu0 %v3595_v42  ;;  %3650 = vmatmul.f32.gmra.mxu1 %v3595_v42 }
0x10f8   :  { %3673 = vmatmul.f32.gmra.mxu2 %v3595_v42  ;;  %3696 = vmatmul.f32.gmra.mxu3 %v3595_v42 }
0x10f9   :  { %3796 = vmatpush.msrb.mxu0 %v9962_v39  ;;  %4196 = vmatpush.msrb.mxu2 %v9962_v39  ;;  %v12271_v39 = vld [vmem:[#allocation40_spill] sm:$0xff] }
0x10fa   :  { %3819 = vmatpush.msrb.mxu1 %v9968_v2  ;;  %4212 = vmatpush.msrb.mxu3 %v9968_v2  ;;  %v12272_v2 = vld [vmem:[#allocation14_spill] sm:$0xff] }
0x10fb   :  { %3797 = vmatpush.msrb.mxu0 %v9980_v3  ;;  %4197 = vmatpush.msrb.mxu2 %v9980_v3  ;;  %v12273_v3 = vld [vmem:[#allocation41_spill] sm:$0xff] }
0x10fc   :  { %3820 = vmatpush.msrb.mxu1 %v12263_v1  ;;  %4213 = vmatpush.msrb.mxu3 %v12263_v1 }
0x10fd   :  { %3798 = vmatpush.msrb.mxu0 %v12264_v23  ;;  %4198 = vmatpush.msrb.mxu2 %v12264_v23 }
0x10fe   :  { %3821 = vmatpush.msrb.mxu1 %v12265_v14  ;;  %4214 = vmatpush.msrb.mxu3 %v12265_v14 }
0x10ff   :  { %3799 = vmatpush.msrb.mxu0 %v12266_v56  ;;  %4199 = vmatpush.msrb.mxu2 %v12266_v56 }
0x1100   :  { %3822 = vmatpush.msrb.mxu1 %v12267_v57  ;;  %4215 = vmatpush.msrb.mxu3 %v12267_v57 }
0x1101   :  { %3716 = vmatmul.f32.vlgmr.msra.gmra.mxu0 %v3594_v38  ;;  %3739 = vmatmul.f32.vlgmr.msra.gmra.mxu1 %v10702_v62 }
0x1102   :  { %3762 = vmatmul.f32.vlgmr.msra.gmra.mxu2 %v10702_v62  ;;  %3785 = vmatmul.f32.vlgmr.msra.gmra.mxu3 %v10702_v62 }
0x1103   :  { %3800 = vmatpush.msrb.mxu0 %v12268_v12  ;;  %4200 = vmatpush.msrb.mxu2 %v12268_v12 }
0x1104   :  { %3823 = vmatpush.msrb.mxu1 %v12269_v34  ;;  %4216 = vmatpush.msrb.mxu3 %v12269_v34  ;;  %v3589_v34 = vmul.f32 %v10709_v61, %v10620_v28 }
0x1105   :  { %3801 = vmatpush.msrb.mxu0 %v12270_v20  ;;  %4201 = vmatpush.msrb.mxu2 %v12270_v20 }
0x1106   :  { %3824 = vmatpush.msrb.mxu1 %v12271_v39  ;;  %4217 = vmatpush.msrb.mxu3 %v12271_v39 }
0x1107   :  { %3802 = vmatpush.msrb.mxu0 %v12272_v2  ;;  %4202 = vmatpush.msrb.mxu2 %v12272_v2 }
0x1108   :  { %3825 = vmatpush.msrb.mxu1 %v12273_v3  ;;  %4218 = vmatpush.msrb.mxu3 %v12273_v3 }
0x1109   :  { %3803 = vmatpush.msrb.mxu0 %v12274_v35  ;;  %4203 = vmatpush.msrb.mxu2 %v12274_v35 }
0x110a   :  { %3826 = vmatpush.msrb.mxu1 %v12275_v52  ;;  %4219 = vmatpush.msrb.mxu3 %v12275_v52 }
0x110b   :  { %3719 = vmatmul.f32.gmra.mxu0 %v3595_v42  ;;  %3742 = vmatmul.f32.gmra.mxu1 %v10718_v54 }
0x110c   :  { %3765 = vmatmul.f32.gmra.mxu2 %v10718_v54  ;;  %3788 = vmatmul.f32.gmra.mxu3 %v10718_v54 }
0x110d   :  { %3804 = vmatpush.msrb.mxu0 %v12276_v10  ;;  %4204 = vmatpush.msrb.mxu2 %v5150_v44  ;;  %v10824_v44 = vadd.f32 %v3589_v34, %v10714_v30 }
0x110e   :  { %3827 = vmatpush.msrb.mxu1 %v5151_v43  ;;  %4220 = vmatpush.msrb.mxu3 %v5151_v43 }
0x110f   :  { %3805 = vmatpush.msrb.mxu0 %v12277_v0  ;;  %4205 = vmatpush.msrb.mxu2 %v5152_v55 }
0x1110   :  { %3828 = vmatpush.msrb.mxu1 %v5153_v6  ;;  %4221 = vmatpush.msrb.mxu3 %v5153_v6 }
0x1111   :  { %3806 = vmatpush.msrb.mxu0 %v5154_v9  ;;  %4206 = vmatpush.msrb.mxu2 %v5154_v9 }
0x1112   :  { %3829 = vmatpush.msrb.mxu1 %v5155_v13  ;;  %4222 = vmatpush.msrb.mxu3 %v5155_v13  ;;  %v3602_v13 = vrot.slane %v10704_v26, 1 }
0x1113   :  { %3807 = vmatpush.msrb.mxu0 %v5156_v29  ;;  %4207 = vmatpush.msrb.mxu2 %v5156_v29 }
0x1114   :  { %3830 = vmatpush.msrb.mxu1 %v5157_v36  ;;  %4223 = vmatpush.msrb.mxu3 %v5157_v36  ;;  %v3603_v36 = vrot.slane %v10824_v44, 1 }
0x1115   :  { %3808 = vmatmul.f32.vlgmr.msrb.gmra.mxu0 %v10702_v62  ;;  %3811 = vmatmul.f32.vlgmr.msrb.gmra.mxu2 %v10718_v54 }
0x1116   :  { %3831 = vmatmul.f32.vlgmr.msrb.gmra.mxu1 %v10702_v62  ;;  %3834 = vmatmul.f32.vlgmr.msrb.gmra.mxu3 %v10718_v54 }
0x116a   :  { %v3625_v22 = vpop.f32.mrf.mxu0  ;;  %v3648_v37 = vpop.f32.mrf.mxu1 }
0x1171   :  { %v3671_v41 = vpop.f32.mrf.mxu2  ;;  %v3694_v5 = vpop.f32.mrf.mxu3 }
0x1174   :  { %v3628_v33 = vpop.f32.mrf.mxu0  ;;  %v3651_v7 = vpop.f32.mrf.mxu1 }
0x117b   :  { %v3674_v50 = vpop.f32.mrf.mxu2  ;;  %v10806_v8 = vpop.f32.mrf.mxu3 }
0x117e   :  { %v3717_v27 = vpop.f32.mrf.mxu0  ;;  %v3740_v31 = vpop.f32.mrf.mxu1 }
0x117f   :  { %v3741_v24 = vadd.f32 %v3740_v31, %v3625_v22 }
0x1181   :  { %v3838_v51 = vadd.f32 %v3741_v24, %v12278_v48 }
0x1183   :  { %v4187_v63 = vmul.f32 -1.442695, %v3838_v51 }
0x1185   :  { %4621 = vpow2.f32 %v4187_v63  ;;  %v3763_v16 = vpop.f32.mrf.mxu2  ;;  %v3786_v59 = vpop.f32.mrf.mxu3 }
0x1186   :  { %v3764_v19 = vadd.f32 %v3763_v16, %v3648_v37  ;;  %v3787_v60 = vadd.f32 %v3786_v59, %v3671_v41 }
0x1188   :  { %v3839_v49 = vadd.f32 %v3764_v19, %v12279_v46  ;;  %v3840_v18 = vadd.f32 %v3787_v60, %v12280_v32  ;;  %v3720_v25 = vpop.f32.mrf.mxu0  ;;  %v3743_v38 = vpop.f32.mrf.mxu1 }
0x1189   :  { %v3744_v40 = vadd.f32 %v3743_v38, %v3628_v33 }
0x118a   :  { %v4183_v17 = vmul.f32 -1.442695, %v3839_v49  ;;  %v4185_v58 = vmul.f32 -1.442695, %v3840_v18 }
0x118b   :  { %v4622_v15 = vpop.eup %4621  ;;  %v3843_v53 = vadd.f32 %v3744_v40, %v12278_v48 }
0x118c   :  { %v10812_v42 = vadd.f32 1.0, %v4622_v15  ;;  %4623 = vpow2.f32 %v4183_v17 }
0x118d   :  { %4625 = vpow2.f32 %v4185_v58  ;;  %v4188_v1 = vmul.f32 -1.442695, %v3843_v53 }
0x118e   :  { %4627 = vrcp.f32 %v10812_v42  ;;  %v3951_v21 = vand.u32 2147483648, %v10812_v42  ;;  %vm3945_vm1 = vweird.f32 %v10812_v42  ;;  %v3949_v41 = vand.u32 2147483647, %v10812_v42 }
0x118f   :  { %4629 = vpow2.f32 %v4188_v1  ;;  %v3766_v23 = vpop.f32.mrf.mxu2  ;;  %v3789_v14 = vpop.f32.mrf.mxu3 }
0x1190   :  { %v3767_v56 = vadd.f32 %v3766_v23, %v3651_v7  ;;  %v3790_v57 = vadd.f32 %v3789_v14, %v3674_v50  ;;  %v10843_v50 = vor.u32 1.1754944e-38, %v3951_v21  ;;  %vm10863_vm6 = vcmp.eq.f32.partialorder %v3949_v41, 8.507059e+37 }
0x1192   :  { %v4624_v12 = vpop.eup %4623  ;;  %v3844_v20 = vadd.f32 %v3767_v56, %v12279_v46  ;;  %v3845_v39 = vadd.f32 %v3790_v57, %v12280_v32  ;;  %v3809_v2 = vpop.f32.mrf.mxu0 }
0x1193   :  { %v4626_v3 = vpop.eup %4625  ;;  %v10819_v35 = vadd.f32 1.0, %v4624_v12  ;;  %v3832_v52 = vpop.f32.mrf.mxu1  ;;  %v3810_v61 = vadd.f32 %v3809_v2, %v3694_v5 }
0x1194   :  { %v10821_v10 = vpop.eup %4627  ;;  %v10826_v43 = vadd.f32 1.0, %v4626_v3  ;;  %v4184_v0 = vmul.f32 -1.442695, %v3844_v20  ;;  %v3833_v55 = vadd.f32 %v3832_v52, %v3717_v27  ;;  %v4186_v28 = vmul.f32 -1.442695, %v3845_v39 }
0x1195   :  { %v4630_v4 = vpop.eup %4629  ;;  %4631 = vrcp.f32 %v10819_v35  ;;  %v3941_v6 = vmul.f32 %v10821_v10, %v10812_v42  ;;  %v3865_v37 = vand.u32 2147483647, %v10819_v35  ;;  %v3841_v5 = vadd.f32 %v3810_v61, %v6359_v45 }
0x1196   :  { %4633 = vrcp.f32 %v10826_v43  ;;  %v10833_v9 = vadd.f32 1.0, %v4630_v4  ;;  %v3842_v30 = vadd.f32 %v3833_v55, %v6362_v47  ;;  %vm3861_vm3 = vweird.f32 %v10819_v35 }
0x1197   :  { %4635 = vpow2.f32 %v4184_v0  ;;  %v3942_v7 = vsub.f32 1.0, %v3941_v6  ;;  %v3867_v24 = vand.u32 2147483648, %v10819_v35  ;;  %vm3901_vm4 = vweird.f32 %v10826_v43 }
0x1198   :  { %4637 = vrcp.f32 %v10833_v9  ;;  %v4189_v29 = vmul.f32 -1.442695, %v3842_v30  ;;  %v3812_v11 = vpop.f32.mrf.mxu2  ;;  %vm10853_vm5 = vcmp.eq.f32.partialorder %v3865_v37, 8.507059e+37  ;;  %v3907_v46 = vand.u32 2147483648, %v10826_v43 }
0x1199   :  { %4639 = vpow2.f32 %v4186_v28  ;;  %v3835_v22 = vpop.f32.mrf.mxu3  ;;  %v3813_v31 = vadd.f32 %v3812_v11, %v10806_v8  ;;  %v3943_v16 = vmul.f32 %v10821_v10, %v3942_v7  ;;  %v3905_v8 = vand.u32 2147483647, %v10826_v43 }
0x119a   :  { %v3836_v33 = vadd.f32 %v3835_v22, %v3720_v25  ;;  %4641 = vpow2.f32 %v4189_v29  ;;  %vm3946_vm8 = vweird.f32 %v10821_v10  ;;  %v3868_v23 = vor.u32 1.1754944e-38, %v3867_v24 }
0x119b   :  { %v4632_v27 = vpop.eup %4631  ;;  %4643 = vtanh.f32 %v3841_v5  ;;  %v3846_v17 = vadd.f32 %v3813_v31, %v6359_v45  ;;  %v3944_v53 = vadd.f32 %v10821_v10, %v3943_v16  ;;  %vm10880_vm10 = vmor %vm3945_vm1, %vm3946_vm8  ;;  %vm10887_vm12 = vcmp.eq.f32.partialorder %v3905_v8, 8.507059e+37 }
0x119c   :  { %v4634_v48 = vpop.eup %4633  ;;  %v3857_v51 = vmul.f32 %v4632_v27, %v10819_v35  ;;  %v3847_v63 = vadd.f32 %v3836_v33, %v6362_v47  ;;  %vm3862_vm7 = vweird.f32 %v4632_v27  ;;  %v3908_v39 = vor.u32 1.1754944e-38, %v3907_v46 }
0x119d   :  { %v4636_v59 = vpop.eup %4635  ;;  %v3897_v19 = vmul.f32 %v4634_v48, %v10826_v43  ;;  %vm3902_vm9 = vweird.f32 %v4634_v48  ;;  %vm3863_vm11 = vmor %vm3861_vm3, %vm3862_vm7  ;;  %v3948_v42 = vsel %vm10880_vm10, %v10821_v10, %v3944_v53  ;;  %vm3960_vm2 = vweird.f32 %v10833_v9 }
0x119e   :  { %v10859_v49 = vpop.eup %4637  ;;  %v3858_v32 = vsub.f32 1.0, %v3857_v51  ;;  %v10861_v18 = vadd.f32 1.0, %v4636_v59  ;;  %v4190_v47 = vmul.f32 -1.442695, %v3847_v63  ;;  %vm3903_vm13 = vmor %vm3901_vm4, %vm3902_vm9  ;;  %v3964_v35 = vand.u32 2147483647, %v10833_v9 }
0x119f   :  { %v4640_v38 = vpop.eup %4639  ;;  %v3898_v40 = vsub.f32 1.0, %v3897_v19  ;;  %v3956_v56 = vmul.f32 %v10859_v49, %v10833_v9  ;;  %vm3961_vm15 = vweird.f32 %v10859_v49  ;;  %v3953_v29 = vsel %vm10863_vm6, %v10843_v50, %v3948_v42 }
0x11a0   :  { %4645 = vrcp.f32 %v10861_v18  ;;  %v10870_v58 = vadd.f32 1.0, %v4640_v38  ;;  %v3859_v15 = vmul.f32 %v4632_v27, %v3858_v32  ;;  %v4642_v1 = vpop.eup %4641  ;;  %vm3876_vm14 = vweird.f32 %v10861_v18  ;;  %vm10941_vm8 = vmor %vm3960_vm2, %vm3961_vm15 }
0x11a1   :  { %4647 = vpow2.f32 %v4190_v47  ;;  %v3899_v14 = vmul.f32 %v4634_v48, %v3898_v40  ;;  %v10876_v45 = vadd.f32 1.0, %v4642_v1  ;;  %v4644_v2 = vpop.eup %4643  ;;  %v3880_v43 = vand.u32 2147483647, %v10861_v18 }
0x11a2   :  { %4649 = vrcp.f32 %v10870_v58  ;;  %v3860_v57 = vadd.f32 %v4632_v27, %v3859_v15  ;;  %v3957_v28 = vsub.f32 1.0, %v3956_v56  ;;  %v3882_v6 = vand.u32 2147483648, %v10861_v18 }
0x11a3   :  { %4651 = vtanh.f32 %v3846_v17  ;;  %v3900_v34 = vadd.f32 %v4634_v48, %v3899_v14  ;;  %vm3916_vm1 = vweird.f32 %v10870_v58  ;;  %v3920_v37 = vand.u32 2147483647, %v10870_v58 }
0x11a4   :  { %4653 = vrcp.f32 %v10876_v45  ;;  %v3864_v3 = vsel %vm3863_vm11, %v4632_v27, %v3860_v57  ;;  %v3958_v41 = vmul.f32 %v10859_v49, %v3957_v28  ;;  %v3922_v27 = vand.u32 2147483648, %v10870_v58 }
0x11a5   :  { %v3869_v52 = vsel %vm10853_vm5, %v3868_v23, %v3864_v3  ;;  %v3904_v0 = vsel %vm3903_vm13, %v4634_v48, %v3900_v34  ;;  %vm10921_vm3 = vcmp.eq.f32.partialorder %v3964_v35, 8.507059e+37  ;;  %v3966_v48 = vand.u32 2147483648, %v10833_v9  ;;  %v4042_v35 = vpop.permute.xlu0 %4041 }
0x11a6   :  { %v4646_v55 = vpop.eup %4645  ;;  %v3886_v4 = vmul.f32 %v3869_v52, %v10704_v26  ;;  %v3909_v10 = vsel %vm10887_vm12, %v3908_v39, %v3904_v0  ;;  %v3959_v24 = vadd.f32 %v10859_v49, %v3958_v41  ;;  %v3970_v51 = vmul.f32 %v4644_v2, %v3953_v29 }
0x11a7   :  { %v4648_v61 = vpop.eup %4647  ;;  %v3872_v21 = vmul.f32 %v4646_v55, %v10861_v18  ;;  %v3926_v30 = vmul.f32 %v3909_v10, %v3602_v13  ;;  %vm3877_vm4 = vweird.f32 %v4646_v55  ;;  %vm10929_vm5 = vcmp.eq.f32.partialorder %v3880_v43, 8.507059e+37 }
0x11a8   :  { %v4650_v11 = vpop.eup %4649  ;;  %v10914_v22 = vadd.f32 1.0, %v4648_v61  ;;  %v3883_v60 = vor.u32 1.1754944e-38, %v3882_v6  ;;  %vm10933_vm6 = vcmp.eq.f32.partialorder %v3920_v37, 8.507059e+37  ;;  %vm3878_vm9 = vmor %vm3876_vm14, %vm3877_vm4  ;;  %v3923_v40 = vor.u32 1.1754944e-38, %v3922_v27 }
0x11a9   :  { %v4652_v5 = vpop.eup %4651  ;;  %v3873_v33 = vsub.f32 1.0, %v3872_v21  ;;  %v3912_v7 = vmul.f32 %v4650_v11, %v10870_v58  ;;  %v3928_v13 = vadd.f32 %v3926_v30, %v3886_v4  ;;  %vm3917_vm7 = vweird.f32 %v4650_v11  ;;  %v4046_v21 = vpop.permute.xlu2 %4045 }
0x11aa   :  { %v4654_v50 = vpop.eup %4653  ;;  %4655 = vrcp.f32 %v10914_v22  ;;  %v3963_v17 = vsel %vm10941_vm8, %v10859_v49, %v3959_v24  ;;  %v3967_v15 = vor.u32 1.1754944e-38, %v3966_v48  ;;  %vm3987_vm10 = vweird.f32 %v10876_v45  ;;  %vm3918_vm12 = vmor %vm3916_vm1, %vm3917_vm7  ;;  %v4377_v49 = vpop.permute.xlu1 %4376 }
0x11ab   :  { %v3913_v63 = vsub.f32 1.0, %v3912_v7  ;;  %v3874_v16 = vmul.f32 %v4646_v55, %v3873_v33  ;;  %v3983_v59 = vmul.f32 %v4654_v50, %v10876_v45  ;;  %v3972_v46 = vadd.f32 %v3970_v51, %v3928_v13 }
0x11ac   :  { %vm3988_vm11 = vweird.f32 %v4654_v50  ;;  %v3991_v18 = vand.u32 2147483647, %v10876_v45  ;;  %v3993_v56 = vand.u32 2147483648, %v10876_v45  ;;  %v3968_v2 = vsel %vm10921_vm3, %v3967_v15, %v3963_v17 }
0x11ad   :  { %v3875_v32 = vadd.f32 %v4646_v55, %v3874_v16  ;;  %v3914_v47 = vmul.f32 %v4650_v11, %v3913_v63  ;;  %v3984_v38 = vsub.f32 1.0, %v3983_v59  ;;  %4657 = vtanh.f32 %v3972_v46  ;;  %vm3989_vm13 = vmor %vm3987_vm10, %vm3988_vm11 }
0x11ae   :  { %v4379_v52 = vunpack.i.h.bf16 %v4377_v49  ;;  %v4378_v0 = vunpack.i.l.bf16 %v4377_v49  ;;  %v3971_v4 = vmul.f32 %v4652_v5, %v3968_v2  ;;  %vm3992_vm2 = vcmp.eq.f32.partialorder %v3991_v18, 8.507059e+37 }
0x11af   :  { %v3879_v53 = vsel %vm3878_vm9, %v4646_v55, %v3875_v32  ;;  %v3915_v1 = vadd.f32 %v4650_v11, %v3914_v47  ;;  %v3985_v23 = vmul.f32 %v4654_v50, %v3984_v38  ;;  %v3994_v55 = vor.u32 1.1754944e-38, %v3993_v56 }
0x11b0   :  { %v4656_v9 = vpop.eup %4655  ;;  %v3884_v14 = vsel %vm10929_vm5, %v3883_v60, %v3879_v53  ;;  %v4048_v6 = vmul.f32 %v4042_v35, %v10702_v62  ;;  %v4052_v41 = vmul.f32 %v4379_v52, %v3972_v46  ;;  %vm4002_vm15 = vweird.f32 %v10914_v22 }
0x11b1   :  { %v3887_v57 = vmul.f32 %v3884_v14, %v10824_v44  ;;  %v3919_v12 = vsel %vm3918_vm12, %v4650_v11, %v3915_v1  ;;  %v3986_v34 = vadd.f32 %v4654_v50, %v3985_v23  ;;  %v3998_v20 = vmul.f32 %v4656_v9, %v10914_v22 }
0x11b2   :  { %v3924_v39 = vsel %vm10933_vm6, %v3923_v40, %v3919_v12  ;;  %vm4003_vm14 = vweird.f32 %v4656_v9  ;;  %v4055_v11 = vmul.f32 %v4046_v21, %v10824_v44  ;;  %v4006_v5 = vand.u32 2147483647, %v10914_v22 }
0x11b3   :  { %v3927_v58 = vmul.f32 %v3924_v39, %v3603_v36  ;;  %v3990_v3 = vsel %vm3989_vm13, %v4654_v50, %v3986_v34  ;;  %v3999_v42 = vsub.f32 1.0, %v3998_v20  ;;  %v4658_v28 = vpop.eup %4657  ;;  %v4008_v36 = vand.u32 2147483648, %v10914_v22  ;;  %vm4004_vm1 = vmor %vm4002_vm15, %vm4003_vm14 }
0x11b4   :  { %v3995_v61 = vsel %vm3992_vm2, %v3994_v55, %v3990_v3  ;;  %v4054_v7 = vmul.f32 %v4042_v35, %v10704_v26  ;;  %vm4007_vm3 = vcmp.eq.f32.partialorder %v4006_v5, 8.507059e+37  ;;  %v4049_v63 = vmul.f32 %v4046_v21, %v10718_v54 }
0x11b5   :  { %v3929_v43 = vadd.f32 %v3927_v58, %v3887_v57  ;;  %v4000_v10 = vmul.f32 %v4656_v9, %v3999_v42  ;;  %v4014_v30 = vmul.f32 %v4658_v28, %v3995_v61  ;;  %v4009_v13 = vor.u32 1.1754944e-38, %v4008_v36 }
0x11b6   :  { %v4056_v31 = vadd.f32 %v4054_v7, %v4052_v41 }
0x11b7   :  { %v3973_v45 = vadd.f32 %v3971_v4, %v3929_v43  ;;  %v4001_v29 = vadd.f32 %v4656_v9, %v4000_v10  ;;  %v4032_v37 = vmul.f32 %v4379_v52, %v4014_v30 }
0x11b9   :  { %4659 = vtanh.f32 %v3973_v45  ;;  %v4053_v33 = vmul.f32 %v4378_v0, %v3973_v45  ;;  %v4050_v62 = vadd.f32 %v4048_v6, %v4032_v37  ;;  %v4005_v44 = vsel %vm4004_vm1, %v4656_v9, %v4001_v29 }
0x11ba   :  { %v4010_v22 = vsel %vm4007_vm3, %v4009_v13, %v4005_v44 }
0x11bb   :  { %v4057_v27 = vadd.f32 %v4055_v11, %v4053_v33 }
0x11bd   :  { %v4066_v50 = vrot.slane %v4057_v27, 7 }
0x11bf   :  { %v4660_v24 = vpop.eup %4659  ;;  %v4067_v26 = vsel %vm655_vm0, %v4066_v50, %v4056_v31 }
0x11c0   :  { %v4015_v48 = vmul.f32 %v4660_v24, %v4010_v22  ;;  %4069 = vst [vmem:[#allocation4] sm:$0x3] %v4067_v26 }
0x11c1   :  { %4091 = dma.vmem_to_hbm [thread:$0]  %s4087_s4, 32, %s4089_s0, [#allocation5]  }
0x11c2   :  { %v4033_v51 = vmul.f32 %v4378_v0, %v4015_v48 }
0x11c4   :  { %v4051_v16 = vadd.f32 %v4049_v63, %v4033_v51 }
0x11c6   :  { %v4060_v59 = vrot.slane %v4051_v16, 7 }
0x11c8   :  { %v4061_v19 = vsel %vm655_vm0, %v4060_v59, %v4050_v62 }
0x11c9   :  { %4063 = vst [vmem:[#allocation2] sm:$0x3] %v4061_v19 }
0x11ca   :  { %4080 = dma.vmem_to_hbm [thread:$0]  %s4076_s8, 32, %s4078_s14, [#allocation3]  }
0x11cb   :  { %5206 = dma.done.wait [#allocation3], 32  }
0x11cc   :  { %5207 = vsyncadd [#allocation3], 4294967264 }
0x11cd   :  { %5208 = dma.done.wait [#allocation5], 32  }
0x11ce   :  { %5209 = vsyncadd [#allocation5], 4294967264 }
0x11cf   :  { %4104 = vsyncpa [#allocation3], 1 }
0x11d0   :  { %4105 = vsyncpa [#allocation5], 1 }

</bundles_post_ra>
